<compile_context>
chip_gen: v7x
topology: tpu7x:2x2x1
jax: 0.10.0
libtpu: 0.0.40
codegen_flags: <defaults>
</compile_context>

<pallas_src>
import functools

import jax
import jax.numpy as jnp
import numpy as np
from jax import lax
from jax.experimental import pallas as pl
from jax.experimental.pallas import tpu as pltpu

ATTN_EPS = 1e-6
LN_EPS = 1e-5


def _elu_plus_one(x):
    # FeatureMap used by the linear transformer: elu(x, alpha=1) + 1.
    # exp(min(x,0)) + max(x,0) == elu(x)+1 without evaluating both branches.
    return jnp.exp(jnp.minimum(x, 0.0)) + jnp.maximum(x, 0.0)


def _layernorm(x, gamma, beta):
    mu = jnp.mean(x, axis=-1, keepdims=True)
    xc = x - mu
    var = jnp.mean(xc * xc, axis=-1, keepdims=True)
    return xc * lax.rsqrt(var + LN_EPS) * gamma + beta


def _block_kernel(compute_dtype, seq_tile, mlp_chunk,
                  x_ref, mask_ref,
                  wq_ref, bq_ref, wk_ref, bk_ref, wv_ref, bv_ref,
                  wo_ref, bo_ref,
                  ln1g_ref, ln1b_ref,
                  w1_ref, b1_ref, w2_ref, b2_ref,
                  ln2g_ref, ln2b_ref,
                  out_ref):
    S, E = x_ref.shape              # batch dim squeezed away
    HD = wq_ref.shape[1]            # qkv feature dim (all heads)
    HM = wv_ref.shape[1]            # value feature dim (all heads)
    MLP = w1_ref.shape[1]
    n_s = S // seq_tile
    n_m = MLP // mlp_chunk

    mask = mask_ref[...]            # (HD, HM) block-diagonal head mask (0/1)

    # ---------------- phase 1: kv = K^T V and k_sum, accumulated over S -----
    kv = jnp.zeros((HD, HM), jnp.float32)
    ksum = jnp.zeros((1, HD), jnp.float32)
    for t in range(n_s):
        sl = pl.ds(t * seq_tile, seq_tile)
        xt = x_ref[sl, :].astype(compute_dtype)
        kt = _elu_plus_one(
            jnp.dot(xt, wk_ref[...], preferred_element_type=jnp.float32)
            + bk_ref[...])                                        # (ts, HD) f32
        vt = (jnp.dot(xt, wv_ref[...], preferred_element_type=jnp.float32)
              + bv_ref[...])                                      # (ts, HM) f32
        ksum = ksum + jnp.sum(kt, axis=0, keepdims=True)          # f32 sum
        # K^T V: contract dim 0 of both operands (native transposed-LHS MXU
        # path; avoids a materialized XLU transpose of K).
        kv = kv + lax.dot_general(
            kt.astype(compute_dtype), vt.astype(compute_dtype),
            dimension_numbers=(((0,), (0,)), ((), ())),
            preferred_element_type=jnp.float32)
    # Keep only same-head (d, m) pairs: one wide masked matmul replaces the
    # per-head loop.
    kv_c = (kv * mask).astype(compute_dtype)

    # ---------------- phase 2: per-S-tile attention + LN1 + MLP + LN2 -------
    for t in range(n_s):
        sl = pl.ds(t * seq_tile, seq_tile)
        xt = x_ref[sl, :]                                          # (ts, E) f32
        qt = _elu_plus_one(
            jnp.dot(xt.astype(compute_dtype), wq_ref[...],
                    preferred_element_type=jnp.float32) + bq_ref[...])
        num = jnp.dot(qt.astype(compute_dtype), kv_c,
                      preferred_element_type=jnp.float32)          # (ts, HM)
        # denom[l, m] = sum_{d in head(m)} q[l, d] * ksum[d]  (wide matmul)
        denom = jnp.dot((qt * ksum).astype(compute_dtype), mask,
                        preferred_element_type=jnp.float32)        # (ts, HM)
        att = num * pl.reciprocal(denom + ATTN_EPS, approx=True)   # EUP recip
        att = (jnp.dot(att.astype(compute_dtype), wo_ref[...],
                       preferred_element_type=jnp.float32) + bo_ref[...])

        # TODO(synk): dropout layers are identity in inference mode (no RNG).
        y = xt + att
        y = _layernorm(y, ln1g_ref[...], ln1b_ref[...])

        # MLP tiled over mlp_dim: never materialize the full (S, MLP) hidden.
        y_c = y.astype(compute_dtype)
        acc = jnp.zeros((seq_tile, E), jnp.float32)
        for j in range(n_m):
            ml = pl.ds(j * mlp_chunk, mlp_chunk)
            h = (jnp.dot(y_c, w1_ref[:, ml],
                         preferred_element_type=jnp.float32) + b1_ref[:, ml])
            h = jax.nn.gelu(h, approximate=True)   # tanh form -> EUP slot
            acc = acc + jnp.dot(h.astype(compute_dtype), w2_ref[ml, :],
                                preferred_element_type=jnp.float32)
        y = y + acc + b2_ref[...]
        y = _layernorm(y, ln2g_ref[...], ln2b_ref[...])

        out_ref[sl, :] = y.astype(out_ref.dtype)


def _pick_tile(total, candidates):
    for c in candidates:
        if c <= total and total % c == 0:
            return c
    return total


def _vmem_cap_bytes():
    # Generation-aware scoped-VMEM ceiling (v7x has 64 MiB/TC vs 128 MiB on
    # v5e/v6e); keep 10% headroom for Mosaic-internal scratch.
    try:
        cap = int(pltpu.get_tpu_info().vmem_capacity_bytes)
    except Exception:
        cap = 64 * 2 ** 20          # conservative default: v7x per-core VMEM
    return int(0.9 * cap)


def linear_transformer_block(x, params, num_heads, compute_dtype=jnp.bfloat16):
    """x: (B, S, E) float32. params: dict of pre-transposed weights.

    compute_dtype controls the MXU operand dtype (bf16 default); accumulation,
    residual stream and LayerNorm math stay float32.
    """
    B, S, E = x.shape
    qkv_dim = params['wq'].shape[1]
    v_dim = params['wv'].shape[1]
    mlp_dim = params['w1'].shape[1]
    head_dim = qkv_dim // num_heads
    v_head_dim = v_dim // num_heads

    seq_tile = _pick_tile(S, (512, 256, 128))
    mlp_chunk = _pick_tile(mlp_dim, (1024, 512, 256, 128))

    # Constant block-diagonal head mask (HD, HM): 1 where row/col are the
    # same head.  Constant index_map -> DMA'd once, stays resident.
    # TODO(synk): for many small heads (e.g. H=16, D=64) group heads into
    # 128/256-lane chunks and run one masked matmul per group to cut the Hx
    # FLOP waste of the full block-diagonal trick.
    row_head = np.repeat(np.arange(num_heads), head_dim)
    col_head = np.repeat(np.arange(num_heads), v_head_dim)
    mask = jnp.asarray((row_head[:, None] == col_head[None, :]),
                       dtype=compute_dtype)

    # Cast weight matrices (not biases / LN params) to the compute dtype once
    # in the wrapper: halves weight VMEM footprint and boosts MXU throughput.
    weight_names = ('wq', 'wk', 'wv', 'wo', 'w1', 'w2')
    param_order = ['wq', 'bq', 'wk', 'bk', 'wv', 'bv', 'wo', 'bo',
                   'ln1_g', 'ln1_b', 'w1', 'b1', 'w2', 'b2', 'ln2_g', 'ln2_b']
    param_arrays = []
    for name in param_order:
        a = params[name]
        if name in weight_names:
            a = a.astype(compute_dtype)
        param_arrays.append(a)

    kernel = functools.partial(_block_kernel, compute_dtype, seq_tile, mlp_chunk)

    x_spec = pl.BlockSpec((pl.Squeezed(), S, E), lambda b: (b, 0, 0))
    out_spec = pl.BlockSpec((pl.Squeezed(), S, E), lambda b: (b, 0, 0))

    def run(single_buffer_params):
        # Constant-index inputs: single-buffered when supported (block index
        # never changes, so a second buffer is pure waste).
        extra = {'pipeline_mode': pl.Buffered(1)} if single_buffer_params else {}
        in_specs = [x_spec]
        for p in (mask, *param_arrays):
            in_specs.append(pl.BlockSpec(
                p.shape, (lambda b, _nd=p.ndim: (0,) * _nd), **extra))

        # ---- VMEM budget (honest about buffer multiplicity) ---------------
        pbuf = 1 if single_buffer_params else 2
        param_bytes = sum(int(a.size) * a.dtype.itemsize for a in param_arrays)
        param_bytes += int(mask.size) * mask.dtype.itemsize
        block_bytes = 4 * S * E * x.dtype.itemsize    # 2x in + 2x out buffers
        widest = max(qkv_dim, v_dim)
        inter_bytes = (seq_tile * (6 * widest + 4 * E + 3 * mlp_chunk) * 4
                       + qkv_dim * v_dim * 8)         # per-tile f32 temporaries
        est = pbuf * param_bytes + block_bytes + inter_bytes
        vmem_limit = int(min(max(32 * 2 ** 20, 2 * est), _vmem_cap_bytes()))

        # TODO(synk): for very long S, stream x itself over an S grid axis
        # (kv/k_sum in VMEM scratch) instead of keeping the (S, E) block
        # resident; and if B can be 1, add a second parallel grid axis so
        # both v7x TensorCores get work / fuse >=2 batch elements per step to
        # better fill the 256-wide MXU on v6e/v7x.
        return pl.pallas_call(
            kernel,
            out_shape=jax.ShapeDtypeStruct((B, S, E), jnp.float32),
            grid=(B,),
            in_specs=in_specs,
            out_specs=out_spec,
            compiler_params=pltpu.CompilerParams(
                dimension_semantics=("parallel",),
                vmem_limit_bytes=vmem_limit),
        )(x, mask, *param_arrays)

    try:
        return jax.block_until_ready(run(True))
    except Exception:
        # pl.Buffered(1) not accepted by this jax/Mosaic version: fall back
        # to default double-buffered constants (correct, just more VMEM).
        return run(False)


# ---------------- pure-JAX reference (for verification) ----------------
def _reference(x, params, num_heads):
    B, S, E = x.shape
    qkv_dim = params['wq'].shape[1]
    D = qkv_dim // num_heads

    def feat(z):  # elu(z) + 1
        return jnp.where(z > 0, z, jnp.expm1(z)) + 1.0

    residual = x
    q = x @ params['wq'] + params['bq']
    k = x @ params['wk'] + params['bk']
    v = x @ params['wv'] + params['bv']
    q = feat(q).reshape(B, S, num_heads, D)
    k = feat(k).reshape(B, S, num_heads, D)
    v = v.reshape(B, S, num_heads, -1)
    kv = jnp.einsum('nshd,nshm->nhmd', k, v)
    z = 1.0 / (jnp.einsum('nlhd,nhd->nlh', q, k.sum(axis=1)) + ATTN_EPS)
    o = jnp.einsum('nlhd,nhmd,nlh->nlhm', q, kv, z).reshape(B, S, qkv_dim)
    o = o @ params['wo'] + params['bo']
    x = residual + o
    x = _layernorm(x, params['ln1_g'], params['ln1_b'])

    residual = x
    h = jax.nn.gelu(x @ params['w1'] + params['b1'], approximate=True)
    h = h @ params['w2'] + params['b2']
    x = residual + h
    x = _layernorm(x, params['ln2_g'], params['ln2_b'])
    return x


def make_params(key, emb_dim, qkv_dim, mlp_dim):
    ks = jax.random.split(key, 12)

    def lin(kk, din, dout, scale=0.05):
        return (scale * jax.random.normal(kk, (din, dout), jnp.float32),
                0.01 * jax.random.normal(jax.random.fold_in(kk, 1),
                                         (1, dout), jnp.float32))

    wq, bq = lin(ks[0], emb_dim, qkv_dim)
    wk, bk = lin(ks[1], emb_dim, qkv_dim)
    wv, bv = lin(ks[2], emb_dim, qkv_dim)
    wo, bo = lin(ks[3], qkv_dim, emb_dim)
    w1, b1 = lin(ks[4], emb_dim, mlp_dim)
    w2, b2 = lin(ks[5], mlp_dim, emb_dim)
    return dict(
        wq=wq, bq=bq, wk=wk, bk=bk, wv=wv, bv=bv, wo=wo, bo=bo,
        ln1_g=jnp.ones((1, emb_dim), jnp.float32),
        ln1_b=jnp.zeros((1, emb_dim), jnp.float32),
        w1=w1, b1=b1, w2=w2, b2=b2,
        ln2_g=jnp.ones((1, emb_dim), jnp.float32),
        ln2_b=jnp.zeros((1, emb_dim), jnp.float32),
    )


if __name__ == "__main__":
    # Lane-aligned small shapes (E / qkv / mlp multiples of 128 -> unmasked
    # stores and full-width MXU tiles).
    B, S, EMB = 2, 128, 128
    QKV, HEADS, MLP = 128, 4, 256

    key = jax.random.PRNGKey(0)
    kx, kp = jax.random.split(key)
    x = jax.random.normal(kx, (B, S, EMB), jnp.float32)
    params = make_params(kp, EMB, QKV, MLP)

    ref = _reference(x, params, HEADS)

    # f32 debug path (approx EUP reciprocal is the only intentional approx).
    out_f32 = jax.block_until_ready(
        linear_transformer_block(x, params, HEADS, compute_dtype=jnp.float32))
    np.testing.assert_allclose(np.asarray(out_f32), np.asarray(ref),
                               rtol=3e-3, atol=3e-3)

    # Default bf16 MXU-operand path (f32 accumulation), looser tolerance.
    out_bf16 = jax.block_until_ready(
        linear_transformer_block(x, params, HEADS))
    np.testing.assert_allclose(np.asarray(out_bf16), np.asarray(ref),
                               rtol=6e-2, atol=6e-2)

    print("KERNEL_OK")
</pallas_src>

<mosaic_0001>
module attributes {stable_mosaic.version = 11 : i64} {
  func.func @_block_kernel(%arg0: i32, %arg1: memref<1x128x128xf32, #tpu.memory_space<vmem>>, %arg2: memref<128x128xf32, #tpu.memory_space<vmem>>, %arg3: memref<128x128xf32, #tpu.memory_space<vmem>>, %arg4: memref<1x128xf32, #tpu.memory_space<vmem>>, %arg5: memref<128x128xf32, #tpu.memory_space<vmem>>, %arg6: memref<1x128xf32, #tpu.memory_space<vmem>>, %arg7: memref<128x128xf32, #tpu.memory_space<vmem>>, %arg8: memref<1x128xf32, #tpu.memory_space<vmem>>, %arg9: memref<128x128xf32, #tpu.memory_space<vmem>>, %arg10: memref<1x128xf32, #tpu.memory_space<vmem>>, %arg11: memref<1x128xf32, #tpu.memory_space<vmem>>, %arg12: memref<1x128xf32, #tpu.memory_space<vmem>>, %arg13: memref<128x256xf32, #tpu.memory_space<vmem>>, %arg14: memref<1x256xf32, #tpu.memory_space<vmem>>, %arg15: memref<256x128xf32, #tpu.memory_space<vmem>>, %arg16: memref<1x128xf32, #tpu.memory_space<vmem>>, %arg17: memref<1x128xf32, #tpu.memory_space<vmem>>, %arg18: memref<1x128xf32, #tpu.memory_space<vmem>>, %arg19: memref<1x128x128xf32, #tpu.memory_space<vmem>>) attributes {dimension_semantics = [#tpu.dimension_semantics<parallel>], iteration_bounds = array<i64: 2>, scalar_prefetch = 0 : i64, scratch_operands = 0 : i64, tpu.core_type = #tpu.core_type<tc>, window_params = [{transform_indices = @transform_0, window_bounds = array<i64: 1, 128, 128>}, {pipeline_mode = #tpu.pipeline_mode<synchronous>, transform_indices = @transform_1, window_bounds = array<i64: 128, 128>}, {pipeline_mode = #tpu.pipeline_mode<synchronous>, transform_indices = @transform_2, window_bounds = array<i64: 128, 128>}, {pipeline_mode = #tpu.pipeline_mode<synchronous>, transform_indices = @transform_3, window_bounds = array<i64: 1, 128>}, {pipeline_mode = #tpu.pipeline_mode<synchronous>, transform_indices = @transform_4, window_bounds = array<i64: 128, 128>}, {pipeline_mode = #tpu.pipeline_mode<synchronous>, transform_indices = @transform_5, window_bounds = array<i64: 1, 128>}, {pipeline_mode = #tpu.pipeline_mode<synchronous>, transform_indices = @transform_6, window_bounds = array<i64: 128, 128>}, {pipeline_mode = #tpu.pipeline_mode<synchronous>, transform_indices = @transform_7, window_bounds = array<i64: 1, 128>}, {pipeline_mode = #tpu.pipeline_mode<synchronous>, transform_indices = @transform_8, window_bounds = array<i64: 128, 128>}, {pipeline_mode = #tpu.pipeline_mode<synchronous>, transform_indices = @transform_9, window_bounds = array<i64: 1, 128>}, {pipeline_mode = #tpu.pipeline_mode<synchronous>, transform_indices = @transform_10, window_bounds = array<i64: 1, 128>}, {pipeline_mode = #tpu.pipeline_mode<synchronous>, transform_indices = @transform_11, window_bounds = array<i64: 1, 128>}, {pipeline_mode = #tpu.pipeline_mode<synchronous>, transform_indices = @transform_12, window_bounds = array<i64: 128, 256>}, {pipeline_mode = #tpu.pipeline_mode<synchronous>, transform_indices = @transform_13, window_bounds = array<i64: 1, 256>}, {pipeline_mode = #tpu.pipeline_mode<synchronous>, transform_indices = @transform_14, window_bounds = array<i64: 256, 128>}, {pipeline_mode = #tpu.pipeline_mode<synchronous>, transform_indices = @transform_15, window_bounds = array<i64: 1, 128>}, {pipeline_mode = #tpu.pipeline_mode<synchronous>, transform_indices = @transform_16, window_bounds = array<i64: 1, 128>}, {pipeline_mode = #tpu.pipeline_mode<synchronous>, transform_indices = @transform_17, window_bounds = array<i64: 1, 128>}, {transform_indices = @transform_18, window_bounds = array<i64: 1, 128, 128>}]} {
    %c0 = arith.constant 0 : index
    %c0_0 = arith.constant 0 : index
    %0 = vector.load %arg2[%c0, %c0_0] : memref<128x128xf32, #tpu.memory_space<vmem>>, vector<128x128xf32>
    %cst = arith.constant 0.000000e+00 : f32
    %1 = vector.broadcast %cst : f32 to vector<128x128xf32>
    %cst_1 = arith.constant 0.000000e+00 : f32
    %2 = vector.broadcast %cst_1 : f32 to vector<1x128xf32>
    %c0_2 = arith.constant 0 : index
    %c0_3 = arith.constant 0 : index
    %c0_4 = arith.constant 0 : index
    %3 = vector.load %arg1[%c0_2, %c0_3, %c0_4] : memref<1x128x128xf32, #tpu.memory_space<vmem>>, vector<1x128x128xf32>
    %4 = vector.shape_cast %3 : vector<1x128x128xf32> to vector<128x128xf32>
    %c0_5 = arith.constant 0 : index
    %c0_6 = arith.constant 0 : index
    %5 = vector.load %arg5[%c0_5, %c0_6] : memref<128x128xf32, #tpu.memory_space<vmem>>, vector<128x128xf32>
    %cst_7 = arith.constant dense<0.000000e+00> : vector<128x128xf32>
    %6 = tpu.matmul %4, %5, %cst_7 {dimension_numbers = #tpu.dot_dimension_numbers<[1], [0], [0], [1], [0, 0, 1, 1], [], []>} : vector<128x128xf32>, vector<128x128xf32>, vector<128x128xf32> -> vector<128x128xf32>
    %c0_8 = arith.constant 0 : index
    %c0_9 = arith.constant 0 : index
    %7 = vector.load %arg6[%c0_8, %c0_9] : memref<1x128xf32, #tpu.memory_space<vmem>>, vector<1x128xf32>
    %8 = vector.broadcast %7 : vector<1x128xf32> to vector<128x128xf32>
    %9 = arith.addf %6, %8 : vector<128x128xf32>
    %cst_10 = arith.constant 0.000000e+00 : f32
    %10 = vector.broadcast %cst_10 : f32 to vector<128x128xf32>
    %11 = arith.minimumf %9, %10 : vector<128x128xf32>
    %12 = math.exp %11 : vector<128x128xf32>
    %cst_11 = arith.constant 0.000000e+00 : f32
    %13 = vector.broadcast %cst_11 : f32 to vector<128x128xf32>
    %14 = arith.maximumf %9, %13 : vector<128x128xf32>
    %15 = arith.addf %12, %14 : vector<128x128xf32>
    %c0_12 = arith.constant 0 : index
    %c0_13 = arith.constant 0 : index
    %16 = vector.load %arg7[%c0_12, %c0_13] : memref<128x128xf32, #tpu.memory_space<vmem>>, vector<128x128xf32>
    %cst_14 = arith.constant dense<0.000000e+00> : vector<128x128xf32>
    %17 = tpu.matmul %4, %16, %cst_14 {dimension_numbers = #tpu.dot_dimension_numbers<[1], [0], [0], [1], [0, 0, 1, 1], [], []>} : vector<128x128xf32>, vector<128x128xf32>, vector<128x128xf32> -> vector<128x128xf32>
    %c0_15 = arith.constant 0 : index
    %c0_16 = arith.constant 0 : index
    %18 = vector.load %arg8[%c0_15, %c0_16] : memref<1x128xf32, #tpu.memory_space<vmem>>, vector<1x128xf32>
    %19 = vector.broadcast %18 : vector<1x128xf32> to vector<128x128xf32>
    %20 = arith.addf %17, %19 : vector<128x128xf32>
    %cst_17 = arith.constant dense<0.000000e+00> : vector<128xf32>
    %21 = vector.multi_reduction <add>, %15, %cst_17 [0] : vector<128x128xf32> to vector<128xf32>
    %22 = vector.shape_cast %21 : vector<128xf32> to vector<1x128xf32>
    %23 = arith.addf %2, %22 : vector<1x128xf32>
    %cst_18 = arith.constant dense<0.000000e+00> : vector<128x128xf32>
    %24 = tpu.matmul %15, %20, %cst_18 {dimension_numbers = #tpu.dot_dimension_numbers<[0], [0], [1], [1], [0, 1, 1, 1], [], []>} : vector<128x128xf32>, vector<128x128xf32>, vector<128x128xf32> -> vector<128x128xf32>
    %25 = arith.addf %1, %24 : vector<128x128xf32>
    %26 = arith.mulf %25, %0 : vector<128x128xf32>
    %c0_19 = arith.constant 0 : index
    %c0_20 = arith.constant 0 : index
    %c0_21 = arith.constant 0 : index
    %27 = vector.load %arg1[%c0_19, %c0_20, %c0_21] : memref<1x128x128xf32, #tpu.memory_space<vmem>>, vector<1x128x128xf32>
    %28 = vector.shape_cast %27 : vector<1x128x128xf32> to vector<128x128xf32>
    %c0_22 = arith.constant 0 : index
    %c0_23 = arith.constant 0 : index
    %29 = vector.load %arg3[%c0_22, %c0_23] : memref<128x128xf32, #tpu.memory_space<vmem>>, vector<128x128xf32>
    %cst_24 = arith.constant dense<0.000000e+00> : vector<128x128xf32>
    %30 = tpu.matmul %28, %29, %cst_24 {dimension_numbers = #tpu.dot_dimension_numbers<[1], [0], [0], [1], [0, 0, 1, 1], [], []>} : vector<128x128xf32>, vector<128x128xf32>, vector<128x128xf32> -> vector<128x128xf32>
    %c0_25 = arith.constant 0 : index
    %c0_26 = arith.constant 0 : index
    %31 = vector.load %arg4[%c0_25, %c0_26] : memref<1x128xf32, #tpu.memory_space<vmem>>, vector<1x128xf32>
    %32 = vector.broadcast %31 : vector<1x128xf32> to vector<128x128xf32>
    %33 = arith.addf %30, %32 : vector<128x128xf32>
    %cst_27 = arith.constant 0.000000e+00 : f32
    %34 = vector.broadcast %cst_27 : f32 to vector<128x128xf32>
    %35 = arith.minimumf %33, %34 : vector<128x128xf32>
    %36 = math.exp %35 : vector<128x128xf32>
    %cst_28 = arith.constant 0.000000e+00 : f32
    %37 = vector.broadcast %cst_28 : f32 to vector<128x128xf32>
    %38 = arith.maximumf %33, %37 : vector<128x128xf32>
    %39 = arith.addf %36, %38 : vector<128x128xf32>
    %cst_29 = arith.constant dense<0.000000e+00> : vector<128x128xf32>
    %40 = tpu.matmul %39, %26, %cst_29 {dimension_numbers = #tpu.dot_dimension_numbers<[1], [0], [0], [1], [0, 0, 1, 1], [], []>} : vector<128x128xf32>, vector<128x128xf32>, vector<128x128xf32> -> vector<128x128xf32>
    %41 = vector.broadcast %23 : vector<1x128xf32> to vector<128x128xf32>
    %42 = arith.mulf %39, %41 : vector<128x128xf32>
    %cst_30 = arith.constant dense<0.000000e+00> : vector<128x128xf32>
    %43 = tpu.matmul %42, %0, %cst_30 {dimension_numbers = #tpu.dot_dimension_numbers<[1], [0], [0], [1], [0, 0, 1, 1], [], []>} : vector<128x128xf32>, vector<128x128xf32>, vector<128x128xf32> -> vector<128x128xf32>
    %cst_31 = arith.constant 9.99999997E-7 : f32
    %44 = vector.broadcast %cst_31 : f32 to vector<128x128xf32>
    %45 = arith.addf %43, %44 : vector<128x128xf32>
    %46 = tpu.reciprocal %45 {approx = true} : vector<128x128xf32> -> vector<128x128xf32>
    %47 = arith.mulf %40, %46 : vector<128x128xf32>
    %c0_32 = arith.constant 0 : index
    %c0_33 = arith.constant 0 : index
    %48 = vector.load %arg9[%c0_32, %c0_33] : memref<128x128xf32, #tpu.memory_space<vmem>>, vector<128x128xf32>
    %cst_34 = arith.constant dense<0.000000e+00> : vector<128x128xf32>
    %49 = tpu.matmul %47, %48, %cst_34 {dimension_numbers = #tpu.dot_dimension_numbers<[1], [0], [0], [1], [0, 0, 1, 1], [], []>} : vector<128x128xf32>, vector<128x128xf32>, vector<128x128xf32> -> vector<128x128xf32>
    %c0_35 = arith.constant 0 : index
    %c0_36 = arith.constant 0 : index
    %50 = vector.load %arg10[%c0_35, %c0_36] : memref<1x128xf32, #tpu.memory_space<vmem>>, vector<1x128xf32>
    %51 = vector.broadcast %50 : vector<1x128xf32> to vector<128x128xf32>
    %52 = arith.addf %49, %51 : vector<128x128xf32>
    %53 = arith.addf %28, %52 : vector<128x128xf32>
    %c0_37 = arith.constant 0 : index
    %c0_38 = arith.constant 0 : index
    %54 = vector.load %arg11[%c0_37, %c0_38] : memref<1x128xf32, #tpu.memory_space<vmem>>, vector<1x128xf32>
    %c0_39 = arith.constant 0 : index
    %c0_40 = arith.constant 0 : index
    %55 = vector.load %arg12[%c0_39, %c0_40] : memref<1x128xf32, #tpu.memory_space<vmem>>, vector<1x128xf32>
    %cst_41 = arith.constant dense<0.000000e+00> : vector<128xf32>
    %56 = vector.multi_reduction <add>, %53, %cst_41 [1] : vector<128x128xf32> to vector<128xf32>
    %57 = vector.shape_cast %56 : vector<128xf32> to vector<128x1xf32>
    %cst_42 = arith.constant 1.280000e+02 : f32
    %58 = vector.broadcast %cst_42 : f32 to vector<128x1xf32>
    %59 = arith.divf %57, %58 : vector<128x1xf32>
    %60 = vector.broadcast %59 : vector<128x1xf32> to vector<128x128xf32>
    %61 = arith.subf %53, %60 : vector<128x128xf32>
    %62 = arith.mulf %61, %61 : vector<128x128xf32>
    %cst_43 = arith.constant dense<0.000000e+00> : vector<128xf32>
    %63 = vector.multi_reduction <add>, %62, %cst_43 [1] : vector<128x128xf32> to vector<128xf32>
    %64 = vector.shape_cast %63 : vector<128xf32> to vector<128x1xf32>
    %cst_44 = arith.constant 1.280000e+02 : f32
    %65 = vector.broadcast %cst_44 : f32 to vector<128x1xf32>
    %66 = arith.divf %64, %65 : vector<128x1xf32>
    %cst_45 = arith.constant 9.99999974E-6 : f32
    %67 = vector.broadcast %cst_45 : f32 to vector<128x1xf32>
    %68 = arith.addf %66, %67 : vector<128x1xf32>
    %69 = math.rsqrt %68 : vector<128x1xf32>
    %70 = vector.broadcast %69 : vector<128x1xf32> to vector<128x128xf32>
    %71 = arith.mulf %61, %70 : vector<128x128xf32>
    %72 = vector.broadcast %54 : vector<1x128xf32> to vector<128x128xf32>
    %73 = arith.mulf %71, %72 : vector<128x128xf32>
    %74 = vector.broadcast %55 : vector<1x128xf32> to vector<128x128xf32>
    %75 = arith.addf %73, %74 : vector<128x128xf32>
    %cst_46 = arith.constant 0.000000e+00 : f32
    %76 = vector.broadcast %cst_46 : f32 to vector<128x128xf32>
    %c0_47 = arith.constant 0 : index
    %c0_48 = arith.constant 0 : index
    %77 = vector.load %arg13[%c0_47, %c0_48] : memref<128x256xf32, #tpu.memory_space<vmem>>, vector<128x256xf32>
    %cst_49 = arith.constant dense<0.000000e+00> : vector<128x256xf32>
    %78 = tpu.matmul %75, %77, %cst_49 {dimension_numbers = #tpu.dot_dimension_numbers<[1], [0], [0], [1], [0, 0, 1, 1], [], []>} : vector<128x128xf32>, vector<128x256xf32>, vector<128x256xf32> -> vector<128x256xf32>
    %c0_50 = arith.constant 0 : index
    %c0_51 = arith.constant 0 : index
    %79 = vector.load %arg14[%c0_50, %c0_51] : memref<1x256xf32, #tpu.memory_space<vmem>>, vector<1x256xf32>
    %80 = vector.broadcast %79 : vector<1x256xf32> to vector<128x256xf32>
    %81 = arith.addf %78, %80 : vector<128x256xf32>
    %82 = arith.mulf %81, %81 : vector<128x256xf32>
    %83 = arith.mulf %81, %82 : vector<128x256xf32>
    %cst_52 = arith.constant 4.471500e-02 : f32
    %84 = vector.broadcast %cst_52 : f32 to vector<128x256xf32>
    %85 = arith.mulf %84, %83 : vector<128x256xf32>
    %86 = arith.addf %81, %85 : vector<128x256xf32>
    %cst_53 = arith.constant 0.797884583 : f32
    %87 = vector.broadcast %cst_53 : f32 to vector<128x256xf32>
    %88 = arith.mulf %87, %86 : vector<128x256xf32>
    %89 = math.tanh %88 : vector<128x256xf32>
    %cst_54 = arith.constant 1.000000e+00 : f32
    %90 = vector.broadcast %cst_54 : f32 to vector<128x256xf32>
    %91 = arith.addf %90, %89 : vector<128x256xf32>
    %cst_55 = arith.constant 5.000000e-01 : f32
    %92 = vector.broadcast %cst_55 : f32 to vector<128x256xf32>
    %93 = arith.mulf %92, %91 : vector<128x256xf32>
    %94 = arith.mulf %81, %93 : vector<128x256xf32>
    %c0_56 = arith.constant 0 : index
    %c0_57 = arith.constant 0 : index
    %95 = vector.load %arg15[%c0_56, %c0_57] : memref<256x128xf32, #tpu.memory_space<vmem>>, vector<256x128xf32>
    %cst_58 = arith.constant dense<0.000000e+00> : vector<128x128xf32>
    %96 = tpu.matmul %94, %95, %cst_58 {dimension_numbers = #tpu.dot_dimension_numbers<[1], [0], [0], [1], [0, 0, 1, 1], [], []>} : vector<128x256xf32>, vector<256x128xf32>, vector<128x128xf32> -> vector<128x128xf32>
    %97 = arith.addf %76, %96 : vector<128x128xf32>
    %98 = arith.addf %75, %97 : vector<128x128xf32>
    %c0_59 = arith.constant 0 : index
    %c0_60 = arith.constant 0 : index
    %99 = vector.load %arg16[%c0_59, %c0_60] : memref<1x128xf32, #tpu.memory_space<vmem>>, vector<1x128xf32>
    %100 = vector.broadcast %99 : vector<1x128xf32> to vector<128x128xf32>
    %101 = arith.addf %98, %100 : vector<128x128xf32>
    %c0_61 = arith.constant 0 : index
    %c0_62 = arith.constant 0 : index
    %102 = vector.load %arg17[%c0_61, %c0_62] : memref<1x128xf32, #tpu.memory_space<vmem>>, vector<1x128xf32>
    %c0_63 = arith.constant 0 : index
    %c0_64 = arith.constant 0 : index
    %103 = vector.load %arg18[%c0_63, %c0_64] : memref<1x128xf32, #tpu.memory_space<vmem>>, vector<1x128xf32>
    %cst_65 = arith.constant dense<0.000000e+00> : vector<128xf32>
    %104 = vector.multi_reduction <add>, %101, %cst_65 [1] : vector<128x128xf32> to vector<128xf32>
    %105 = vector.shape_cast %104 : vector<128xf32> to vector<128x1xf32>
    %cst_66 = arith.constant 1.280000e+02 : f32
    %106 = vector.broadcast %cst_66 : f32 to vector<128x1xf32>
    %107 = arith.divf %105, %106 : vector<128x1xf32>
    %108 = vector.broadcast %107 : vector<128x1xf32> to vector<128x128xf32>
    %109 = arith.subf %101, %108 : vector<128x128xf32>
    %110 = arith.mulf %109, %109 : vector<128x128xf32>
    %cst_67 = arith.constant dense<0.000000e+00> : vector<128xf32>
    %111 = vector.multi_reduction <add>, %110, %cst_67 [1] : vector<128x128xf32> to vector<128xf32>
    %112 = vector.shape_cast %111 : vector<128xf32> to vector<128x1xf32>
    %cst_68 = arith.constant 1.280000e+02 : f32
    %113 = vector.broadcast %cst_68 : f32 to vector<128x1xf32>
    %114 = arith.divf %112, %113 : vector<128x1xf32>
    %cst_69 = arith.constant 9.99999974E-6 : f32
    %115 = vector.broadcast %cst_69 : f32 to vector<128x1xf32>
    %116 = arith.addf %114, %115 : vector<128x1xf32>
    %117 = math.rsqrt %116 : vector<128x1xf32>
    %118 = vector.broadcast %117 : vector<128x1xf32> to vector<128x128xf32>
    %119 = arith.mulf %109, %118 : vector<128x128xf32>
    %120 = vector.broadcast %102 : vector<1x128xf32> to vector<128x128xf32>
    %121 = arith.mulf %119, %120 : vector<128x128xf32>
    %122 = vector.broadcast %103 : vector<1x128xf32> to vector<128x128xf32>
    %123 = arith.addf %121, %122 : vector<128x128xf32>
    %c0_70 = arith.constant 0 : index
    %c0_71 = arith.constant 0 : index
    %c0_72 = arith.constant 0 : index
    %124 = vector.load %arg19[%c0_70, %c0_71, %c0_72] : memref<1x128x128xf32, #tpu.memory_space<vmem>>, vector<1x128x128xf32>
    %125 = vector.shape_cast %124 : vector<1x128x128xf32> to vector<128x128xf32>
    %126 = vector.shape_cast %123 : vector<128x128xf32> to vector<1x128x128xf32>
    tpu.vector_store %arg19[%c0_70, %c0_71, %c0_72], %126 {strides = array<i32>} : memref<1x128x128xf32, #tpu.memory_space<vmem>>, vector<1x128x128xf32>,
    return
  }
  func.func @transform_0(%arg0: i32) -> (i32, i32, i32) {
    %c0_i32 = arith.constant 0 : i32
    %c0_i32_0 = arith.constant 0 : i32
    %c0_i32_1 = arith.constant 0 : i32
    return %arg0, %c0_i32, %c0_i32_0 : i32, i32, i32
  }
  func.func @transform_1(%arg0: i32) -> (i32, i32) {
    %c0_i32 = arith.constant 0 : i32
    %c0_i32_0 = arith.constant 0 : i32
    %c0_i32_1 = arith.constant 0 : i32
    return %c0_i32, %c0_i32_0 : i32, i32
  }
  func.func @transform_2(%arg0: i32) -> (i32, i32) {
    %c0_i32 = arith.constant 0 : i32
    %c0_i32_0 = arith.constant 0 : i32
    %c0_i32_1 = arith.constant 0 : i32
    return %c0_i32, %c0_i32_0 : i32, i32
  }
  func.func @transform_3(%arg0: i32) -> (i32, i32) {
    %c0_i32 = arith.constant 0 : i32
    %c0_i32_0 = arith.constant 0 : i32
    %c0_i32_1 = arith.constant 0 : i32
    return %c0_i32, %c0_i32_0 : i32, i32
  }
  func.func @transform_4(%arg0: i32) -> (i32, i32) {
    %c0_i32 = arith.constant 0 : i32
    %c0_i32_0 = arith.constant 0 : i32
    %c0_i32_1 = arith.constant 0 : i32
    return %c0_i32, %c0_i32_0 : i32, i32
  }
  func.func @transform_5(%arg0: i32) -> (i32, i32) {
    %c0_i32 = arith.constant 0 : i32
    %c0_i32_0 = arith.constant 0 : i32
    %c0_i32_1 = arith.constant 0 : i32
    return %c0_i32, %c0_i32_0 : i32, i32
  }
  func.func @transform_6(%arg0: i32) -> (i32, i32) {
    %c0_i32 = arith.constant 0 : i32
    %c0_i32_0 = arith.constant 0 : i32
    %c0_i32_1 = arith.constant 0 : i32
    return %c0_i32, %c0_i32_0 : i32, i32
  }
  func.func @transform_7(%arg0: i32) -> (i32, i32) {
    %c0_i32 = arith.constant 0 : i32
    %c0_i32_0 = arith.constant 0 : i32
    %c0_i32_1 = arith.constant 0 : i32
    return %c0_i32, %c0_i32_0 : i32, i32
  }
  func.func @transform_8(%arg0: i32) -> (i32, i32) {
    %c0_i32 = arith.constant 0 : i32
    %c0_i32_0 = arith.constant 0 : i32
    %c0_i32_1 = arith.constant 0 : i32
    return %c0_i32, %c0_i32_0 : i32, i32
  }
  func.func @transform_9(%arg0: i32) -> (i32, i32) {
    %c0_i32 = arith.constant 0 : i32
    %c0_i32_0 = arith.constant 0 : i32
    %c0_i32_1 = arith.constant 0 : i32
    return %c0_i32, %c0_i32_0 : i32, i32
  }
  func.func @transform_10(%arg0: i32) -> (i32, i32) {
    %c0_i32 = arith.constant 0 : i32
    %c0_i32_0 = arith.constant 0 : i32
    %c0_i32_1 = arith.constant 0 : i32
    return %c0_i32, %c0_i32_0 : i32, i32
  }
  func.func @transform_11(%arg0: i32) -> (i32, i32) {
    %c0_i32 = arith.constant 0 : i32
    %c0_i32_0 = arith.constant 0 : i32
    %c0_i32_1 = arith.constant 0 : i32
    return %c0_i32, %c0_i32_0 : i32, i32
  }
  func.func @transform_12(%arg0: i32) -> (i32, i32) {
    %c0_i32 = arith.constant 0 : i32
    %c0_i32_0 = arith.constant 0 : i32
    %c0_i32_1 = arith.constant 0 : i32
    return %c0_i32, %c0_i32_0 : i32, i32
  }
  func.func @transform_13(%arg0: i32) -> (i32, i32) {
    %c0_i32 = arith.constant 0 : i32
    %c0_i32_0 = arith.constant 0 : i32
    %c0_i32_1 = arith.constant 0 : i32
    return %c0_i32, %c0_i32_0 : i32, i32
  }
  func.func @transform_14(%arg0: i32) -> (i32, i32) {
    %c0_i32 = arith.constant 0 : i32
    %c0_i32_0 = arith.constant 0 : i32
    %c0_i32_1 = arith.constant 0 : i32
    return %c0_i32, %c0_i32_0 : i32, i32
  }
  func.func @transform_15(%arg0: i32) -> (i32, i32) {
    %c0_i32 = arith.constant 0 : i32
    %c0_i32_0 = arith.constant 0 : i32
    %c0_i32_1 = arith.constant 0 : i32
    return %c0_i32, %c0_i32_0 : i32, i32
  }
  func.func @transform_16(%arg0: i32) -> (i32, i32) {
    %c0_i32 = arith.constant 0 : i32
    %c0_i32_0 = arith.constant 0 : i32
    %c0_i32_1 = arith.constant 0 : i32
    return %c0_i32, %c0_i32_0 : i32, i32
  }
  func.func @transform_17(%arg0: i32) -> (i32, i32) {
    %c0_i32 = arith.constant 0 : i32
    %c0_i32_0 = arith.constant 0 : i32
    %c0_i32_1 = arith.constant 0 : i32
    return %c0_i32, %c0_i32_0 : i32, i32
  }
  func.func @transform_18(%arg0: i32) -> (i32, i32, i32) {
    %c0_i32 = arith.constant 0 : i32
    %c0_i32_0 = arith.constant 0 : i32
    %c0_i32_1 = arith.constant 0 : i32
    return %arg0, %c0_i32, %c0_i32_0 : i32, i32, i32
  }
}

module attributes {stable_mosaic.version = 11 : i64} {
  func.func @_block_kernel(%arg0: i32, %arg1: memref<1x128x128xf32, #tpu.memory_space<vmem>>, %arg2: memref<128x128xf32, #tpu.memory_space<vmem>>, %arg3: memref<128x128xf32, #tpu.memory_space<vmem>>, %arg4: memref<1x128xf32, #tpu.memory_space<vmem>>, %arg5: memref<128x128xf32, #tpu.memory_space<vmem>>, %arg6: memref<1x128xf32, #tpu.memory_space<vmem>>, %arg7: memref<128x128xf32, #tpu.memory_space<vmem>>, %arg8: memref<1x128xf32, #tpu.memory_space<vmem>>, %arg9: memref<128x128xf32, #tpu.memory_space<vmem>>, %arg10: memref<1x128xf32, #tpu.memory_space<vmem>>, %arg11: memref<1x128xf32, #tpu.memory_space<vmem>>, %arg12: memref<1x128xf32, #tpu.memory_space<vmem>>, %arg13: memref<128x256xf32, #tpu.memory_space<vmem>>, %arg14: memref<1x256xf32, #tpu.memory_space<vmem>>, %arg15: memref<256x128xf32, #tpu.memory_space<vmem>>, %arg16: memref<1x128xf32, #tpu.memory_space<vmem>>, %arg17: memref<1x128xf32, #tpu.memory_space<vmem>>, %arg18: memref<1x128xf32, #tpu.memory_space<vmem>>, %arg19: memref<1x128x128xf32, #tpu.memory_space<vmem>>) attributes {dimension_semantics = [#tpu.dimension_semantics<parallel>], iteration_bounds = array<i64: 2>, scalar_prefetch = 0 : i64, scratch_operands = 0 : i64, tpu.core_type = #tpu.core_type<tc>, window_params = [{transform_indices = @transform_0, window_bounds = array<i64: 1, 128, 128>}, {pipeline_mode = #tpu.pipeline_mode<synchronous>, transform_indices = @transform_1, window_bounds = array<i64: 128, 128>}, {pipeline_mode = #tpu.pipeline_mode<synchronous>, transform_indices = @transform_2, window_bounds = array<i64: 128, 128>}, {pipeline_mode = #tpu.pipeline_mode<synchronous>, transform_indices = @transform_3, window_bounds = array<i64: 1, 128>}, {pipeline_mode = #tpu.pipeline_mode<synchronous>, transform_indices = @transform_4, window_bounds = array<i64: 128, 128>}, {pipeline_mode = #tpu.pipeline_mode<synchronous>, transform_indices = @transform_5, window_bounds = array<i64: 1, 128>}, {pipeline_mode = #tpu.pipeline_mode<synchronous>, transform_indices = @transform_6, window_bounds = array<i64: 128, 128>}, {pipeline_mode = #tpu.pipeline_mode<synchronous>, transform_indices = @transform_7, window_bounds = array<i64: 1, 128>}, {pipeline_mode = #tpu.pipeline_mode<synchronous>, transform_indices = @transform_8, window_bounds = array<i64: 128, 128>}, {pipeline_mode = #tpu.pipeline_mode<synchronous>, transform_indices = @transform_9, window_bounds = array<i64: 1, 128>}, {pipeline_mode = #tpu.pipeline_mode<synchronous>, transform_indices = @transform_10, window_bounds = array<i64: 1, 128>}, {pipeline_mode = #tpu.pipeline_mode<synchronous>, transform_indices = @transform_11, window_bounds = array<i64: 1, 128>}, {pipeline_mode = #tpu.pipeline_mode<synchronous>, transform_indices = @transform_12, window_bounds = array<i64: 128, 256>}, {pipeline_mode = #tpu.pipeline_mode<synchronous>, transform_indices = @transform_13, window_bounds = array<i64: 1, 256>}, {pipeline_mode = #tpu.pipeline_mode<synchronous>, transform_indices = @transform_14, window_bounds = array<i64: 256, 128>}, {pipeline_mode = #tpu.pipeline_mode<synchronous>, transform_indices = @transform_15, window_bounds = array<i64: 1, 128>}, {pipeline_mode = #tpu.pipeline_mode<synchronous>, transform_indices = @transform_16, window_bounds = array<i64: 1, 128>}, {pipeline_mode = #tpu.pipeline_mode<synchronous>, transform_indices = @transform_17, window_bounds = array<i64: 1, 128>}, {transform_indices = @transform_18, window_bounds = array<i64: 1, 128, 128>}]} {
    %c0 = arith.constant 0 : index
    %c0_0 = arith.constant 0 : index
    %0 = vector.load %arg2[%c0, %c0_0] : memref<128x128xf32, #tpu.memory_space<vmem>>, vector<128x128xf32>
    %cst = arith.constant 0.000000e+00 : f32
    %1 = vector.broadcast %cst : f32 to vector<128x128xf32>
    %cst_1 = arith.constant 0.000000e+00 : f32
    %2 = vector.broadcast %cst_1 : f32 to vector<1x128xf32>
    %c0_2 = arith.constant 0 : index
    %c0_3 = arith.constant 0 : index
    %c0_4 = arith.constant 0 : index
    %3 = vector.load %arg1[%c0_2, %c0_3, %c0_4] : memref<1x128x128xf32, #tpu.memory_space<vmem>>, vector<1x128x128xf32>
    %4 = vector.shape_cast %3 : vector<1x128x128xf32> to vector<128x128xf32>
    %c0_5 = arith.constant 0 : index
    %c0_6 = arith.constant 0 : index
    %5 = vector.load %arg5[%c0_5, %c0_6] : memref<128x128xf32, #tpu.memory_space<vmem>>, vector<128x128xf32>
    %cst_7 = arith.constant dense<0.000000e+00> : vector<128x128xf32>
    %6 = tpu.matmul %4, %5, %cst_7 {dimension_numbers = #tpu.dot_dimension_numbers<[1], [0], [0], [1], [0, 0, 1, 1], [], []>} : vector<128x128xf32>, vector<128x128xf32>, vector<128x128xf32> -> vector<128x128xf32>
    %c0_8 = arith.constant 0 : index
    %c0_9 = arith.constant 0 : index
    %7 = vector.load %arg6[%c0_8, %c0_9] : memref<1x128xf32, #tpu.memory_space<vmem>>, vector<1x128xf32>
    %8 = vector.broadcast %7 : vector<1x128xf32> to vector<128x128xf32>
    %9 = arith.addf %6, %8 : vector<128x128xf32>
    %cst_10 = arith.constant 0.000000e+00 : f32
    %10 = vector.broadcast %cst_10 : f32 to vector<128x128xf32>
    %11 = arith.minimumf %9, %10 : vector<128x128xf32>
    %12 = math.exp %11 : vector<128x128xf32>
    %cst_11 = arith.constant 0.000000e+00 : f32
    %13 = vector.broadcast %cst_11 : f32 to vector<128x128xf32>
    %14 = arith.maximumf %9, %13 : vector<128x128xf32>
    %15 = arith.addf %12, %14 : vector<128x128xf32>
    %c0_12 = arith.constant 0 : index
    %c0_13 = arith.constant 0 : index
    %16 = vector.load %arg7[%c0_12, %c0_13] : memref<128x128xf32, #tpu.memory_space<vmem>>, vector<128x128xf32>
    %cst_14 = arith.constant dense<0.000000e+00> : vector<128x128xf32>
    %17 = tpu.matmul %4, %16, %cst_14 {dimension_numbers = #tpu.dot_dimension_numbers<[1], [0], [0], [1], [0, 0, 1, 1], [], []>} : vector<128x128xf32>, vector<128x128xf32>, vector<128x128xf32> -> vector<128x128xf32>
    %c0_15 = arith.constant 0 : index
    %c0_16 = arith.constant 0 : index
    %18 = vector.load %arg8[%c0_15, %c0_16] : memref<1x128xf32, #tpu.memory_space<vmem>>, vector<1x128xf32>
    %19 = vector.broadcast %18 : vector<1x128xf32> to vector<128x128xf32>
    %20 = arith.addf %17, %19 : vector<128x128xf32>
    %cst_17 = arith.constant dense<0.000000e+00> : vector<128xf32>
    %21 = vector.multi_reduction <add>, %15, %cst_17 [0] : vector<128x128xf32> to vector<128xf32>
    %22 = vector.shape_cast %21 : vector<128xf32> to vector<1x128xf32>
    %23 = arith.addf %2, %22 : vector<1x128xf32>
    %cst_18 = arith.constant dense<0.000000e+00> : vector<128x128xf32>
    %24 = tpu.matmul %15, %20, %cst_18 {dimension_numbers = #tpu.dot_dimension_numbers<[0], [0], [1], [1], [0, 1, 1, 1], [], []>} : vector<128x128xf32>, vector<128x128xf32>, vector<128x128xf32> -> vector<128x128xf32>
    %25 = arith.addf %1, %24 : vector<128x128xf32>
    %26 = arith.mulf %25, %0 : vector<128x128xf32>
    %c0_19 = arith.constant 0 : index
    %c0_20 = arith.constant 0 : index
    %c0_21 = arith.constant 0 : index
    %27 = vector.load %arg1[%c0_19, %c0_20, %c0_21] : memref<1x128x128xf32, #tpu.memory_space<vmem>>, vector<1x128x128xf32>
    %28 = vector.shape_cast %27 : vector<1x128x128xf32> to vector<128x128xf32>
    %c0_22 = arith.constant 0 : index
    %c0_23 = arith.constant 0 : index
    %29 = vector.load %arg3[%c0_22, %c0_23] : memref<128x128xf32, #tpu.memory_space<vmem>>, vector<128x128xf32>
    %cst_24 = arith.constant dense<0.000000e+00> : vector<128x128xf32>
    %30 = tpu.matmul %28, %29, %cst_24 {dimension_numbers = #tpu.dot_dimension_numbers<[1], [0], [0], [1], [0, 0, 1, 1], [], []>} : vector<128x128xf32>, vector<128x128xf32>, vector<128x128xf32> -> vector<128x128xf32>
    %c0_25 = arith.constant 0 : index
    %c0_26 = arith.constant 0 : index
    %31 = vector.load %arg4[%c0_25, %c0_26] : memref<1x128xf32, #tpu.memory_space<vmem>>, vector<1x128xf32>
    %32 = vector.broadcast %31 : vector<1x128xf32> to vector<128x128xf32>
    %33 = arith.addf %30, %32 : vector<128x128xf32>
    %cst_27 = arith.constant 0.000000e+00 : f32
    %34 = vector.broadcast %cst_27 : f32 to vector<128x128xf32>
    %35 = arith.minimumf %33, %34 : vector<128x128xf32>
    %36 = math.exp %35 : vector<128x128xf32>
    %cst_28 = arith.constant 0.000000e+00 : f32
    %37 = vector.broadcast %cst_28 : f32 to vector<128x128xf32>
    %38 = arith.maximumf %33, %37 : vector<128x128xf32>
    %39 = arith.addf %36, %38 : vector<128x128xf32>
    %cst_29 = arith.constant dense<0.000000e+00> : vector<128x128xf32>
    %40 = tpu.matmul %39, %26, %cst_29 {dimension_numbers = #tpu.dot_dimension_numbers<[1], [0], [0], [1], [0, 0, 1, 1], [], []>} : vector<128x128xf32>, vector<128x128xf32>, vector<128x128xf32> -> vector<128x128xf32>
    %41 = vector.broadcast %23 : vector<1x128xf32> to vector<128x128xf32>
    %42 = arith.mulf %39, %41 : vector<128x128xf32>
    %cst_30 = arith.constant dense<0.000000e+00> : vector<128x128xf32>
    %43 = tpu.matmul %42, %0, %cst_30 {dimension_numbers = #tpu.dot_dimension_numbers<[1], [0], [0], [1], [0, 0, 1, 1], [], []>} : vector<128x128xf32>, vector<128x128xf32>, vector<128x128xf32> -> vector<128x128xf32>
    %cst_31 = arith.constant 9.99999997E-7 : f32
    %44 = vector.broadcast %cst_31 : f32 to vector<128x128xf32>
    %45 = arith.addf %43, %44 : vector<128x128xf32>
    %46 = tpu.reciprocal %45 {approx = true} : vector<128x128xf32> -> vector<128x128xf32>
    %47 = arith.mulf %40, %46 : vector<128x128xf32>
    %c0_32 = arith.constant 0 : index
    %c0_33 = arith.constant 0 : index
    %48 = vector.load %arg9[%c0_32, %c0_33] : memref<128x128xf32, #tpu.memory_space<vmem>>, vector<128x128xf32>
    %cst_34 = arith.constant dense<0.000000e+00> : vector<128x128xf32>
    %49 = tpu.matmul %47, %48, %cst_34 {dimension_numbers = #tpu.dot_dimension_numbers<[1], [0], [0], [1], [0, 0, 1, 1], [], []>} : vector<128x128xf32>, vector<128x128xf32>, vector<128x128xf32> -> vector<128x128xf32>
    %c0_35 = arith.constant 0 : index
    %c0_36 = arith.constant 0 : index
    %50 = vector.load %arg10[%c0_35, %c0_36] : memref<1x128xf32, #tpu.memory_space<vmem>>, vector<1x128xf32>
    %51 = vector.broadcast %50 : vector<1x128xf32> to vector<128x128xf32>
    %52 = arith.addf %49, %51 : vector<128x128xf32>
    %53 = arith.addf %28, %52 : vector<128x128xf32>
    %c0_37 = arith.constant 0 : index
    %c0_38 = arith.constant 0 : index
    %54 = vector.load %arg11[%c0_37, %c0_38] : memref<1x128xf32, #tpu.memory_space<vmem>>, vector<1x128xf32>
    %c0_39 = arith.constant 0 : index
    %c0_40 = arith.constant 0 : index
    %55 = vector.load %arg12[%c0_39, %c0_40] : memref<1x128xf32, #tpu.memory_space<vmem>>, vector<1x128xf32>
    %cst_41 = arith.constant dense<0.000000e+00> : vector<128xf32>
    %56 = vector.multi_reduction <add>, %53, %cst_41 [1] : vector<128x128xf32> to vector<128xf32>
    %57 = vector.shape_cast %56 : vector<128xf32> to vector<128x1xf32>
    %cst_42 = arith.constant 1.280000e+02 : f32
    %58 = vector.broadcast %cst_42 : f32 to vector<128x1xf32>
    %59 = arith.divf %57, %58 : vector<128x1xf32>
    %60 = vector.broadcast %59 : vector<128x1xf32> to vector<128x128xf32>
    %61 = arith.subf %53, %60 : vector<128x128xf32>
    %62 = arith.mulf %61, %61 : vector<128x128xf32>
    %cst_43 = arith.constant dense<0.000000e+00> : vector<128xf32>
    %63 = vector.multi_reduction <add>, %62, %cst_43 [1] : vector<128x128xf32> to vector<128xf32>
    %64 = vector.shape_cast %63 : vector<128xf32> to vector<128x1xf32>
    %cst_44 = arith.constant 1.280000e+02 : f32
    %65 = vector.broadcast %cst_44 : f32 to vector<128x1xf32>
    %66 = arith.divf %64, %65 : vector<128x1xf32>
    %cst_45 = arith.constant 9.99999974E-6 : f32
    %67 = vector.broadcast %cst_45 : f32 to vector<128x1xf32>
    %68 = arith.addf %66, %67 : vector<128x1xf32>
    %69 = math.rsqrt %68 : vector<128x1xf32>
    %70 = vector.broadcast %69 : vector<128x1xf32> to vector<128x128xf32>
    %71 = arith.mulf %61, %70 : vector<128x128xf32>
    %72 = vector.broadcast %54 : vector<1x128xf32> to vector<128x128xf32>
    %73 = arith.mulf %71, %72 : vector<128x128xf32>
    %74 = vector.broadcast %55 : vector<1x128xf32> to vector<128x128xf32>
    %75 = arith.addf %73, %74 : vector<128x128xf32>
    %cst_46 = arith.constant 0.000000e+00 : f32
    %76 = vector.broadcast %cst_46 : f32 to vector<128x128xf32>
    %c0_47 = arith.constant 0 : index
    %c0_48 = arith.constant 0 : index
    %77 = vector.load %arg13[%c0_47, %c0_48] : memref<128x256xf32, #tpu.memory_space<vmem>>, vector<128x256xf32>
    %cst_49 = arith.constant dense<0.000000e+00> : vector<128x256xf32>
    %78 = tpu.matmul %75, %77, %cst_49 {dimension_numbers = #tpu.dot_dimension_numbers<[1], [0], [0], [1], [0, 0, 1, 1], [], []>} : vector<128x128xf32>, vector<128x256xf32>, vector<128x256xf32> -> vector<128x256xf32>
    %c0_50 = arith.constant 0 : index
    %c0_51 = arith.constant 0 : index
    %79 = vector.load %arg14[%c0_50, %c0_51] : memref<1x256xf32, #tpu.memory_space<vmem>>, vector<1x256xf32>
    %80 = vector.broadcast %79 : vector<1x256xf32> to vector<128x256xf32>
    %81 = arith.addf %78, %80 : vector<128x256xf32>
    %82 = arith.mulf %81, %81 : vector<128x256xf32>
    %83 = arith.mulf %81, %82 : vector<128x256xf32>
    %cst_52 = arith.constant 4.471500e-02 : f32
    %84 = vector.broadcast %cst_52 : f32 to vector<128x256xf32>
    %85 = arith.mulf %84, %83 : vector<128x256xf32>
    %86 = arith.addf %81, %85 : vector<128x256xf32>
    %cst_53 = arith.constant 0.797884583 : f32
    %87 = vector.broadcast %cst_53 : f32 to vector<128x256xf32>
    %88 = arith.mulf %87, %86 : vector<128x256xf32>
    %89 = math.tanh %88 : vector<128x256xf32>
    %cst_54 = arith.constant 1.000000e+00 : f32
    %90 = vector.broadcast %cst_54 : f32 to vector<128x256xf32>
    %91 = arith.addf %90, %89 : vector<128x256xf32>
    %cst_55 = arith.constant 5.000000e-01 : f32
    %92 = vector.broadcast %cst_55 : f32 to vector<128x256xf32>
    %93 = arith.mulf %92, %91 : vector<128x256xf32>
    %94 = arith.mulf %81, %93 : vector<128x256xf32>
    %c0_56 = arith.constant 0 : index
    %c0_57 = arith.constant 0 : index
    %95 = vector.load %arg15[%c0_56, %c0_57] : memref<256x128xf32, #tpu.memory_space<vmem>>, vector<256x128xf32>
    %cst_58 = arith.constant dense<0.000000e+00> : vector<128x128xf32>
    %96 = tpu.matmul %94, %95, %cst_58 {dimension_numbers = #tpu.dot_dimension_numbers<[1], [0], [0], [1], [0, 0, 1, 1], [], []>} : vector<128x256xf32>, vector<256x128xf32>, vector<128x128xf32> -> vector<128x128xf32>
    %97 = arith.addf %76, %96 : vector<128x128xf32>
    %98 = arith.addf %75, %97 : vector<128x128xf32>
    %c0_59 = arith.constant 0 : index
    %c0_60 = arith.constant 0 : index
    %99 = vector.load %arg16[%c0_59, %c0_60] : memref<1x128xf32, #tpu.memory_space<vmem>>, vector<1x128xf32>
    %100 = vector.broadcast %99 : vector<1x128xf32> to vector<128x128xf32>
    %101 = arith.addf %98, %100 : vector<128x128xf32>
    %c0_61 = arith.constant 0 : index
    %c0_62 = arith.constant 0 : index
    %102 = vector.load %arg17[%c0_61, %c0_62] : memref<1x128xf32, #tpu.memory_space<vmem>>, vector<1x128xf32>
    %c0_63 = arith.constant 0 : index
    %c0_64 = arith.constant 0 : index
    %103 = vector.load %arg18[%c0_63, %c0_64] : memref<1x128xf32, #tpu.memory_space<vmem>>, vector<1x128xf32>
    %cst_65 = arith.constant dense<0.000000e+00> : vector<128xf32>
    %104 = vector.multi_reduction <add>, %101, %cst_65 [1] : vector<128x128xf32> to vector<128xf32>
    %105 = vector.shape_cast %104 : vector<128xf32> to vector<128x1xf32>
    %cst_66 = arith.constant 1.280000e+02 : f32
    %106 = vector.broadcast %cst_66 : f32 to vector<128x1xf32>
    %107 = arith.divf %105, %106 : vector<128x1xf32>
    %108 = vector.broadcast %107 : vector<128x1xf32> to vector<128x128xf32>
    %109 = arith.subf %101, %108 : vector<128x128xf32>
    %110 = arith.mulf %109, %109 : vector<128x128xf32>
    %cst_67 = arith.constant dense<0.000000e+00> : vector<128xf32>
    %111 = vector.multi_reduction <add>, %110, %cst_67 [1] : vector<128x128xf32> to vector<128xf32>
    %112 = vector.shape_cast %111 : vector<128xf32> to vector<128x1xf32>
    %cst_68 = arith.constant 1.280000e+02 : f32
    %113 = vector.broadcast %cst_68 : f32 to vector<128x1xf32>
    %114 = arith.divf %112, %113 : vector<128x1xf32>
    %cst_69 = arith.constant 9.99999974E-6 : f32
    %115 = vector.broadcast %cst_69 : f32 to vector<128x1xf32>
    %116 = arith.addf %114, %115 : vector<128x1xf32>
    %117 = math.rsqrt %116 : vector<128x1xf32>
    %118 = vector.broadcast %117 : vector<128x1xf32> to vector<128x128xf32>
    %119 = arith.mulf %109, %118 : vector<128x128xf32>
    %120 = vector.broadcast %102 : vector<1x128xf32> to vector<128x128xf32>
    %121 = arith.mulf %119, %120 : vector<128x128xf32>
    %122 = vector.broadcast %103 : vector<1x128xf32> to vector<128x128xf32>
    %123 = arith.addf %121, %122 : vector<128x128xf32>
    %c0_70 = arith.constant 0 : index
    %c0_71 = arith.constant 0 : index
    %c0_72 = arith.constant 0 : index
    %124 = vector.load %arg19[%c0_70, %c0_71, %c0_72] : memref<1x128x128xf32, #tpu.memory_space<vmem>>, vector<1x128x128xf32>
    %125 = vector.shape_cast %124 : vector<1x128x128xf32> to vector<128x128xf32>
    %126 = vector.shape_cast %123 : vector<128x128xf32> to vector<1x128x128xf32>
    tpu.vector_store %arg19[%c0_70, %c0_71, %c0_72], %126 {strides = array<i32>} : memref<1x128x128xf32, #tpu.memory_space<vmem>>, vector<1x128x128xf32>,
    return
  }
  func.func @transform_0(%arg0: i32) -> (i32, i32, i32) {
    %c0_i32 = arith.constant 0 : i32
    %c0_i32_0 = arith.constant 0 : i32
    %c0_i32_1 = arith.constant 0 : i32
    return %arg0, %c0_i32, %c0_i32_0 : i32, i32, i32
  }
  func.func @transform_1(%arg0: i32) -> (i32, i32) {
    %c0_i32 = arith.constant 0 : i32
    %c0_i32_0 = arith.constant 0 : i32
    %c0_i32_1 = arith.constant 0 : i32
    return %c0_i32, %c0_i32_0 : i32, i32
  }
  func.func @transform_2(%arg0: i32) -> (i32, i32) {
    %c0_i32 = arith.constant 0 : i32
    %c0_i32_0 = arith.constant 0 : i32
    %c0_i32_1 = arith.constant 0 : i32
    return %c0_i32, %c0_i32_0 : i32, i32
  }
  func.func @transform_3(%arg0: i32) -> (i32, i32) {
    %c0_i32 = arith.constant 0 : i32
    %c0_i32_0 = arith.constant 0 : i32
    %c0_i32_1 = arith.constant 0 : i32
    return %c0_i32, %c0_i32_0 : i32, i32
  }
  func.func @transform_4(%arg0: i32) -> (i32, i32) {
    %c0_i32 = arith.constant 0 : i32
    %c0_i32_0 = arith.constant 0 : i32
    %c0_i32_1 = arith.constant 0 : i32
    return %c0_i32, %c0_i32_0 : i32, i32
  }
  func.func @transform_5(%arg0: i32) -> (i32, i32) {
    %c0_i32 = arith.constant 0 : i32
    %c0_i32_0 = arith.constant 0 : i32
    %c0_i32_1 = arith.constant 0 : i32
    return %c0_i32, %c0_i32_0 : i32, i32
  }
  func.func @transform_6(%arg0: i32) -> (i32, i32) {
    %c0_i32 = arith.constant 0 : i32
    %c0_i32_0 = arith.constant 0 : i32
    %c0_i32_1 = arith.constant 0 : i32
    return %c0_i32, %c0_i32_0 : i32, i32
  }
  func.func @transform_7(%arg0: i32) -> (i32, i32) {
    %c0_i32 = arith.constant 0 : i32
    %c0_i32_0 = arith.constant 0 : i32
    %c0_i32_1 = arith.constant 0 : i32
    return %c0_i32, %c0_i32_0 : i32, i32
  }
  func.func @transform_8(%arg0: i32) -> (i32, i32) {
    %c0_i32 = arith.constant 0 : i32
    %c0_i32_0 = arith.constant 0 : i32
    %c0_i32_1 = arith.constant 0 : i32
    return %c0_i32, %c0_i32_0 : i32, i32
  }
  func.func @transform_9(%arg0: i32) -> (i32, i32) {
    %c0_i32 = arith.constant 0 : i32
    %c0_i32_0 = arith.constant 0 : i32
    %c0_i32_1 = arith.constant 0 : i32
    return %c0_i32, %c0_i32_0 : i32, i32
  }
  func.func @transform_10(%arg0: i32) -> (i32, i32) {
    %c0_i32 = arith.constant 0 : i32
    %c0_i32_0 = arith.constant 0 : i32
    %c0_i32_1 = arith.constant 0 : i32
    return %c0_i32, %c0_i32_0 : i32, i32
  }
  func.func @transform_11(%arg0: i32) -> (i32, i32) {
    %c0_i32 = arith.constant 0 : i32
    %c0_i32_0 = arith.constant 0 : i32
    %c0_i32_1 = arith.constant 0 : i32
    return %c0_i32, %c0_i32_0 : i32, i32
  }
  func.func @transform_12(%arg0: i32) -> (i32, i32) {
    %c0_i32 = arith.constant 0 : i32
    %c0_i32_0 = arith.constant 0 : i32
    %c0_i32_1 = arith.constant 0 : i32
    return %c0_i32, %c0_i32_0 : i32, i32
  }
  func.func @transform_13(%arg0: i32) -> (i32, i32) {
    %c0_i32 = arith.constant 0 : i32
    %c0_i32_0 = arith.constant 0 : i32
    %c0_i32_1 = arith.constant 0 : i32
    return %c0_i32, %c0_i32_0 : i32, i32
  }
  func.func @transform_14(%arg0: i32) -> (i32, i32) {
    %c0_i32 = arith.constant 0 : i32
    %c0_i32_0 = arith.constant 0 : i32
    %c0_i32_1 = arith.constant 0 : i32
    return %c0_i32, %c0_i32_0 : i32, i32
  }
  func.func @transform_15(%arg0: i32) -> (i32, i32) {
    %c0_i32 = arith.constant 0 : i32
    %c0_i32_0 = arith.constant 0 : i32
    %c0_i32_1 = arith.constant 0 : i32
    return %c0_i32, %c0_i32_0 : i32, i32
  }
  func.func @transform_16(%arg0: i32) -> (i32, i32) {
    %c0_i32 = arith.constant 0 : i32
    %c0_i32_0 = arith.constant 0 : i32
    %c0_i32_1 = arith.constant 0 : i32
    return %c0_i32, %c0_i32_0 : i32, i32
  }
  func.func @transform_17(%arg0: i32) -> (i32, i32) {
    %c0_i32 = arith.constant 0 : i32
    %c0_i32_0 = arith.constant 0 : i32
    %c0_i32_1 = arith.constant 0 : i32
    return %c0_i32, %c0_i32_0 : i32, i32
  }
  func.func @transform_18(%arg0: i32) -> (i32, i32, i32) {
    %c0_i32 = arith.constant 0 : i32
    %c0_i32_0 = arith.constant 0 : i32
    %c0_i32_1 = arith.constant 0 : i32
    return %arg0, %c0_i32, %c0_i32_0 : i32, i32, i32
  }
}

</mosaic_0001>

<bundles_post_ra>
// kernel: tpu_custom_call.1
= control target key start
LH: loop header
LB: loop body
LE: loop exit
PB: predicated region body
PF: predicated region fallthrough
CT: control target
= control target key end

     0   :  { %s6914_s0 = inlined_call_operand.hbm [shape: f32[2,128,128], index: 0, kind: input, shape index: {}]   ;;  %s6915_s1 = inlined_call_operand.hbm [shape: f32[128,128], index: 1, kind: input, shape index: {}]   ;;  %s6916_s2 = inlined_call_operand.hbm [shape: f32[128,128], index: 2, kind: input, shape index: {}]   ;;  %s6917_s3 = inlined_call_operand.vmem [shape: f32[1,128], index: 3, kind: input, shape index: {}]   ;;  %s6918_s4 = inlined_call_operand.hbm [shape: f32[128,128], index: 4, kind: input, shape index: {}]   ;;  %s6919_s5 = inlined_call_operand.vmem [shape: f32[1,128], index: 5, kind: input, shape index: {}]   ;;  %s6920_s6 = inlined_call_operand.hbm [shape: f32[128,128], index: 6, kind: input, shape index: {}]   ;;  %s6921_s7 = inlined_call_operand.vmem [shape: f32[1,128], index: 7, kind: input, shape index: {}]   ;;  %s6922_s8 = inlined_call_operand.hbm [shape: f32[128,128], index: 8, kind: input, shape index: {}]   ;;  %s6923_s9 = inlined_call_operand.vmem [shape: f32[1,128], index: 9, kind: input, shape index: {}]   ;;  %s6924_s10 = inlined_call_operand.vmem [shape: f32[1,128], index: 10, kind: input, shape index: {}]   ;;  %s6925_s11 = inlined_call_operand.vmem [shape: f32[1,128], index: 11, kind: input, shape index: {}]   ;;  %s6926_s12 = inlined_call_operand.hbm [shape: f32[128,256], index: 12, kind: input, shape index: {}]   ;;  %s6927_s13 = inlined_call_operand.vmem [shape: f32[1,256], index: 13, kind: input, shape index: {}]   ;;  %s6928_s14 = inlined_call_operand.hbm [shape: f32[256,128], index: 14, kind: input, shape index: {}]   ;;  %s6929_s15 = inlined_call_operand.vmem [shape: f32[1,128], index: 15, kind: input, shape index: {}]   ;;  %s6930_s16 = inlined_call_operand.vmem [shape: f32[1,128], index: 16, kind: input, shape index: {}]   ;;  %s6931_s17 = inlined_call_operand.vmem [shape: f32[1,128], index: 17, kind: input, shape index: {}]   ;;  %s6932_s18 = inlined_call_operand.hbm [shape: f32[2,128,128], index: 18, kind: output, shape index: {}]  }
   0x1   :  { %6949 = sst [smem:[#allocation28_spill]] %s6914_s0 }
   0x2   :  { %6950 = sst [smem:[#allocation29_spill]] %s6915_s1 }
   0x3   :  { %6951 = sst [smem:[#allocation30_spill]] %s6916_s2 }
   0x4   :  { %6952 = sst [smem:[#allocation31_spill]] %s6918_s4 }
   0x5   :  { %6953 = sst [smem:[#allocation32_spill]] %s6920_s6 }
   0x6   :  { %6954 = sst [smem:[#allocation33_spill]] %s6923_s9 }
   0x7   :  { %6955 = sst [smem:[#allocation34_spill]] %s6924_s10 }
   0x8   :  { %6956 = sst [smem:[#allocation35_spill]] %s6925_s11 }
   0x9   :  { %6957 = sst [smem:[#allocation36_spill]] %s6927_s13 }
   0xa   :  { %6958 = sst [smem:[#allocation37_spill]] %s6929_s15 }
   0xb   :  { %6959 = sst [smem:[#allocation38_spill]] %s6930_s16 }
   0xc   :  { %6960 = sst [smem:[#allocation39_spill]] %s6931_s17 }
   0xd   :  { %6961 = sst [smem:[#allocation40_spill]] %s6932_s18 }
   0xe   :  { %23 = vsyncpa [#allocation3], 0 }
   0xf   :  { %25 = vsyncpa [#allocation3 + $0x1], 0 }
  0x10   :  { %26 = vsyncpa [#allocation6], 0 }
  0x11   :  { %27 = vsyncpa [#allocation9], 0 }
  0x12   :  { %28 = vsyncpa [#allocation12], 0 }
  0x13   :  { %29 = vsyncpa [#allocation15], 0 }
  0x14   :  { %30 = vsyncpa [#allocation4], 0 }
  0x15   :  { %32 = vsyncpa [#allocation4 + $0x1], 0  ;;  %s5277_s27 = smov 0   ;;  %s5279_s28 = smov 0  }
  0x16   :  { %s5281_s29 = smov 0   ;;  %s5283_s30 = smov 0  }
  0x17 LB: > { %s5166_s0 = smov [#allocation5]   ;;  %s5298_s1 = sadd.s32 4294967295, %s5164_s30   ;;  %s5164_s30 = sphi %s5283_s30, %s7010_s30   ;;  %s5160_s29 = sphi %s5281_s29, %s7009_s29   ;;  %s5156_s28 = sphi %s5279_s28, %s7008_s28   ;;  %s5152_s27 = sphi %s5277_s27, %s7007_s27  }
  0x18   : > { %s464_s19 = sshll.u32 %s5166_s0, 4  ;;  %p3454_p0 = scmp.ge.s32.totalorder %s5164_s30, 1  ;;  %s5303_s19 = int_to_ptr.vmem [resolvable:$true] %s464_s19 }
  0x19   : > { %p6938_p1 = scmp.eq.s32.totalorder %s5298_s1, 0  ;;  %p452_p2 = scmp.lt.s32.totalorder %s5164_s30, 3 }
  0x1a   : > { %s5167_s21 = smov [#allocation8]   ;;  %s5168_s23 = smov [#allocation11]  }
  0x1b   : > { %p5305_p3 = pnand %p3454_p0, %p452_p2  ;;  %s493_s22 = sshll.u32 %s5167_s21, 4  ;;  %s5318_s22 = int_to_ptr.vmem [resolvable:$true] %s493_s22 }
  0x1c   : > { %s525_s24 = sshll.u32 %s5168_s23, 4  ;;  %s6964_s0 = sld [smem:[#allocation29_spill]]  ;;  %s5320_s24 = int_to_ptr.vmem [resolvable:$true] %s525_s24 }
  0x1d   : > { %s6962_s20 = scalar_select %p5305_p3, 1, 0 }
  0x1e   : > { %p4524_p5 = pneg %p5305_p3 }
  0x20   : > { %p5314_p6 = pnand %p4524_p5, %p6938_p1 }
  0x22   : > { %s4856_s18 = scalar_lea.hbm %s6964_s0, 2048  ;;  %p5330_p8 = pneg %p5314_p6 }
  0x23   : > { %p4857_p7 = scmp.ne.s32.totalorder %s6964_s0, %s4856_s18  ;;  %p4863_p11 = scmp.lt.u32.totalorder %s4856_s18, %s6964_s0 }
  0x25   : > { %p4859_p9 = pnand %p5330_p8, %p4857_p7 }
  0x27   : > { %p4860_p10 = pneg %p4859_p9 }
  0x29   : > { %p4865_p12 = pnand %p4863_p11, %p4860_p10 }
  0x2b   : > { %4868 = shalt.err (!%p4865_p12)
}
  0x2c   : > { %s4869_s16 = scalar_lea.vmem %s5303_s19, 2048  ;;  %p4877_p5 = scmp.lt.s32.totalorder %s5303_s19, %s5303_s19 }
  0x2d   : > { %p4870_p13 = scmp.ne.s32.totalorder %s5303_s19, %s4869_s16  ;;  %p4878_p4 = scmp.lt.s32.totalorder %s4869_s16, %s4869_s16 }
  0x2f   : > { %p4872_p0 = pnand %p4870_p13, %p5330_p8  ;;  %p4879_p7 = por %p4878_p4, %p4877_p5 }
  0x31   : > { %p4873_p2 = pneg %p4872_p0 }
  0x33   : > { %p4880_p9 = pnand %p4879_p7, %p4873_p2 }
  0x35   : > { %4883 = shalt.err (!%p4880_p9)
}
  0x36   : > { %s6940_s17 = smov 128   ;;  %s6942_s15 = smov 8  }
  0x37   : > { %4527 = dma.hbm_to_vmem [thread:$0]  (!%p5314_p6), %s6964_s0, 2048, %s5303_s19, [#allocation6], %s6940_s17, %s6940_s17, %s6942_s15  }
  0x38   : > { %s6966_s4 = sld [smem:[#allocation31_spill]] }
  0x3e   : > { %s4884_s16 = scalar_lea.hbm %s6966_s4, 2048 }
  0x3f   : > { %p4885_p4 = scmp.ne.s32.totalorder %s6966_s4, %s4884_s16  ;;  %p4891_p12 = scmp.lt.u32.totalorder %s4884_s16, %s6966_s4 }
  0x41   : > { %p4887_p10 = pnand %p4885_p4, %p5330_p8 }
  0x43   : > { %p4888_p11 = pneg %p4887_p10 }
  0x45   : > { %p4893_p13 = pnand %p4891_p12, %p4888_p11 }
  0x47   : > { %4896 = shalt.err (!%p4893_p13)
}
  0x48   : > { %s4897_s19 = scalar_lea.vmem %s5318_s22, 2048  ;;  %p4905_p7 = scmp.lt.s32.totalorder %s5318_s22, %s5318_s22 }
  0x49   : > { %p4898_p0 = scmp.ne.s32.totalorder %s5318_s22, %s4897_s19  ;;  %p4906_p9 = scmp.lt.s32.totalorder %s4897_s19, %s4897_s19 }
  0x4b   : > { %p4900_p2 = pnand %p4898_p0, %p5330_p8  ;;  %p4907_p4 = por %p4906_p9, %p4905_p7 }
  0x4d   : > { %p4901_p5 = pneg %p4900_p2 }
  0x4f   : > { %p4908_p10 = pnand %p4907_p4, %p4901_p5 }
  0x51   : > { %4911 = shalt.err (!%p4908_p10)
}
  0x52   : > { %4533 = dma.hbm_to_vmem [thread:$0]  (!%p5314_p6), %s6966_s4, 2048, %s5318_s22, [#allocation9], %s6940_s17, %s6940_s17, %s6942_s15  }
  0x53   : > { %s4912_s18 = scalar_lea.hbm %s6922_s8, 2048 }
  0x54   : > { %p4913_p11 = scmp.ne.s32.totalorder %s6922_s8, %s4912_s18  ;;  %p4919_p0 = scmp.lt.u32.totalorder %s4912_s18, %s6922_s8 }
  0x56   : > { %p4915_p12 = pnand %p4913_p11, %p5330_p8 }
  0x58   : > { %p4916_p13 = pneg %p4915_p12 }
  0x5a   : > { %p4921_p2 = pnand %p4919_p0, %p4916_p13 }
  0x5c   : > { %4924 = shalt.err (!%p4921_p2)
}
  0x5d   : > { %s4925_s22 = scalar_lea.vmem %s5320_s24, 2048  ;;  %p4933_p4 = scmp.lt.s32.totalorder %s5320_s24, %s5320_s24 }
  0x5e   : > { %p4926_p5 = scmp.ne.s32.totalorder %s5320_s24, %s4925_s22  ;;  %p4934_p10 = scmp.lt.s32.totalorder %s4925_s22, %s4925_s22 }
  0x60   : > { %p4928_p7 = pnand %p4926_p5, %p5330_p8  ;;  %p4935_p11 = por %p4934_p10, %p4933_p4 }
  0x62   : > { %p4929_p9 = pneg %p4928_p7 }
  0x64   : > { %p4936_p12 = pnand %p4935_p11, %p4929_p9 }
  0x66   : > { %4939 = shalt.err (!%p4936_p12)
}
  0x67   : > { %4539 = dma.hbm_to_vmem [thread:$0]  (!%p5314_p6), %s6922_s8, 2048, %s5320_s24, [#allocation12], %s6940_s17, %s6940_s17, %s6942_s15  }
  0x68   : > { %s5171_s10 = smov [#allocation7]   ;;  %s5172_s13 = smov [#allocation10]  }
  0x69   : > { %s477_s11 = sshll.u32 %s5171_s10, 4  ;;  %s509_s18 = sshll.u32 %s5172_s13, 4  ;;  %s478_s11 = int_to_ptr.vmem [resolvable:$true] %s477_s11  ;;  %s510_s18 = int_to_ptr.vmem [resolvable:$true] %s509_s18 }
  0x6a   : > { %s6967_s23 = sld [smem:[#allocation30_spill]] }
  0x70   : > { %s4940_s16 = scalar_lea.hbm %s6967_s23, 2048 }
  0x71   : > { %p4941_p13 = scmp.ne.s32.totalorder %s6967_s23, %s4940_s16  ;;  %p4947_p5 = scmp.lt.u32.totalorder %s4940_s16, %s6967_s23 }
  0x73   : > { %p4943_p0 = pnand %p4941_p13, %p5330_p8 }
  0x75   : > { %p4944_p2 = pneg %p4943_p0 }
  0x77   : > { %p4949_p7 = pnand %p4947_p5, %p4944_p2 }
  0x79   : > { %4952 = shalt.err (!%p4949_p7)
}
  0x7a   : > { %s4953_s24 = scalar_lea.vmem %s478_s11, 2048  ;;  %p4961_p11 = scmp.lt.s32.totalorder %s478_s11, %s478_s11 }
  0x7b   : > { %p4954_p9 = scmp.ne.s32.totalorder %s478_s11, %s4953_s24  ;;  %p4962_p12 = scmp.lt.s32.totalorder %s4953_s24, %s4953_s24 }
  0x7d   : > { %p4956_p4 = pnand %p4954_p9, %p5330_p8  ;;  %p4963_p1 = por %p4962_p12, %p4961_p11 }
  0x7f   : > { %p4957_p10 = pneg %p4956_p4 }
  0x81   : > { %p4964_p3 = pnand %p4963_p1, %p4957_p10 }
  0x83   : > { %4967 = shalt.err (!%p4964_p3)
}
  0x84   : > { %4530 = dma.hbm_to_vmem [thread:$0]  (!%p5314_p6), %s6967_s23, 2048, %s478_s11, [#allocation6], %s6940_s17, %s6940_s17, %s6942_s15  }
  0x85   : > { %s6968_s6 = sld [smem:[#allocation32_spill]] }
  0x8b   : > { %s4968_s13 = scalar_lea.hbm %s6968_s6, 2048 }
  0x8c   : > { %p4969_p1 = scmp.ne.s32.totalorder %s6968_s6, %s4968_s13  ;;  %p4975_p0 = scmp.lt.u32.totalorder %s4968_s13, %s6968_s6 }
  0x8e   : > { %p4971_p3 = pnand %p4969_p1, %p5330_p8 }
  0x90   : > { %p4972_p13 = pneg %p4971_p3 }
  0x92   : > { %p4977_p2 = pnand %p4975_p0, %p4972_p13 }
  0x94   : > { %4980 = shalt.err (!%p4977_p2)
}
  0x95   : > { %s4981_s19 = scalar_lea.vmem %s510_s18, 2048  ;;  %p4989_p4 = scmp.lt.s32.totalorder %s510_s18, %s510_s18 }
  0x96   : > { %p4982_p5 = scmp.ne.s32.totalorder %s510_s18, %s4981_s19  ;;  %p4990_p10 = scmp.lt.s32.totalorder %s4981_s19, %s4981_s19 }
  0x98   : > { %p4984_p7 = pnand %p4982_p5, %p5330_p8  ;;  %p4991_p11 = por %p4990_p10, %p4989_p4 }
  0x9a   : > { %p4985_p9 = pneg %p4984_p7 }
  0x9c   : > { %p4992_p12 = pnand %p4991_p11, %p4985_p9 }
  0x9e   : > { %4995 = shalt.err (!%p4992_p12)
}
  0x9f   : > { %4536 = dma.hbm_to_vmem [thread:$0]  (!%p5314_p6), %s6968_s6, 2048, %s510_s18, [#allocation9], %s6940_s17, %s6940_s17, %s6942_s15  }
  0xa0   : > { %s5173_s4 = smov [#allocation13]   ;;  %s4996_s13 = scalar_lea.hbm %s6926_s12, 4096 }
  0xa1   : > { %s547_s0 = sshll.u32 %s5173_s4, 4  ;;  %p4997_p1 = scmp.ne.s32.totalorder %s6926_s12, %s4996_s13  ;;  %s548_s0 = int_to_ptr.vmem [resolvable:$true] %s547_s0 }
  0xa2   : > { %p5003_p0 = scmp.lt.u32.totalorder %s4996_s13, %s6926_s12 }
  0xa3   : > { %p4999_p3 = pnand %p4997_p1, %p5330_p8 }
  0xa5   : > { %p5000_p13 = pneg %p4999_p3 }
  0xa7   : > { %p5005_p2 = pnand %p5003_p0, %p5000_p13 }
  0xa9   : > { %5008 = shalt.err (!%p5005_p2)
}
  0xaa   : > { %s5009_s18 = scalar_lea.vmem %s548_s0, 4096  ;;  %p5017_p4 = scmp.lt.s32.totalorder %s548_s0, %s548_s0 }
  0xab   : > { %p5010_p5 = scmp.ne.s32.totalorder %s548_s0, %s5009_s18  ;;  %p5018_p10 = scmp.lt.s32.totalorder %s5009_s18, %s5009_s18 }
  0xad   : > { %p5012_p7 = pnand %p5010_p5, %p5330_p8  ;;  %p5019_p11 = por %p5018_p10, %p5017_p4 }
  0xaf   : > { %p5013_p9 = pneg %p5012_p7 }
  0xb1   : > { %p5020_p12 = pnand %p5019_p11, %p5013_p9 }
  0xb3   : > { %5023 = shalt.err (!%p5020_p12)
}
  0xb4   : > { %s5174_s19 = smov 256   ;;  %s5175_s11 = smov 16  }
  0xb5   : > { %4542 = dma.hbm_to_vmem [thread:$0]  (!%p5314_p6), %s6926_s12, 4096, %s548_s0, [#allocation12], %s5174_s19, %s5174_s19, %s5175_s11  }
  0xb6   : > { %s5176_s9 = smov [#allocation14]   ;;  %s5024_s26 = scalar_lea.hbm %s6928_s14, 4096 }
  0xb7   : > { %s563_s10 = sshll.u32 %s5176_s9, 4  ;;  %p5025_p1 = scmp.ne.s32.totalorder %s6928_s14, %s5024_s26  ;;  %s564_s10 = int_to_ptr.vmem [resolvable:$true] %s563_s10 }
  0xb8   : > { %p5031_p0 = scmp.lt.u32.totalorder %s5024_s26, %s6928_s14 }
  0xb9   : > { %p5027_p3 = pnand %p5025_p1, %p5330_p8 }
  0xbb   : > { %p5028_p13 = pneg %p5027_p3 }
  0xbd   : > { %p5033_p2 = pnand %p5031_p0, %p5028_p13 }
  0xbf   : > { %5036 = shalt.err (!%p5033_p2)
}
  0xc0   : > { %s5037_s0 = scalar_lea.vmem %s564_s10, 4096  ;;  %p5045_p4 = scmp.lt.s32.totalorder %s564_s10, %s564_s10 }
  0xc1   : > { %p5038_p5 = scmp.ne.s32.totalorder %s564_s10, %s5037_s0  ;;  %p5046_p10 = scmp.lt.s32.totalorder %s5037_s0, %s5037_s0 }
  0xc3   : > { %p5040_p7 = pnand %p5038_p5, %p5330_p8  ;;  %p5047_p11 = por %p5046_p10, %p5045_p4 }
  0xc5   : > { %p5041_p9 = pneg %p5040_p7 }
  0xc7   : > { %p5048_p12 = pnand %p5047_p11, %p5041_p9 }
  0xc9   : > { %5051 = shalt.err (!%p5048_p12)
}
  0xca   : > { %s6969_s19 = smov 128   ;;  %s3453_s2 = sadd.s32 4294967294, %s5164_s30  }
  0xcb   : > { %4545 = dma.hbm_to_vmem [thread:$0]  (!%p5314_p6), %s6928_s14, 4096, %s564_s10, [#allocation15], %s6969_s19, %s6969_s19, %s6942_s15  }
  0xcc   : > { %s5489_s21 = sadd.s32 1, %s5164_s30   ;;  %s45_s24 = sadd.s32 1, %s5160_s29 }
  0xcd   : > { %s42_s4 = ssub.s32 %s5164_s30, %s5489_s21  ;;  %p52_p8 = scmp.ne.s32.totalorder %s5160_s29, %s5156_s28 }
  0xce   : > { %p43_p1 = scmp.eq.s32.totalorder %s42_s4, 0  ;;  %p53_p3 = scmp.eq.s32.totalorder %s5164_s30, 0 }
  0xcf   : > { %p58_p13 = scmp.ne.s32.totalorder %s5156_s28, %s5152_s27  ;;  %p439_p0 = scmp.eq.s32.totalorder %s5298_s1, 1 }
  0xd0   : > { %s5501_s9 = scalar_select %p43_p1, %s5160_s29, %s45_s24  }
  0xd1   : > { %p54_p2 = por %p53_p3, %p52_p8  ;;  %p6970_p5 = scmp.eq.s32.totalorder %s5298_s1, 0 }
  0xd2   : > { %p5509_p6 = por %p439_p0, %p52_p8  ;;  %p445_p9 = scmp.eq.s32.totalorder %s3453_s2, 1 }
  0xd3   : > { %p5505_p7 = por %p6970_p5, %p58_p13  ;;  %p4561_p4 = scmp.lt.s32.totalorder %s5164_s30, 2 }
  0xd4   : > { %s6972_s10 = scalar_select %p5509_p6, 1, 0 }
  0xd5   : > { %s586_s25 = sand.u32 1, %s5160_s29   ;;  %p5515_p10 = por %p445_p9, %p58_p13 }
  0xd6   : > { %s3463_s16 = sshll.u32 %s586_s25, 7  ;;  %s3490_s22 = sshll.u32 %s5164_s30, 11 }
  0xd7   : > { %s6973_s26 = scalar_select %p5515_p10, 1, 0 }
  0xd8   : > { %s6974_s17 = sld [smem:[#allocation28_spill]]  ;;  %s590_s24 = scalar_lea.vmem [#allocation2], %s3463_s16 }
  0xd9   : > { %s597_s4 = sshll.u32 %s590_s24, 4  ;;  %p5525_p11 = pnand %p4561_p4, %p54_p2  ;;  %s5529_s4 = int_to_ptr.vmem [resolvable:$true] %s597_s4 }
  0xda   : > { %s5531_s15 = scalar_lea.sflag [#allocation3], %s586_s25 }
  0xdb   : > { %p5054_p8 = pneg %p5525_p11 }
  0xde   : > { %s5523_s11 = scalar_lea.hbm %s6974_s17, %s3490_s22  ;;  %s5057_s18 = scalar_lea.hbm %s6974_s17, 4096 }
  0xdf   : > { %s5052_s6 = scalar_lea.hbm %s5523_s11, 2048  ;;  %p5058_p13 = scmp.lt.u32.totalorder %s5523_s11, %s6974_s17 }
  0xe0   : > { %p5053_p12 = scmp.ne.s32.totalorder %s5523_s11, %s5052_s6  ;;  %p5059_p0 = scmp.lt.u32.totalorder %s5057_s18, %s5052_s6 }
  0xe1   : > { %p5061_p5 = scmp.lt.u32.totalorder %s5052_s6, %s5523_s11 }
  0xe2   : > { %p5055_p1 = pnand %p5054_p8, %p5053_p12  ;;  %p5060_p2 = por %p5059_p0, %p5058_p13 }
  0xe4   : > { %p5056_p3 = pneg %p5055_p1  ;;  %p5062_p9 = por %p5061_p5, %p5060_p2 }
  0xe6   : > { %p5063_p4 = pnand %p5062_p9, %p5056_p3 }
  0xe8   : > { %5066 = shalt.err (!%p5063_p4)
}
  0xe9   : > { %s5067_s25 = scalar_lea.vmem %s5529_s4, 2048  ;;  %s5177_s16 = smov [#allocation2]  }
  0xea   : > { %p5068_p12 = scmp.ne.s32.totalorder %s5529_s4, %s5067_s25  ;;  %s5072_s22 = sshll.u32 %s5177_s16, 4  ;;  %s5073_s22 = int_to_ptr.vmem [resolvable:$false] %s5072_s22 }
  0xeb   : > { %s5074_s0 = scalar_lea.vmem %s5073_s22, 4096  ;;  %p5075_p6 = scmp.lt.s32.totalorder %s5529_s4, %s5073_s22 }
  0xec   : > { %p5070_p1 = pnand %p5068_p12, %p5054_p8  ;;  %p5076_p13 = scmp.lt.s32.totalorder %s5074_s0, %s5067_s25 }
  0xee   : > { %p5071_p10 = pneg %p5070_p1  ;;  %p5077_p0 = por %p5076_p13, %p5075_p6 }
  0xf0   : > { %p5078_p2 = pnand %p5077_p0, %p5071_p10 }
  0xf2   : > { %5081 = shalt.err (!%p5078_p2)
}
  0xf3   : > { %s6976_s6 = smov 8   ;;  %p6977_p8 = scmp.ne.s32.totalorder %s6962_s20, 0 }
  0xf4   : > { %4549 = dma.hbm_to_vmem [thread:$0]  (!%p5525_p11), %s5523_s11, 2048, %s5529_s4, %s5531_s15, %s6969_s19, %s6969_s19, %s6976_s6  }
  0xf5   : > { %609 = sbr.rel (%p6977_p8) target bundleno = 2552 (0x9f8), region = 92 }
  0xfc   : > { %s5565_s18 = sand.u32 1, %s5156_s28  }
  0xfd   : > { %s3467_s24 = sshll.u32 %s5565_s18, 7  ;;  %s612_s25 = scalar_lea.sflag [#allocation3], %s5565_s18 }
  0xfe   : > { %s5571_s2 = scalar_lea.vmem [#allocation2], %s3467_s24 }
  0xff   : > { %5127 = dma.done.wait (%p5505_p7), %s612_s25, 2048  }
 0x100   : > { %5129 = vsyncadd (%p5505_p7), %s612_s25, 4294965248  ;;  %p6978_p6 = scmp.eq.s32.totalorder %s5298_s1, 0 }
 0x102   : > { %5131 = dma.done.wait (%p6978_p6), [#allocation6], 4096   ;;  %p6979_p10 = pmov %p6978_p6 }
 0x103   : > { %p6980_p11 = pmov %p6978_p6 }
 0x104   : > { %5133 = vsyncadd (%p6979_p10), [#allocation6], 4294963200 }
 0x105   : > { %5135 = dma.done.wait (%p6980_p11), [#allocation9], 4096   ;;  %p6981_p3 = pmov %p6978_p6 }
 0x107   : > { %5137 = vsyncadd (%p6981_p3), [#allocation9], 4294963200  ;;  %p6982_p5 = pmov %p6981_p3 }
 0x108   : > { %p6983_p9 = pmov %p6981_p3 }
 0x109   : > { %5139 = dma.done.wait (%p6982_p5), [#allocation12], 6144  }
 0x10a   : > { %5141 = vsyncadd (%p6983_p9), [#allocation12], 4294961152  ;;  %p6984_p7 = pmov %p6981_p3 }
 0x10b   : > { %p6985_p4 = pmov %p6981_p3 }
 0x10c   : > { %5143 = dma.done.wait (%p6984_p7), [#allocation15], 4096  }
 0x10d   : > { %5145 = vsyncadd (%p6985_p4), [#allocation15], 4294963200  ;;  %v728_v0 = vld [vmem:[#allocation8] sm:$0xff]  ;;  %v729_v1 = vld [vmem:[#allocation8 + $0x8] sm:$0xff]  ;;  %s6986_s0 = sld [smem:[#allocation33_spill]]  ;;  %s6988_s19 = sld [smem:[#allocation35_spill]] }
 0x10e   : > { %v976_v2 = vld [vmem:[#allocation10] sm:$0xff]  ;;  %v4188_v3 = vpack.c.bf16 %v729_v1, %v728_v0  ;;  %v977_v4 = vld [vmem:[#allocation10 + $0x8] sm:$0xff]  ;;  %v730_v5 = vld [vmem:[#allocation8 + $0x10] sm:$0xff]  ;;  %s6994_s4 = sld [smem:[#allocation36_spill]]  ;;  %s6801_s13 = scalar_lea.vmem [#allocation16], %s3467_s24 }
 0x10f   : > { %v731_v6 = vld [vmem:[#allocation8 + $0x18] sm:$0xff]  ;;  %v4220_v7 = vpack.c.bf16 %v977_v4, %v976_v2  ;;  %v978_v9 = vld [vmem:[#allocation10 + $0x10] sm:$0xff]  ;;  %v732_v11 = vld [vmem:[#allocation8 + $0x20] sm:$0xff]  ;;  %s3491_s24 = sshll.u32 %s5298_s1, 11  ;;  %s3313_s11 = sshll.u32 %s6801_s13, 4  ;;  %s6868_s11 = int_to_ptr.vmem [resolvable:$true] %s3313_s11 }
 0x110   : > { %v4192_v8 = vpack.c.bf16 %v731_v6, %v730_v5  ;;  %v979_v10 = vld [vmem:[#allocation10 + $0x18] sm:$0xff]  ;;  %4189 = vmatprep.subr.bf16.mxu0 %v4188_v3  ;;  %v733_v13 = vld [vmem:[#allocation8 + $0x28] sm:$0xff]  ;;  %v980_v14 = vld [vmem:[#allocation10 + $0x20] sm:$0xff]  ;;  %s7003_s22 = sld [smem:[#allocation40_spill]]  ;;  %s3300_s6 = scalar_lea.sflag [#allocation4], %s5565_s18 }
 0x111   : > { %v4224_v12 = vpack.c.bf16 %v979_v10, %v978_v9  ;;  %v981_v15 = vld [vmem:[#allocation10 + $0x28] sm:$0xff]  ;;  %4221 = vmatprep.subr.bf16.mxu1 %v4220_v7  ;;  %4191 = vmatpush3.bf16.msra.mxu0 %v4188_v3  ;;  %v4196_v16 = vpack.c.bf16 %v733_v13, %v732_v11  ;;  %v734_v18 = vld [vmem:[#allocation8 + $0x30] sm:$0xff]  ;;  %v735_v19 = vld [vmem:[#allocation8 + $0x38] sm:$0xff]  ;;  %s5082_s1 = scalar_lea.vmem %s6868_s11, 2048  ;;  %p7004_p1 = scmp.ne.s32.totalorder %s6972_s10, 0 }
 0x112   : > { %4223 = vmatpush3.bf16.msra.mxu1 %v4220_v7  ;;  %4193 = vmatprep.subr.bf16.mxu0 %v4192_v8  ;;  %v4228_v17 = vpack.c.bf16 %v981_v15, %v980_v14  ;;  %v982_v20 = vld [vmem:[#allocation10 + $0x30] sm:$0xff]  ;;  %v983_v21 = vld [vmem:[#allocation10 + $0x38] sm:$0xff]  ;;  %v4200_v22 = vpack.c.bf16 %v735_v19, %v734_v18  ;;  %v736_v24 = vld [vmem:[#allocation8 + $0x40] sm:$0xff]  ;;  %p5083_p12 = scmp.ne.s32.totalorder %s6868_s11, %s5082_s1  ;;  %s5179_s25 = smov [#allocation16]  }
 0x113   : > { %4225 = vmatprep.subr.bf16.mxu1 %v4224_v12  ;;  %v4232_v23 = vpack.c.bf16 %v983_v21, %v982_v20  ;;  %v737_v25 = vld [vmem:[#allocation8 + $0x48] sm:$0xff]  ;;  %v5594_v26 = vld [vmem:[%s5571_s2] sm:$0xff]  ;;  %v738_v31 = vld [vmem:[#allocation8 + $0x50] sm:$0xff] }
 0x114   : > { %v984_v27 = vld [vmem:[#allocation10 + $0x40] sm:$0xff]  ;;  %v985_v28 = vld [vmem:[#allocation10 + $0x48] sm:$0xff]  ;;  %3828 = vmatprep.mubr.f32.mxu0 %v5594_v26  ;;  %3884 = vmatprep.mubr.f32.mxu1 %v5594_v26  ;;  %v4204_v29 = vpack.c.bf16 %v737_v25, %v736_v24  ;;  %v739_v32 = vld [vmem:[#allocation8 + $0x58] sm:$0xff]  ;;  %p5084_p13 = pnand %p5083_p12, %p7004_p1 }
 0x115   : > { %4195 = vmatpush3.bf16.msra.mxu0 %v4192_v8  ;;  %v4236_v30 = vpack.c.bf16 %v985_v28, %v984_v27  ;;  %v986_v33 = vld [vmem:[#allocation10 + $0x50] sm:$0xff]  ;;  %v987_v34 = vld [vmem:[#allocation10 + $0x58] sm:$0xff]  ;;  %v4208_v35 = vpack.c.bf16 %v739_v32, %v738_v31  ;;  %v740_v37 = vld [vmem:[#allocation8 + $0x60] sm:$0xff] }
 0x116   : > { %4227 = vmatpush3.bf16.msra.mxu1 %v4224_v12  ;;  %4197 = vmatprep.subr.bf16.mxu0 %v4196_v16  ;;  %v4240_v36 = vpack.c.bf16 %v987_v34, %v986_v33  ;;  %v741_v38 = vld [vmem:[#allocation8 + $0x68] sm:$0xff]  ;;  %v988_v39 = vld [vmem:[#allocation10 + $0x60] sm:$0xff]  ;;  %v742_v43 = vld [vmem:[#allocation8 + $0x70] sm:$0xff]  ;;  %p5085_p0 = pneg %p5084_p13 }
 0x117   : > { %4229 = vmatprep.subr.bf16.mxu1 %v4228_v17  ;;  %v989_v40 = vld [vmem:[#allocation10 + $0x68] sm:$0xff]  ;;  %v4212_v41 = vpack.c.bf16 %v741_v38, %v740_v37  ;;  %v743_v44 = vld [vmem:[#allocation8 + $0x78] sm:$0xff]  ;;  %v990_v45 = vld [vmem:[#allocation10 + $0x70] sm:$0xff] }
 0x118   : > { %v4244_v42 = vpack.c.bf16 %v989_v40, %v988_v39  ;;  %v991_v46 = vld [vmem:[#allocation10 + $0x78] sm:$0xff]  ;;  %v4216_v47 = vpack.c.bf16 %v743_v44, %v742_v43  ;;  %v1359_v49 = vld [vmem:[#allocation7] sm:$0xff]  ;;  %v1360_v50 = vld [vmem:[#allocation7 + $0x8] sm:$0xff] }
 0x119   : > { %4199 = vmatpush3.bf16.msra.mxu0 %v4196_v16  ;;  %v4248_v48 = vpack.c.bf16 %v991_v46, %v990_v45  ;;  %v4284_v51 = vpack.c.bf16 %v1360_v50, %v1359_v49  ;;  %v1361_v52 = vld [vmem:[#allocation7 + $0x10] sm:$0xff]  ;;  %v1362_v53 = vld [vmem:[#allocation7 + $0x18] sm:$0xff]  ;;  %v5599_v54 = vld [vmem:[%s5571_s2 + $0x8] sm:$0xff] }
 0x11a   : > { %4231 = vmatpush3.bf16.msra.mxu1 %v4228_v17  ;;  %4201 = vmatprep.subr.bf16.mxu0 %v4200_v22  ;;  %v5602_v55 = vld [vmem:[%s5571_s2 + $0x10] sm:$0xff]  ;;  %v4288_v56 = vpack.c.bf16 %v1362_v53, %v1361_v52  ;;  %v1363_v57 = vld [vmem:[#allocation7 + $0x20] sm:$0xff]  ;;  %v1364_v58 = vld [vmem:[#allocation7 + $0x28] sm:$0xff] }
 0x11b   : > { %4233 = vmatprep.subr.bf16.mxu1 %v4232_v23  ;;  %v5608_v59 = vld [vmem:[%s5571_s2 + $0x18] sm:$0xff]  ;;  %v5612_v60 = vld [vmem:[%s5571_s2 + $0x20] sm:$0xff]  ;;  %v4292_v61 = vpack.c.bf16 %v1364_v58, %v1363_v57  ;;  %v1365_v62 = vld [vmem:[#allocation7 + $0x30] sm:$0xff] }
 0x11c   : > { %v1366_v63 = vld [vmem:[#allocation7 + $0x38] sm:$0xff]  ;;  %v5618_v0 = vld [vmem:[%s5571_s2 + $0x28] sm:$0xff]  ;;  %v718_v1 = vld [vmem:[%s5571_s2 + $0x30] sm:$0xff] }
 0x11d   : > { %4203 = vmatpush3.bf16.msra.mxu0 %v4200_v22  ;;  %v4296_v2 = vpack.c.bf16 %v1366_v63, %v1365_v62  ;;  %v1367_v3 = vld [vmem:[#allocation7 + $0x40] sm:$0xff]  ;;  %v1368_v4 = vld [vmem:[#allocation7 + $0x48] sm:$0xff]  ;;  %v719_v5 = vld [vmem:[%s5571_s2 + $0x38] sm:$0xff] }
 0x11e   : > { %4235 = vmatpush3.bf16.msra.mxu1 %v4232_v23  ;;  %4205 = vmatprep.subr.bf16.mxu0 %v4204_v29  ;;  %v720_v6 = vld [vmem:[%s5571_s2 + $0x40] sm:$0xff]  ;;  %v4300_v7 = vpack.c.bf16 %v1368_v4, %v1367_v3  ;;  %v1369_v8 = vld [vmem:[#allocation7 + $0x50] sm:$0xff]  ;;  %v1370_v9 = vld [vmem:[#allocation7 + $0x58] sm:$0xff] }
 0x11f   : > { %4237 = vmatprep.subr.bf16.mxu1 %v4236_v30  ;;  %v721_v10 = vld [vmem:[%s5571_s2 + $0x48] sm:$0xff]  ;;  %v722_v11 = vld [vmem:[%s5571_s2 + $0x50] sm:$0xff]  ;;  %v4304_v12 = vpack.c.bf16 %v1370_v9, %v1369_v8  ;;  %v1371_v13 = vld [vmem:[#allocation7 + $0x60] sm:$0xff] }
 0x120   : > { %v1372_v14 = vld [vmem:[#allocation7 + $0x68] sm:$0xff]  ;;  %v723_v15 = vld [vmem:[%s5571_s2 + $0x58] sm:$0xff]  ;;  %v724_v16 = vld [vmem:[%s5571_s2 + $0x60] sm:$0xff] }
 0x121   : > { %4207 = vmatpush3.bf16.msra.mxu0 %v4204_v29  ;;  %v4308_v17 = vpack.c.bf16 %v1372_v14, %v1371_v13  ;;  %v1373_v18 = vld [vmem:[#allocation7 + $0x70] sm:$0xff]  ;;  %v1374_v19 = vld [vmem:[#allocation7 + $0x78] sm:$0xff]  ;;  %v725_v20 = vld [vmem:[%s5571_s2 + $0x68] sm:$0xff] }
 0x122   : > { %4239 = vmatpush3.bf16.msra.mxu1 %v4236_v30  ;;  %4209 = vmatprep.subr.bf16.mxu0 %v4208_v35  ;;  %v726_v21 = vld [vmem:[%s5571_s2 + $0x70] sm:$0xff]  ;;  %v4312_v22 = vpack.c.bf16 %v1374_v19, %v1373_v18  ;;  %v727_v23 = vld [vmem:[%s5571_s2 + $0x78] sm:$0xff]  ;;  %v5639_v24 = vld [vmem:[#allocation5] sm:$0xff] }
 0x123   : > { %4241 = vmatprep.subr.bf16.mxu1 %v4240_v36  ;;  %v5641_v25 = vld [vmem:[#allocation5 + $0x8] sm:$0xff]  ;;  %v5645_v27 = vld [vmem:[#allocation5 + $0x10] sm:$0xff]  ;;  %v5647_v28 = vld [vmem:[#allocation5 + $0x18] sm:$0xff] }
 0x124   : > { %v4352_v29 = vpack.c.bf16 %v5647_v28, %v5645_v27  ;;  %v5651_v30 = vld [vmem:[#allocation5 + $0x20] sm:$0xff]  ;;  %v5653_v31 = vld [vmem:[#allocation5 + $0x28] sm:$0xff]  ;;  %v5657_v33 = vld [vmem:[#allocation5 + $0x30] sm:$0xff] }
 0x125   : > { %4211 = vmatpush3.bf16.msra.mxu0 %v4208_v35  ;;  %v4356_v32 = vpack.c.bf16 %v5653_v31, %v5651_v30  ;;  %v5659_v34 = vld [vmem:[#allocation5 + $0x38] sm:$0xff]  ;;  %v5665_v37 = vld [vmem:[#allocation5 + $0x48] sm:$0xff]  ;;  %v5669_v39 = vld [vmem:[#allocation5 + $0x50] sm:$0xff] }
 0x126   : > { %4243 = vmatpush3.bf16.msra.mxu1 %v4240_v36  ;;  %4213 = vmatprep.subr.bf16.mxu0 %v4212_v41  ;;  %v4360_v35 = vpack.c.bf16 %v5659_v34, %v5657_v33  ;;  %v5663_v36 = vld [vmem:[#allocation5 + $0x40] sm:$0xff]  ;;  %v5671_v40 = vld [vmem:[#allocation5 + $0x58] sm:$0xff]  ;;  %v5677_v43 = vld [vmem:[#allocation5 + $0x68] sm:$0xff] }
 0x127   : > { %4245 = vmatprep.subr.bf16.mxu1 %v4244_v42  ;;  %v4364_v38 = vpack.c.bf16 %v5665_v37, %v5663_v36  ;;  %v5681_v45 = vld [vmem:[#allocation5 + $0x70] sm:$0xff]  ;;  %v5683_v46 = vld [vmem:[#allocation5 + $0x78] sm:$0xff]  ;;  %v5695_v49 = vld [vmem:[%s6921_s7] ss:$0 sm:$0xff] }
 0x129   : > { %4215 = vmatpush3.bf16.msra.mxu0 %v4212_v41  ;;  %v4368_v41 = vpack.c.bf16 %v5671_v40, %v5669_v39 }
 0x12a   : > { %4247 = vmatpush3.bf16.msra.mxu1 %v4244_v42  ;;  %4217 = vmatprep.subr.bf16.mxu0 %v4216_v47  ;;  %v5675_v42 = vld [vmem:[#allocation5 + $0x60] sm:$0xff] }
 0x12b   : > { %4249 = vmatprep.subr.bf16.mxu1 %v4248_v48  ;;  %v4372_v44 = vpack.c.bf16 %v5677_v43, %v5675_v42 }
 0x12d   : > { %4219 = vmatpush3.bf16.msra.mxu0 %v4216_v47  ;;  %v4376_v47 = vpack.c.bf16 %v5683_v46, %v5681_v45 }
 0x12e   : > { %4251 = vmatpush3.bf16.msra.mxu1 %v4248_v48  ;;  %v5690_v48 = vld [vmem:[%s6919_s5] ss:$0 sm:$0xff] }
 0x12f   : > { %4285 = vmatprep.subr.bf16.mxu1 %v4284_v51 }
 0x130   : > { %3829 = vmatmul.mubr.f32.vlgmr.msra.gmra.mrb[0].mxu0 %v5599_v54 }
 0x131   : > { %3885 = vmatmul.mubr.f32.vlgmr.msra.gmra.mrb[0].mxu1 %v5599_v54  ;;  %3831 = vmatprep.mubr.f32.mxu0 %v5602_v55 }
 0x132   : > { %4287 = vmatpush3.bf16.msra.mxu1 %v4284_v51  ;;  %3887 = vmatprep.mubr.f32.mxu1 %v5602_v55 }
 0x133   : > { %4289 = vmatprep.subr.bf16.mxu1 %v4288_v56 }
 0x134   : > { %3832 = vmatmul.mubr.f32.gmra.mrb[2].mxu0 %v5608_v59 }
 0x135   : > { %3888 = vmatmul.mubr.f32.gmra.mrb[2].mxu1 %v5608_v59  ;;  %3834 = vmatprep.mubr.f32.mxu0 %v5612_v60 }
 0x136   : > { %4291 = vmatpush3.bf16.msra.mxu1 %v4288_v56  ;;  %3890 = vmatprep.mubr.f32.mxu1 %v5612_v60 }
 0x137   : > { %4293 = vmatprep.subr.bf16.mxu1 %v4292_v61 }
 0x138   : > { %3835 = vmatmul.mubr.f32.gmra.mrb[4].mxu0 %v5618_v0 }
 0x139   : > { %3891 = vmatmul.mubr.f32.gmra.mrb[4].mxu1 %v5618_v0  ;;  %3837 = vmatprep.mubr.f32.mxu0 %v718_v1 }
 0x13a   : > { %4295 = vmatpush3.bf16.msra.mxu1 %v4292_v61  ;;  %3893 = vmatprep.mubr.f32.mxu1 %v718_v1 }
 0x13b   : > { %4297 = vmatprep.subr.bf16.mxu1 %v4296_v2 }
 0x13c   : > { %3838 = vmatmul.mubr.f32.gmra.mrb[6].mxu0 %v719_v5 }
 0x13d   : > { %3894 = vmatmul.mubr.f32.gmra.mrb[6].mxu1 %v719_v5  ;;  %3840 = vmatprep.mubr.f32.mxu0 %v720_v6 }
 0x13e   : > { %4299 = vmatpush3.bf16.msra.mxu1 %v4296_v2  ;;  %3896 = vmatprep.mubr.f32.mxu1 %v720_v6 }
 0x13f   : > { %4301 = vmatprep.subr.bf16.mxu1 %v4300_v7 }
 0x140   : > { %3841 = vmatmul.mubr.f32.gmra.mrb[8].mxu0 %v721_v10 }
 0x141   : > { %3897 = vmatmul.mubr.f32.gmra.mrb[8].mxu1 %v721_v10  ;;  %3843 = vmatprep.mubr.f32.mxu0 %v722_v11 }
 0x142   : > { %4303 = vmatpush3.bf16.msra.mxu1 %v4300_v7  ;;  %3899 = vmatprep.mubr.f32.mxu1 %v722_v11 }
 0x143   : > { %4305 = vmatprep.subr.bf16.mxu1 %v4304_v12 }
 0x144   : > { %3844 = vmatmul.mubr.f32.gmra.mrb[10].mxu0 %v723_v15 }
 0x145   : > { %3900 = vmatmul.mubr.f32.gmra.mrb[10].mxu1 %v723_v15  ;;  %3846 = vmatprep.mubr.f32.mxu0 %v724_v16 }
 0x146   : > { %4307 = vmatpush3.bf16.msra.mxu1 %v4304_v12  ;;  %3902 = vmatprep.mubr.f32.mxu1 %v724_v16 }
 0x147   : > { %4309 = vmatprep.subr.bf16.mxu1 %v4308_v17 }
 0x148   : > { %3847 = vmatmul.mubr.f32.gmra.mrb[12].mxu0 %v725_v20 }
 0x149   : > { %3903 = vmatmul.mubr.f32.gmra.mrb[12].mxu1 %v725_v20  ;;  %3849 = vmatprep.mubr.f32.mxu0 %v726_v21 }
 0x14a   : > { %4311 = vmatpush3.bf16.msra.mxu1 %v4308_v17  ;;  %3905 = vmatprep.mubr.f32.mxu1 %v726_v21 }
 0x14b   : > { %4313 = vmatprep.subr.bf16.mxu1 %v4312_v22 }
 0x14c   : > { %3850 = vmatmul.mubr.f32.gmra.mrb[14].mxu0 %v727_v23 }
 0x14d   : > { %3906 = vmatmul.mubr.f32.gmra.mrb[14].mxu1 %v727_v23 }
 0x14e   : > { %4315 = vmatpush3.bf16.msra.mxu1 %v4312_v22  ;;  %3996 = vmatprep.mubr.f32.mxu1 %v5594_v26  ;;  %v4348_v26 = vpack.c.bf16 %v5641_v25, %v5639_v24 }
 0x150   : > { %4349 = vmatprep.subr.bf16.mxu1 %v4348_v26 }
 0x151   : > { %3997 = vmatmul.mubr.f32.vlgmr.msra.gmra.mrb[16].mxu1 %v5599_v54 }
 0x152   : > { %3999 = vmatprep.mubr.f32.mxu1 %v5602_v55  ;;  %4351 = vmatpush3.bf16.msra.mxu1 %v4348_v26 }
 0x153   : > { %4353 = vmatprep.subr.bf16.mxu1 %v4352_v29 }
 0x155   : > { %4000 = vmatmul.mubr.f32.gmra.mrb[18].mxu1 %v5608_v59 }
 0x156   : > { %4002 = vmatprep.mubr.f32.mxu1 %v5612_v60  ;;  %4355 = vmatpush3.bf16.msra.mxu1 %v4352_v29 }
 0x157   : > { %4357 = vmatprep.subr.bf16.mxu1 %v4356_v32 }
 0x159   : > { %4003 = vmatmul.mubr.f32.gmra.mrb[20].mxu1 %v5618_v0 }
 0x15a   : > { %4005 = vmatprep.mubr.f32.mxu1 %v718_v1  ;;  %4359 = vmatpush3.bf16.msra.mxu1 %v4356_v32 }
 0x15b   : > { %4361 = vmatprep.subr.bf16.mxu1 %v4360_v35 }
 0x15d   : > { %4006 = vmatmul.mubr.f32.gmra.mrb[22].mxu1 %v719_v5 }
 0x15e   : > { %4008 = vmatprep.mubr.f32.mxu1 %v720_v6  ;;  %4363 = vmatpush3.bf16.msra.mxu1 %v4360_v35 }
 0x15f   : > { %4365 = vmatprep.subr.bf16.mxu1 %v4364_v38 }
 0x161   : > { %4009 = vmatmul.mubr.f32.gmra.mrb[24].mxu1 %v721_v10 }
 0x162   : > { %4011 = vmatprep.mubr.f32.mxu1 %v722_v11  ;;  %4367 = vmatpush3.bf16.msra.mxu1 %v4364_v38 }
 0x163   : > { %4369 = vmatprep.subr.bf16.mxu1 %v4368_v41 }
 0x165   : > { %4012 = vmatmul.mubr.f32.gmra.mrb[26].mxu1 %v723_v15 }
 0x166   : > { %4014 = vmatprep.mubr.f32.mxu1 %v724_v16  ;;  %4371 = vmatpush3.bf16.msra.mxu1 %v4368_v41 }
 0x167   : > { %4373 = vmatprep.subr.bf16.mxu1 %v4372_v44 }
 0x169   : > { %4015 = vmatmul.mubr.f32.gmra.mrb[28].mxu1 %v725_v20 }
 0x16a   : > { %4017 = vmatprep.mubr.f32.mxu1 %v726_v21  ;;  %4375 = vmatpush3.bf16.msra.mxu1 %v4372_v44 }
 0x16b   : > { %4377 = vmatprep.subr.bf16.mxu1 %v4376_v47 }
 0x16d   : > { %4018 = vmatmul.mubr.f32.gmra.mrb[30].mxu1 %v727_v23 }
 0x16e   : > { %4379 = vmatpush3.bf16.msra.mxu1 %v4376_v47 }
 0x203   : > { %v3830_v50 = vpop.f32.mrb[0].mxu0 }
 0x204   : > { %v5698_v51 = vadd.f32 %v3830_v50, %v5690_v48  ;;  %v817_v52 = vpop.f32.mrb[1].mxu0  ;;  %v3886_v53 = vpop.f32.mrb[0].mxu1 }
 0x205   : > { %v5701_v54 = vadd.f32 %v5690_v48, %v817_v52  ;;  %v1071_v55 = vadd.f32 %v3886_v53, %v5695_v49  ;;  %v1065_v56 = vpop.f32.mrb[1].mxu1 }
 0x206   : > { %v897_v57 = vmin.f32 %v5698_v51, 0.0  ;;  %v1066_v58 = vadd.f32 %v5695_v49, %v1065_v56  ;;  %v945_v53 = vmax.f32 %v5698_v51, 0.0 }
 0x207   : > { %v896_v59 = vmin.f32 %v5701_v54, 0.0  ;;  %v3833_v60 = vpop.f32.mrb[2].mxu0 }
 0x208   : > { %v914_v61 = vmul.f32 1.442695, %v897_v57  ;;  %v5708_v62 = vadd.f32 %v3833_v60, %v5690_v48  ;;  %v827_v63 = vpop.f32.mrb[3].mxu0  ;;  %v4252_v0 = vpack.c.bf16 %v1071_v55, %v1066_v58  ;;  %v3889_v1 = vpop.f32.mrb[2].mxu1  ;;  %v944_v58 = vmax.f32 %v5701_v54, 0.0 }
 0x209   : > { %v912_v2 = vmul.f32 1.442695, %v896_v59  ;;  %v5711_v3 = vadd.f32 %v5690_v48, %v827_v63  ;;  %v1081_v4 = vadd.f32 %v3889_v1, %v5695_v49  ;;  %v1075_v5 = vpop.f32.mrb[3].mxu1 }
 0x20a   : > { %4616 = vpow2.f32 %v914_v61  ;;  %v899_v6 = vmin.f32 %v5708_v62, 0.0  ;;  %v1076_v7 = vadd.f32 %v5695_v49, %v1075_v5  ;;  %4253 = vmatprep.subr.bf16.mxu0 %v4252_v0 }
 0x20b   : > { %4618 = vpow2.f32 %v912_v2  ;;  %v898_v8 = vmin.f32 %v5711_v3, 0.0  ;;  %v3836_v9 = vpop.f32.mrb[4].mxu0  ;;  %4255 = vmatpush3.bf16.msra.mxu0 %v4252_v0 }
 0x20c   : > { %v918_v10 = vmul.f32 1.442695, %v899_v6  ;;  %v5718_v11 = vadd.f32 %v3836_v9, %v5690_v48  ;;  %v837_v12 = vpop.f32.mrb[5].mxu0  ;;  %v4256_v13 = vpack.c.bf16 %v1081_v4, %v1076_v7  ;;  %v3892_v14 = vpop.f32.mrb[4].mxu1 }
 0x20d   : > { %v916_v15 = vmul.f32 1.442695, %v898_v8  ;;  %v5721_v16 = vadd.f32 %v5690_v48, %v837_v12  ;;  %v1091_v17 = vadd.f32 %v3892_v14, %v5695_v49  ;;  %v1085_v18 = vpop.f32.mrb[5].mxu1  ;;  %v946_v8 = vmax.f32 %v5711_v3, 0.0 }
 0x20e   : > { %4620 = vpow2.f32 %v918_v10  ;;  %v901_v19 = vmin.f32 %v5718_v11, 0.0  ;;  %v1086_v20 = vadd.f32 %v5695_v49, %v1085_v18  ;;  %4257 = vmatprep.subr.bf16.mxu0 %v4256_v13 }
 0x20f   : > { %4622 = vpow2.f32 %v916_v15  ;;  %v900_v21 = vmin.f32 %v5721_v16, 0.0  ;;  %v3839_v22 = vpop.f32.mrb[6].mxu0  ;;  %4259 = vmatpush3.bf16.msra.mxu0 %v4256_v13 }
 0x210   : > { %v5728_v23 = vadd.f32 %v3839_v22, %v5690_v48  ;;  %v847_v26 = vpop.f32.mrb[7].mxu0  ;;  %v4260_v29 = vpack.c.bf16 %v1091_v17, %v1086_v20  ;;  %v3895_v32 = vpop.f32.mrb[6].mxu1  ;;  %v922_v47 = vmul.f32 1.442695, %v901_v19 }
 0x211   : > { %v920_v35 = vmul.f32 1.442695, %v900_v21  ;;  %v5731_v38 = vadd.f32 %v5690_v48, %v847_v26  ;;  %v1101_v41 = vadd.f32 %v3895_v32, %v5695_v49  ;;  %v1095_v44 = vpop.f32.mrb[7].mxu1  ;;  %v947_v32 = vmax.f32 %v5708_v62, 0.0 }
 0x212   : > { %v903_v50 = vmin.f32 %v5728_v23, 0.0  ;;  %v1096_v52 = vadd.f32 %v5695_v49, %v1095_v44  ;;  %4261 = vmatprep.subr.bf16.mxu0 %v4260_v29 }
 0x213   : > { %4624 = vpow2.f32 %v920_v35  ;;  %v902_v55 = vmin.f32 %v5731_v38, 0.0  ;;  %v3842_v56 = vpop.f32.mrb[8].mxu0  ;;  %4263 = vmatpush3.bf16.msra.mxu0 %v4260_v29 }
 0x214   : > { %v4617_v57 = vpop.eup %4616  ;;  %v926_v59 = vmul.f32 1.442695, %v903_v50  ;;  %v5740_v60 = vadd.f32 %v3842_v56, %v5690_v48  ;;  %v857_v61 = vpop.f32.mrb[9].mxu0  ;;  %v4264_v63 = vpack.c.bf16 %v1101_v41, %v1096_v52  ;;  %4626 = vpow2.f32 %v922_v47 }
 0x215   : > { %v3898_v0 = vpop.f32.mrb[8].mxu1  ;;  %v4619_v1 = vpop.eup %4618  ;;  %v924_v2 = vmul.f32 1.442695, %v902_v55  ;;  %v5743_v4 = vadd.f32 %v5690_v48, %v857_v61  ;;  %v961_v51 = vadd.f32 %v4617_v57, %v945_v53 }
 0x216   : > { %v1111_v5 = vadd.f32 %v3898_v0, %v5695_v49  ;;  %v1105_v6 = vpop.f32.mrb[9].mxu1  ;;  %v905_v7 = vmin.f32 %v5740_v60, 0.0  ;;  %v960_v54 = vadd.f32 %v4619_v1, %v944_v58  ;;  %4265 = vmatprep.subr.bf16.mxu0 %v4264_v63 }
 0x217   : > { %4628 = vpow2.f32 %v924_v2  ;;  %v904_v9 = vmin.f32 %v5743_v4, 0.0  ;;  %v3845_v10 = vpop.f32.mrb[10].mxu0  ;;  %v1106_v12 = vadd.f32 %v5695_v49, %v1105_v6  ;;  %4267 = vmatpush3.bf16.msra.mxu0 %v4264_v63  ;;  %v949_v2 = vmax.f32 %v5718_v11, 0.0 }
 0x218   : > { %v4621_v13 = vpop.eup %4620  ;;  %4630 = vpow2.f32 %v926_v59  ;;  %v930_v14 = vmul.f32 1.442695, %v905_v7  ;;  %v5751_v15 = vadd.f32 %v3845_v10, %v5690_v48  ;;  %v867_v17 = vpop.f32.mrb[11].mxu0  ;;  %1166 = vxpose.xlu0.b32.start [1/16] %v960_v54, 128  ;;  %v1144_v18 = vadd.f32 %v961_v51, %v960_v54 }
 0x219   : > { %v3901_v19 = vpop.f32.mrb[10].mxu1  ;;  %v4623_v20 = vpop.eup %4622  ;;  %v928_v21 = vmul.f32 1.442695, %v904_v9  ;;  %v5754_v3 = vadd.f32 %v5690_v48, %v867_v17  ;;  %v4268_v22 = vpack.c.bf16 %v1111_v5, %v1106_v12  ;;  %v963_v57 = vadd.f32 %v4621_v13, %v947_v32 }
 0x21a   : > { %v1121_v26 = vadd.f32 %v3901_v19, %v5695_v49  ;;  %v1115_v29 = vpop.f32.mrb[11].mxu1  ;;  %4632 = vpow2.f32 %v930_v14  ;;  %v907_v35 = vmin.f32 %v5751_v15, 0.0  ;;  %v962_v41 = vadd.f32 %v4623_v20, %v946_v8 }
 0x21b   : > { %4634 = vpow2.f32 %v928_v21  ;;  %v906_v44 = vmin.f32 %v5754_v3, 0.0  ;;  %v3848_v47 = vpop.f32.mrb[12].mxu0  ;;  %v1116_v50 = vadd.f32 %v5695_v49, %v1115_v29  ;;  %4269 = vmatprep.subr.bf16.mxu0 %v4268_v22  ;;  %v948_v5 = vmax.f32 %v5721_v16, 0.0 }
 0x21c   : > { %v934_v52 = vmul.f32 1.442695, %v907_v35  ;;  %v5762_v53 = vadd.f32 %v3848_v47, %v5690_v48  ;;  %v877_v55 = vpop.f32.mrb[13].mxu0  ;;  %1167 = vxpose.xlu0.b32.cont [2/16] %v961_v51, 128  ;;  %v1145_v56 = vadd.f32 %v1144_v18, %v962_v41  ;;  %v3904_v62 = vpop.f32.mrb[12].mxu1  ;;  %4271 = vmatpush3.bf16.msra.mxu0 %v4268_v22  ;;  %v951_v7 = vmax.f32 %v5728_v23, 0.0 }
 0x21d   : > { %v4625_v58 = vpop.eup %4624  ;;  %v932_v59 = vmul.f32 1.442695, %v906_v44  ;;  %v5765_v61 = vadd.f32 %v5690_v48, %v877_v55  ;;  %v4272_v63 = vpack.c.bf16 %v1121_v26, %v1116_v50  ;;  %v1131_v0 = vadd.f32 %v3904_v62, %v5695_v49  ;;  %v1125_v1 = vpop.f32.mrb[13].mxu1 }
 0x21e   : > { %v909_v6 = vmin.f32 %v5762_v53, 0.0  ;;  %v1146_v51 = vadd.f32 %v1145_v56, %v963_v57  ;;  %v1126_v9 = vadd.f32 %v5695_v49, %v1125_v1  ;;  %v4627_v10 = vpop.eup %4626  ;;  %v964_v14 = vadd.f32 %v4625_v58, %v948_v5 }
 0x21f   : > { %4636 = vpow2.f32 %v932_v59  ;;  %v908_v54 = vmin.f32 %v5765_v61, 0.0  ;;  %v3851_v8 = vpop.f32.mrb[14].mxu0  ;;  %4273 = vmatprep.subr.bf16.mxu0 %v4272_v63  ;;  %v950_v26 = vmax.f32 %v5731_v38, 0.0  ;;  %v952_v29 = vmax.f32 %v5743_v4, 0.0 }
 0x220   : > { %4638 = vpow2.f32 %v934_v52  ;;  %v938_v12 = vmul.f32 1.442695, %v909_v6  ;;  %v5775_v13 = vadd.f32 %v3851_v8, %v5690_v48  ;;  %v887_v11 = vpop.f32.mrb[15].mxu0  ;;  %1168 = vxpose.xlu0.b32.cont [3/16] %v962_v41, 128  ;;  %v3907_v16 = vpop.f32.mrb[14].mxu1  ;;  %4275 = vmatpush3.bf16.msra.mxu0 %v4272_v63  ;;  %v4276_v19 = vpack.c.bf16 %v1131_v0, %v1126_v9  ;;  %v5791_v63 = vld [vmem:[%s6917_s3] ss:$0 sm:$0xff] }
 0x221   : > { %v4629_v17 = vpop.eup %4628  ;;  %v936_v23 = vmul.f32 1.442695, %v908_v54  ;;  %v5778_v18 = vadd.f32 %v5690_v48, %v887_v11  ;;  %v1141_v20 = vadd.f32 %v3907_v16, %v5695_v49  ;;  %v1135_v21 = vpop.f32.mrb[15].mxu1  ;;  %v1147_v44 = vadd.f32 %v1146_v51, %v964_v14 }
 0x222   : > { %v4631_v22 = vpop.eup %4630  ;;  %v911_v32 = vmin.f32 %v5775_v13, 0.0  ;;  %v1136_v35 = vadd.f32 %v5695_v49, %v1135_v21  ;;  %v965_v47 = vadd.f32 %v4627_v10, %v949_v2  ;;  %4277 = vmatprep.subr.bf16.mxu0 %v4276_v19  ;;  %v966_v55 = vadd.f32 %v4629_v17, %v950_v26 }
 0x223   : > { %4640 = vpow2.f32 %v936_v23  ;;  %v910_v41 = vmin.f32 %v5778_v18, 0.0  ;;  %v953_v4 = vmax.f32 %v5740_v60, 0.0  ;;  %v954_v59 = vmax.f32 %v5754_v3, 0.0 }
 0x224   : > { %v4633_v48 = vpop.eup %4632  ;;  %4642 = vpow2.f32 %v938_v12  ;;  %1169 = vxpose.xlu0.b32.cont [4/16] %v963_v57, 128  ;;  %v4280_v50 = vpack.c.bf16 %v1141_v20, %v1136_v35  ;;  %v3998_v52 = vpop.f32.mrb[16].mxu1  ;;  %4279 = vmatpush3.bf16.msra.mxu0 %v4276_v19  ;;  %v942_v56 = vmul.f32 1.442695, %v911_v32  ;;  %v1148_v49 = vadd.f32 %v1147_v44, %v965_v47 }
 0x225   : > { %v4635_v38 = vpop.eup %4634  ;;  %v940_v62 = vmul.f32 1.442695, %v910_v41  ;;  %v1448_v58 = vpop.f32.mrb[17].mxu1  ;;  %v967_v0 = vadd.f32 %v4631_v22, %v951_v7  ;;  %v955_v5 = vmax.f32 %v5751_v15, 0.0  ;;  %v5794_v3 = vadd.f32 %v4633_v48, %v953_v4 }
 0x226   : > { %4281 = vmatprep.subr.bf16.mxu0 %v4280_v50  ;;  %v1149_v57 = vadd.f32 %v1148_v49, %v966_v55  ;;  %v968_v1 = vadd.f32 %v4635_v38, %v952_v29  ;;  %v5797_v8 = vadd.f32 %v3998_v52, %v5791_v63  ;;  %v956_v9 = vmax.f32 %v5765_v61, 0.0 }
 0x227   : > { %4644 = vpow2.f32 %v940_v62  ;;  %v5801_v7 = vadd.f32 %v5791_v63, %v1448_v58  ;;  %v957_v16 = vmax.f32 %v5762_v53, 0.0  ;;  %v958_v29 = vmax.f32 %v5778_v18, 0.0 }
 0x228   : > { %1170 = vxpose.xlu0.b32.cont [5/16] %v964_v14, 128  ;;  %v4001_v2 = vpop.f32.mrb[18].mxu1  ;;  %4283 = vmatpush3.bf16.msra.mxu0 %v4280_v50  ;;  %4646 = vpow2.f32 %v942_v56  ;;  %v1150_v51 = vadd.f32 %v1149_v57, %v967_v0  ;;  %v1528_v20 = vmin.f32 %v5797_v8, 0.0  ;;  %v959_v52 = vmax.f32 %v5775_v13, 0.0 }
 0x229   : > { %v4637_v60 = vpop.eup %4636  ;;  %v1458_v6 = vpop.f32.mrb[19].mxu1  ;;  %v1527_v22 = vmin.f32 %v5801_v7, 0.0  ;;  %v5819_v53 = vadd.f32 %v4001_v2, %v5791_v63 }
 0x22a   : > { %v4639_v54 = vpop.eup %4638  ;;  %v1151_v10 = vadd.f32 %v1150_v51, %v968_v1  ;;  %v5803_v12 = vadd.f32 %v4637_v60, %v954_v59  ;;  %v5807_v14 = vadd.f32 %v5791_v63, %v1458_v6  ;;  %v1545_v38 = vmul.f32 1.442695, %v1528_v20 }
 0x22b   : > { %v5810_v19 = vadd.f32 %v4639_v54, %v955_v5  ;;  %v1543_v4 = vmul.f32 1.442695, %v1527_v22 }
 0x22c   : > { %1171 = vxpose.xlu0.b32.cont [6/16] %v965_v47, 128  ;;  %v4004_v11 = vpop.f32.mrb[20].mxu1  ;;  %v1152_v23 = vadd.f32 %v1151_v10, %v5794_v3  ;;  %v1529_v44 = vmin.f32 %v5807_v14, 0.0  ;;  %4648 = vpow2.f32 %v1545_v38 }
 0x22d   : > { %v4641_v15 = vpop.eup %4640  ;;  %v1468_v17 = vpop.f32.mrb[21].mxu1  ;;  %v5834_v58 = vadd.f32 %v4004_v11, %v5791_v63  ;;  %4650 = vpow2.f32 %v1543_v4 }
 0x22e   : > { %v4643_v61 = vpop.eup %4642  ;;  %v5813_v21 = vadd.f32 %v4641_v15, %v956_v9  ;;  %v1153_v26 = vadd.f32 %v1152_v23, %v5803_v12  ;;  %v5825_v47 = vadd.f32 %v5791_v63, %v1468_v17  ;;  %v1547_v59 = vmul.f32 1.442695, %v1529_v44 }
 0x22f   : > { %v5821_v41 = vadd.f32 %v4643_v61, %v957_v16  ;;  %v1532_v51 = vmin.f32 %v5834_v58, 0.0 }
 0x230   : > { %v4007_v32 = vpop.f32.mrb[22].mxu1  ;;  %1172 = vxpose.xlu0.b32.cont [7/16] %v966_v55, 128  ;;  %v1154_v50 = vadd.f32 %v1153_v26, %v5810_v19  ;;  %v1530_v55 = vmin.f32 %v5819_v53, 0.0  ;;  %v1531_v57 = vmin.f32 %v5825_v47, 0.0  ;;  %4652 = vpow2.f32 %v1547_v59 }
 0x231   : > { %v4645_v35 = vpop.eup %4644  ;;  %v1478_v48 = vpop.f32.mrb[23].mxu1  ;;  %v5845_v54 = vadd.f32 %v4007_v32, %v5791_v63  ;;  %v1553_v61 = vmul.f32 1.442695, %v1532_v51  ;;  %v1578_v51 = vmax.f32 %v5819_v53, 0.0 }
 0x232   : > { %v4647_v18 = vpop.eup %4646  ;;  %v1155_v56 = vadd.f32 %v1154_v50, %v5813_v21  ;;  %v5830_v62 = vadd.f32 %v4645_v35, %v958_v29  ;;  %v5838_v2 = vadd.f32 %v5791_v63, %v1478_v48  ;;  %v1549_v6 = vmul.f32 1.442695, %v1530_v55 }
 0x233   : > { %v5841_v5 = vadd.f32 %v4647_v18, %v959_v52  ;;  %v1551_v10 = vmul.f32 1.442695, %v1531_v57  ;;  %v1534_v20 = vmin.f32 %v5845_v54, 0.0  ;;  %v1576_v48 = vmax.f32 %v5797_v8, 0.0 }
 0x234   : > { %v4010_v49 = vpop.f32.mrb[24].mxu1  ;;  %1173 = vxpose.xlu0.b32.cont [8/16] %v967_v0, 128  ;;  %v1156_v60 = vadd.f32 %v1155_v56, %v5821_v41  ;;  %v1533_v11 = vmin.f32 %v5838_v2, 0.0  ;;  %4654 = vpow2.f32 %v1549_v6 }
 0x235   : > { %v1488_v13 = vpop.f32.mrb[25].mxu1  ;;  %v5854_v23 = vadd.f32 %v4010_v49, %v5791_v63  ;;  %4656 = vpow2.f32 %v1551_v10  ;;  %v1557_v18 = vmul.f32 1.442695, %v1534_v20  ;;  %v1579_v20 = vmax.f32 %v5825_v47, 0.0 }
 0x236   : > { %v1157_v9 = vadd.f32 %v1156_v60, %v5830_v62  ;;  %v5850_v15 = vadd.f32 %v5791_v63, %v1488_v13  ;;  %v1555_v26 = vmul.f32 1.442695, %v1533_v11  ;;  %v4649_v38 = vpop.eup %4648  ;;  %4658 = vpow2.f32 %v1553_v61 }
 0x237   : > { %v1536_v50 = vmin.f32 %v5854_v23, 0.0  ;;  %v4651_v55 = vpop.eup %4650  ;;  %v1577_v13 = vmax.f32 %v5807_v14, 0.0 }
 0x238   : > { %v4013_v0 = vpop.f32.mrb[26].mxu1  ;;  %1174 = vxpose.xlu0.b32.cont [9/16] %v968_v1, 128  ;;  %v1158_v17 = vadd.f32 %v1157_v9, %v5841_v5  ;;  %v1535_v29 = vmin.f32 %v5850_v15, 0.0  ;;  %4660 = vpow2.f32 %v1555_v26 }
 0x239   : > { %v1498_v16 = vpop.f32.mrb[27].mxu1  ;;  %v5865_v52 = vadd.f32 %v4013_v0, %v5791_v63  ;;  %v1561_v0 = vmul.f32 1.442695, %v1536_v50  ;;  %4662 = vpow2.f32 %v1557_v18 }
 0x23a   : > { %v1159_v22 = vrot.slane %v1158_v17, 4  ;;  %v5860_v32 = vadd.f32 %v5791_v63, %v1498_v16  ;;  %v1559_v49 = vmul.f32 1.442695, %v1535_v29  ;;  %v4653_v6 = vpop.eup %4652 }
 0x23b   : > { %v5888_v61 = vadd.f32 %v4653_v6, %v1577_v13 }
 0x23c   : > { %v4016_v1 = vpop.f32.mrb[28].mxu1  ;;  %1175 = vxpose.xlu0.b32.cont [10/16] %v5794_v3, 128  ;;  %v1160_v44 = vadd.f32 %v1159_v22, %v1158_v17  ;;  %v1575_v3 = vmax.f32 %v5801_v7, 0.0  ;;  %v1537_v59 = vmin.f32 %v5860_v32, 0.0  ;;  %v5874_v7 = vadd.f32 %v4649_v38, %v1576_v48 }
 0x23d   : > { %v1508_v35 = vpop.f32.mrb[29].mxu1  ;;  %v5881_v10 = vadd.f32 %v4016_v1, %v5791_v63  ;;  %4664 = vpow2.f32 %v1559_v49  ;;  %v1580_v1 = vmax.f32 %v5834_v58, 0.0 }
 0x23e   : > { %v1161_v56 = vrot.slane %v1160_v44, 2  ;;  %v5871_v8 = vadd.f32 %v5791_v63, %v1508_v35  ;;  %v5878_v9 = vadd.f32 %v4651_v55, %v1575_v3  ;;  %v1563_v14 = vmul.f32 1.442695, %v1537_v59  ;;  %v4655_v53 = vpop.eup %4654 }
 0x23f   : > { %v4657_v26 = vpop.eup %4656  ;;  %4666 = vpow2.f32 %v1561_v0  ;;  %v1540_v29 = vmin.f32 %v5881_v10, 0.0  ;;  %v5903_v47 = vadd.f32 %v4655_v53, %v1578_v51 }
 0x240   : > { %v4019_v4 = vpop.f32.mrb[30].mxu1  ;;  %1176 = vxpose.xlu0.b32.cont [11/16] %v5803_v12, 128  ;;  %v1162_v60 = vadd.f32 %v1161_v56, %v1160_v44  ;;  %v1538_v12 = vmin.f32 %v5865_v52, 0.0  ;;  %v1539_v16 = vmin.f32 %v5871_v8, 0.0  ;;  %4668 = vpow2.f32 %v1563_v14  ;;  %v4659_v38 = vpop.eup %4658 }
 0x241   : > { %v1518_v57 = vpop.f32.mrb[31].mxu1  ;;  %v5896_v35 = vadd.f32 %v4019_v4, %v5791_v63  ;;  %v5906_v3 = vadd.f32 %v4657_v26, %v1579_v20  ;;  %v1582_v56 = vmax.f32 %v5845_v54, 0.0  ;;  %v5914_v49 = vadd.f32 %v4659_v38, %v1580_v1 }
 0x242   : > { %v1163_v11 = vrot.slane %v1162_v60, 1  ;;  %v5886_v17 = vadd.f32 %v5791_v63, %v1518_v57  ;;  %v1567_v50 = vmul.f32 1.442695, %v1539_v16  ;;  %v1581_v63 = vmax.f32 %v5838_v2, 0.0  ;;  %v4661_v4 = vpop.eup %4660 }
 0x243   : > { %v1542_v55 = vmin.f32 %v5896_v35, 0.0  ;;  %v4663_v57 = vpop.eup %4662  ;;  %v1585_v14 = vmax.f32 %v5860_v32, 0.0  ;;  %v1587_v32 = vmax.f32 %v5871_v8, 0.0 }
 0x244   : > { %1177 = vxpose.xlu0.b32.cont [12/16] %v5810_v19, 128  ;;  %v5891_v22 = vadd.f32 %v1163_v11, %v1162_v60  ;;  %v1565_v19 = vmul.f32 1.442695, %v1538_v12  ;;  %v1541_v58 = vmin.f32 %v5886_v17, 0.0  ;;  %v5918_v13 = vadd.f32 %v4661_v4, %v1581_v63 }
 0x245   : > { %v1583_v60 = vmax.f32 %v5850_v15, 0.0  ;;  %v1573_v51 = vmul.f32 1.442695, %v1542_v55  ;;  %v5924_v0 = vadd.f32 %v4663_v57, %v1582_v56  ;;  %v1584_v12 = vmax.f32 %v5854_v23, 0.0 }
 0x246   : > { %v1752_v44 = vmul.f32 %v5878_v9, %v5891_v22  ;;  %v1753_v48 = vmul.f32 %v5874_v7, %v5891_v22  ;;  %v1754_v18 = vmul.f32 %v5888_v61, %v5891_v22  ;;  %4670 = vpow2.f32 %v1565_v19 }
 0x247   : > { %4672 = vpow2.f32 %v1567_v50  ;;  %v1571_v59 = vmul.f32 1.442695, %v1541_v58  ;;  %v1755_v2 = vmul.f32 %v5903_v47, %v5891_v22  ;;  %v1756_v54 = vmul.f32 %v5906_v3, %v5891_v22  ;;  %v4665_v6 = vpop.eup %4664 }
 0x248   : > { %1178 = vxpose.xlu0.b32.cont [13/16] %v5813_v21, 128  ;;  %4108 = vmatprep.mubr.f32.mxu1 %v1752_v44  ;;  %v1569_v21 = vmul.f32 1.442695, %v1540_v29  ;;  %v1757_v11 = vmul.f32 %v5914_v49, %v5891_v22  ;;  %v5929_v15 = vadd.f32 %v4665_v6, %v1583_v60  ;;  %v1758_v16 = vmul.f32 %v5918_v13, %v5891_v22 }
 0x249   : > { %4109 = vmatmul.mubr.f32.vlgmr.msra.gmra.mrb[32].mxu1 %v1753_v48  ;;  %v1586_v23 = vmax.f32 %v5865_v52, 0.0  ;;  %v1759_v20 = vmul.f32 %v5924_v0, %v5891_v22  ;;  %v1589_v58 = vmax.f32 %v5886_v17, 0.0 }
 0x24a   : > { %4111 = vmatprep.mubr.f32.mxu1 %v1754_v18  ;;  %4674 = vpow2.f32 %v1569_v21  ;;  %v1760_v19 = vmul.f32 %v5929_v15, %v5891_v22  ;;  %v1590_v18 = vmax.f32 %v5896_v35, 0.0 }
 0x24b   : > { %4676 = vpow2.f32 %v1571_v59 }
 0x24c   : > { %1179 = vxpose.xlu0.b32.cont [14/16] %v5821_v41, 128  ;;  %v4667_v41 = vpop.eup %4666  ;;  %4678 = vpow2.f32 %v1573_v51 }
 0x24d   : > { %4112 = vmatmul.mubr.f32.gmra.mrb[34].mxu1 %v1755_v2  ;;  %v4669_v53 = vpop.eup %4668 }
 0x24e   : > { %4114 = vmatprep.mubr.f32.mxu1 %v1756_v54  ;;  %v5940_v1 = vadd.f32 %v4669_v53, %v1585_v14 }
 0x250   : > { %1180 = vxpose.xlu0.b32.cont [15/16] %v5830_v62, 128  ;;  %v5935_v62 = vadd.f32 %v4667_v41, %v1584_v12  ;;  %v4671_v26 = vpop.eup %4670  ;;  %v1762_v8 = vmul.f32 %v5940_v1, %v5891_v22 }
 0x251   : > { %4115 = vmatmul.mubr.f32.gmra.mrb[36].mxu1 %v1757_v11  ;;  %v4673_v29 = vpop.eup %4672  ;;  %v5945_v44 = vadd.f32 %v4671_v26, %v1586_v23 }
 0x252   : > { %4117 = vmatprep.mubr.f32.mxu1 %v1758_v16  ;;  %v1761_v52 = vmul.f32 %v5935_v62, %v5891_v22  ;;  %v5950_v50 = vadd.f32 %v4673_v29, %v1587_v32 }
 0x254   : > { %1181 = vxpose.xlu0.b32.end [16/16] %v5841_v5, 128  ;;  %v1588_v5 = vmax.f32 %v5881_v10, 0.0  ;;  %v4675_v48 = vpop.eup %4674  ;;  %v1763_v10 = vmul.f32 %v5945_v44, %v5891_v22  ;;  %v1764_v21 = vmul.f32 %v5950_v50, %v5891_v22 }
 0x255   : > { %4118 = vmatmul.mubr.f32.gmra.mrb[38].mxu1 %v1759_v20  ;;  %v4677_v38 = vpop.eup %4676 }
 0x256   : > { %4120 = vmatprep.mubr.f32.mxu1 %v1760_v19  ;;  %v5955_v63 = vadd.f32 %v4675_v48, %v1588_v5  ;;  %v4679_v4 = vpop.eup %4678  ;;  %v5960_v56 = vadd.f32 %v4677_v38, %v1589_v58 }
 0x257   : > { %v5964_v17 = vadd.f32 %v4679_v4, %v1590_v18 }
 0x258   : > { %v1765_v55 = vmul.f32 %v5955_v63, %v5891_v22  ;;  %v1766_v59 = vmul.f32 %v5960_v56, %v5891_v22 }
 0x259   : > { %4121 = vmatmul.mubr.f32.gmra.mrb[40].mxu1 %v1761_v52  ;;  %v1767_v35 = vmul.f32 %v5964_v17, %v5891_v22 }
 0x25a   : > { %4123 = vmatprep.mubr.f32.mxu1 %v1762_v8 }
 0x25d   : > { %4124 = vmatmul.mubr.f32.gmra.mrb[42].mxu1 %v1763_v10 }
 0x25e   : > { %4126 = vmatprep.mubr.f32.mxu1 %v1764_v21 }
 0x261   : > { %4127 = vmatmul.mubr.f32.gmra.mrb[44].mxu1 %v1765_v55 }
 0x262   : > { %4129 = vmatprep.mubr.f32.mxu1 %v1766_v59 }
 0x265   : > { %4130 = vmatmul.mubr.f32.gmra.mrb[46].mxu1 %v1767_v35 }
 0x298   : > { %v1182_v2 = vpop.trf.xlu0 }
 0x299   : > { %3940 = vmatprep.mubr.f32.mxu0 %v1182_v2 }
 0x29c   : > { %v1183_v57 = vpop.trf.xlu0 }
 0x29d   : > { %3941 = vmatmul.mubr.f32.vlgmr.msra.gmra.mrb[16].mxu0 %v1183_v57 }
 0x2a0   : > { %v1184_v60 = vpop.trf.xlu0 }
 0x2a1   : > { %3943 = vmatprep.mubr.f32.mxu0 %v1184_v60 }
 0x2a4   : > { %v1185_v54 = vpop.trf.xlu0 }
 0x2a5   : > { %3944 = vmatmul.mubr.f32.gmra.mrb[18].mxu0 %v1185_v54 }
 0x2a8   : > { %v1186_v6 = vpop.trf.xlu0 }
 0x2a9   : > { %3946 = vmatprep.mubr.f32.mxu0 %v1186_v6 }
 0x2ac   : > { %v1187_v51 = vpop.trf.xlu0 }
 0x2ad   : > { %3947 = vmatmul.mubr.f32.gmra.mrb[20].mxu0 %v1187_v51 }
 0x2b0   : > { %v1188_v41 = vpop.trf.xlu0 }
 0x2b1   : > { %3949 = vmatprep.mubr.f32.mxu0 %v1188_v41 }
 0x2b4   : > { %v1189_v12 = vpop.trf.xlu0 }
 0x2b5   : > { %3950 = vmatmul.mubr.f32.gmra.mrb[22].mxu0 %v1189_v12 }
 0x2b8   : > { %v1190_v11 = vpop.trf.xlu0 }
 0x2b9   : > { %3952 = vmatprep.mubr.f32.mxu0 %v1190_v11 }
 0x2bc   : > { %v1191_v22 = vpop.trf.xlu0 }
 0x2bd   : > { %3953 = vmatmul.mubr.f32.gmra.mrb[24].mxu0 %v1191_v22 }
 0x2c0   : > { %v1192_v14 = vpop.trf.xlu0 }
 0x2c1   : > { %3955 = vmatprep.mubr.f32.mxu0 %v1192_v14 }
 0x2c4   : > { %v1193_v16 = vpop.trf.xlu0 }
 0x2c5   : > { %3956 = vmatmul.mubr.f32.gmra.mrb[26].mxu0 %v1193_v16 }
 0x2c8   : > { %v1194_v53 = vpop.trf.xlu0 }
 0x2c9   : > { %3958 = vmatprep.mubr.f32.mxu0 %v1194_v53 }
 0x2cc   : > { %v1195_v23 = vpop.trf.xlu0 }
 0x2cd   : > { %3959 = vmatmul.mubr.f32.gmra.mrb[28].mxu0 %v1195_v23 }
 0x2d0   : > { %v1196_v20 = vpop.trf.xlu0 }
 0x2d1   : > { %3961 = vmatprep.mubr.f32.mxu0 %v1196_v20 }
 0x2d4   : > { %v1197_v26 = vpop.trf.xlu0 }
 0x2d5   : > { %3962 = vmatmul.mubr.f32.gmra.mrb[30].mxu0 %v1197_v26 }
 0x2d6   : > { %4052 = vmatprep.mubr.f32.mxu0 %v5878_v9 }
 0x31c   : > { %v5973_v32 = vpop.f32.mrb[32].mxu1 }
 0x31d   : > { %v5975_v19 = vpop.f32.mrb[33].mxu1 }
 0x320   : > { %v5977_v29 = vpop.f32.mrb[34].mxu1 }
 0x321   : > { %v5979_v5 = vpop.f32.mrb[35].mxu1 }
 0x324   : > { %v5981_v52 = vpop.f32.mrb[36].mxu1 }
 0x325   : > { %v5983_v48 = vpop.f32.mrb[37].mxu1 }
 0x328   : > { %v5985_v58 = vpop.f32.mrb[38].mxu1 }
 0x329   : > { %v5987_v8 = vpop.f32.mrb[39].mxu1 }
 0x32c   : > { %v5989_v38 = vpop.f32.mrb[40].mxu1 }
 0x32d   : > { %v5991_v18 = vpop.f32.mrb[41].mxu1 }
 0x330   : > { %v5993_v9 = vpop.f32.mrb[42].mxu1 }
 0x331   : > { %v5995_v10 = vpop.f32.mrb[43].mxu1 }
 0x334   : > { %v5997_v4 = vpop.f32.mrb[44].mxu1 }
 0x335   : > { %v5999_v21 = vpop.f32.mrb[45].mxu1 }
 0x338   : > { %v6001_v55 = vpop.f32.mrb[46].mxu1 }
 0x339   : > { %v6003_v59 = vpop.f32.mrb[47].mxu1 }
 0x370   : > { %v3942_v35 = vpop.f32.mrb[16].mxu0 }
 0x371   : > { %v1344_v2 = vmul.f32 %v3942_v35, %v5641_v25  ;;  %v1264_v57 = vpop.f32.mrb[17].mxu0 }
 0x372   : > { %v1343_v60 = vmul.f32 %v1264_v57, %v5639_v24 }
 0x374   : > { %v4316_v54 = vpack.c.bf16 %v1344_v2, %v1343_v60 }
 0x376   : > { %4317 = vmatprep.subr.bf16.mxu0 %v4316_v54 }
 0x377   : > { %4319 = vmatpush3.bf16.msra.mxu0 %v4316_v54 }
 0x378   : > { %v3945_v6 = vpop.f32.mrb[18].mxu0 }
 0x379   : > { %v1346_v51 = vmul.f32 %v3945_v6, %v5647_v28  ;;  %v1274_v41 = vpop.f32.mrb[19].mxu0 }
 0x37a   : > { %v1345_v12 = vmul.f32 %v1274_v41, %v5645_v27 }
 0x37c   : > { %v4320_v11 = vpack.c.bf16 %v1346_v51, %v1345_v12 }
 0x37e   : > { %4321 = vmatprep.subr.bf16.mxu0 %v4320_v11 }
 0x37f   : > { %4323 = vmatpush3.bf16.msra.mxu0 %v4320_v11 }
 0x380   : > { %v3948_v22 = vpop.f32.mrb[20].mxu0 }
 0x381   : > { %v1348_v14 = vmul.f32 %v3948_v22, %v5653_v31  ;;  %v1284_v16 = vpop.f32.mrb[21].mxu0 }
 0x382   : > { %v1347_v25 = vmul.f32 %v1284_v16, %v5651_v30 }
 0x384   : > { %v4324_v53 = vpack.c.bf16 %v1348_v14, %v1347_v25  ;;  %v1946_v14 = vld [vmem:[#allocation11 + $0x8] sm:$0xff] }
 0x386   : > { %4325 = vmatprep.subr.bf16.mxu0 %v4324_v53 }
 0x387   : > { %4327 = vmatpush3.bf16.msra.mxu0 %v4324_v53  ;;  %v1947_v53 = vld [vmem:[#allocation11 + $0x10] sm:$0xff] }
 0x388   : > { %v3951_v24 = vpop.f32.mrb[22].mxu0 }
 0x389   : > { %v1350_v23 = vmul.f32 %v3951_v24, %v5659_v34  ;;  %v1294_v20 = vpop.f32.mrb[23].mxu0  ;;  %v1948_v24 = vld [vmem:[#allocation11 + $0x18] sm:$0xff] }
 0x38a   : > { %v1349_v28 = vmul.f32 %v1294_v20, %v5657_v33  ;;  %v1951_v20 = vld [vmem:[#allocation11 + $0x30] sm:$0xff] }
 0x38c   : > { %v4328_v26 = vpack.c.bf16 %v1350_v23, %v1349_v28  ;;  %v1950_v23 = vld [vmem:[#allocation11 + $0x28] sm:$0xff]  ;;  %v1952_v28 = vld [vmem:[#allocation11 + $0x38] sm:$0xff] }
 0x38e   : > { %4329 = vmatprep.subr.bf16.mxu0 %v4328_v26 }
 0x38f   : > { %4331 = vmatpush3.bf16.msra.mxu0 %v4328_v26  ;;  %v1953_v26 = vld [vmem:[#allocation11 + $0x40] sm:$0xff] }
 0x390   : > { %v3954_v27 = vpop.f32.mrb[24].mxu0 }
 0x391   : > { %v1352_v35 = vmul.f32 %v3954_v27, %v5665_v37  ;;  %v1304_v2 = vpop.f32.mrb[25].mxu0  ;;  %v1954_v27 = vld [vmem:[#allocation11 + $0x48] sm:$0xff] }
 0x392   : > { %v1351_v31 = vmul.f32 %v1304_v2, %v5663_v36  ;;  %v1958_v2 = vld [vmem:[#allocation11 + $0x68] sm:$0xff] }
 0x394   : > { %v4332_v57 = vpack.c.bf16 %v1352_v35, %v1351_v31  ;;  %v1956_v35 = vld [vmem:[#allocation11 + $0x58] sm:$0xff] }
 0x396   : > { %4333 = vmatprep.subr.bf16.mxu0 %v4332_v57 }
 0x397   : > { %4335 = vmatpush3.bf16.msra.mxu0 %v4332_v57 }
 0x398   : > { %v3957_v30 = vpop.f32.mrb[26].mxu0 }
 0x399   : > { %v1354_v60 = vmul.f32 %v3957_v30, %v5671_v40  ;;  %v1314_v54 = vpop.f32.mrb[27].mxu0  ;;  %v1945_v40 = vld [vmem:[#allocation11] sm:$0xff] }
 0x39a   : > { %v1353_v34 = vmul.f32 %v1314_v54, %v5669_v39  ;;  %v4380_v25 = vpack.c.bf16 %v1946_v14, %v1945_v40 }
 0x39c   : > { %v4336_v6 = vpack.c.bf16 %v1354_v60, %v1353_v34 }
 0x39e   : > { %4337 = vmatprep.subr.bf16.mxu0 %v4336_v6 }
 0x39f   : > { %4339 = vmatpush3.bf16.msra.mxu0 %v4336_v6 }
 0x3a0   : > { %v3960_v33 = vpop.f32.mrb[28].mxu0 }
 0x3a1   : > { %v1356_v51 = vmul.f32 %v3960_v33, %v5677_v43  ;;  %v1324_v41 = vpop.f32.mrb[29].mxu0  ;;  %v4384_v43 = vpack.c.bf16 %v1948_v24, %v1947_v53  ;;  %v1905_v53 = vadd.f32 1e-06, %v6003_v59 }
 0x3a2   : > { %v1355_v37 = vmul.f32 %v1324_v41, %v5675_v42  ;;  %v1949_v42 = vld [vmem:[#allocation11 + $0x20] sm:$0xff] }
 0x3a4   : > { %v4340_v12 = vpack.c.bf16 %v1356_v51, %v1355_v37  ;;  %v1885_v51 = vadd.f32 1e-06, %v5995_v10 }
 0x3a6   : > { %4341 = vmatprep.subr.bf16.mxu0 %v4340_v12 }
 0x3a7   : > { %4343 = vmatpush3.bf16.msra.mxu0 %v4340_v12 }
 0x3a8   : > { %v3963_v36 = vpop.f32.mrb[30].mxu0 }
 0x3a9   : > { %v1358_v11 = vmul.f32 %v3963_v36, %v5683_v46  ;;  %v1334_v22 = vpop.f32.mrb[31].mxu0  ;;  %v4388_v46 = vpack.c.bf16 %v1950_v23, %v1949_v42  ;;  %v1900_v36 = vadd.f32 1e-06, %v5997_v4 }
 0x3aa   : > { %v1357_v39 = vmul.f32 %v1334_v22, %v5681_v45  ;;  %v4392_v45 = vpack.c.bf16 %v1952_v28, %v1951_v20  ;;  %v1895_v22 = vadd.f32 1e-06, %v5999_v21 }
 0x3ac   : > { %v4344_v16 = vpack.c.bf16 %v1358_v11, %v1357_v39 }
 0x3ae   : > { %4345 = vmatprep.subr.bf16.mxu0 %v4344_v16 }
 0x3af   : > { %4347 = vmatpush3.bf16.msra.mxu0 %v4344_v16  ;;  %v1910_v16 = vadd.f32 1e-06, %v6001_v55 }
 0x3b0   : > { %4381 = vmatprep.subr.bf16.mxu0 %v4380_v25 }
 0x3b2   : > { %4053 = vmatmul.mubr.f32.vlgmr.msra.gmra.mrb[32].mxu0 %v5874_v7  ;;  %v4396_v7 = vpack.c.bf16 %v1954_v27, %v1953_v26 }
 0x3b3   : > { %4055 = vmatprep.mubr.f32.mxu0 %v5888_v61  ;;  %4383 = vmatpush3.bf16.msra.mxu0 %v4380_v25  ;;  %v1955_v61 = vld [vmem:[#allocation11 + $0x50] sm:$0xff] }
 0x3b4   : > { %4385 = vmatprep.subr.bf16.mxu0 %v4384_v43 }
 0x3b6   : > { %4056 = vmatmul.mubr.f32.gmra.mrb[34].mxu0 %v5903_v47  ;;  %v4400_v47 = vpack.c.bf16 %v1956_v35, %v1955_v61 }
 0x3b7   : > { %4058 = vmatprep.mubr.f32.mxu0 %v5906_v3  ;;  %4387 = vmatpush3.bf16.msra.mxu0 %v4384_v43  ;;  %v1957_v3 = vld [vmem:[#allocation11 + $0x60] sm:$0xff] }
 0x3b8   : > { %4389 = vmatprep.subr.bf16.mxu0 %v4388_v46 }
 0x3ba   : > { %4059 = vmatmul.mubr.f32.gmra.mrb[36].mxu0 %v5914_v49  ;;  %v4404_v49 = vpack.c.bf16 %v1958_v2, %v1957_v3 }
 0x3bb   : > { %4061 = vmatprep.mubr.f32.mxu0 %v5918_v13  ;;  %4391 = vmatpush3.bf16.msra.mxu0 %v4388_v46  ;;  %v1959_v13 = vld [vmem:[#allocation11 + $0x70] sm:$0xff] }
 0x3bc   : > { %4393 = vmatprep.subr.bf16.mxu0 %v4392_v45 }
 0x3be   : > { %4062 = vmatmul.mubr.f32.gmra.mrb[38].mxu0 %v5924_v0  ;;  %v1960_v0 = vld [vmem:[#allocation11 + $0x78] sm:$0xff] }
 0x3bf   : > { %4064 = vmatprep.mubr.f32.mxu0 %v5929_v15  ;;  %4395 = vmatpush3.bf16.msra.mxu0 %v4392_v45  ;;  %v4408_v15 = vpack.c.bf16 %v1960_v0, %v1959_v13 }
 0x3c0   : > { %4397 = vmatprep.subr.bf16.mxu0 %v4396_v7 }
 0x3c2   : > { %4065 = vmatmul.mubr.f32.gmra.mrb[40].mxu0 %v5935_v62  ;;  %v1840_v62 = vadd.f32 1e-06, %v5973_v32  ;;  %v1865_v32 = vadd.f32 1e-06, %v5987_v8  ;;  %v1890_v8 = vadd.f32 1e-06, %v5993_v9 }
 0x3c3   : > { %4067 = vmatprep.mubr.f32.mxu0 %v5940_v1  ;;  %4399 = vmatpush3.bf16.msra.mxu0 %v4396_v7  ;;  %v1835_v1 = vadd.f32 1e-06, %v5975_v19 }
 0x3c4   : > { %4401 = vmatprep.subr.bf16.mxu0 %v4400_v47  ;;  %4680 = vrcp.f32 %v1840_v62  ;;  %v6055_v62 = vld [vmem:[%s6986_s0] ss:$0 sm:$0xff]  ;;  %s6995_s0 = sld [smem:[#allocation37_spill]] }
 0x3c5   : > { %4682 = vrcp.f32 %v1835_v1 }
 0x3c6   : > { %4068 = vmatmul.mubr.f32.gmra.mrb[42].mxu0 %v5945_v44  ;;  %v1850_v44 = vadd.f32 1e-06, %v5977_v29 }
 0x3c7   : > { %4070 = vmatprep.mubr.f32.mxu0 %v5950_v50  ;;  %4403 = vmatpush3.bf16.msra.mxu0 %v4400_v47  ;;  %v1845_v50 = vadd.f32 1e-06, %v5979_v5  ;;  %v1880_v5 = vadd.f32 1e-06, %v5989_v38 }
 0x3c8   : > { %4405 = vmatprep.subr.bf16.mxu0 %v4404_v49  ;;  %4684 = vrcp.f32 %v1850_v44 }
 0x3c9   : > { %4686 = vrcp.f32 %v1845_v50 }
 0x3ca   : > { %4071 = vmatmul.mubr.f32.gmra.mrb[44].mxu0 %v5955_v63  ;;  %v1860_v63 = vadd.f32 1e-06, %v5981_v52  ;;  %v1875_v52 = vadd.f32 1e-06, %v5991_v18 }
 0x3cb   : > { %4073 = vmatprep.mubr.f32.mxu0 %v5960_v56  ;;  %4407 = vmatpush3.bf16.msra.mxu0 %v4404_v49  ;;  %v1855_v56 = vadd.f32 1e-06, %v5983_v48 }
 0x3cc   : > { %4409 = vmatprep.subr.bf16.mxu0 %v4408_v15  ;;  %4688 = vrcp.f32 %v1860_v63 }
 0x3cd   : > { %4690 = vrcp.f32 %v1855_v56 }
 0x3ce   : > { %4074 = vmatmul.mubr.f32.gmra.mrb[46].mxu0 %v5964_v17  ;;  %v1870_v17 = vadd.f32 1e-06, %v5985_v58  ;;  %v4681_v31 = vpop.eup %4680 }
 0x3cf   : > { %4411 = vmatpush3.bf16.msra.mxu0 %v4408_v15  ;;  %v4683_v57 = vpop.eup %4682 }
 0x3d0   : > { %4692 = vrcp.f32 %v1870_v17  ;;  %v4840_v17 = vld [vmem:[%s5571_s2] sm:$0xff] }
 0x3d1   : > { %4694 = vrcp.f32 %v1865_v32 }
 0x3d2   : > { %v4685_v54 = vpop.eup %4684  ;;  %4696 = vrcp.f32 %v1880_v5 }
 0x3d3   : > { %v4687_v34 = vpop.eup %4686  ;;  %4698 = vrcp.f32 %v1875_v52 }
 0x3d4   : > { %4700 = vrcp.f32 %v1890_v8  ;;  %v4843_v8 = vld [vmem:[%s5571_s2 + $0x18] sm:$0xff] }
 0x3d5   : > { %4702 = vrcp.f32 %v1885_v51 }
 0x3d6   : > { %v4689_v41 = vpop.eup %4688  ;;  %4704 = vrcp.f32 %v1900_v36 }
 0x3d7   : > { %v4691_v37 = vpop.eup %4690  ;;  %4706 = vrcp.f32 %v1895_v22  ;;  %v4845_v22 = vld [vmem:[%s5571_s2 + $0x28] sm:$0xff] }
 0x3d8   : > { %4708 = vrcp.f32 %v1910_v16 }
 0x3d9   : > { %4710 = vrcp.f32 %v1905_v53 }
 0x3da   : > { %v4693_v40 = vpop.eup %4692 }
 0x3db   : > { %v4695_v14 = vpop.eup %4694 }
 0x3dc   : > { %v4697_v24 = vpop.eup %4696 }
 0x3dd   : > { %v4699_v43 = vpop.eup %4698 }
 0x3de   : > { %v4701_v46 = vpop.eup %4700 }
 0x3df   : > { %v4703_v28 = vpop.eup %4702 }
 0x3e0   : > { %v4705_v27 = vpop.eup %4704 }
 0x3e1   : > { %v4707_v7 = vpop.eup %4706 }
 0x3e2   : > { %v4709_v3 = vpop.eup %4708 }
 0x3e3   : > { %v4711_v49 = vpop.eup %4710 }
 0x485   : > { %v4054_v19 = vpop.f32.mrb[32].mxu0 }
 0x486   : > { %v1930_v30 = vmul.f32 %v4681_v31, %v4054_v19  ;;  %v1673_v29 = vpop.f32.mrb[33].mxu0 }
 0x487   : > { %v1929_v60 = vmul.f32 %v4683_v57, %v1673_v29 }
 0x489   : > { %v4057_v48 = vpop.f32.mrb[34].mxu0  ;;  %4164 = vmatprep.mubr.f32.mxu0 %v1929_v60 }
 0x48a   : > { %v1932_v58 = vmul.f32 %v4685_v54, %v4057_v48  ;;  %v1683_v6 = vpop.f32.mrb[35].mxu0  ;;  %4165 = vmatmul.mubr.f32.vlgmr.msra.gmra.mrb[48].mxu0 %v1930_v30  ;;  %v4841_v30 = vld [vmem:[%s5571_s2 + $0x8] sm:$0xff]  ;;  %v4842_v54 = vld [vmem:[%s5571_s2 + $0x10] sm:$0xff] }
 0x48b   : > { %v1931_v33 = vmul.f32 %v4687_v34, %v1683_v6 }
 0x48d   : > { %v4060_v38 = vpop.f32.mrb[36].mxu0  ;;  %4167 = vmatprep.mubr.f32.mxu0 %v1931_v33 }
 0x48e   : > { %v1934_v12 = vmul.f32 %v4689_v41, %v4060_v38  ;;  %v1693_v18 = vpop.f32.mrb[37].mxu0  ;;  %4168 = vmatmul.mubr.f32.gmra.mrb[50].mxu0 %v1932_v58 }
 0x48f   : > { %v1933_v11 = vmul.f32 %v4691_v37, %v1693_v18  ;;  %v4844_v37 = vld [vmem:[%s5571_s2 + $0x20] sm:$0xff] }
 0x491   : > { %v4063_v9 = vpop.f32.mrb[38].mxu0  ;;  %4170 = vmatprep.mubr.f32.mxu0 %v1933_v11 }
 0x492   : > { %v1936_v39 = vmul.f32 %v4693_v40, %v4063_v9  ;;  %v1703_v10 = vpop.f32.mrb[39].mxu0  ;;  %4171 = vmatmul.mubr.f32.gmra.mrb[52].mxu0 %v1934_v12 }
 0x493   : > { %v1935_v25 = vmul.f32 %v4695_v14, %v1703_v10  ;;  %v4846_v10 = vld [vmem:[%s5571_s2 + $0x30] sm:$0xff] }
 0x495   : > { %v4066_v4 = vpop.f32.mrb[40].mxu0  ;;  %4173 = vmatprep.mubr.f32.mxu0 %v1935_v25 }
 0x496   : > { %v1938_v42 = vmul.f32 %v4697_v24, %v4066_v4  ;;  %v1713_v21 = vpop.f32.mrb[41].mxu0  ;;  %4174 = vmatmul.mubr.f32.gmra.mrb[54].mxu0 %v1936_v39  ;;  %v4847_v24 = vld [vmem:[%s5571_s2 + $0x38] sm:$0xff] }
 0x497   : > { %v1937_v23 = vmul.f32 %v4699_v43, %v1713_v21 }
 0x499   : > { %v4069_v20 = vpop.f32.mrb[42].mxu0  ;;  %4176 = vmatprep.mubr.f32.mxu0 %v1937_v23 }
 0x49a   : > { %v1940_v45 = vmul.f32 %v4701_v46, %v4069_v20  ;;  %v1723_v55 = vpop.f32.mrb[43].mxu0  ;;  %4177 = vmatmul.mubr.f32.gmra.mrb[56].mxu0 %v1938_v42  ;;  %v4848_v42 = vld [vmem:[%s5571_s2 + $0x40] sm:$0xff]  ;;  %v4849_v46 = vld [vmem:[%s5571_s2 + $0x48] sm:$0xff] }
 0x49b   : > { %v1939_v26 = vmul.f32 %v4703_v28, %v1723_v55 }
 0x49d   : > { %v4072_v59 = vpop.f32.mrb[44].mxu0  ;;  %4179 = vmatprep.mubr.f32.mxu0 %v1939_v26 }
 0x49e   : > { %v1942_v61 = vmul.f32 %v4705_v27, %v4072_v59  ;;  %v1733_v35 = vpop.f32.mrb[45].mxu0  ;;  %4180 = vmatmul.mubr.f32.gmra.mrb[58].mxu0 %v1940_v45  ;;  %v4850_v45 = vld [vmem:[%s5571_s2 + $0x50] sm:$0xff]  ;;  %v4851_v27 = vld [vmem:[%s5571_s2 + $0x58] sm:$0xff] }
 0x49f   : > { %v1941_v47 = vmul.f32 %v4707_v7, %v1733_v35 }
 0x4a1   : > { %v4075_v2 = vpop.f32.mrb[46].mxu0  ;;  %4182 = vmatprep.mubr.f32.mxu0 %v1941_v47 }
 0x4a2   : > { %v1944_v13 = vmul.f32 %v4709_v3, %v4075_v2  ;;  %v1743_v0 = vpop.f32.mrb[47].mxu0  ;;  %4183 = vmatmul.mubr.f32.gmra.mrb[60].mxu0 %v1942_v61  ;;  %v4852_v61 = vld [vmem:[%s5571_s2 + $0x60] sm:$0xff]  ;;  %v4853_v3 = vld [vmem:[%s5571_s2 + $0x68] sm:$0xff] }
 0x4a3   : > { %v1943_v15 = vmul.f32 %v4711_v49, %v1743_v0 }
 0x4a5   : > { %4185 = vmatprep.mubr.f32.mxu0 %v1943_v15  ;;  %v4855_v15 = vld [vmem:[%s5571_s2 + $0x78] sm:$0xff] }
 0x4a6   : > { %4186 = vmatmul.mubr.f32.gmra.mrb[62].mxu0 %v1944_v13  ;;  %v4854_v13 = vld [vmem:[%s5571_s2 + $0x70] sm:$0xff]  ;;  %s6987_s2 = sld [smem:[#allocation34_spill]] }
 0x55d   : > { %v4166_v1 = vpop.f32.mrb[48].mxu0 }
 0x55e   : > { %v2034_v44 = vpop.f32.mrb[49].mxu0  ;;  %v2040_v63 = vadd.f32 %v4166_v1, %v6055_v62 }
 0x55f   : > { %v2035_v50 = vadd.f32 %v6055_v62, %v2034_v44  ;;  %v2353_v44 = vld [vmem:[#allocation13 + $0x8] sm:$0xff] }
 0x560   : > { %v6065_v29 = vadd.f32 %v4841_v30, %v2040_v63  ;;  %v2352_v63 = vld [vmem:[#allocation13] sm:$0xff] }
 0x561   : > { %v4169_v56 = vpop.f32.mrb[50].mxu0  ;;  %v6060_v32 = vadd.f32 %v4840_v17, %v2035_v50  ;;  %v2355_v50 = vld [vmem:[#allocation13 + $0x18] sm:$0xff]  ;;  %v2354_v17 = vld [vmem:[#allocation13 + $0x10] sm:$0xff] }
 0x562   : > { %v2044_v31 = vpop.f32.mrb[51].mxu0  ;;  %v2050_v60 = vadd.f32 %v4169_v56, %v6055_v62  ;;  %v4412_v56 = vpack.c.bf16 %v2355_v50, %v2353_v44  ;;  %v2369_v44 = vld [vmem:[#allocation13 + $0x88] sm:$0xff]  ;;  %v2371_v50 = vld [vmem:[#allocation13 + $0x98] sm:$0xff] }
 0x563   : > { %2131 = vadd.xlane.f32.xlu1 %v6060_v32  ;;  %v2045_v19 = vadd.f32 %v6055_v62, %v2044_v31  ;;  %v2357_v31 = vld [vmem:[#allocation13 + $0x28] sm:$0xff] }
 0x564   : > { %v6075_v33 = vadd.f32 %v4843_v8, %v2050_v60  ;;  %v2361_v60 = vld [vmem:[#allocation13 + $0x48] sm:$0xff]  ;;  %4413 = vmatprep.subr.bf16.mxu1 %v4412_v56  ;;  %v2368_v56 = vld [vmem:[#allocation13 + $0x80] sm:$0xff] }
 0x565   : > { %v4172_v57 = vpop.f32.mrb[52].mxu0  ;;  %v6070_v48 = vadd.f32 %v4842_v54, %v2045_v19  ;;  %v2359_v19 = vld [vmem:[#allocation13 + $0x38] sm:$0xff] }
 0x566   : > { %v2054_v5 = vpop.f32.mrb[53].mxu0  ;;  %v2060_v41 = vadd.f32 %v4172_v57, %v6055_v62  ;;  %v4414_v57 = vpack.c.bf16 %v2354_v17, %v2352_v63  ;;  %v4416_v30 = vpack.c.bf16 %v2359_v19, %v2357_v31  ;;  %v4428_v63 = vpack.c.bf16 %v2371_v50, %v2369_v44  ;;  %v2370_v17 = vld [vmem:[#allocation13 + $0x90] sm:$0xff] }
 0x567   : > { %2133 = vadd.xlane.f32.xlu1 %v6065_v29  ;;  %v2055_v58 = vadd.f32 %v6055_v62, %v2054_v5  ;;  %v2358_v5 = vld [vmem:[#allocation13 + $0x30] sm:$0xff] }
 0x568   : > { %v6085_v40 = vadd.f32 %v4845_v22, %v2060_v41  ;;  %4415 = vmatpush1.bf16.msra.mxu1 %v4414_v57 }
 0x569   : > { %v4175_v52 = vpop.f32.mrb[54].mxu0  ;;  %v6080_v12 = vadd.f32 %v4844_v37, %v2055_v58  ;;  %4417 = vmatprep.subr.bf16.mxu1 %v4416_v30  ;;  %v2360_v58 = vld [vmem:[#allocation13 + $0x40] sm:$0xff] }
 0x56a   : > { %v2064_v34 = vpop.f32.mrb[55].mxu0  ;;  %v2070_v14 = vadd.f32 %v4175_v52, %v6055_v62  ;;  %v2363_v52 = vld [vmem:[#allocation13 + $0x58] sm:$0xff] }
 0x56b   : > { %2135 = vadd.xlane.f32.xlu1 %v6070_v48  ;;  %v2065_v36 = vadd.f32 %v6055_v62, %v2064_v34  ;;  %v4420_v34 = vpack.c.bf16 %v2363_v52, %v2361_v60  ;;  %v2372_v52 = vld [vmem:[#allocation13 + $0xa0] sm:$0xff] }
 0x56c   : > { %v6095_v4 = vadd.f32 %v4847_v24, %v2070_v14 }
 0x56d   : > { %v4178_v6 = vpop.f32.mrb[56].mxu0  ;;  %v6090_v16 = vadd.f32 %v4846_v10, %v2065_v36 }
 0x56e   : > { %v2074_v51 = vpop.f32.mrb[57].mxu0  ;;  %v2080_v43 = vadd.f32 %v4178_v6, %v6055_v62  ;;  %v2362_v6 = vld [vmem:[#allocation13 + $0x50] sm:$0xff] }
 0x56f   : > { %2137 = vadd.xlane.f32.xlu1 %v6075_v33  ;;  %v2075_v53 = vadd.f32 %v6055_v62, %v2074_v51  ;;  %v4422_v8 = vpack.c.bf16 %v2362_v6, %v2360_v58 }
 0x570   : > { %v6105_v20 = vadd.f32 %v4849_v46, %v2080_v43 }
 0x571   : > { %v4181_v38 = vpop.f32.mrb[58].mxu0  ;;  %v6100_v21 = vadd.f32 %v4848_v42, %v2075_v53 }
 0x572   : > { %v2084_v18 = vpop.f32.mrb[59].mxu0  ;;  %v2090_v28 = vadd.f32 %v4181_v38, %v6055_v62 }
 0x573   : > { %2139 = vadd.xlane.f32.xlu1 %v6080_v12  ;;  %v2085_v23 = vadd.f32 %v6055_v62, %v2084_v18 }
 0x574   : > { %v6115_v59 = vadd.f32 %v4851_v27, %v2090_v28  ;;  %v2365_v27 = vld [vmem:[#allocation13 + $0x68] sm:$0xff] }
 0x575   : > { %v4184_v11 = vpop.f32.mrb[60].mxu0  ;;  %v6110_v55 = vadd.f32 %v4850_v45, %v2085_v23 }
 0x576   : > { %v2094_v9 = vpop.f32.mrb[61].mxu0  ;;  %v2100_v7 = vadd.f32 %v4184_v11, %v6055_v62 }
 0x577   : > { %2141 = vadd.xlane.f32.xlu1 %v6085_v40  ;;  %v2095_v26 = vadd.f32 %v6055_v62, %v2094_v9 }
 0x578   : > { %v6125_v2 = vadd.f32 %v4853_v3, %v2100_v7  ;;  %v2367_v7 = vld [vmem:[#allocation13 + $0x78] sm:$0xff] }
 0x579   : > { %v4187_v39 = vpop.f32.mrb[62].mxu0  ;;  %v6120_v35 = vadd.f32 %v4852_v61, %v2095_v26  ;;  %v4424_v61 = vpack.c.bf16 %v2367_v7, %v2365_v27 }
 0x57a   : > { %v2104_v25 = vpop.f32.mrb[63].mxu0  ;;  %v2110_v49 = vadd.f32 %v4187_v39, %v6055_v62 }
 0x57b   : > { %2143 = vadd.xlane.f32.xlu1 %v6090_v16  ;;  %v2105_v47 = vadd.f32 %v6055_v62, %v2104_v25  ;;  %v2356_v62 = vld [vmem:[#allocation13 + $0x20] sm:$0xff] }
 0x57c   : > { %v6134_v1 = vadd.f32 %v4855_v15, %v2110_v49  ;;  %v4418_v54 = vpack.c.bf16 %v2358_v5, %v2356_v62  ;;  %v2373_v62 = vld [vmem:[#allocation13 + $0xa8] sm:$0xff]  ;;  %v2375_v5 = vld [vmem:[#allocation13 + $0xb8] sm:$0xff] }
 0x57d   : > { %v6130_v0 = vadd.f32 %v4854_v13, %v2105_v47  ;;  %v2366_v47 = vld [vmem:[#allocation13 + $0x70] sm:$0xff]  ;;  %v4432_v60 = vpack.c.bf16 %v2375_v5, %v2373_v62 }
 0x57e   : > { %4419 = vmatpush1.bf16.msra.mxu1 %v4418_v54  ;;  %v2374_v54 = vld [vmem:[#allocation13 + $0xb0] sm:$0xff] }
 0x57f   : > { %2145 = vadd.xlane.f32.xlu1 %v6095_v4  ;;  %4421 = vmatprep.subr.bf16.mxu1 %v4420_v34 }
 0x582   : > { %4423 = vmatpush1.bf16.msra.mxu1 %v4422_v8 }
 0x583   : > { %2147 = vadd.xlane.f32.xlu1 %v6100_v21  ;;  %4425 = vmatprep.subr.bf16.mxu1 %v4424_v61 }
 0x587   : > { %2149 = vadd.xlane.f32.xlu1 %v6105_v20 }
 0x58b   : > { %2151 = vadd.xlane.f32.xlu1 %v6110_v55 }
 0x58f   : > { %2153 = vadd.xlane.f32.xlu1 %v6115_v59 }
 0x593   : > { %2155 = vadd.xlane.f32.xlu1 %v6120_v35 }
 0x597   : > { %2157 = vadd.xlane.f32.xlu1 %v6125_v2 }
 0x59b   : > { %2159 = vadd.xlane.f32.xlu1 %v6130_v0 }
 0x59f   : > { %2161 = vadd.xlane.f32.xlu1 %v6134_v1 }
 0x5f0   : > { %v2132_v51 = vpop.xlane.xlu1 %2131 }
 0x5f1   : > { %v2164_v41 = vmul.f32 0.0078125, %v2132_v51  ;;  %v2377_v51 = vld [vmem:[#allocation13 + $0xc8] sm:$0xff] }
 0x5f3   : > { %v6138_v38 = vsub.f32 %v6060_v32, %v2164_v41  ;;  %v2379_v41 = vld [vmem:[#allocation13 + $0xd8] sm:$0xff] }
 0x5f4   : > { %v2134_v37 = vpop.xlane.xlu1 %2133 }
 0x5f5   : > { %v2165_v18 = vmul.f32 0.0078125, %v2134_v37  ;;  %v2196_v36 = vmul.f32 %v6138_v38, %v6138_v38  ;;  %v2376_v37 = vld [vmem:[#allocation13 + $0xc0] sm:$0xff] }
 0x5f7   : > { %v6143_v11 = vsub.f32 %v6065_v29, %v2165_v18  ;;  %2212 = vadd.xlane.f32.xlu0 %v2196_v36  ;;  %v4436_v18 = vpack.c.bf16 %v2379_v41, %v2377_v51  ;;  %v2378_v36 = vld [vmem:[#allocation13 + $0xd0] sm:$0xff]  ;;  %v6227_v41 = vld [vmem:[%s6988_s19] ss:$0 sm:$0xff]  ;;  %s7002_s19 = sld [smem:[#allocation39_spill]] }
 0x5f8   : > { %v2136_v22 = vpop.xlane.xlu1 %2135 }
 0x5f9   : > { %v2166_v9 = vmul.f32 0.0078125, %v2136_v22  ;;  %v2197_v14 = vmul.f32 %v6143_v11, %v6143_v11 }
 0x5fb   : > { %v6148_v39 = vsub.f32 %v6070_v48, %v2166_v9  ;;  %2214 = vadd.xlane.f32.xlu1 %v2197_v14 }
 0x5fc   : > { %v2138_v32 = vpop.xlane.xlu1 %2137 }
 0x5fd   : > { %v2167_v10 = vmul.f32 0.0078125, %v2138_v32  ;;  %v2198_v25 = vmul.f32 %v6148_v39, %v6148_v39 }
 0x5ff   : > { %v6153_v53 = vsub.f32 %v6075_v33, %v2167_v10  ;;  %2216 = vadd.xlane.f32.xlu1 %v2198_v25  ;;  %v2381_v10 = vld [vmem:[#allocation13 + $0xe8] sm:$0xff]  ;;  %v2383_v25 = vld [vmem:[#allocation13 + $0xf8] sm:$0xff] }
 0x600   : > { %v2140_v29 = vpop.xlane.xlu1 %2139 }
 0x601   : > { %v2168_v24 = vmul.f32 0.0078125, %v2140_v29  ;;  %v2199_v43 = vmul.f32 %v6153_v53, %v6153_v53  ;;  %v2380_v29 = vld [vmem:[#allocation13 + $0xe0] sm:$0xff] }
 0x603   : > { %v6158_v42 = vsub.f32 %v6080_v12, %v2168_v24  ;;  %2218 = vadd.xlane.f32.xlu1 %v2199_v43  ;;  %v2364_v12 = vld [vmem:[#allocation13 + $0x60] sm:$0xff]  ;;  %v4440_v24 = vpack.c.bf16 %v2383_v25, %v2381_v10  ;;  %v2382_v43 = vld [vmem:[#allocation13 + $0xf0] sm:$0xff] }
 0x604   : > { %v2142_v48 = vpop.xlane.xlu1 %2141  ;;  %v4426_v49 = vpack.c.bf16 %v2366_v47, %v2364_v12 }
 0x605   : > { %v2169_v23 = vmul.f32 0.0078125, %v2142_v48  ;;  %v2200_v46 = vmul.f32 %v6158_v42, %v6158_v42 }
 0x606   : > { %4427 = vmatpush1.bf16.msra.mxu1 %v4426_v49 }
 0x607   : > { %v6163_v28 = vsub.f32 %v6085_v40, %v2169_v23  ;;  %2220 = vadd.xlane.f32.xlu1 %v2200_v46  ;;  %4429 = vmatprep.subr.bf16.mxu1 %v4428_v63 }
 0x608   : > { %v2144_v33 = vpop.xlane.xlu1 %2143 }
 0x609   : > { %v2170_v45 = vmul.f32 0.0078125, %v2144_v33  ;;  %v2201_v26 = vmul.f32 %v6163_v28, %v6163_v28 }
 0x60b   : > { %v6168_v3 = vsub.f32 %v6090_v16, %v2170_v45  ;;  %2222 = vadd.xlane.f32.xlu1 %v2201_v26  ;;  %v4430_v16 = vpack.c.bf16 %v2370_v17, %v2368_v56  ;;  %v5178_v45 = vmov 0.0  }
 0x60c   : > { %v2146_v13 = vpop.xlane.xlu1 %2145  ;;  %2460 = vmatprep.mubr.f32.mxu1 %v5178_v45 }
 0x60d   : > { %v2171_v40 = vmul.f32 0.0078125, %v2146_v13  ;;  %v2202_v15 = vmul.f32 %v6168_v3, %v6168_v3  ;;  %4431 = vmatpush1.bf16.msra.mxu1 %v4430_v16 }
 0x60e   : > { %4433 = vmatprep.subr.bf16.mxu1 %v4432_v60 }
 0x60f   : > { %v6173_v31 = vsub.f32 %v6095_v4, %v2171_v40  ;;  %2224 = vadd.xlane.f32.xlu1 %v2202_v15  ;;  %v4434_v4 = vpack.c.bf16 %v2374_v54, %v2372_v52 }
 0x610   : > { %v2148_v19 = vpop.xlane.xlu1 %2147 }
 0x611   : > { %v2172_v57 = vmul.f32 0.0078125, %v2148_v19  ;;  %v2203_v30 = vmul.f32 %v6173_v31, %v6173_v31  ;;  %4435 = vmatpush1.bf16.msra.mxu1 %v4434_v4 }
 0x612   : > { %4437 = vmatprep.subr.bf16.mxu1 %v4436_v18 }
 0x613   : > { %v6178_v34 = vsub.f32 %v6100_v21, %v2172_v57  ;;  %2226 = vadd.xlane.f32.xlu1 %v2203_v30  ;;  %v4438_v21 = vpack.c.bf16 %v2378_v36, %v2376_v37 }
 0x614   : > { %v2150_v58 = vpop.xlane.xlu1 %2149 }
 0x615   : > { %v2173_v6 = vmul.f32 0.0078125, %v2150_v58  ;;  %v2204_v8 = vmul.f32 %v6178_v34, %v6178_v34  ;;  %4439 = vmatpush1.bf16.msra.mxu1 %v4438_v21  ;;  %v6221_v58 = vld [vmem:[%s6987_s2] ss:$0 sm:$0xff]  ;;  %s7001_s2 = sld [smem:[#allocation38_spill]] }
 0x616   : > { %4441 = vmatprep.subr.bf16.mxu1 %v4440_v24 }
 0x617   : > { %v6183_v22 = vsub.f32 %v6105_v20, %v2173_v6  ;;  %2228 = vadd.xlane.f32.xlu1 %v2204_v8  ;;  %v4442_v20 = vpack.c.bf16 %v2382_v43, %v2380_v29 }
 0x618   : > { %v2152_v9 = vpop.xlane.xlu1 %2151 }
 0x619   : > { %v2174_v14 = vmul.f32 0.0078125, %v2152_v9  ;;  %v2205_v32 = vmul.f32 %v6183_v22, %v6183_v22  ;;  %4443 = vmatpush1.bf16.msra.mxu1 %v4442_v20 }
 0x61b   : > { %v6188_v48 = vsub.f32 %v6110_v55, %v2174_v14  ;;  %2230 = vadd.xlane.f32.xlu1 %v2205_v32 }
 0x61c   : > { %v2154_v23 = vpop.xlane.xlu1 %2153 }
 0x61d   : > { %v2175_v46 = vmul.f32 0.0078125, %v2154_v23  ;;  %v2206_v33 = vmul.f32 %v6188_v48, %v6188_v48 }
 0x61f   : > { %v6194_v26 = vsub.f32 %v6115_v59, %v2175_v46  ;;  %2232 = vadd.xlane.f32.xlu1 %v2206_v33 }
 0x620   : > { %v2156_v27 = vpop.xlane.xlu1 %2155 }
 0x621   : > { %v2176_v7 = vmul.f32 0.0078125, %v2156_v27  ;;  %v2207_v55 = vmul.f32 %v6194_v26, %v6194_v26 }
 0x623   : > { %v6199_v61 = vsub.f32 %v6120_v35, %v2176_v7  ;;  %2234 = vadd.xlane.f32.xlu1 %v2207_v55 }
 0x624   : > { %v2158_v12 = vpop.xlane.xlu1 %2157 }
 0x625   : > { %v2177_v47 = vmul.f32 0.0078125, %v2158_v12  ;;  %v2208_v49 = vmul.f32 %v6199_v61, %v6199_v61 }
 0x627   : > { %v6204_v13 = vsub.f32 %v6125_v2, %v2177_v47  ;;  %2236 = vadd.xlane.f32.xlu1 %v2208_v49 }
 0x628   : > { %v2160_v59 = vpop.xlane.xlu1 %2159 }
 0x629   : > { %v2178_v40 = vmul.f32 0.0078125, %v2160_v59  ;;  %v2209_v15 = vmul.f32 %v6204_v13, %v6204_v13 }
 0x62b   : > { %v6209_v44 = vsub.f32 %v6130_v0, %v2178_v40  ;;  %2238 = vadd.xlane.f32.xlu0 %v2209_v15 }
 0x62c   : > { %v2162_v35 = vpop.xlane.xlu1 %2161 }
 0x62d   : > { %v2179_v50 = vmul.f32 0.0078125, %v2162_v35  ;;  %v2210_v63 = vmul.f32 %v6209_v44, %v6209_v44 }
 0x62f   : > { %v6214_v56 = vsub.f32 %v6134_v1, %v2179_v50  ;;  %2240 = vadd.xlane.f32.xlu1 %v2210_v63 }
 0x631   : > { %v2211_v2 = vmul.f32 %v6214_v56, %v6214_v56 }
 0x633   : > { %2242 = vadd.xlane.f32.xlu0 %v2211_v2 }
 0x684   : > { %v2213_v17 = vpop.xlane.xlu0 %2212 }
 0x685   : > { %v2244_v16 = vmul.f32 0.0078125, %v2213_v17 }
 0x687   : > { %v2260_v19 = vadd.f32 1e-05, %v2244_v16 }
 0x688   : > { %v2215_v57 = vpop.xlane.xlu1 %2214 }
 0x689   : > { %4712 = vrsqrt.f32 %v2260_v19  ;;  %v2245_v0 = vmul.f32 0.0078125, %v2215_v57 }
 0x68b   : > { %v2261_v30 = vadd.f32 1e-05, %v2245_v0 }
 0x68c   : > { %v2217_v62 = vpop.xlane.xlu1 %2216 }
 0x68d   : > { %4714 = vrsqrt.f32 %v2261_v30  ;;  %v2246_v5 = vmul.f32 0.0078125, %v2217_v62 }
 0x68f   : > { %v2262_v60 = vadd.f32 1e-05, %v2246_v5 }
 0x690   : > { %v2219_v52 = vpop.xlane.xlu1 %2218 }
 0x691   : > { %4716 = vrsqrt.f32 %v2262_v60  ;;  %v2247_v1 = vmul.f32 0.0078125, %v2219_v52 }
 0x693   : > { %v4713_v54 = vpop.eup %4712  ;;  %v2263_v4 = vadd.f32 1e-05, %v2247_v1 }
 0x694   : > { %v2292_v6 = vmul.f32 %v4713_v54, %v6138_v38  ;;  %v2221_v8 = vpop.xlane.xlu1 %2220 }
 0x695   : > { %4718 = vrsqrt.f32 %v2263_v4  ;;  %v2248_v51 = vmul.f32 0.0078125, %v2221_v8 }
 0x696   : > { %v2314_v37 = vmul.f32 %v6221_v58, %v2292_v6 }
 0x697   : > { %v4715_v18 = vpop.eup %4714  ;;  %v2264_v36 = vadd.f32 1e-05, %v2248_v51 }
 0x698   : > { %v2223_v21 = vpop.xlane.xlu1 %2222  ;;  %v6231_v9 = vadd.f32 %v6227_v41, %v2314_v37  ;;  %v2293_v14 = vmul.f32 %v4715_v18, %v6143_v11 }
 0x699   : > { %4720 = vrsqrt.f32 %v2264_v36  ;;  %v2249_v38 = vmul.f32 0.0078125, %v2223_v21 }
 0x69a   : > { %2461 = vmatmul.mubr.f32.vlgmr.msra.gmra.mrb[48].mxu1 %v6231_v9  ;;  %v2315_v32 = vmul.f32 %v6221_v58, %v2293_v14 }
 0x69b   : > { %v4717_v10 = vpop.eup %4716  ;;  %v2265_v25 = vadd.f32 1e-05, %v2249_v38  ;;  %2466 = vmatprep.mubr.f32.mxu1 %v5178_v45 }
 0x69c   : > { %v2225_v29 = vpop.xlane.xlu1 %2224  ;;  %v6238_v24 = vadd.f32 %v6227_v41, %v2315_v32  ;;  %v2294_v43 = vmul.f32 %v4717_v10, %v6148_v39 }
 0x69d   : > { %4722 = vrsqrt.f32 %v2265_v25  ;;  %v2250_v20 = vmul.f32 0.0078125, %v2225_v29 }
 0x69e   : > { %2467 = vmatmul.mubr.f32.gmra.mrb[50].mxu1 %v6238_v24  ;;  %v2316_v11 = vmul.f32 %v6221_v58, %v2294_v43 }
 0x69f   : > { %v4719_v23 = vpop.eup %4718  ;;  %v2266_v46 = vadd.f32 1e-05, %v2250_v20  ;;  %2472 = vmatprep.mubr.f32.mxu1 %v5178_v45 }
 0x6a0   : > { %v2227_v33 = vpop.xlane.xlu1 %2226  ;;  %v6245_v27 = vadd.f32 %v6227_v41, %v2316_v11  ;;  %v2295_v7 = vmul.f32 %v4719_v23, %v6153_v53 }
 0x6a1   : > { %4724 = vrsqrt.f32 %v2266_v46  ;;  %v2251_v55 = vmul.f32 0.0078125, %v2227_v33 }
 0x6a2   : > { %2473 = vmatmul.mubr.f32.gmra.mrb[52].mxu1 %v6245_v27  ;;  %v2317_v39 = vmul.f32 %v6221_v58, %v2295_v7 }
 0x6a3   : > { %v4721_v12 = vpop.eup %4720  ;;  %v2267_v47 = vadd.f32 1e-05, %v2251_v55  ;;  %2478 = vmatprep.mubr.f32.mxu1 %v5178_v45 }
 0x6a4   : > { %v2229_v49 = vpop.xlane.xlu1 %2228  ;;  %v6252_v59 = vadd.f32 %v6227_v41, %v2317_v39  ;;  %v2296_v40 = vmul.f32 %v4721_v12, %v6158_v42 }
 0x6a5   : > { %4726 = vrsqrt.f32 %v2267_v47  ;;  %v2252_v15 = vmul.f32 0.0078125, %v2229_v49 }
 0x6a6   : > { %2479 = vmatmul.mubr.f32.gmra.mrb[54].mxu1 %v6252_v59  ;;  %v2318_v53 = vmul.f32 %v6221_v58, %v2296_v40 }
 0x6a7   : > { %v4723_v35 = vpop.eup %4722  ;;  %v2268_v50 = vadd.f32 1e-05, %v2252_v15  ;;  %2484 = vmatprep.mubr.f32.mxu1 %v5178_v45 }
 0x6a8   : > { %v2231_v63 = vpop.xlane.xlu1 %2230  ;;  %v6259_v2 = vadd.f32 %v6227_v41, %v2318_v53  ;;  %v2297_v17 = vmul.f32 %v4723_v35, %v6163_v28 }
 0x6a9   : > { %4728 = vrsqrt.f32 %v2268_v50  ;;  %v2253_v16 = vmul.f32 0.0078125, %v2231_v63 }
 0x6aa   : > { %2485 = vmatmul.mubr.f32.gmra.mrb[56].mxu1 %v6259_v2  ;;  %v2319_v42 = vmul.f32 %v6221_v58, %v2297_v17 }
 0x6ab   : > { %v4725_v19 = vpop.eup %4724  ;;  %v2269_v57 = vadd.f32 1e-05, %v2253_v16  ;;  %2490 = vmatprep.mubr.f32.mxu1 %v5178_v45 }
 0x6ac   : > { %v2233_v0 = vpop.xlane.xlu1 %2232  ;;  %v6266_v30 = vadd.f32 %v6227_v41, %v2319_v42  ;;  %v2298_v62 = vmul.f32 %v4725_v19, %v6168_v3 }
 0x6ad   : > { %4730 = vrsqrt.f32 %v2269_v57  ;;  %v2254_v5 = vmul.f32 0.0078125, %v2233_v0 }
 0x6ae   : > { %2491 = vmatmul.mubr.f32.gmra.mrb[58].mxu1 %v6266_v30  ;;  %v2320_v28 = vmul.f32 %v6221_v58, %v2298_v62 }
 0x6af   : > { %v4727_v60 = vpop.eup %4726  ;;  %v2270_v52 = vadd.f32 1e-05, %v2254_v5  ;;  %2496 = vmatprep.mubr.f32.mxu1 %v5178_v45 }
 0x6b0   : > { %v2235_v1 = vpop.xlane.xlu1 %2234  ;;  %v6273_v54 = vadd.f32 %v6227_v41, %v2320_v28  ;;  %v2299_v4 = vmul.f32 %v4727_v60, %v6173_v31  ;;  %v2861_v28 = vld [vmem:[#allocation14 + $0x80] sm:$0xff]  ;;  %v2862_v60 = vld [vmem:[#allocation14 + $0x88] sm:$0xff] }
 0x6b1   : > { %4732 = vrsqrt.f32 %v2270_v52  ;;  %v2255_v6 = vmul.f32 0.0078125, %v2235_v1  ;;  %v4444_v52 = vpack.c.bf16 %v2862_v60, %v2861_v28  ;;  %v2845_v1 = vld [vmem:[#allocation14] sm:$0xff]  ;;  %v2386_v28 = vlaneseq }
 0x6b2   : > { %2497 = vmatmul.mubr.f32.gmra.mrb[60].mxu1 %v6273_v54  ;;  %v2321_v3 = vmul.f32 %v6221_v58, %v2299_v4  ;;  %v2846_v4 = vld [vmem:[#allocation14 + $0x8] sm:$0xff] }
 0x6b3   : > { %v4729_v8 = vpop.eup %4728  ;;  %v2271_v51 = vadd.f32 1e-05, %v2255_v6  ;;  %2502 = vmatprep.mubr.f32.mxu1 %v5178_v45  ;;  %v4446_v6 = vpack.c.bf16 %v2846_v4, %v2845_v1  ;;  %4445 = vmatprep.subr.bf16.mxu0 %v4444_v52  ;;  %v2387_v60 = vshrl.u32 %v2386_v28, 7  ;;  %v2384_v1 = vld [vmem:[%s6994_s4] sm:$0x3] }
 0x6b4   : > { %v2237_v37 = vpop.xlane.xlu1 %2236  ;;  %v6280_v18 = vadd.f32 %v6227_v41, %v2321_v3  ;;  %v2300_v36 = vmul.f32 %v4729_v8, %v6178_v34  ;;  %4476 = vmatprep.subr.bf16.mxu1 %v4444_v52  ;;  %v2864_v3 = vld [vmem:[#allocation14 + $0x98] sm:$0xff]  ;;  %v2847_v8 = vld [vmem:[#allocation14 + $0x10] sm:$0xff] }
 0x6b5   : > { %4734 = vrsqrt.f32 %v2271_v51  ;;  %v2256_v21 = vmul.f32 0.0078125, %v2237_v37  ;;  %4447 = vmatpush3.bf16.msra.mxu0 %v4446_v6  ;;  %4484 = vmatpush3.bf16.msra.mxu1 %v4446_v6  ;;  %v2866_v37 = vld [vmem:[#allocation14 + $0xa8] sm:$0xff]  ;;  %v2388_v52 = vsub.s32 0, %v2387_v60  ;;  %v2392_v4 = vsub.s32 1, %v2387_v60 }
 0x6b6   : > { %2503 = vmatmul.mubr.f32.gmra.mrb[62].mxu1 %v6280_v18  ;;  %v2322_v31 = vmul.f32 %v6221_v58, %v2300_v36 }
 0x6b7   : > { %v4731_v14 = vpop.eup %4730  ;;  %v2272_v38 = vadd.f32 1e-05, %v2256_v21  ;;  %2508 = vmatprep.mubr.f32.mxu1 %v5178_v45  ;;  %v2849_v21 = vld [vmem:[#allocation14 + $0x20] sm:$0xff]  ;;  %v6342_v6 = vrot.slane %v2384_v1, %v2388_v52 }
 0x6b8   : > { %v2239_v32 = vpop.xlane.xlu0 %2238  ;;  %v6287_v10 = vadd.f32 %v6227_v41, %v2322_v31  ;;  %v2301_v25 = vmul.f32 %v4731_v14, %v6183_v22  ;;  %v2850_v31 = vld [vmem:[#allocation14 + $0x28] sm:$0xff] }
 0x6b9   : > { %4736 = vrsqrt.f32 %v2272_v38  ;;  %v2257_v29 = vmul.f32 0.0078125, %v2239_v32  ;;  %v4454_v14 = vpack.c.bf16 %v2850_v31, %v2849_v21  ;;  %v2867_v38 = vld [vmem:[#allocation14 + $0xb0] sm:$0xff]  ;;  %v2868_v32 = vld [vmem:[#allocation14 + $0xb8] sm:$0xff] }
 0x6ba   : > { %2509 = vmatmul.mubr.f32.gmra.mrb[64].mxu1 %v6287_v10  ;;  %v2323_v34 = vmul.f32 %v6221_v58, %v2301_v25  ;;  %v4456_v25 = vpack.c.bf16 %v2868_v32, %v2867_v38 }
 0x6bb   : > { %v4733_v43 = vpop.eup %4732  ;;  %v2273_v20 = vadd.f32 1e-05, %v2257_v29  ;;  %2514 = vmatprep.mubr.f32.mxu1 %v5178_v45  ;;  %v2851_v29 = vld [vmem:[#allocation14 + $0x30] sm:$0xff] }
 0x6bc   : > { %v2241_v11 = vpop.xlane.xlu1 %2240  ;;  %v6294_v23 = vadd.f32 %v6227_v41, %v2323_v34  ;;  %v2302_v46 = vmul.f32 %v4733_v43, %v6188_v48  ;;  %v2852_v34 = vld [vmem:[#allocation14 + $0x38] sm:$0xff] }
 0x6bd   : > { %4738 = vrsqrt.f32 %v2273_v20  ;;  %v2258_v33 = vmul.f32 0.0078125, %v2241_v11  ;;  %v4458_v43 = vpack.c.bf16 %v2852_v34, %v2851_v29  ;;  %v2869_v20 = vld [vmem:[#allocation14 + $0xc0] sm:$0xff]  ;;  %v2870_v11 = vld [vmem:[#allocation14 + $0xc8] sm:$0xff] }
 0x6be   : > { %2515 = vmatmul.mubr.f32.gmra.mrb[66].mxu1 %v6294_v23  ;;  %v2324_v22 = vmul.f32 %v6221_v58, %v2302_v46  ;;  %v4460_v46 = vpack.c.bf16 %v2870_v11, %v2869_v20 }
 0x6bf   : > { %v4735_v7 = vpop.eup %4734  ;;  %v2274_v55 = vadd.f32 1e-05, %v2258_v33  ;;  %2520 = vmatprep.mubr.f32.mxu1 %v5178_v45  ;;  %v2853_v33 = vld [vmem:[#allocation14 + $0x40] sm:$0xff] }
 0x6c0   : > { %v2243_v39 = vpop.xlane.xlu0 %2242  ;;  %v6301_v12 = vadd.f32 %v6227_v41, %v2324_v22  ;;  %v2303_v47 = vmul.f32 %v4735_v7, %v6194_v26  ;;  %v2854_v22 = vld [vmem:[#allocation14 + $0x48] sm:$0xff] }
 0x6c1   : > { %4740 = vrsqrt.f32 %v2274_v55  ;;  %v2259_v49 = vmul.f32 0.0078125, %v2243_v39  ;;  %v4462_v7 = vpack.c.bf16 %v2854_v22, %v2853_v33  ;;  %v2871_v55 = vld [vmem:[#allocation14 + $0xd0] sm:$0xff]  ;;  %v2872_v39 = vld [vmem:[#allocation14 + $0xd8] sm:$0xff] }
 0x6c2   : > { %2521 = vmatmul.mubr.f32.gmra.mrb[68].mxu1 %v6301_v12  ;;  %v2325_v48 = vmul.f32 %v6221_v58, %v2303_v47  ;;  %v4464_v47 = vpack.c.bf16 %v2872_v39, %v2871_v55 }
 0x6c3   : > { %v4737_v40 = vpop.eup %4736  ;;  %v2275_v15 = vadd.f32 1e-05, %v2259_v49  ;;  %2526 = vmatprep.mubr.f32.mxu1 %v5178_v45  ;;  %v2855_v49 = vld [vmem:[#allocation14 + $0x50] sm:$0xff] }
 0x6c4   : > { %v6308_v53 = vadd.f32 %v6227_v41, %v2325_v48  ;;  %v2304_v35 = vmul.f32 %v4737_v40, %v6199_v61  ;;  %v2856_v48 = vld [vmem:[#allocation14 + $0x58] sm:$0xff] }
 0x6c5   : > { %4742 = vrsqrt.f32 %v2275_v15  ;;  %v4466_v40 = vpack.c.bf16 %v2856_v48, %v2855_v49  ;;  %v2873_v15 = vld [vmem:[#allocation14 + $0xe0] sm:$0xff] }
 0x6c6   : > { %6989 = vst [vmem:[#allocation23_spill] sm:$0xff] %v6308_v53  ;;  %2527 = vmatmul.mubr.f32.gmra.mrb[70].mxu1 %v6308_v53  ;;  %v2326_v26 = vmul.f32 %v6221_v58, %v2304_v35  ;;  %v2874_v35 = vld [vmem:[#allocation14 + $0xe8] sm:$0xff] }
 0x6c7   : > { %v4739_v50 = vpop.eup %4738  ;;  %2532 = vmatprep.mubr.f32.mxu1 %v5178_v45 }
 0x6c8   : > { %v6315_v63 = vadd.f32 %v6227_v41, %v2326_v26  ;;  %v2305_v17 = vmul.f32 %v4739_v50, %v6204_v13  ;;  %v4468_v26 = vpack.c.bf16 %v2874_v35, %v2873_v15  ;;  %v2857_v50 = vld [vmem:[#allocation14 + $0x60] sm:$0xff] }
 0x6ca   : > { %6990 = vst [vmem:[#allocation24_spill] sm:$0xff] %v6315_v63  ;;  %2533 = vmatmul.mubr.f32.gmra.mrb[72].mxu1 %v6315_v63  ;;  %v2327_v16 = vmul.f32 %v6221_v58, %v2305_v17  ;;  %v2858_v17 = vld [vmem:[#allocation14 + $0x68] sm:$0xff] }
 0x6cb   : > { %v4741_v42 = vpop.eup %4740  ;;  %2538 = vmatprep.mubr.f32.mxu1 %v5178_v45 }
 0x6cc   : > { %v6322_v61 = vadd.f32 %v6227_v41, %v2327_v16  ;;  %v2306_v19 = vmul.f32 %v4741_v42, %v6209_v44  ;;  %v4470_v16 = vpack.c.bf16 %v2858_v17, %v2857_v50  ;;  %v2875_v42 = vld [vmem:[#allocation14 + $0xf0] sm:$0xff] }
 0x6ce   : > { %6991 = vst [vmem:[#allocation25_spill] sm:$0xff] %v6322_v61  ;;  %2539 = vmatmul.mubr.f32.gmra.mrb[74].mxu1 %v6322_v61  ;;  %v2328_v57 = vmul.f32 %v6221_v58, %v2306_v19  ;;  %v2876_v19 = vld [vmem:[#allocation14 + $0xf8] sm:$0xff] }
 0x6cf   : > { %v4743_v0 = vpop.eup %4742  ;;  %2544 = vmatprep.mubr.f32.mxu1 %v5178_v45 }
 0x6d0   : > { %v6329_v13 = vadd.f32 %v6227_v41, %v2328_v57  ;;  %v2307_v62 = vmul.f32 %v4743_v0, %v6214_v56  ;;  %v2863_v56 = vld [vmem:[#allocation14 + $0x90] sm:$0xff]  ;;  %v4472_v57 = vpack.c.bf16 %v2876_v19, %v2875_v42 }
 0x6d1   : > { %v2859_v0 = vld [vmem:[#allocation14 + $0x70] sm:$0xff] }
 0x6d2   : > { %6992 = vst [vmem:[#allocation26_spill] sm:$0xff] %v6329_v13  ;;  %2545 = vmatmul.mubr.f32.gmra.mrb[76].mxu1 %v6329_v13  ;;  %v2329_v5 = vmul.f32 %v6221_v58, %v2307_v62  ;;  %v4448_v58 = vpack.c.bf16 %v2864_v3, %v2863_v56  ;;  %v2860_v62 = vld [vmem:[#allocation14 + $0x78] sm:$0xff]  ;;  %v6344_v56 = vrot.slane %v2384_v1, %v2392_v4 }
 0x6d3   : > { %2550 = vmatprep.mubr.f32.mxu1 %v5178_v45  ;;  %v2848_v45 = vld [vmem:[#allocation14 + $0x18] sm:$0xff] }
 0x6d4   : > { %v6336_v44 = vadd.f32 %v6227_v41, %v2329_v5  ;;  %v4450_v51 = vpack.c.bf16 %v2848_v45, %v2847_v8  ;;  %4449 = vmatprep.subr.bf16.mxu0 %v4448_v58  ;;  %4477 = vmatprep.subr.bf16.mxu1 %v4448_v58  ;;  %v2865_v41 = vld [vmem:[#allocation14 + $0xa0] sm:$0xff]  ;;  %v4474_v5 = vpack.c.bf16 %v2860_v62, %v2859_v0 }
 0x6d5   : > { %v4452_v36 = vpack.c.bf16 %v2866_v37, %v2865_v41 }
 0x6d6   : > { %6993 = vst [vmem:[#allocation27_spill] sm:$0xff] %v6336_v44  ;;  %2551 = vmatmul.mubr.f32.gmra.mrb[78].mxu1 %v6336_v44  ;;  %4451 = vmatpush3.bf16.msra.mxu0 %v4450_v51 }
 0x6d7   : > { %4485 = vmatpush3.bf16.msra.mxu1 %v4450_v51  ;;  %4453 = vmatprep.subr.bf16.mxu0 %v4452_v36 }
 0x6d8   : > { %4478 = vmatprep.subr.bf16.mxu1 %v4452_v36 }
 0x6da   : > { %4455 = vmatpush3.bf16.msra.mxu0 %v4454_v14 }
 0x6db   : > { %4486 = vmatpush3.bf16.msra.mxu1 %v4454_v14  ;;  %4457 = vmatprep.subr.bf16.mxu0 %v4456_v25 }
 0x6dc   : > { %4479 = vmatprep.subr.bf16.mxu1 %v4456_v25 }
 0x6de   : > { %4459 = vmatpush3.bf16.msra.mxu0 %v4458_v43 }
 0x6df   : > { %4487 = vmatpush3.bf16.msra.mxu1 %v4458_v43  ;;  %4461 = vmatprep.subr.bf16.mxu0 %v4460_v46 }
 0x6e0   : > { %4480 = vmatprep.subr.bf16.mxu1 %v4460_v46 }
 0x6e2   : > { %4463 = vmatpush3.bf16.msra.mxu0 %v4462_v7 }
 0x6e3   : > { %4488 = vmatpush3.bf16.msra.mxu1 %v4462_v7  ;;  %4465 = vmatprep.subr.bf16.mxu0 %v4464_v47 }
 0x6e4   : > { %4481 = vmatprep.subr.bf16.mxu1 %v4464_v47 }
 0x6e6   : > { %4467 = vmatpush3.bf16.msra.mxu0 %v4466_v40 }
 0x6e7   : > { %4489 = vmatpush3.bf16.msra.mxu1 %v4466_v40  ;;  %4469 = vmatprep.subr.bf16.mxu0 %v4468_v26 }
 0x6e8   : > { %4482 = vmatprep.subr.bf16.mxu1 %v4468_v26 }
 0x6ea   : > { %4471 = vmatpush3.bf16.msra.mxu0 %v4470_v16 }
 0x6eb   : > { %4490 = vmatpush3.bf16.msra.mxu1 %v4470_v16  ;;  %4473 = vmatprep.subr.bf16.mxu0 %v4472_v57 }
 0x6ec   : > { %4483 = vmatprep.subr.bf16.mxu1 %v4472_v57 }
 0x6ee   : > { %4475 = vmatpush3.bf16.msra.mxu0 %v4474_v5 }
 0x6ef   : > { %4491 = vmatpush3.bf16.msra.mxu1 %v4474_v5 }
 0x76d   : > { %v2462_v3 = vpop.f32.mrb[48].mxu1 }
 0x76e   : > { %v6347_v58 = vadd.f32 %v2462_v3, %v6342_v6  ;;  %v2464_v8 = vpop.f32.mrb[49].mxu1 }
 0x76f   : > { %v6350_v45 = vadd.f32 %v2464_v8, %v6344_v56 }
 0x770   : > { %v2557_v51 = vmul.f32 %v6347_v58, %v6347_v58 }
 0x771   : > { %v2558_v41 = vmul.f32 %v6350_v45, %v6350_v45  ;;  %v2468_v37 = vpop.f32.mrb[50].mxu1 }
 0x772   : > { %v2589_v36 = vmul.f32 %v2557_v51, %v6347_v58  ;;  %v6358_v21 = vadd.f32 %v2468_v37, %v6342_v6  ;;  %v2470_v31 = vpop.f32.mrb[51].mxu1 }
 0x773   : > { %v2590_v14 = vmul.f32 %v2558_v41, %v6350_v45  ;;  %v6362_v38 = vadd.f32 %v2470_v31, %v6344_v56 }
 0x774   : > { %v2621_v32 = vmul.f32 0.044715, %v2589_v36  ;;  %v2559_v25 = vmul.f32 %v6358_v21, %v6358_v21 }
 0x775   : > { %v2622_v29 = vmul.f32 0.044715, %v2590_v14  ;;  %v2560_v34 = vmul.f32 %v6362_v38, %v6362_v38  ;;  %v2474_v43 = vpop.f32.mrb[52].mxu1 }
 0x776   : > { %v2653_v20 = vadd.f32 %v2621_v32, %v6347_v58  ;;  %v2591_v11 = vmul.f32 %v2559_v25, %v6358_v21  ;;  %v6371_v46 = vadd.f32 %v2474_v43, %v6342_v6  ;;  %v2476_v33 = vpop.f32.mrb[53].mxu1 }
 0x777   : > { %v2654_v22 = vadd.f32 %v2622_v29, %v6350_v45  ;;  %v2592_v7 = vmul.f32 %v2560_v34, %v6362_v38  ;;  %v6376_v55 = vadd.f32 %v2476_v33, %v6344_v56 }
 0x778   : > { %v2685_v39 = vmul.f32 0.7978846, %v2653_v20  ;;  %v2623_v47 = vmul.f32 0.044715, %v2591_v11  ;;  %v2561_v49 = vmul.f32 %v6371_v46, %v6371_v46 }
 0x779   : > { %v2686_v48 = vmul.f32 0.7978846, %v2654_v22  ;;  %v2624_v40 = vmul.f32 0.044715, %v2592_v7  ;;  %v2562_v15 = vmul.f32 %v6376_v55, %v6376_v55  ;;  %v2480_v35 = vpop.f32.mrb[54].mxu1 }
 0x77a   : > { %4744 = vtanh.f32 %v2685_v39  ;;  %v2655_v26 = vadd.f32 %v2623_v47, %v6358_v21  ;;  %v2593_v50 = vmul.f32 %v2561_v49, %v6371_v46  ;;  %v6385_v17 = vadd.f32 %v2480_v35, %v6342_v6  ;;  %v2482_v16 = vpop.f32.mrb[55].mxu1 }
 0x77b   : > { %v2656_v42 = vadd.f32 %v2624_v40, %v6362_v38  ;;  %v2594_v19 = vmul.f32 %v2562_v15, %v6376_v55  ;;  %v6390_v57 = vadd.f32 %v2482_v16, %v6344_v56  ;;  %4746 = vtanh.f32 %v2686_v48 }
 0x77c   : > { %v2687_v0 = vmul.f32 0.7978846, %v2655_v26  ;;  %v2625_v62 = vmul.f32 0.044715, %v2593_v50  ;;  %v2563_v5 = vmul.f32 %v6385_v17, %v6385_v17 }
 0x77d   : > { %v2688_v28 = vmul.f32 0.7978846, %v2656_v42  ;;  %v2626_v60 = vmul.f32 0.044715, %v2594_v19  ;;  %v2564_v52 = vmul.f32 %v6390_v57, %v6390_v57  ;;  %v2486_v1 = vpop.f32.mrb[56].mxu1 }
 0x77e   : > { %v2657_v4 = vadd.f32 %v2625_v62, %v6371_v46  ;;  %v2595_v3 = vmul.f32 %v2563_v5, %v6385_v17  ;;  %v6399_v8 = vadd.f32 %v2486_v1, %v6342_v6  ;;  %v2488_v51 = vpop.f32.mrb[57].mxu1  ;;  %4748 = vtanh.f32 %v2687_v0 }
 0x77f   : > { %v2658_v41 = vadd.f32 %v2626_v60, %v6376_v55  ;;  %v2596_v37 = vmul.f32 %v2564_v52, %v6390_v57  ;;  %v6404_v36 = vadd.f32 %v2488_v51, %v6344_v56  ;;  %4750 = vtanh.f32 %v2688_v28 }
 0x780   : > { %v2627_v31 = vmul.f32 0.044715, %v2595_v3  ;;  %v2565_v14 = vmul.f32 %v6399_v8, %v6399_v8  ;;  %v2689_v32 = vmul.f32 0.7978846, %v2657_v4 }
 0x781   : > { %v2690_v25 = vmul.f32 0.7978846, %v2658_v41  ;;  %v2566_v29 = vmul.f32 %v6404_v36, %v6404_v36  ;;  %v2492_v34 = vpop.f32.mrb[58].mxu1  ;;  %v2628_v33 = vmul.f32 0.044715, %v2596_v37 }
 0x782   : > { %v2597_v43 = vmul.f32 %v2565_v14, %v6399_v8  ;;  %v6412_v20 = vadd.f32 %v2492_v34, %v6342_v6  ;;  %v2494_v11 = vpop.f32.mrb[59].mxu1  ;;  %v2659_v39 = vadd.f32 %v2627_v31, %v6385_v17 }
 0x783   : > { %v6415_v22 = vadd.f32 %v2494_v11, %v6344_v56  ;;  %v2598_v47 = vmul.f32 %v2566_v29, %v6404_v36  ;;  %4752 = vtanh.f32 %v2690_v25  ;;  %v2660_v60 = vadd.f32 %v2628_v33, %v6390_v57 }
 0x784   : > { %v4745_v7 = vpop.eup %4744  ;;  %v2567_v49 = vmul.f32 %v6412_v20, %v6412_v20  ;;  %v2629_v15 = vmul.f32 0.044715, %v2597_v43  ;;  %4754 = vtanh.f32 %v2689_v32  ;;  %v6434_v51 = vmul.f32 0.7978846, %v2659_v39 }
 0x785   : > { %v4747_v48 = vpop.eup %4746  ;;  %v2749_v40 = vadd.f32 1.0, %v4745_v7  ;;  %v2568_v35 = vmul.f32 %v6415_v22, %v6415_v22  ;;  %v2498_v26 = vpop.f32.mrb[60].mxu1  ;;  %v2630_v52 = vmul.f32 0.044715, %v2598_v47  ;;  %v2692_v47 = vmul.f32 0.7978846, %v2660_v60 }
 0x786   : > { %v2599_v50 = vmul.f32 %v2567_v49, %v6412_v20  ;;  %v6425_v16 = vadd.f32 %v2498_v26, %v6342_v6  ;;  %v2500_v42 = vpop.f32.mrb[61].mxu1  ;;  %v2750_v19 = vadd.f32 1.0, %v4747_v48  ;;  %v2661_v41 = vadd.f32 %v2629_v15, %v6399_v8 }
 0x787   : > { %v2781_v0 = vmul.f32 0.5, %v2749_v40  ;;  %v2600_v62 = vmul.f32 %v2568_v35, %v6415_v22  ;;  %v6429_v5 = vadd.f32 %v2500_v42, %v6344_v56  ;;  %v2662_v49 = vadd.f32 %v2630_v52, %v6404_v36 }
 0x788   : > { %v4749_v28 = vpop.eup %4748  ;;  %v2569_v1 = vmul.f32 %v6425_v16, %v6425_v16  ;;  %v2782_v4 = vmul.f32 0.5, %v2750_v19  ;;  %v2631_v37 = vmul.f32 0.044715, %v2599_v50  ;;  %v2693_v42 = vmul.f32 0.7978846, %v2661_v41 }
 0x789   : > { %v4751_v3 = vpop.eup %4750  ;;  %v2570_v31 = vmul.f32 %v6429_v5, %v6429_v5  ;;  %v2504_v14 = vpop.f32.mrb[62].mxu1  ;;  %v2813_v32 = vmul.f32 %v2781_v0, %v6347_v58  ;;  %v2632_v11 = vmul.f32 0.044715, %v2600_v62  ;;  %v2751_v48 = vadd.f32 1.0, %v4749_v28 }
 0x78a   : > { %v2601_v25 = vmul.f32 %v2569_v1, %v6425_v16  ;;  %v6442_v29 = vadd.f32 %v2504_v14, %v6342_v6  ;;  %v2506_v34 = vpop.f32.mrb[63].mxu1  ;;  %v2814_v43 = vmul.f32 %v2782_v4, %v6350_v45  ;;  %v2752_v39 = vadd.f32 1.0, %v4751_v3 }
 0x78b   : > { %v2602_v33 = vmul.f32 %v2570_v31, %v6429_v5  ;;  %v6447_v7 = vadd.f32 %v2506_v34, %v6344_v56  ;;  %v2663_v19 = vadd.f32 %v2631_v37, %v6412_v20  ;;  %v2783_v60 = vmul.f32 0.5, %v2751_v48 }
 0x78c   : > { %v2571_v58 = vmul.f32 %v6442_v29, %v6442_v29  ;;  %2941 = vmatprep.mubr.f32.mxu0 %v2814_v43  ;;  %v2633_v40 = vmul.f32 0.044715, %v2601_v25  ;;  %v2784_v26 = vmul.f32 0.5, %v2752_v39  ;;  %v2664_v28 = vadd.f32 %v2632_v11, %v6415_v22 }
 0x78d   : > { %v2634_v15 = vmul.f32 0.044715, %v2602_v33  ;;  %v2572_v45 = vmul.f32 %v6447_v7, %v6447_v7  ;;  %v2510_v35 = vpop.f32.mrb[64].mxu1  ;;  %2942 = vmatmul.mubr.f32.vlgmr.msra.gmra.mrb[64].mxu0 %v2813_v32  ;;  %v4753_v50 = vpop.eup %4752  ;;  %v2694_v31 = vmul.f32 0.7978846, %v2662_v49  ;;  %v2815_v14 = vmul.f32 %v2783_v60, %v6358_v21 }
 0x78e   : > { %v6456_v0 = vadd.f32 %v2510_v35, %v6342_v6  ;;  %v2512_v62 = vpop.f32.mrb[65].mxu1  ;;  %v4755_v52 = vpop.eup %4754  ;;  %v2816_v3 = vmul.f32 %v2784_v26, %v6362_v38  ;;  %v2603_v41 = vmul.f32 %v2571_v58, %v6442_v29  ;;  %v2665_v32 = vadd.f32 %v2633_v40, %v6425_v16 }
 0x78f   : > { %v2604_v1 = vmul.f32 %v2572_v45, %v6447_v7  ;;  %v6461_v4 = vadd.f32 %v2512_v62, %v6344_v56  ;;  %v2666_v25 = vadd.f32 %v2634_v15, %v6429_v5  ;;  %v2754_v11 = vadd.f32 1.0, %v4753_v50 }
 0x790   : > { %v2573_v37 = vmul.f32 %v6456_v0, %v6456_v0  ;;  %2946 = vmatprep.mubr.f32.mxu0 %v2816_v3  ;;  %v2695_v33 = vmul.f32 0.7978846, %v2663_v19  ;;  %v2753_v58 = vadd.f32 1.0, %v4755_v52  ;;  %v2696_v48 = vmul.f32 0.7978846, %v2664_v28 }
 0x791   : > { %v2574_v34 = vmul.f32 %v6461_v4, %v6461_v4  ;;  %v2516_v43 = vpop.f32.mrb[66].mxu1  ;;  %v2636_v38 = vmul.f32 0.044715, %v2604_v1  ;;  %2947 = vmatmul.mubr.f32.gmra.mrb[66].mxu0 %v2815_v14  ;;  %v2786_v15 = vmul.f32 0.5, %v2754_v11  ;;  %v2635_v45 = vmul.f32 0.044715, %v2603_v41 }
 0x792   : > { %v6473_v39 = vadd.f32 %v2516_v43, %v6342_v6  ;;  %v2518_v49 = vpop.f32.mrb[67].mxu1  ;;  %v2605_v21 = vmul.f32 %v2573_v37, %v6456_v0  ;;  %v2785_v50 = vmul.f32 0.5, %v2753_v58  ;;  %v2697_v19 = vmul.f32 0.7978846, %v2665_v32 }
 0x793   : > { %v6477_v40 = vadd.f32 %v2518_v49, %v6344_v56  ;;  %v2606_v35 = vmul.f32 %v2574_v34, %v6461_v4  ;;  %v2698_v62 = vmul.f32 0.7978846, %v2666_v25  ;;  %v2818_v52 = vmul.f32 %v2786_v15, %v6376_v55 }
 0x794   : > { %v2575_v26 = vmul.f32 %v6473_v39, %v6473_v39  ;;  %v2668_v1 = vadd.f32 %v2636_v38, %v6447_v7  ;;  %v2817_v37 = vmul.f32 %v2785_v50, %v6371_v46  ;;  %v2637_v34 = vmul.f32 0.044715, %v2605_v21 }
 0x795   : > { %v2576_v60 = vmul.f32 %v6477_v40, %v6477_v40  ;;  %v2522_v28 = vpop.f32.mrb[68].mxu1  ;;  %2951 = vmatprep.mubr.f32.mxu0 %v2818_v52  ;;  %4756 = vtanh.f32 %v2692_v47  ;;  %v2667_v55 = vadd.f32 %v2635_v45, %v6442_v29  ;;  %v2638_v43 = vmul.f32 0.044715, %v2606_v35 }
 0x796   : > { %v2607_v3 = vmul.f32 %v2575_v26, %v6473_v39  ;;  %v6488_v41 = vadd.f32 %v2522_v28, %v6342_v6  ;;  %v2524_v14 = vpop.f32.mrb[69].mxu1  ;;  %2952 = vmatmul.mubr.f32.gmra.mrb[68].mxu0 %v2817_v37  ;;  %4758 = vtanh.f32 %v6434_v51  ;;  %v2700_v21 = vmul.f32 0.7978846, %v2668_v1 }
 0x797   : > { %v2608_v32 = vmul.f32 %v2576_v60, %v6477_v40  ;;  %v6493_v25 = vadd.f32 %v2524_v14, %v6344_v56  ;;  %4760 = vtanh.f32 %v2694_v31  ;;  %v2669_v35 = vadd.f32 %v2637_v34, %v6456_v0 }
 0x798   : > { %v2577_v11 = vmul.f32 %v6488_v41, %v6488_v41  ;;  %v2639_v38 = vmul.f32 0.044715, %v2607_v3  ;;  %4762 = vtanh.f32 %v2693_v42  ;;  %v2670_v50 = vadd.f32 %v2638_v43, %v6461_v4 }
 0x799   : > { %v2640_v46 = vmul.f32 0.044715, %v2608_v32  ;;  %v2578_v49 = vmul.f32 %v6493_v25, %v6493_v25  ;;  %v2528_v58 = vpop.f32.mrb[70].mxu1  ;;  %4764 = vtanh.f32 %v2696_v48  ;;  %v2699_v3 = vmul.f32 0.7978846, %v2667_v55 }
 0x79a   : > { %v2609_v15 = vmul.f32 %v2577_v11, %v6488_v41  ;;  %v6503_v47 = vadd.f32 %v2528_v58, %v6342_v6  ;;  %v2530_v45 = vpop.f32.mrb[71].mxu1  ;;  %4766 = vtanh.f32 %v2695_v33  ;;  %v2671_v52 = vadd.f32 %v2639_v38, %v6473_v39 }
 0x79b   : > { %v2610_v26 = vmul.f32 %v2578_v49, %v6493_v25  ;;  %v6508_v51 = vadd.f32 %v2530_v45, %v6344_v56  ;;  %v2672_v28 = vadd.f32 %v2640_v46, %v6477_v40  ;;  %4768 = vtanh.f32 %v2698_v62 }
 0x79c   : > { %v2641_v60 = vmul.f32 0.044715, %v2609_v15  ;;  %v2579_v31 = vmul.f32 %v6503_v47, %v6503_v47  ;;  %4770 = vtanh.f32 %v2697_v19  ;;  %v6525_v43 = vmul.f32 0.7978846, %v2669_v35 }
 0x79d   : > { %v2642_v42 = vmul.f32 0.044715, %v2610_v26  ;;  %v2534_v1 = vpop.f32.mrb[72].mxu1  ;;  %v2580_v37 = vmul.f32 %v6508_v51, %v6508_v51  ;;  %4772 = vtanh.f32 %v2700_v21  ;;  %v2702_v62 = vmul.f32 0.7978846, %v2670_v50 }
 0x79e   : > { %v6518_v48 = vadd.f32 %v2534_v1, %v6342_v6  ;;  %v2536_v14 = vpop.f32.mrb[73].mxu1  ;;  %v2673_v34 = vadd.f32 %v2641_v60, %v6488_v41  ;;  %v2611_v33 = vmul.f32 %v2579_v31, %v6503_v47  ;;  %v6529_v38 = vmul.f32 0.7978846, %v2671_v52 }
 0x79f   : > { %v6523_v32 = vadd.f32 %v2536_v14, %v6344_v56  ;;  %v4757_v11 = vpop.eup %4756  ;;  %v6531_v46 = vmul.f32 0.7978846, %v2672_v28  ;;  %v2674_v19 = vadd.f32 %v2642_v42, %v6493_v25  ;;  %v2612_v21 = vmul.f32 %v2580_v37, %v6508_v51 }
 0x7a0   : > { %v2581_v55 = vmul.f32 %v6518_v48, %v6518_v48  ;;  %v4759_v15 = vpop.eup %4758  ;;  %v2756_v45 = vadd.f32 1.0, %v4757_v11  ;;  %v6541_v31 = vmul.f32 0.7978846, %v2673_v34  ;;  %v2643_v52 = vmul.f32 0.044715, %v2611_v33 }
 0x7a1   : > { %v2582_v49 = vmul.f32 %v6523_v32, %v6523_v32  ;;  %v2540_v58 = vpop.f32.mrb[74].mxu1  ;;  %v4761_v60 = vpop.eup %4760  ;;  %v2755_v28 = vadd.f32 1.0, %v4759_v15  ;;  %4774 = vtanh.f32 %v2699_v3 }
 0x7a2   : > { %v2613_v35 = vmul.f32 %v2581_v55, %v6518_v48  ;;  %v6539_v26 = vadd.f32 %v2540_v58, %v6342_v6  ;;  %v2542_v50 = vpop.f32.mrb[75].mxu1  ;;  %v4763_v42 = vpop.eup %4762  ;;  %v2788_v1 = vmul.f32 0.5, %v2756_v45  ;;  %v2758_v14 = vadd.f32 1.0, %v4761_v60 }
 0x7a3   : > { %4776 = vtanh.f32 %v2702_v62  ;;  %v4765_v11 = vpop.eup %4764  ;;  %v2787_v13 = vmul.f32 0.5, %v2755_v28  ;;  %v2757_v37 = vadd.f32 1.0, %v4763_v42  ;;  %v2614_v55 = vmul.f32 %v2582_v49, %v6523_v32 }
 0x7a4   : > { %v2645_v44 = vmul.f32 0.044715, %v2613_v35  ;;  %v6545_v58 = vadd.f32 %v2542_v50, %v6344_v56  ;;  %v4767_v61 = vpop.eup %4766  ;;  %v2820_v34 = vmul.f32 %v2788_v1, %v6390_v57  ;;  %v2790_v53 = vmul.f32 0.5, %v2758_v14 }
 0x7a5   : > { %v2760_v3 = vadd.f32 1.0, %v4765_v11  ;;  %v2546_v15 = vpop.f32.mrb[76].mxu1  ;;  %v4769_v45 = vpop.eup %4768  ;;  %v6549_v60 = vmul.f32 0.7978846, %v2674_v19  ;;  %v2819_v62 = vmul.f32 %v2787_v13, %v6385_v17  ;;  %v2789_v35 = vmul.f32 0.5, %v2757_v37 }
 0x7a6   : > { %v2677_v33 = vadd.f32 %v2645_v44, %v6518_v48  ;;  %v2583_v49 = vmul.f32 %v6539_v26, %v6539_v26  ;;  %v2548_v28 = vpop.f32.mrb[77].mxu1  ;;  %v4771_v50 = vpop.eup %4770  ;;  %2956 = vmatprep.mubr.f32.mxu0 %v2820_v34  ;;  %v2644_v42 = vmul.f32 0.044715, %v2612_v21  ;;  %v2822_v57 = vmul.f32 %v2790_v53, %v6404_v36 }
 0x7a7   : > { %v2792_v1 = vmul.f32 0.5, %v2760_v3  ;;  %v2759_v14 = vadd.f32 1.0, %v4767_v61  ;;  %v4773_v44 = vpop.eup %4772  ;;  %v2675_v11 = vadd.f32 %v2643_v52, %v6503_v47  ;;  %2957 = vmatmul.mubr.f32.gmra.mrb[70].mxu0 %v2819_v62  ;;  %v2646_v63 = vmul.f32 0.044715, %v2614_v55 }
 0x7a8   : > { %v2709_v19 = vmul.f32 0.7978846, %v2677_v33  ;;  %v2584_v13 = vmul.f32 %v6545_v58, %v6545_v58  ;;  %2961 = vmatprep.mubr.f32.mxu0 %v2822_v57  ;;  %v2821_v37 = vmul.f32 %v2789_v35, %v6399_v8  ;;  %v2615_v21 = vmul.f32 %v2583_v49, %v6539_v26 }
 0x7a9   : > { %v2552_v17 = vpop.f32.mrb[78].mxu1  ;;  %v2824_v34 = vmul.f32 %v2792_v1, %v6415_v22  ;;  %v2762_v53 = vadd.f32 1.0, %v4769_v45  ;;  %v2791_v61 = vmul.f32 0.5, %v2759_v14  ;;  %v6563_v52 = vadd.f32 %v2546_v15, %v6342_v6 }
 0x7aa   : > { %v2554_v36 = vpop.f32.mrb[79].mxu1  ;;  %v2616_v3 = vmul.f32 %v2584_v13, %v6545_v58  ;;  %v2761_v55 = vadd.f32 1.0, %v4771_v50  ;;  %v2676_v33 = vadd.f32 %v2644_v42, %v6508_v51  ;;  %v6567_v57 = vadd.f32 %v2548_v28, %v6344_v56 }
 0x7ab   : > { %v2794_v62 = vmul.f32 0.5, %v2762_v53  ;;  %v2764_v8 = vadd.f32 1.0, %v4773_v44  ;;  %v4775_v35 = vpop.eup %4774  ;;  %2962 = vmatmul.mubr.f32.gmra.mrb[72].mxu0 %v2821_v37  ;;  %v2678_v22 = vadd.f32 %v2646_v63, %v6523_v32  ;;  %v2585_v49 = vmul.f32 %v6563_v52, %v6563_v52 }
 0x7ac   : > { %v2648_v45 = vmul.f32 0.044715, %v2616_v3  ;;  %v2793_v1 = vmul.f32 0.5, %v2761_v55  ;;  %2966 = vmatprep.mubr.f32.mxu0 %v2824_v34  ;;  %v2586_v50 = vmul.f32 %v6567_v57, %v6567_v57  ;;  %v6576_v28 = vadd.f32 %v2552_v17, %v6342_v6 }
 0x7ad   : > { %v4777_v14 = vpop.eup %4776  ;;  %v2826_v15 = vmul.f32 %v2794_v62, %v6429_v5  ;;  %v2796_v42 = vmul.f32 0.5, %v2764_v8  ;;  %4778 = vtanh.f32 %v2709_v19  ;;  %v2647_v44 = vmul.f32 0.044715, %v2615_v21 }
 0x7ae   : > { %v2823_v63 = vmul.f32 %v2791_v61, %v6412_v20  ;;  %v2617_v13 = vmul.f32 %v2585_v49, %v6563_v52  ;;  %v2680_v37 = vadd.f32 %v2648_v45, %v6545_v58  ;;  %v2618_v53 = vmul.f32 %v2586_v50, %v6567_v57 }
 0x7af   : > { %v2587_v5 = vmul.f32 %v6576_v28, %v6576_v28  ;;  %v2763_v34 = vadd.f32 1.0, %v4775_v35  ;;  %v2825_v3 = vmul.f32 %v2793_v1, %v6425_v16  ;;  %v2828_v6 = vmul.f32 %v2796_v42, %v6447_v7 }
 0x7b0   : > { %2967 = vmatmul.mubr.f32.gmra.mrb[74].mxu0 %v2823_v63  ;;  %v6587_v19 = vadd.f32 %v2554_v36, %v6344_v56  ;;  %v2766_v17 = vadd.f32 1.0, %v4777_v14  ;;  %v2649_v20 = vmul.f32 0.044715, %v2617_v13  ;;  %v2650_v21 = vmul.f32 0.044715, %v2618_v53 }
 0x7b1   : > { %2971 = vmatprep.mubr.f32.mxu0 %v2826_v15  ;;  %v2619_v61 = vmul.f32 %v2587_v5, %v6576_v28  ;;  %4780 = vtanh.f32 %v6525_v43  ;;  %v2795_v55 = vmul.f32 0.5, %v2763_v34  ;;  %v2708_v16 = vmul.f32 0.7978846, %v2676_v33 }
 0x7b2   : > { %v2588_v62 = vmul.f32 %v6587_v19, %v6587_v19  ;;  %v2798_v8 = vmul.f32 0.5, %v2766_v17  ;;  %4782 = vtanh.f32 %v6531_v46  ;;  %v2679_v7 = vadd.f32 %v2647_v44, %v6539_v26 }
 0x7b3   : > { %4784 = vtanh.f32 %v6529_v38  ;;  %v2707_v56 = vmul.f32 0.7978846, %v2675_v11  ;;  %v2682_v36 = vadd.f32 %v2650_v21, %v6567_v57  ;;  %v2651_v35 = vmul.f32 0.044715, %v2619_v61 }
 0x7b4   : > { %2972 = vmatmul.mubr.f32.gmra.mrb[76].mxu0 %v2825_v3  ;;  %v2620_v45 = vmul.f32 %v2588_v62, %v6587_v19  ;;  %v2710_v43 = vmul.f32 0.7978846, %v2678_v22  ;;  %v2681_v49 = vadd.f32 %v2649_v20, %v6563_v52  ;;  %v2830_v1 = vmul.f32 %v2798_v8, %v6461_v4 }
 0x7b5   : > { %2976 = vmatprep.mubr.f32.mxu0 %v2828_v6  ;;  %4786 = vtanh.f32 %v6549_v60  ;;  %v2712_v46 = vmul.f32 0.7978846, %v2680_v37  ;;  %v2827_v33 = vmul.f32 %v2795_v55, %v6442_v29  ;;  %v2711_v38 = vmul.f32 0.7978846, %v2679_v7 }
 0x7b6   : > { %v2652_v14 = vmul.f32 0.044715, %v2620_v45  ;;  %4788 = vtanh.f32 %v6541_v31  ;;  %v2714_v15 = vmul.f32 0.7978846, %v2682_v36  ;;  %v2683_v50 = vadd.f32 %v2651_v35, %v6576_v28 }
 0x7b7   : > { %4790 = vtanh.f32 %v2708_v16  ;;  %v4779_v11 = vpop.eup %4778  ;;  %v2713_v42 = vmul.f32 0.7978846, %v2681_v49 }
 0x7b8   : > { %2977 = vmatmul.mubr.f32.gmra.mrb[78].mxu0 %v2827_v33  ;;  %v2684_v22 = vadd.f32 %v2652_v14, %v6587_v19  ;;  %4792 = vtanh.f32 %v2707_v56  ;;  %v2715_v44 = vmul.f32 0.7978846, %v2683_v50  ;;  %v2773_v34 = vadd.f32 1.0, %v4779_v11 }
 0x7b9   : > { %2981 = vmatprep.mubr.f32.mxu0 %v2830_v1  ;;  %4794 = vtanh.f32 %v2710_v43 }
 0x7ba   : > { %v2716_v4 = vmul.f32 0.7978846, %v2684_v22  ;;  %4796 = vtanh.f32 %v2712_v46  ;;  %v2805_v36 = vmul.f32 0.5, %v2773_v34 }
 0x7bb   : > { %v4781_v60 = vpop.eup %4780  ;;  %4798 = vtanh.f32 %v2711_v38 }
 0x7bc   : > { %v4783_v29 = vpop.eup %4782  ;;  %v2765_v31 = vadd.f32 1.0, %v4781_v60  ;;  %4800 = vtanh.f32 %v2714_v15  ;;  %v2837_v50 = vmul.f32 %v2805_v36, %v6518_v48 }
 0x7bd   : > { %v4785_v63 = vpop.eup %4784  ;;  %v2768_v13 = vadd.f32 1.0, %v4783_v29  ;;  %4802 = vtanh.f32 %v2713_v42 }
 0x7be   : > { %v2797_v37 = vmul.f32 0.5, %v2765_v31  ;;  %v2767_v53 = vadd.f32 1.0, %v4785_v63  ;;  %4804 = vtanh.f32 %v2716_v4 }
 0x7bf   : > { %v4787_v5 = vpop.eup %4786  ;;  %v2800_v3 = vmul.f32 0.5, %v2768_v13  ;;  %4806 = vtanh.f32 %v2715_v44 }
 0x7c0   : > { %v4789_v6 = vpop.eup %4788  ;;  %v2829_v17 = vmul.f32 %v2797_v37, %v6456_v0  ;;  %v2799_v20 = vmul.f32 0.5, %v2767_v53  ;;  %v2770_v21 = vadd.f32 1.0, %v4787_v5 }
 0x7c1   : > { %v4791_v61 = vpop.eup %4790  ;;  %v2832_v55 = vmul.f32 %v2800_v3, %v6477_v40  ;;  %v2769_v62 = vadd.f32 1.0, %v4789_v6 }
 0x7c2   : > { %v4793_v8 = vpop.eup %4792  ;;  %2982 = vmatmul.mubr.f32.gmra.mrb[80].mxu0 %v2829_v17  ;;  %v2802_v16 = vmul.f32 0.5, %v2770_v21  ;;  %v2772_v7 = vadd.f32 1.0, %v4791_v61  ;;  %v2831_v35 = vmul.f32 %v2799_v20, %v6473_v39 }
 0x7c3   : > { %v4795_v56 = vpop.eup %4794  ;;  %2986 = vmatprep.mubr.f32.mxu0 %v2832_v55  ;;  %v2801_v45 = vmul.f32 0.5, %v2769_v62  ;;  %v2771_v1 = vadd.f32 1.0, %v4793_v8 }
 0x7c4   : > { %v4797_v43 = vpop.eup %4796  ;;  %v2834_v0 = vmul.f32 %v2802_v16, %v6493_v25  ;;  %v2804_v49 = vmul.f32 0.5, %v2772_v7  ;;  %v2774_v46 = vadd.f32 1.0, %v4795_v56 }
 0x7c5   : > { %v4799_v33 = vpop.eup %4798  ;;  %v2776_v14 = vadd.f32 1.0, %v4797_v43  ;;  %v2833_v25 = vmul.f32 %v2801_v45, %v6488_v41  ;;  %v2803_v60 = vmul.f32 0.5, %v2771_v1 }
 0x7c6   : > { %v4801_v40 = vpop.eup %4800  ;;  %2987 = vmatmul.mubr.f32.gmra.mrb[82].mxu0 %v2831_v35  ;;  %v2806_v38 = vmul.f32 0.5, %v2774_v46  ;;  %v2775_v11 = vadd.f32 1.0, %v4799_v33  ;;  %v2836_v22 = vmul.f32 %v2804_v49, %v6508_v51 }
 0x7c7   : > { %v4803_v15 = vpop.eup %4802  ;;  %2991 = vmatprep.mubr.f32.mxu0 %v2834_v0  ;;  %v2808_v39 = vmul.f32 0.5, %v2776_v14  ;;  %v2778_v42 = vadd.f32 1.0, %v4801_v40  ;;  %v2835_v51 = vmul.f32 %v2803_v60, %v6503_v47 }
 0x7c8   : > { %v4805_v4 = vpop.eup %4804  ;;  %v2838_v29 = vmul.f32 %v2806_v38, %v6523_v32  ;;  %v2807_v44 = vmul.f32 0.5, %v2775_v11  ;;  %v2777_v13 = vadd.f32 1.0, %v4803_v15 }
 0x7c9   : > { %v2840_v31 = vmul.f32 %v2808_v39, %v6545_v58  ;;  %v2810_v63 = vmul.f32 0.5, %v2778_v42  ;;  %v2780_v37 = vadd.f32 1.0, %v4805_v4  ;;  %v4807_v53 = vpop.eup %4806 }
 0x7ca   : > { %2992 = vmatmul.mubr.f32.gmra.mrb[84].mxu0 %v2833_v25  ;;  %3001 = vmatprep.mubr.f32.mxu1 %v2838_v29  ;;  %v2839_v5 = vmul.f32 %v2807_v44, %v6539_v26  ;;  %v2809_v32 = vmul.f32 0.5, %v2777_v13  ;;  %v2779_v34 = vadd.f32 1.0, %v4807_v53  ;;  %v6623_v26 = vld [vmem:[%s6995_s0] ss:$0 sm:$0xff]  ;;  %s6866_s0 = scalar_lea.hbm %s7003_s22, %s3491_s24 }
 0x7cb   : > { %2996 = vmatprep.mubr.f32.mxu0 %v2836_v22  ;;  %3002 = vmatmul.mubr.f32.vlgmr.msra.gmra.mrb[80].mxu1 %v2837_v50  ;;  %v2842_v48 = vmul.f32 %v2810_v63, %v6567_v57  ;;  %v2812_v41 = vmul.f32 0.5, %v2780_v37 }
 0x7cc   : > { %3006 = vmatprep.mubr.f32.mxu1 %v2840_v31  ;;  %v2841_v3 = vmul.f32 %v2809_v32, %v6563_v52  ;;  %v2811_v6 = vmul.f32 0.5, %v2779_v34 }
 0x7cd   : > { %v2844_v58 = vmul.f32 %v2812_v41, %v6587_v19 }
 0x7ce   : > { %2997 = vmatmul.mubr.f32.gmra.mrb[86].mxu0 %v2835_v51  ;;  %v2843_v47 = vmul.f32 %v2811_v6, %v6576_v28  ;;  %v6996_v6 = vld [vmem:[#allocation24_spill] sm:$0xff] }
 0x7cf   : > { %3007 = vmatmul.mubr.f32.gmra.mrb[82].mxu1 %v2839_v5 }
 0x7d0   : > { %3011 = vmatprep.mubr.f32.mxu1 %v2842_v48 }
 0x7d3   : > { %3012 = vmatmul.mubr.f32.gmra.mrb[84].mxu1 %v2841_v3 }
 0x7d4   : > { %3016 = vmatprep.mubr.f32.mxu1 %v2844_v58 }
 0x7d7   : > { %3017 = vmatmul.mubr.f32.gmra.mrb[86].mxu1 %v2843_v47 }
 0x860   : > { %v3748_v17 = vpop.f32.mrb[64].mxu0 }
 0x861   : > { %v3749_v57 = vpop.f32.mrb[65].mxu0 }
 0x862   : > { %v3750_v20 = vadd.f32 %v3749_v57, %v3748_v17 }
 0x864   : > { %v3022_v21 = vadd.f32 %v3750_v20, %v6231_v9  ;;  %v3751_v61 = vpop.f32.mrb[66].mxu0 }
 0x865   : > { %v3752_v19 = vpop.f32.mrb[67].mxu0 }
 0x866   : > { %v6627_v52 = vadd.f32 %v6623_v26, %v3022_v21  ;;  %v3753_v55 = vadd.f32 %v3752_v19, %v3751_v61  ;;  %v6997_v61 = vld [vmem:[#allocation23_spill] sm:$0xff] }
 0x868   : > { %3063 = vadd.xlane.f32.xlu1 %v6627_v52  ;;  %v3023_v28 = vadd.f32 %v3753_v55, %v6238_v24 }
 0x869   : > { %v3754_v62 = vpop.f32.mrb[68].mxu0 }
 0x86a   : > { %v6632_v8 = vadd.f32 %v6623_v26, %v3023_v28  ;;  %v3755_v16 = vpop.f32.mrb[69].mxu0 }
 0x86b   : > { %v3756_v7 = vadd.f32 %v3755_v16, %v3754_v62 }
 0x86c   : > { %3065 = vadd.xlane.f32.xlu0 %v6632_v8 }
 0x86d   : > { %v3024_v9 = vadd.f32 %v3756_v7, %v6245_v27 }
 0x86f   : > { %v6637_v56 = vadd.f32 %v6623_v26, %v3024_v9 }
 0x871   : > { %3067 = vadd.xlane.f32.xlu1 %v6637_v56 }
 0x87a   : > { %v3757_v36 = vpop.f32.mrb[70].mxu0 }
 0x87b   : > { %v3758_v35 = vpop.f32.mrb[71].mxu0 }
 0x87c   : > { %v3759_v45 = vadd.f32 %v3758_v35, %v3757_v36  ;;  %v6999_v35 = vld [vmem:[#allocation26_spill] sm:$0xff] }
 0x87e   : > { %v3025_v24 = vadd.f32 %v3759_v45, %v6252_v59  ;;  %v3760_v43 = vpop.f32.mrb[72].mxu0 }
 0x87f   : > { %v3761_v0 = vpop.f32.mrb[73].mxu0 }
 0x880   : > { %v3762_v49 = vadd.f32 %v3761_v0, %v3760_v43  ;;  %v6642_v1 = vadd.f32 %v6623_v26, %v3025_v24 }
 0x882   : > { %v3026_v46 = vadd.f32 %v3762_v49, %v6259_v2  ;;  %3069 = vadd.xlane.f32.xlu0 %v6642_v1 }
 0x883   : > { %v3763_v27 = vpop.f32.mrb[74].mxu0 }
 0x884   : > { %v3764_v33 = vpop.f32.mrb[75].mxu0  ;;  %v6647_v40 = vadd.f32 %v6623_v26, %v3026_v46  ;;  %v7000_v46 = vld [vmem:[#allocation27_spill] sm:$0xff] }
 0x885   : > { %v3765_v14 = vadd.f32 %v3764_v33, %v3763_v27 }
 0x886   : > { %3071 = vadd.xlane.f32.xlu1 %v6647_v40 }
 0x887   : > { %v3027_v38 = vadd.f32 %v3765_v14, %v6266_v30  ;;  %v3766_v59 = vpop.f32.mrb[76].mxu0 }
 0x888   : > { %v3767_v11 = vpop.f32.mrb[77].mxu0 }
 0x889   : > { %v3768_v15 = vadd.f32 %v3767_v11, %v3766_v59  ;;  %v6652_v50 = vadd.f32 %v6623_v26, %v3027_v38 }
 0x88b   : > { %v3028_v2 = vadd.f32 %v3768_v15, %v6273_v54  ;;  %3073 = vadd.xlane.f32.xlu0 %v6652_v50  ;;  %v3769_v22 = vpop.f32.mrb[78].mxu0 }
 0x88c   : > { %v3770_v39 = vpop.f32.mrb[79].mxu0 }
 0x88d   : > { %v3771_v42 = vadd.f32 %v3770_v39, %v3769_v22  ;;  %v6657_v4 = vadd.f32 %v6623_v26, %v3028_v2 }
 0x88f   : > { %v3029_v30 = vadd.f32 %v3771_v42, %v6280_v18  ;;  %3075 = vadd.xlane.f32.xlu1 %v6657_v4 }
 0x891   : > { %v6662_v25 = vadd.f32 %v6623_v26, %v3029_v30 }
 0x893   : > { %3077 = vadd.xlane.f32.xlu0 %v6662_v25 }
 0x895   : > { %v3772_v60 = vpop.f32.mrb[80].mxu0 }
 0x896   : > { %v3773_v29 = vpop.f32.mrb[81].mxu0 }
 0x897   : > { %v3774_v54 = vadd.f32 %v3773_v29, %v3772_v60 }
 0x899   : > { %v3030_v44 = vadd.f32 %v3774_v54, %v6287_v10  ;;  %v3775_v31 = vpop.f32.mrb[82].mxu0 }
 0x89a   : > { %v3776_v63 = vpop.f32.mrb[83].mxu0 }
 0x89b   : > { %v3777_v13 = vadd.f32 %v3776_v63, %v3775_v31  ;;  %v6667_v37 = vadd.f32 %v6623_v26, %v3030_v44 }
 0x89d   : > { %v3031_v18 = vadd.f32 %v3777_v13, %v6294_v23  ;;  %3079 = vadd.xlane.f32.xlu1 %v6667_v37  ;;  %v3778_v53 = vpop.f32.mrb[84].mxu0 }
 0x89e   : > { %v3779_v51 = vpop.f32.mrb[85].mxu0  ;;  %v3784_v48 = vpop.f32.mrb[80].mxu1 }
 0x89f   : > { %v3780_v41 = vadd.f32 %v3779_v51, %v3778_v53  ;;  %v6672_v5 = vadd.f32 %v6623_v26, %v3031_v18  ;;  %v3785_v32 = vpop.f32.mrb[81].mxu1 }
 0x8a0   : > { %v3786_v34 = vadd.f32 %v3785_v32, %v3784_v48 }
 0x8a1   : > { %v3032_v10 = vadd.f32 %v3780_v41, %v6301_v12  ;;  %3081 = vadd.xlane.f32.xlu0 %v6672_v5  ;;  %v3781_v58 = vpop.f32.mrb[86].mxu0  ;;  %v6998_v12 = vld [vmem:[#allocation25_spill] sm:$0xff] }
 0x8a2   : > { %v3782_v3 = vpop.f32.mrb[87].mxu0  ;;  %v3034_v47 = vadd.f32 %v3786_v34, %v6996_v6  ;;  %v3787_v23 = vpop.f32.mrb[82].mxu1 }
 0x8a3   : > { %v3783_v17 = vadd.f32 %v3782_v3, %v3781_v58  ;;  %v6678_v57 = vadd.f32 %v6623_v26, %v3032_v10  ;;  %v3788_v20 = vpop.f32.mrb[83].mxu1 }
 0x8a4   : > { %v3789_v21 = vadd.f32 %v3788_v20, %v3787_v23  ;;  %v6683_v55 = vadd.f32 %v6623_v26, %v3034_v47 }
 0x8a5   : > { %v3033_v19 = vadd.f32 %v3783_v17, %v6997_v61  ;;  %3083 = vadd.xlane.f32.xlu1 %v6678_v57 }
 0x8a6   : > { %v3035_v28 = vadd.f32 %v3789_v21, %v6998_v12  ;;  %v3790_v62 = vpop.f32.mrb[84].mxu1 }
 0x8a7   : > { %v6687_v16 = vadd.f32 %v6623_v26, %v3033_v19  ;;  %v3791_v7 = vpop.f32.mrb[85].mxu1 }
 0x8a8   : > { %v3792_v9 = vadd.f32 %v3791_v7, %v3790_v62  ;;  %v6692_v36 = vadd.f32 %v6623_v26, %v3035_v28 }
 0x8a9   : > { %3085 = vadd.xlane.f32.xlu0 %v6687_v16  ;;  %3087 = vadd.xlane.f32.xlu1 %v6683_v55 }
 0x8aa   : > { %v3036_v45 = vadd.f32 %v3792_v9, %v6999_v35  ;;  %v3793_v24 = vpop.f32.mrb[86].mxu1 }
 0x8ab   : > { %v3794_v43 = vpop.f32.mrb[87].mxu1 }
 0x8ac   : > { %v3795_v0 = vadd.f32 %v3794_v43, %v3793_v24  ;;  %v6696_v49 = vadd.f32 %v6623_v26, %v3036_v45 }
 0x8ad   : > { %3089 = vadd.xlane.f32.xlu0 %v6692_v36 }
 0x8ae   : > { %v3037_v27 = vadd.f32 %v3795_v0, %v7000_v46  ;;  %3091 = vadd.xlane.f32.xlu1 %v6696_v49 }
 0x8b0   : > { %v6702_v33 = vadd.f32 %v6623_v26, %v3037_v27 }
 0x8b2   : > { %3093 = vadd.xlane.f32.xlu0 %v6702_v33 }
 0x8f5   : > { %v3064_v14 = vpop.xlane.xlu1 %3063 }
 0x8f6   : > { %v3095_v38 = vmul.f32 0.0078125, %v3064_v14 }
 0x8f8   : > { %v6706_v59 = vsub.f32 %v6627_v52, %v3095_v38 }
 0x8f9   : > { %v3066_v11 = vpop.xlane.xlu0 %3065 }
 0x8fa   : > { %v3127_v15 = vmul.f32 %v6706_v59, %v6706_v59  ;;  %v3096_v2 = vmul.f32 0.0078125, %v3066_v11 }
 0x8fc   : > { %3143 = vadd.xlane.f32.xlu1 %v3127_v15  ;;  %v6711_v22 = vsub.f32 %v6632_v8, %v3096_v2 }
 0x8fe   : > { %v3128_v26 = vmul.f32 %v6711_v22, %v6711_v22  ;;  %v3068_v39 = vpop.xlane.xlu1 %3067 }
 0x8ff   : > { %v3097_v42 = vmul.f32 0.0078125, %v3068_v39 }
 0x900   : > { %3145 = vadd.xlane.f32.xlu0 %v3128_v26 }
 0x901   : > { %v6716_v30 = vsub.f32 %v6637_v56, %v3097_v42 }
 0x903   : > { %v3129_v52 = vmul.f32 %v6716_v30, %v6716_v30 }
 0x905   : > { %3147 = vadd.xlane.f32.xlu1 %v3129_v52 }
 0x90f   : > { %v3070_v60 = vpop.xlane.xlu0 %3069 }
 0x910   : > { %v3098_v29 = vmul.f32 0.0078125, %v3070_v60 }
 0x912   : > { %v6721_v54 = vsub.f32 %v6642_v1, %v3098_v29 }
 0x913   : > { %v3072_v8 = vpop.xlane.xlu1 %3071 }
 0x914   : > { %v3099_v44 = vmul.f32 0.0078125, %v3072_v8  ;;  %v3130_v31 = vmul.f32 %v6721_v54, %v6721_v54 }
 0x916   : > { %v6726_v63 = vsub.f32 %v6647_v40, %v3099_v44  ;;  %3149 = vadd.xlane.f32.xlu0 %v3130_v31  ;;  %v6794_v44 = vld [vmem:[%s7002_s19] ss:$0 sm:$0xff] }
 0x918   : > { %v3074_v56 = vpop.xlane.xlu0 %3073  ;;  %v3131_v18 = vmul.f32 %v6726_v63, %v6726_v63 }
 0x919   : > { %v3100_v13 = vmul.f32 0.0078125, %v3074_v56 }
 0x91a   : > { %3151 = vadd.xlane.f32.xlu1 %v3131_v18 }
 0x91b   : > { %v6731_v53 = vsub.f32 %v6652_v50, %v3100_v13 }
 0x91c   : > { %v3076_v1 = vpop.xlane.xlu1 %3075 }
 0x91d   : > { %v3101_v51 = vmul.f32 0.0078125, %v3076_v1  ;;  %v3132_v48 = vmul.f32 %v6731_v53, %v6731_v53 }
 0x91f   : > { %v6736_v41 = vsub.f32 %v6657_v4, %v3101_v51  ;;  %3153 = vadd.xlane.f32.xlu0 %v3132_v48 }
 0x920   : > { %v3078_v40 = vpop.xlane.xlu0 %3077 }
 0x921   : > { %v3102_v32 = vmul.f32 0.0078125, %v3078_v40  ;;  %v3133_v34 = vmul.f32 %v6736_v41, %v6736_v41 }
 0x923   : > { %v6741_v10 = vsub.f32 %v6662_v25, %v3102_v32  ;;  %3155 = vadd.xlane.f32.xlu1 %v3133_v34 }
 0x925   : > { %v3134_v50 = vmul.f32 %v6741_v10, %v6741_v10 }
 0x927   : > { %3157 = vadd.xlane.f32.xlu0 %v3134_v50 }
 0x92a   : > { %v3080_v58 = vpop.xlane.xlu1 %3079 }
 0x92b   : > { %v3103_v3 = vmul.f32 0.0078125, %v3080_v58 }
 0x92d   : > { %v6746_v6 = vsub.f32 %v6667_v37, %v3103_v3 }
 0x92e   : > { %v3082_v4 = vpop.xlane.xlu0 %3081 }
 0x92f   : > { %v3104_v47 = vmul.f32 0.0078125, %v3082_v4  ;;  %v3135_v23 = vmul.f32 %v6746_v6, %v6746_v6 }
 0x931   : > { %v6751_v17 = vsub.f32 %v6672_v5, %v3104_v47  ;;  %3159 = vadd.xlane.f32.xlu1 %v3135_v23 }
 0x932   : > { %v3084_v25 = vpop.xlane.xlu1 %3083 }
 0x933   : > { %v3105_v20 = vmul.f32 0.0078125, %v3084_v25  ;;  %v3136_v21 = vmul.f32 %v6751_v17, %v6751_v17 }
 0x935   : > { %v6756_v61 = vsub.f32 %v6678_v57, %v3105_v20  ;;  %3161 = vadd.xlane.f32.xlu0 %v3136_v21 }
 0x936   : > { %v3086_v37 = vpop.xlane.xlu0 %3085  ;;  %v3088_v19 = vpop.xlane.xlu1 %3087 }
 0x937   : > { %v3106_v12 = vmul.f32 0.0078125, %v3086_v37  ;;  %v3137_v28 = vmul.f32 %v6756_v61, %v6756_v61  ;;  %v3107_v62 = vmul.f32 0.0078125, %v3088_v19 }
 0x939   : > { %v6761_v5 = vsub.f32 %v6687_v16, %v3106_v12  ;;  %3163 = vadd.xlane.f32.xlu1 %v3137_v28  ;;  %v6764_v7 = vsub.f32 %v6683_v55, %v3107_v62 }
 0x93a   : > { %v3090_v9 = vpop.xlane.xlu0 %3089 }
 0x93b   : > { %v3138_v57 = vmul.f32 %v6761_v5, %v6761_v5  ;;  %v3108_v35 = vmul.f32 0.0078125, %v3090_v9  ;;  %v3139_v45 = vmul.f32 %v6764_v7, %v6764_v7  ;;  %v3092_v24 = vpop.xlane.xlu1 %3091 }
 0x93c   : > { %v3109_v43 = vmul.f32 0.0078125, %v3092_v24 }
 0x93d   : > { %3165 = vadd.xlane.f32.xlu0 %v3138_v57  ;;  %v6771_v0 = vsub.f32 %v6692_v36, %v3108_v35  ;;  %3167 = vadd.xlane.f32.xlu1 %v3139_v45 }
 0x93e   : > { %v6774_v16 = vsub.f32 %v6696_v49, %v3109_v43 }
 0x93f   : > { %v3140_v55 = vmul.f32 %v6771_v0, %v6771_v0  ;;  %v3094_v46 = vpop.xlane.xlu0 %3093 }
 0x940   : > { %v3110_v27 = vmul.f32 0.0078125, %v3094_v46  ;;  %v3141_v14 = vmul.f32 %v6774_v16, %v6774_v16 }
 0x941   : > { %3169 = vadd.xlane.f32.xlu0 %v3140_v55 }
 0x942   : > { %v6781_v38 = vsub.f32 %v6702_v33, %v3110_v27  ;;  %3171 = vadd.xlane.f32.xlu1 %v3141_v14  ;;  %v6788_v33 = vld [vmem:[%s7001_s2] ss:$0 sm:$0xff]  ;;  %s5086_s2 = sshll.u32 %s5179_s25, 4  ;;  %s5087_s2 = int_to_ptr.vmem [resolvable:$false] %s5086_s2 }
 0x943   : > { %s5088_s20 = scalar_lea.vmem %s5087_s2, 4096  ;;  %p5089_p2 = scmp.lt.s32.totalorder %s6868_s11, %s5087_s2 }
 0x944   : > { %v3142_v36 = vmul.f32 %v6781_v38, %v6781_v38  ;;  %p5090_p8 = scmp.lt.s32.totalorder %s5088_s20, %s5082_s1 }
 0x946   : > { %3173 = vadd.xlane.f32.xlu0 %v3142_v36  ;;  %p5091_p6 = por %p5090_p8, %p5089_p2 }
 0x948   : > { %p5092_p10 = pnand %p5091_p6, %p5085_p0 }
 0x989   : > { %v3144_v11 = vpop.xlane.xlu1 %3143 }
 0x98a   : > { %v3175_v49 = vmul.f32 0.0078125, %v3144_v11 }
 0x98c   : > { %v3191_v15 = vadd.f32 1e-05, %v3175_v49 }
 0x98d   : > { %v3146_v2 = vpop.xlane.xlu0 %3145 }
 0x98e   : > { %4808 = vrsqrt.f32 %v3191_v15  ;;  %v3176_v26 = vmul.f32 0.0078125, %v3146_v2 }
 0x990   : > { %v3192_v39 = vadd.f32 1e-05, %v3176_v26 }
 0x992   : > { %4810 = vrsqrt.f32 %v3192_v39  ;;  %v3148_v42 = vpop.xlane.xlu1 %3147 }
 0x993   : > { %v3177_v52 = vmul.f32 0.0078125, %v3148_v42 }
 0x995   : > { %v3193_v60 = vadd.f32 1e-05, %v3177_v52 }
 0x997   : > { %4812 = vrsqrt.f32 %v3193_v60 }
 0x998   : > { %v4809_v29 = vpop.eup %4808 }
 0x999   : > { %v3223_v8 = vmul.f32 %v4809_v29, %v6706_v59 }
 0x99b   : > { %v3245_v31 = vmul.f32 %v6788_v33, %v3223_v8 }
 0x99c   : > { %v4811_v56 = vpop.eup %4810 }
 0x99d   : > { %v3267_v13 = vadd.f32 %v6794_v44, %v3245_v31  ;;  %v3224_v18 = vmul.f32 %v4811_v56, %v6711_v22 }
 0x99f   : > { %3283 = vst [vmem:[%s6801_s13] sm:$0xff] %v3267_v13  ;;  %v3246_v59 = vmul.f32 %v6788_v33, %v3224_v18 }
 0x9a1   : > { %v3268_v1 = vadd.f32 %v6794_v44, %v3246_v59  ;;  %v4813_v51 = vpop.eup %4812 }
 0x9a2   : > { %v3225_v48 = vmul.f32 %v4813_v51, %v6716_v30 }
 0x9a3   : > { %3284 = vst [vmem:[%s6801_s13 + $0x8] sm:$0xff] %v3268_v1  ;;  %v3150_v40 = vpop.xlane.xlu0 %3149 }
 0x9a4   : > { %v3247_v32 = vmul.f32 %v6788_v33, %v3225_v48  ;;  %v3178_v34 = vmul.f32 0.0078125, %v3150_v40 }
 0x9a6   : > { %v3269_v22 = vadd.f32 %v6794_v44, %v3247_v32  ;;  %v3194_v50 = vadd.f32 1e-05, %v3178_v34 }
 0x9a7   : > { %v3152_v58 = vpop.xlane.xlu1 %3151 }
 0x9a8   : > { %3285 = vst [vmem:[%s6801_s13 + $0x10] sm:$0xff] %v3269_v22  ;;  %4814 = vrsqrt.f32 %v3194_v50  ;;  %v3179_v3 = vmul.f32 0.0078125, %v3152_v58 }
 0x9aa   : > { %v3195_v4 = vadd.f32 1e-05, %v3179_v3 }
 0x9ac   : > { %v3154_v47 = vpop.xlane.xlu0 %3153  ;;  %4816 = vrsqrt.f32 %v3195_v4 }
 0x9ad   : > { %v3180_v23 = vmul.f32 0.0078125, %v3154_v47 }
 0x9af   : > { %v3196_v25 = vadd.f32 1e-05, %v3180_v23 }
 0x9b0   : > { %v3156_v20 = vpop.xlane.xlu1 %3155 }
 0x9b1   : > { %4818 = vrsqrt.f32 %v3196_v25  ;;  %v3181_v30 = vmul.f32 0.0078125, %v3156_v20 }
 0x9b2   : > { %v4815_v21 = vpop.eup %4814 }
 0x9b3   : > { %v3197_v37 = vadd.f32 1e-05, %v3181_v30  ;;  %v3226_v19 = vmul.f32 %v4815_v21, %v6721_v54 }
 0x9b4   : > { %v3158_v12 = vpop.xlane.xlu0 %3157 }
 0x9b5   : > { %4820 = vrsqrt.f32 %v3197_v37  ;;  %v3182_v28 = vmul.f32 0.0078125, %v3158_v12  ;;  %v3248_v62 = vmul.f32 %v6788_v33, %v3226_v19 }
 0x9b6   : > { %v4817_v9 = vpop.eup %4816 }
 0x9b7   : > { %v3198_v57 = vadd.f32 1e-05, %v3182_v28  ;;  %v3270_v35 = vadd.f32 %v6794_v44, %v3248_v62  ;;  %v3227_v45 = vmul.f32 %v4817_v9, %v6726_v63 }
 0x9b9   : > { %4822 = vrsqrt.f32 %v3198_v57  ;;  %3286 = vst [vmem:[%s6801_s13 + $0x18] sm:$0xff] %v3270_v35  ;;  %v3249_v24 = vmul.f32 %v6788_v33, %v3227_v45 }
 0x9bb   : > { %v4819_v43 = vpop.eup %4818  ;;  %v3271_v55 = vadd.f32 %v6794_v44, %v3249_v24 }
 0x9bc   : > { %v3228_v54 = vmul.f32 %v4819_v43, %v6731_v53 }
 0x9bd   : > { %3287 = vst [vmem:[%s6801_s13 + $0x20] sm:$0xff] %v3271_v55 }
 0x9be   : > { %v3250_v46 = vmul.f32 %v6788_v33, %v3228_v54  ;;  %v3160_v27 = vpop.xlane.xlu1 %3159 }
 0x9bf   : > { %v4821_v14 = vpop.eup %4820  ;;  %v3183_v36 = vmul.f32 0.0078125, %v3160_v27 }
 0x9c0   : > { %v3272_v11 = vadd.f32 %v6794_v44, %v3250_v46  ;;  %v3229_v63 = vmul.f32 %v4821_v14, %v6736_v41 }
 0x9c1   : > { %v3199_v49 = vadd.f32 1e-05, %v3183_v36 }
 0x9c2   : > { %3288 = vst [vmem:[%s6801_s13 + $0x28] sm:$0xff] %v3272_v11  ;;  %v3251_v15 = vmul.f32 %v6788_v33, %v3229_v63  ;;  %v3162_v2 = vpop.xlane.xlu0 %3161 }
 0x9c3   : > { %v4823_v26 = vpop.eup %4822  ;;  %4824 = vrsqrt.f32 %v3199_v49  ;;  %v3184_v53 = vmul.f32 0.0078125, %v3162_v2 }
 0x9c4   : > { %v3273_v39 = vadd.f32 %v6794_v44, %v3251_v15  ;;  %v3230_v42 = vmul.f32 %v4823_v26, %v6741_v10 }
 0x9c5   : > { %v3200_v52 = vadd.f32 1e-05, %v3184_v53 }
 0x9c6   : > { %3289 = vst [vmem:[%s6801_s13 + $0x30] sm:$0xff] %v3273_v39  ;;  %v3252_v60 = vmul.f32 %v6788_v33, %v3230_v42  ;;  %v3164_v29 = vpop.xlane.xlu1 %3163 }
 0x9c7   : > { %4826 = vrsqrt.f32 %v3200_v52  ;;  %v3185_v41 = vmul.f32 0.0078125, %v3164_v29 }
 0x9c8   : > { %v3274_v8 = vadd.f32 %v6794_v44, %v3252_v60 }
 0x9c9   : > { %v3201_v31 = vadd.f32 1e-05, %v3185_v41 }
 0x9ca   : > { %3290 = vst [vmem:[%s6801_s13 + $0x38] sm:$0xff] %v3274_v8  ;;  %v3166_v56 = vpop.xlane.xlu0 %3165  ;;  %v3168_v13 = vpop.xlane.xlu1 %3167 }
 0x9cb   : > { %4828 = vrsqrt.f32 %v3201_v31  ;;  %v3186_v18 = vmul.f32 0.0078125, %v3166_v56  ;;  %v3187_v59 = vmul.f32 0.0078125, %v3168_v13 }
 0x9cd   : > { %v4825_v1 = vpop.eup %4824  ;;  %v3202_v51 = vadd.f32 1e-05, %v3186_v18  ;;  %v3203_v48 = vadd.f32 1e-05, %v3187_v59 }
 0x9ce   : > { %v3231_v10 = vmul.f32 %v4825_v1, %v6746_v6  ;;  %v3170_v40 = vpop.xlane.xlu0 %3169 }
 0x9cf   : > { %4830 = vrsqrt.f32 %v3202_v51  ;;  %v3188_v32 = vmul.f32 0.0078125, %v3170_v40  ;;  %v3172_v34 = vpop.xlane.xlu1 %3171 }
 0x9d0   : > { %v3253_v22 = vmul.f32 %v6788_v33, %v3231_v10  ;;  %4832 = vrsqrt.f32 %v3203_v48  ;;  %v3189_v50 = vmul.f32 0.0078125, %v3172_v34 }
 0x9d1   : > { %v4827_v58 = vpop.eup %4826  ;;  %v3204_v3 = vadd.f32 1e-05, %v3188_v32 }
 0x9d2   : > { %v3275_v4 = vadd.f32 %v6794_v44, %v3253_v22  ;;  %v3232_v47 = vmul.f32 %v4827_v58, %v6751_v17  ;;  %v3205_v23 = vadd.f32 1e-05, %v3189_v50 }
 0x9d3   : > { %4834 = vrsqrt.f32 %v3204_v3  ;;  %v3174_v25 = vpop.xlane.xlu0 %3173 }
 0x9d4   : > { %3291 = vst [vmem:[%s6801_s13 + $0x40] sm:$0xff] %v3275_v4  ;;  %v3254_v6 = vmul.f32 %v6788_v33, %v3232_v47  ;;  %4836 = vrsqrt.f32 %v3205_v23  ;;  %v3190_v20 = vmul.f32 0.0078125, %v3174_v25 }
 0x9d5   : > { %v4829_v30 = vpop.eup %4828 }
 0x9d6   : > { %v3276_v21 = vadd.f32 %v6794_v44, %v3254_v6  ;;  %v3233_v37 = vmul.f32 %v4829_v30, %v6756_v61  ;;  %v3206_v19 = vadd.f32 1e-05, %v3190_v20 }
 0x9d8   : > { %3292 = vst [vmem:[%s6801_s13 + $0x48] sm:$0xff] %v3276_v21  ;;  %v3255_v12 = vmul.f32 %v6788_v33, %v3233_v37  ;;  %4838 = vrsqrt.f32 %v3206_v19 }
 0x9d9   : > { %v4831_v17 = vpop.eup %4830 }
 0x9da   : > { %v4833_v28 = vpop.eup %4832  ;;  %v3277_v62 = vadd.f32 %v6794_v44, %v3255_v12  ;;  %v3234_v9 = vmul.f32 %v4831_v17, %v6761_v5 }
 0x9db   : > { %v3235_v57 = vmul.f32 %v4833_v28, %v6764_v7 }
 0x9dc   : > { %3293 = vst [vmem:[%s6801_s13 + $0x50] sm:$0xff] %v3277_v62  ;;  %v3256_v35 = vmul.f32 %v6788_v33, %v3234_v9 }
 0x9dd   : > { %v4835_v61 = vpop.eup %4834  ;;  %v3257_v45 = vmul.f32 %v6788_v33, %v3235_v57 }
 0x9de   : > { %v4837_v24 = vpop.eup %4836  ;;  %v3278_v43 = vadd.f32 %v6794_v44, %v3256_v35  ;;  %v3236_v55 = vmul.f32 %v4835_v61, %v6771_v0 }
 0x9df   : > { %v3279_v54 = vadd.f32 %v6794_v44, %v3257_v45  ;;  %v3237_v5 = vmul.f32 %v4837_v24, %v6774_v16 }
 0x9e0   : > { %3294 = vst [vmem:[%s6801_s13 + $0x58] sm:$0xff] %v3278_v43  ;;  %v3258_v7 = vmul.f32 %v6788_v33, %v3236_v55 }
 0x9e1   : > { %3295 = vst [vmem:[%s6801_s13 + $0x60] sm:$0xff] %v3279_v54  ;;  %v3259_v46 = vmul.f32 %v6788_v33, %v3237_v5 }
 0x9e2   : > { %v4839_v27 = vpop.eup %4838  ;;  %v3280_v14 = vadd.f32 %v6794_v44, %v3258_v7 }
 0x9e3   : > { %v3281_v36 = vadd.f32 %v6794_v44, %v3259_v46  ;;  %v3238_v0 = vmul.f32 %v4839_v27, %v6781_v38 }
 0x9e4   : > { %3296 = vst [vmem:[%s6801_s13 + $0x68] sm:$0xff] %v3280_v14 }
 0x9e5   : > { %3297 = vst [vmem:[%s6801_s13 + $0x70] sm:$0xff] %v3281_v36  ;;  %v3260_v16 = vmul.f32 %v6788_v33, %v3238_v0 }
 0x9e7   : > { %v3282_v11 = vadd.f32 %v6794_v44, %v3260_v16 }
 0x9e9   : > { %3298 = vst [vmem:[%s6801_s13 + $0x78] sm:$0xff] %v3282_v11 }
 0x9ea   : > { %5095 = shalt.err (!%p5092_p10)
}
 0x9eb   : > { %s5096_s15 = scalar_lea.hbm %s6866_s0, 2048  ;;  %s5100_s24 = scalar_lea.hbm %s7003_s22, 4096 }
 0x9ec   : > { %p5097_p11 = scmp.ne.s32.totalorder %s6866_s0, %s5096_s15  ;;  %p5101_p9 = scmp.lt.u32.totalorder %s6866_s0, %s7003_s22 }
 0x9ed   : > { %p5102_p7 = scmp.lt.u32.totalorder %s5100_s24, %s5096_s15  ;;  %p5104_p12 = scmp.lt.u32.totalorder %s5096_s15, %s6866_s0 }
 0x9ee   : > { %p5098_p3 = pnand %p5097_p11, %p7004_p1 }
 0x9ef   : > { %p5103_p4 = por %p5102_p7, %p5101_p9 }
 0x9f0   : > { %p5099_p5 = pneg %p5098_p3 }
 0x9f1   : > { %p5105_p13 = por %p5104_p12, %p5103_p4 }
 0x9f3   : > { %p5106_p0 = pnand %p5105_p13, %p5099_p5 }
 0x9f5   : > { %5109 = shalt.err (!%p5106_p0)
}
 0x9f6   : > { %s5180_s1 = smov 128   ;;  %s5181_s25 = smov 8  }
 0x9f7   : > { %4522 = dma.vmem_to_hbm [thread:$0]  (%p7004_p1), %s6868_s11, 2048, %s6866_s0, %s3300_s6, %s5180_s1, %s5180_s1, %s5181_s25  }
 0x9f8 PF: > { %s3328_s2 = sand.u32 1, %s5152_s27   ;;  %p7005_p2 = scmp.ne.s32.totalorder %s6973_s26, 0 }
 0x9f9   : > { %p7006_p8 = scmp.ge.s32.totalorder %s5164_s30, 2  ;;  %s3329_s20 = scalar_lea.sflag [#allocation4], %s3328_s2 }
 0x9fb   : > { %p4551_p6 = pnand %p7006_p8, %p7005_p2 }
 0x9fd   : > { %5147 = dma.done.wait (!%p4551_p6), %s3329_s20, 2048  }
 0x9fe   : > { %5149 = vsyncadd (!%p4551_p6), %s3329_s20, 4294965248  ;;  %p35_p10 = scmp.ge.s32.totalorder %s5489_s21, 4   ;;  %s7007_s27 = smov %s5156_s28 }
 0x9ff   : > { %s7008_s28 = smov %s5160_s29  ;;  %s7009_s29 = smov %s5501_s9 }
 0xa00   : > { %s7010_s30 = smov %s5489_s21  ;;  %37 = sbr.rel (!%p35_p10) target bundleno = 23 (0x17), region = 165 }
 0xa07   :  { %3334 = vsyncpa [#allocation3], 1 }
 0xa08   :  { %3336 = vsyncpa [#allocation3 + $0x1], 1 }
 0xa09   :  { %3337 = vsyncpa [#allocation6], 1 }
 0xa0a   :  { %3338 = vsyncpa [#allocation9], 1 }
 0xa0b   :  { %3339 = vsyncpa [#allocation12], 1 }
 0xa0c   :  { %3340 = vsyncpa [#allocation15], 1 }
 0xa0d   :  { %3341 = vsyncpa [#allocation4], 1 }
 0xa0e   :  { %3343 = vsyncpa [#allocation4 + $0x1], 1 }

// kernel: tpu_custom_call.1
= control target key start
LH: loop header
LB: loop body
LE: loop exit
PB: predicated region body
PF: predicated region fallthrough
CT: control target
= control target key end

     0   :  { %s6914_s0 = inlined_call_operand.hbm [shape: f32[2,128,128], index: 0, kind: input, shape index: {}]   ;;  %s6915_s1 = inlined_call_operand.hbm [shape: f32[128,128], index: 1, kind: input, shape index: {}]   ;;  %s6916_s2 = inlined_call_operand.hbm [shape: f32[128,128], index: 2, kind: input, shape index: {}]   ;;  %s6917_s3 = inlined_call_operand.vmem [shape: f32[1,128], index: 3, kind: input, shape index: {}]   ;;  %s6918_s4 = inlined_call_operand.hbm [shape: f32[128,128], index: 4, kind: input, shape index: {}]   ;;  %s6919_s5 = inlined_call_operand.vmem [shape: f32[1,128], index: 5, kind: input, shape index: {}]   ;;  %s6920_s6 = inlined_call_operand.hbm [shape: f32[128,128], index: 6, kind: input, shape index: {}]   ;;  %s6921_s7 = inlined_call_operand.vmem [shape: f32[1,128], index: 7, kind: input, shape index: {}]   ;;  %s6922_s8 = inlined_call_operand.hbm [shape: f32[128,128], index: 8, kind: input, shape index: {}]   ;;  %s6923_s9 = inlined_call_operand.vmem [shape: f32[1,128], index: 9, kind: input, shape index: {}]   ;;  %s6924_s10 = inlined_call_operand.vmem [shape: f32[1,128], index: 10, kind: input, shape index: {}]   ;;  %s6925_s11 = inlined_call_operand.vmem [shape: f32[1,128], index: 11, kind: input, shape index: {}]   ;;  %s6926_s12 = inlined_call_operand.hbm [shape: f32[128,256], index: 12, kind: input, shape index: {}]   ;;  %s6927_s13 = inlined_call_operand.vmem [shape: f32[1,256], index: 13, kind: input, shape index: {}]   ;;  %s6928_s14 = inlined_call_operand.hbm [shape: f32[256,128], index: 14, kind: input, shape index: {}]   ;;  %s6929_s15 = inlined_call_operand.vmem [shape: f32[1,128], index: 15, kind: input, shape index: {}]   ;;  %s6930_s16 = inlined_call_operand.vmem [shape: f32[1,128], index: 16, kind: input, shape index: {}]   ;;  %s6931_s17 = inlined_call_operand.vmem [shape: f32[1,128], index: 17, kind: input, shape index: {}]   ;;  %s6932_s18 = inlined_call_operand.hbm [shape: f32[2,128,128], index: 18, kind: output, shape index: {}]  }
   0x1   :  { %6949 = sst [smem:[#allocation28_spill]] %s6914_s0 }
   0x2   :  { %6950 = sst [smem:[#allocation29_spill]] %s6915_s1 }
   0x3   :  { %6951 = sst [smem:[#allocation30_spill]] %s6916_s2 }
   0x4   :  { %6952 = sst [smem:[#allocation31_spill]] %s6918_s4 }
   0x5   :  { %6953 = sst [smem:[#allocation32_spill]] %s6920_s6 }
   0x6   :  { %6954 = sst [smem:[#allocation33_spill]] %s6923_s9 }
   0x7   :  { %6955 = sst [smem:[#allocation34_spill]] %s6924_s10 }
   0x8   :  { %6956 = sst [smem:[#allocation35_spill]] %s6925_s11 }
   0x9   :  { %6957 = sst [smem:[#allocation36_spill]] %s6927_s13 }
   0xa   :  { %6958 = sst [smem:[#allocation37_spill]] %s6929_s15 }
   0xb   :  { %6959 = sst [smem:[#allocation38_spill]] %s6930_s16 }
   0xc   :  { %6960 = sst [smem:[#allocation39_spill]] %s6931_s17 }
   0xd   :  { %6961 = sst [smem:[#allocation40_spill]] %s6932_s18 }
   0xe   :  { %23 = vsyncpa [#allocation3], 0 }
   0xf   :  { %25 = vsyncpa [#allocation3 + $0x1], 0 }
  0x10   :  { %26 = vsyncpa [#allocation6], 0 }
  0x11   :  { %27 = vsyncpa [#allocation9], 0 }
  0x12   :  { %28 = vsyncpa [#allocation12], 0 }
  0x13   :  { %29 = vsyncpa [#allocation15], 0 }
  0x14   :  { %30 = vsyncpa [#allocation4], 0 }
  0x15   :  { %32 = vsyncpa [#allocation4 + $0x1], 0  ;;  %s5277_s27 = smov 0   ;;  %s5279_s28 = smov 0  }
  0x16   :  { %s5281_s29 = smov 0   ;;  %s5283_s30 = smov 0  }
  0x17 LB: > { %s5166_s0 = smov [#allocation5]   ;;  %s5298_s1 = sadd.s32 4294967295, %s5164_s30   ;;  %s5164_s30 = sphi %s5283_s30, %s7010_s30   ;;  %s5160_s29 = sphi %s5281_s29, %s7009_s29   ;;  %s5156_s28 = sphi %s5279_s28, %s7008_s28   ;;  %s5152_s27 = sphi %s5277_s27, %s7007_s27  }
  0x18   : > { %s464_s19 = sshll.u32 %s5166_s0, 4  ;;  %p3454_p0 = scmp.ge.s32.totalorder %s5164_s30, 1  ;;  %s5303_s19 = int_to_ptr.vmem [resolvable:$true] %s464_s19 }
  0x19   : > { %p6938_p1 = scmp.eq.s32.totalorder %s5298_s1, 0  ;;  %p452_p2 = scmp.lt.s32.totalorder %s5164_s30, 3 }
  0x1a   : > { %s5167_s21 = smov [#allocation8]   ;;  %s5168_s23 = smov [#allocation11]  }
  0x1b   : > { %p5305_p3 = pnand %p3454_p0, %p452_p2  ;;  %s493_s22 = sshll.u32 %s5167_s21, 4  ;;  %s5318_s22 = int_to_ptr.vmem [resolvable:$true] %s493_s22 }
  0x1c   : > { %s525_s24 = sshll.u32 %s5168_s23, 4  ;;  %s6964_s0 = sld [smem:[#allocation29_spill]]  ;;  %s5320_s24 = int_to_ptr.vmem [resolvable:$true] %s525_s24 }
  0x1d   : > { %s6962_s20 = scalar_select %p5305_p3, 1, 0 }
  0x1e   : > { %p4524_p5 = pneg %p5305_p3 }
  0x20   : > { %p5314_p6 = pnand %p4524_p5, %p6938_p1 }
  0x22   : > { %s4856_s18 = scalar_lea.hbm %s6964_s0, 2048  ;;  %p5330_p8 = pneg %p5314_p6 }
  0x23   : > { %p4857_p7 = scmp.ne.s32.totalorder %s6964_s0, %s4856_s18  ;;  %p4863_p11 = scmp.lt.u32.totalorder %s4856_s18, %s6964_s0 }
  0x25   : > { %p4859_p9 = pnand %p5330_p8, %p4857_p7 }
  0x27   : > { %p4860_p10 = pneg %p4859_p9 }
  0x29   : > { %p4865_p12 = pnand %p4863_p11, %p4860_p10 }
  0x2b   : > { %4868 = shalt.err (!%p4865_p12)
}
  0x2c   : > { %s4869_s16 = scalar_lea.vmem %s5303_s19, 2048  ;;  %p4877_p5 = scmp.lt.s32.totalorder %s5303_s19, %s5303_s19 }
  0x2d   : > { %p4870_p13 = scmp.ne.s32.totalorder %s5303_s19, %s4869_s16  ;;  %p4878_p4 = scmp.lt.s32.totalorder %s4869_s16, %s4869_s16 }
  0x2f   : > { %p4872_p0 = pnand %p4870_p13, %p5330_p8  ;;  %p4879_p7 = por %p4878_p4, %p4877_p5 }
  0x31   : > { %p4873_p2 = pneg %p4872_p0 }
  0x33   : > { %p4880_p9 = pnand %p4879_p7, %p4873_p2 }
  0x35   : > { %4883 = shalt.err (!%p4880_p9)
}
  0x36   : > { %s6940_s17 = smov 128   ;;  %s6942_s15 = smov 8  }
  0x37   : > { %4527 = dma.hbm_to_vmem [thread:$0]  (!%p5314_p6), %s6964_s0, 2048, %s5303_s19, [#allocation6], %s6940_s17, %s6940_s17, %s6942_s15  }
  0x38   : > { %s6966_s4 = sld [smem:[#allocation31_spill]] }
  0x3e   : > { %s4884_s16 = scalar_lea.hbm %s6966_s4, 2048 }
  0x3f   : > { %p4885_p4 = scmp.ne.s32.totalorder %s6966_s4, %s4884_s16  ;;  %p4891_p12 = scmp.lt.u32.totalorder %s4884_s16, %s6966_s4 }
  0x41   : > { %p4887_p10 = pnand %p4885_p4, %p5330_p8 }
  0x43   : > { %p4888_p11 = pneg %p4887_p10 }
  0x45   : > { %p4893_p13 = pnand %p4891_p12, %p4888_p11 }
  0x47   : > { %4896 = shalt.err (!%p4893_p13)
}
  0x48   : > { %s4897_s19 = scalar_lea.vmem %s5318_s22, 2048  ;;  %p4905_p7 = scmp.lt.s32.totalorder %s5318_s22, %s5318_s22 }
  0x49   : > { %p4898_p0 = scmp.ne.s32.totalorder %s5318_s22, %s4897_s19  ;;  %p4906_p9 = scmp.lt.s32.totalorder %s4897_s19, %s4897_s19 }
  0x4b   : > { %p4900_p2 = pnand %p4898_p0, %p5330_p8  ;;  %p4907_p4 = por %p4906_p9, %p4905_p7 }
  0x4d   : > { %p4901_p5 = pneg %p4900_p2 }
  0x4f   : > { %p4908_p10 = pnand %p4907_p4, %p4901_p5 }
  0x51   : > { %4911 = shalt.err (!%p4908_p10)
}
  0x52   : > { %4533 = dma.hbm_to_vmem [thread:$0]  (!%p5314_p6), %s6966_s4, 2048, %s5318_s22, [#allocation9], %s6940_s17, %s6940_s17, %s6942_s15  }
  0x53   : > { %s4912_s18 = scalar_lea.hbm %s6922_s8, 2048 }
  0x54   : > { %p4913_p11 = scmp.ne.s32.totalorder %s6922_s8, %s4912_s18  ;;  %p4919_p0 = scmp.lt.u32.totalorder %s4912_s18, %s6922_s8 }
  0x56   : > { %p4915_p12 = pnand %p4913_p11, %p5330_p8 }
  0x58   : > { %p4916_p13 = pneg %p4915_p12 }
  0x5a   : > { %p4921_p2 = pnand %p4919_p0, %p4916_p13 }
  0x5c   : > { %4924 = shalt.err (!%p4921_p2)
}
  0x5d   : > { %s4925_s22 = scalar_lea.vmem %s5320_s24, 2048  ;;  %p4933_p4 = scmp.lt.s32.totalorder %s5320_s24, %s5320_s24 }
  0x5e   : > { %p4926_p5 = scmp.ne.s32.totalorder %s5320_s24, %s4925_s22  ;;  %p4934_p10 = scmp.lt.s32.totalorder %s4925_s22, %s4925_s22 }
  0x60   : > { %p4928_p7 = pnand %p4926_p5, %p5330_p8  ;;  %p4935_p11 = por %p4934_p10, %p4933_p4 }
  0x62   : > { %p4929_p9 = pneg %p4928_p7 }
  0x64   : > { %p4936_p12 = pnand %p4935_p11, %p4929_p9 }
  0x66   : > { %4939 = shalt.err (!%p4936_p12)
}
  0x67   : > { %4539 = dma.hbm_to_vmem [thread:$0]  (!%p5314_p6), %s6922_s8, 2048, %s5320_s24, [#allocation12], %s6940_s17, %s6940_s17, %s6942_s15  }
  0x68   : > { %s5171_s10 = smov [#allocation7]   ;;  %s5172_s13 = smov [#allocation10]  }
  0x69   : > { %s477_s11 = sshll.u32 %s5171_s10, 4  ;;  %s509_s18 = sshll.u32 %s5172_s13, 4  ;;  %s478_s11 = int_to_ptr.vmem [resolvable:$true] %s477_s11  ;;  %s510_s18 = int_to_ptr.vmem [resolvable:$true] %s509_s18 }
  0x6a   : > { %s6967_s23 = sld [smem:[#allocation30_spill]] }
  0x70   : > { %s4940_s16 = scalar_lea.hbm %s6967_s23, 2048 }
  0x71   : > { %p4941_p13 = scmp.ne.s32.totalorder %s6967_s23, %s4940_s16  ;;  %p4947_p5 = scmp.lt.u32.totalorder %s4940_s16, %s6967_s23 }
  0x73   : > { %p4943_p0 = pnand %p4941_p13, %p5330_p8 }
  0x75   : > { %p4944_p2 = pneg %p4943_p0 }
  0x77   : > { %p4949_p7 = pnand %p4947_p5, %p4944_p2 }
  0x79   : > { %4952 = shalt.err (!%p4949_p7)
}
  0x7a   : > { %s4953_s24 = scalar_lea.vmem %s478_s11, 2048  ;;  %p4961_p11 = scmp.lt.s32.totalorder %s478_s11, %s478_s11 }
  0x7b   : > { %p4954_p9 = scmp.ne.s32.totalorder %s478_s11, %s4953_s24  ;;  %p4962_p12 = scmp.lt.s32.totalorder %s4953_s24, %s4953_s24 }
  0x7d   : > { %p4956_p4 = pnand %p4954_p9, %p5330_p8  ;;  %p4963_p1 = por %p4962_p12, %p4961_p11 }
  0x7f   : > { %p4957_p10 = pneg %p4956_p4 }
  0x81   : > { %p4964_p3 = pnand %p4963_p1, %p4957_p10 }
  0x83   : > { %4967 = shalt.err (!%p4964_p3)
}
  0x84   : > { %4530 = dma.hbm_to_vmem [thread:$0]  (!%p5314_p6), %s6967_s23, 2048, %s478_s11, [#allocation6], %s6940_s17, %s6940_s17, %s6942_s15  }
  0x85   : > { %s6968_s6 = sld [smem:[#allocation32_spill]] }
  0x8b   : > { %s4968_s13 = scalar_lea.hbm %s6968_s6, 2048 }
  0x8c   : > { %p4969_p1 = scmp.ne.s32.totalorder %s6968_s6, %s4968_s13  ;;  %p4975_p0 = scmp.lt.u32.totalorder %s4968_s13, %s6968_s6 }
  0x8e   : > { %p4971_p3 = pnand %p4969_p1, %p5330_p8 }
  0x90   : > { %p4972_p13 = pneg %p4971_p3 }
  0x92   : > { %p4977_p2 = pnand %p4975_p0, %p4972_p13 }
  0x94   : > { %4980 = shalt.err (!%p4977_p2)
}
  0x95   : > { %s4981_s19 = scalar_lea.vmem %s510_s18, 2048  ;;  %p4989_p4 = scmp.lt.s32.totalorder %s510_s18, %s510_s18 }
  0x96   : > { %p4982_p5 = scmp.ne.s32.totalorder %s510_s18, %s4981_s19  ;;  %p4990_p10 = scmp.lt.s32.totalorder %s4981_s19, %s4981_s19 }
  0x98   : > { %p4984_p7 = pnand %p4982_p5, %p5330_p8  ;;  %p4991_p11 = por %p4990_p10, %p4989_p4 }
  0x9a   : > { %p4985_p9 = pneg %p4984_p7 }
  0x9c   : > { %p4992_p12 = pnand %p4991_p11, %p4985_p9 }
  0x9e   : > { %4995 = shalt.err (!%p4992_p12)
}
  0x9f   : > { %4536 = dma.hbm_to_vmem [thread:$0]  (!%p5314_p6), %s6968_s6, 2048, %s510_s18, [#allocation9], %s6940_s17, %s6940_s17, %s6942_s15  }
  0xa0   : > { %s5173_s4 = smov [#allocation13]   ;;  %s4996_s13 = scalar_lea.hbm %s6926_s12, 4096 }
  0xa1   : > { %s547_s0 = sshll.u32 %s5173_s4, 4  ;;  %p4997_p1 = scmp.ne.s32.totalorder %s6926_s12, %s4996_s13  ;;  %s548_s0 = int_to_ptr.vmem [resolvable:$true] %s547_s0 }
  0xa2   : > { %p5003_p0 = scmp.lt.u32.totalorder %s4996_s13, %s6926_s12 }
  0xa3   : > { %p4999_p3 = pnand %p4997_p1, %p5330_p8 }
  0xa5   : > { %p5000_p13 = pneg %p4999_p3 }
  0xa7   : > { %p5005_p2 = pnand %p5003_p0, %p5000_p13 }
  0xa9   : > { %5008 = shalt.err (!%p5005_p2)
}
  0xaa   : > { %s5009_s18 = scalar_lea.vmem %s548_s0, 4096  ;;  %p5017_p4 = scmp.lt.s32.totalorder %s548_s0, %s548_s0 }
  0xab   : > { %p5010_p5 = scmp.ne.s32.totalorder %s548_s0, %s5009_s18  ;;  %p5018_p10 = scmp.lt.s32.totalorder %s5009_s18, %s5009_s18 }
  0xad   : > { %p5012_p7 = pnand %p5010_p5, %p5330_p8  ;;  %p5019_p11 = por %p5018_p10, %p5017_p4 }
  0xaf   : > { %p5013_p9 = pneg %p5012_p7 }
  0xb1   : > { %p5020_p12 = pnand %p5019_p11, %p5013_p9 }
  0xb3   : > { %5023 = shalt.err (!%p5020_p12)
}
  0xb4   : > { %s5174_s19 = smov 256   ;;  %s5175_s11 = smov 16  }
  0xb5   : > { %4542 = dma.hbm_to_vmem [thread:$0]  (!%p5314_p6), %s6926_s12, 4096, %s548_s0, [#allocation12], %s5174_s19, %s5174_s19, %s5175_s11  }
  0xb6   : > { %s5176_s9 = smov [#allocation14]   ;;  %s5024_s26 = scalar_lea.hbm %s6928_s14, 4096 }
  0xb7   : > { %s563_s10 = sshll.u32 %s5176_s9, 4  ;;  %p5025_p1 = scmp.ne.s32.totalorder %s6928_s14, %s5024_s26  ;;  %s564_s10 = int_to_ptr.vmem [resolvable:$true] %s563_s10 }
  0xb8   : > { %p5031_p0 = scmp.lt.u32.totalorder %s5024_s26, %s6928_s14 }
  0xb9   : > { %p5027_p3 = pnand %p5025_p1, %p5330_p8 }
  0xbb   : > { %p5028_p13 = pneg %p5027_p3 }
  0xbd   : > { %p5033_p2 = pnand %p5031_p0, %p5028_p13 }
  0xbf   : > { %5036 = shalt.err (!%p5033_p2)
}
  0xc0   : > { %s5037_s0 = scalar_lea.vmem %s564_s10, 4096  ;;  %p5045_p4 = scmp.lt.s32.totalorder %s564_s10, %s564_s10 }
  0xc1   : > { %p5038_p5 = scmp.ne.s32.totalorder %s564_s10, %s5037_s0  ;;  %p5046_p10 = scmp.lt.s32.totalorder %s5037_s0, %s5037_s0 }
  0xc3   : > { %p5040_p7 = pnand %p5038_p5, %p5330_p8  ;;  %p5047_p11 = por %p5046_p10, %p5045_p4 }
  0xc5   : > { %p5041_p9 = pneg %p5040_p7 }
  0xc7   : > { %p5048_p12 = pnand %p5047_p11, %p5041_p9 }
  0xc9   : > { %5051 = shalt.err (!%p5048_p12)
}
  0xca   : > { %s6969_s19 = smov 128   ;;  %s3453_s2 = sadd.s32 4294967294, %s5164_s30  }
  0xcb   : > { %4545 = dma.hbm_to_vmem [thread:$0]  (!%p5314_p6), %s6928_s14, 4096, %s564_s10, [#allocation15], %s6969_s19, %s6969_s19, %s6942_s15  }
  0xcc   : > { %s5489_s21 = sadd.s32 1, %s5164_s30   ;;  %s45_s24 = sadd.s32 1, %s5160_s29 }
  0xcd   : > { %s42_s4 = ssub.s32 %s5164_s30, %s5489_s21  ;;  %p52_p8 = scmp.ne.s32.totalorder %s5160_s29, %s5156_s28 }
  0xce   : > { %p43_p1 = scmp.eq.s32.totalorder %s42_s4, 0  ;;  %p53_p3 = scmp.eq.s32.totalorder %s5164_s30, 0 }
  0xcf   : > { %p58_p13 = scmp.ne.s32.totalorder %s5156_s28, %s5152_s27  ;;  %p439_p0 = scmp.eq.s32.totalorder %s5298_s1, 1 }
  0xd0   : > { %s5501_s9 = scalar_select %p43_p1, %s5160_s29, %s45_s24  }
  0xd1   : > { %p54_p2 = por %p53_p3, %p52_p8  ;;  %p6970_p5 = scmp.eq.s32.totalorder %s5298_s1, 0 }
  0xd2   : > { %p5509_p6 = por %p439_p0, %p52_p8  ;;  %p445_p9 = scmp.eq.s32.totalorder %s3453_s2, 1 }
  0xd3   : > { %p5505_p7 = por %p6970_p5, %p58_p13  ;;  %p4561_p4 = scmp.lt.s32.totalorder %s5164_s30, 2 }
  0xd4   : > { %s6972_s10 = scalar_select %p5509_p6, 1, 0 }
  0xd5   : > { %s586_s25 = sand.u32 1, %s5160_s29   ;;  %p5515_p10 = por %p445_p9, %p58_p13 }
  0xd6   : > { %s3463_s16 = sshll.u32 %s586_s25, 7  ;;  %s3490_s22 = sshll.u32 %s5164_s30, 11 }
  0xd7   : > { %s6973_s26 = scalar_select %p5515_p10, 1, 0 }
  0xd8   : > { %s6974_s17 = sld [smem:[#allocation28_spill]]  ;;  %s590_s24 = scalar_lea.vmem [#allocation2], %s3463_s16 }
  0xd9   : > { %s597_s4 = sshll.u32 %s590_s24, 4  ;;  %p5525_p11 = pnand %p4561_p4, %p54_p2  ;;  %s5529_s4 = int_to_ptr.vmem [resolvable:$true] %s597_s4 }
  0xda   : > { %s5531_s15 = scalar_lea.sflag [#allocation3], %s586_s25 }
  0xdb   : > { %p5054_p8 = pneg %p5525_p11 }
  0xde   : > { %s5523_s11 = scalar_lea.hbm %s6974_s17, %s3490_s22  ;;  %s5057_s18 = scalar_lea.hbm %s6974_s17, 4096 }
  0xdf   : > { %s5052_s6 = scalar_lea.hbm %s5523_s11, 2048  ;;  %p5058_p13 = scmp.lt.u32.totalorder %s5523_s11, %s6974_s17 }
  0xe0   : > { %p5053_p12 = scmp.ne.s32.totalorder %s5523_s11, %s5052_s6  ;;  %p5059_p0 = scmp.lt.u32.totalorder %s5057_s18, %s5052_s6 }
  0xe1   : > { %p5061_p5 = scmp.lt.u32.totalorder %s5052_s6, %s5523_s11 }
  0xe2   : > { %p5055_p1 = pnand %p5054_p8, %p5053_p12  ;;  %p5060_p2 = por %p5059_p0, %p5058_p13 }
  0xe4   : > { %p5056_p3 = pneg %p5055_p1  ;;  %p5062_p9 = por %p5061_p5, %p5060_p2 }
  0xe6   : > { %p5063_p4 = pnand %p5062_p9, %p5056_p3 }
  0xe8   : > { %5066 = shalt.err (!%p5063_p4)
}
  0xe9   : > { %s5067_s25 = scalar_lea.vmem %s5529_s4, 2048  ;;  %s5177_s16 = smov [#allocation2]  }
  0xea   : > { %p5068_p12 = scmp.ne.s32.totalorder %s5529_s4, %s5067_s25  ;;  %s5072_s22 = sshll.u32 %s5177_s16, 4  ;;  %s5073_s22 = int_to_ptr.vmem [resolvable:$false] %s5072_s22 }
  0xeb   : > { %s5074_s0 = scalar_lea.vmem %s5073_s22, 4096  ;;  %p5075_p6 = scmp.lt.s32.totalorder %s5529_s4, %s5073_s22 }
  0xec   : > { %p5070_p1 = pnand %p5068_p12, %p5054_p8  ;;  %p5076_p13 = scmp.lt.s32.totalorder %s5074_s0, %s5067_s25 }
  0xee   : > { %p5071_p10 = pneg %p5070_p1  ;;  %p5077_p0 = por %p5076_p13, %p5075_p6 }
  0xf0   : > { %p5078_p2 = pnand %p5077_p0, %p5071_p10 }
  0xf2   : > { %5081 = shalt.err (!%p5078_p2)
}
  0xf3   : > { %s6976_s6 = smov 8   ;;  %p6977_p8 = scmp.ne.s32.totalorder %s6962_s20, 0 }
  0xf4   : > { %4549 = dma.hbm_to_vmem [thread:$0]  (!%p5525_p11), %s5523_s11, 2048, %s5529_s4, %s5531_s15, %s6969_s19, %s6969_s19, %s6976_s6  }
  0xf5   : > { %609 = sbr.rel (%p6977_p8) target bundleno = 2552 (0x9f8), region = 92 }
  0xfc   : > { %s5565_s18 = sand.u32 1, %s5156_s28  }
  0xfd   : > { %s3467_s24 = sshll.u32 %s5565_s18, 7  ;;  %s612_s25 = scalar_lea.sflag [#allocation3], %s5565_s18 }
  0xfe   : > { %s5571_s2 = scalar_lea.vmem [#allocation2], %s3467_s24 }
  0xff   : > { %5127 = dma.done.wait (%p5505_p7), %s612_s25, 2048  }
 0x100   : > { %5129 = vsyncadd (%p5505_p7), %s612_s25, 4294965248  ;;  %p6978_p6 = scmp.eq.s32.totalorder %s5298_s1, 0 }
 0x102   : > { %5131 = dma.done.wait (%p6978_p6), [#allocation6], 4096   ;;  %p6979_p10 = pmov %p6978_p6 }
 0x103   : > { %p6980_p11 = pmov %p6978_p6 }
 0x104   : > { %5133 = vsyncadd (%p6979_p10), [#allocation6], 4294963200 }
 0x105   : > { %5135 = dma.done.wait (%p6980_p11), [#allocation9], 4096   ;;  %p6981_p3 = pmov %p6978_p6 }
 0x107   : > { %5137 = vsyncadd (%p6981_p3), [#allocation9], 4294963200  ;;  %p6982_p5 = pmov %p6981_p3 }
 0x108   : > { %p6983_p9 = pmov %p6981_p3 }
 0x109   : > { %5139 = dma.done.wait (%p6982_p5), [#allocation12], 6144  }
 0x10a   : > { %5141 = vsyncadd (%p6983_p9), [#allocation12], 4294961152  ;;  %p6984_p7 = pmov %p6981_p3 }
 0x10b   : > { %p6985_p4 = pmov %p6981_p3 }
 0x10c   : > { %5143 = dma.done.wait (%p6984_p7), [#allocation15], 4096  }
 0x10d   : > { %5145 = vsyncadd (%p6985_p4), [#allocation15], 4294963200  ;;  %v728_v0 = vld [vmem:[#allocation8] sm:$0xff]  ;;  %v729_v1 = vld [vmem:[#allocation8 + $0x8] sm:$0xff]  ;;  %s6986_s0 = sld [smem:[#allocation33_spill]]  ;;  %s6988_s19 = sld [smem:[#allocation35_spill]] }
 0x10e   : > { %v976_v2 = vld [vmem:[#allocation10] sm:$0xff]  ;;  %v4188_v3 = vpack.c.bf16 %v729_v1, %v728_v0  ;;  %v977_v4 = vld [vmem:[#allocation10 + $0x8] sm:$0xff]  ;;  %v730_v5 = vld [vmem:[#allocation8 + $0x10] sm:$0xff]  ;;  %s6994_s4 = sld [smem:[#allocation36_spill]]  ;;  %s6801_s13 = scalar_lea.vmem [#allocation16], %s3467_s24 }
 0x10f   : > { %v731_v6 = vld [vmem:[#allocation8 + $0x18] sm:$0xff]  ;;  %v4220_v7 = vpack.c.bf16 %v977_v4, %v976_v2  ;;  %v978_v9 = vld [vmem:[#allocation10 + $0x10] sm:$0xff]  ;;  %v732_v11 = vld [vmem:[#allocation8 + $0x20] sm:$0xff]  ;;  %s3491_s24 = sshll.u32 %s5298_s1, 11  ;;  %s3313_s11 = sshll.u32 %s6801_s13, 4  ;;  %s6868_s11 = int_to_ptr.vmem [resolvable:$true] %s3313_s11 }
 0x110   : > { %v4192_v8 = vpack.c.bf16 %v731_v6, %v730_v5  ;;  %v979_v10 = vld [vmem:[#allocation10 + $0x18] sm:$0xff]  ;;  %4189 = vmatprep.subr.bf16.mxu0 %v4188_v3  ;;  %v733_v13 = vld [vmem:[#allocation8 + $0x28] sm:$0xff]  ;;  %v980_v14 = vld [vmem:[#allocation10 + $0x20] sm:$0xff]  ;;  %s7003_s22 = sld [smem:[#allocation40_spill]]  ;;  %s3300_s6 = scalar_lea.sflag [#allocation4], %s5565_s18 }
 0x111   : > { %v4224_v12 = vpack.c.bf16 %v979_v10, %v978_v9  ;;  %v981_v15 = vld [vmem:[#allocation10 + $0x28] sm:$0xff]  ;;  %4221 = vmatprep.subr.bf16.mxu1 %v4220_v7  ;;  %4191 = vmatpush3.bf16.msra.mxu0 %v4188_v3  ;;  %v4196_v16 = vpack.c.bf16 %v733_v13, %v732_v11  ;;  %v734_v18 = vld [vmem:[#allocation8 + $0x30] sm:$0xff]  ;;  %v735_v19 = vld [vmem:[#allocation8 + $0x38] sm:$0xff]  ;;  %s5082_s1 = scalar_lea.vmem %s6868_s11, 2048  ;;  %p7004_p1 = scmp.ne.s32.totalorder %s6972_s10, 0 }
 0x112   : > { %4223 = vmatpush3.bf16.msra.mxu1 %v4220_v7  ;;  %4193 = vmatprep.subr.bf16.mxu0 %v4192_v8  ;;  %v4228_v17 = vpack.c.bf16 %v981_v15, %v980_v14  ;;  %v982_v20 = vld [vmem:[#allocation10 + $0x30] sm:$0xff]  ;;  %v983_v21 = vld [vmem:[#allocation10 + $0x38] sm:$0xff]  ;;  %v4200_v22 = vpack.c.bf16 %v735_v19, %v734_v18  ;;  %v736_v24 = vld [vmem:[#allocation8 + $0x40] sm:$0xff]  ;;  %p5083_p12 = scmp.ne.s32.totalorder %s6868_s11, %s5082_s1  ;;  %s5179_s25 = smov [#allocation16]  }
 0x113   : > { %4225 = vmatprep.subr.bf16.mxu1 %v4224_v12  ;;  %v4232_v23 = vpack.c.bf16 %v983_v21, %v982_v20  ;;  %v737_v25 = vld [vmem:[#allocation8 + $0x48] sm:$0xff]  ;;  %v5594_v26 = vld [vmem:[%s5571_s2] sm:$0xff]  ;;  %v738_v31 = vld [vmem:[#allocation8 + $0x50] sm:$0xff] }
 0x114   : > { %v984_v27 = vld [vmem:[#allocation10 + $0x40] sm:$0xff]  ;;  %v985_v28 = vld [vmem:[#allocation10 + $0x48] sm:$0xff]  ;;  %3828 = vmatprep.mubr.f32.mxu0 %v5594_v26  ;;  %3884 = vmatprep.mubr.f32.mxu1 %v5594_v26  ;;  %v4204_v29 = vpack.c.bf16 %v737_v25, %v736_v24  ;;  %v739_v32 = vld [vmem:[#allocation8 + $0x58] sm:$0xff]  ;;  %p5084_p13 = pnand %p5083_p12, %p7004_p1 }
 0x115   : > { %4195 = vmatpush3.bf16.msra.mxu0 %v4192_v8  ;;  %v4236_v30 = vpack.c.bf16 %v985_v28, %v984_v27  ;;  %v986_v33 = vld [vmem:[#allocation10 + $0x50] sm:$0xff]  ;;  %v987_v34 = vld [vmem:[#allocation10 + $0x58] sm:$0xff]  ;;  %v4208_v35 = vpack.c.bf16 %v739_v32, %v738_v31  ;;  %v740_v37 = vld [vmem:[#allocation8 + $0x60] sm:$0xff] }
 0x116   : > { %4227 = vmatpush3.bf16.msra.mxu1 %v4224_v12  ;;  %4197 = vmatprep.subr.bf16.mxu0 %v4196_v16  ;;  %v4240_v36 = vpack.c.bf16 %v987_v34, %v986_v33  ;;  %v741_v38 = vld [vmem:[#allocation8 + $0x68] sm:$0xff]  ;;  %v988_v39 = vld [vmem:[#allocation10 + $0x60] sm:$0xff]  ;;  %v742_v43 = vld [vmem:[#allocation8 + $0x70] sm:$0xff]  ;;  %p5085_p0 = pneg %p5084_p13 }
 0x117   : > { %4229 = vmatprep.subr.bf16.mxu1 %v4228_v17  ;;  %v989_v40 = vld [vmem:[#allocation10 + $0x68] sm:$0xff]  ;;  %v4212_v41 = vpack.c.bf16 %v741_v38, %v740_v37  ;;  %v743_v44 = vld [vmem:[#allocation8 + $0x78] sm:$0xff]  ;;  %v990_v45 = vld [vmem:[#allocation10 + $0x70] sm:$0xff] }
 0x118   : > { %v4244_v42 = vpack.c.bf16 %v989_v40, %v988_v39  ;;  %v991_v46 = vld [vmem:[#allocation10 + $0x78] sm:$0xff]  ;;  %v4216_v47 = vpack.c.bf16 %v743_v44, %v742_v43  ;;  %v1359_v49 = vld [vmem:[#allocation7] sm:$0xff]  ;;  %v1360_v50 = vld [vmem:[#allocation7 + $0x8] sm:$0xff] }
 0x119   : > { %4199 = vmatpush3.bf16.msra.mxu0 %v4196_v16  ;;  %v4248_v48 = vpack.c.bf16 %v991_v46, %v990_v45  ;;  %v4284_v51 = vpack.c.bf16 %v1360_v50, %v1359_v49  ;;  %v1361_v52 = vld [vmem:[#allocation7 + $0x10] sm:$0xff]  ;;  %v1362_v53 = vld [vmem:[#allocation7 + $0x18] sm:$0xff]  ;;  %v5599_v54 = vld [vmem:[%s5571_s2 + $0x8] sm:$0xff] }
 0x11a   : > { %4231 = vmatpush3.bf16.msra.mxu1 %v4228_v17  ;;  %4201 = vmatprep.subr.bf16.mxu0 %v4200_v22  ;;  %v5602_v55 = vld [vmem:[%s5571_s2 + $0x10] sm:$0xff]  ;;  %v4288_v56 = vpack.c.bf16 %v1362_v53, %v1361_v52  ;;  %v1363_v57 = vld [vmem:[#allocation7 + $0x20] sm:$0xff]  ;;  %v1364_v58 = vld [vmem:[#allocation7 + $0x28] sm:$0xff] }
 0x11b   : > { %4233 = vmatprep.subr.bf16.mxu1 %v4232_v23  ;;  %v5608_v59 = vld [vmem:[%s5571_s2 + $0x18] sm:$0xff]  ;;  %v5612_v60 = vld [vmem:[%s5571_s2 + $0x20] sm:$0xff]  ;;  %v4292_v61 = vpack.c.bf16 %v1364_v58, %v1363_v57  ;;  %v1365_v62 = vld [vmem:[#allocation7 + $0x30] sm:$0xff] }
 0x11c   : > { %v1366_v63 = vld [vmem:[#allocation7 + $0x38] sm:$0xff]  ;;  %v5618_v0 = vld [vmem:[%s5571_s2 + $0x28] sm:$0xff]  ;;  %v718_v1 = vld [vmem:[%s5571_s2 + $0x30] sm:$0xff] }
 0x11d   : > { %4203 = vmatpush3.bf16.msra.mxu0 %v4200_v22  ;;  %v4296_v2 = vpack.c.bf16 %v1366_v63, %v1365_v62  ;;  %v1367_v3 = vld [vmem:[#allocation7 + $0x40] sm:$0xff]  ;;  %v1368_v4 = vld [vmem:[#allocation7 + $0x48] sm:$0xff]  ;;  %v719_v5 = vld [vmem:[%s5571_s2 + $0x38] sm:$0xff] }
 0x11e   : > { %4235 = vmatpush3.bf16.msra.mxu1 %v4232_v23  ;;  %4205 = vmatprep.subr.bf16.mxu0 %v4204_v29  ;;  %v720_v6 = vld [vmem:[%s5571_s2 + $0x40] sm:$0xff]  ;;  %v4300_v7 = vpack.c.bf16 %v1368_v4, %v1367_v3  ;;  %v1369_v8 = vld [vmem:[#allocation7 + $0x50] sm:$0xff]  ;;  %v1370_v9 = vld [vmem:[#allocation7 + $0x58] sm:$0xff] }
 0x11f   : > { %4237 = vmatprep.subr.bf16.mxu1 %v4236_v30  ;;  %v721_v10 = vld [vmem:[%s5571_s2 + $0x48] sm:$0xff]  ;;  %v722_v11 = vld [vmem:[%s5571_s2 + $0x50] sm:$0xff]  ;;  %v4304_v12 = vpack.c.bf16 %v1370_v9, %v1369_v8  ;;  %v1371_v13 = vld [vmem:[#allocation7 + $0x60] sm:$0xff] }
 0x120   : > { %v1372_v14 = vld [vmem:[#allocation7 + $0x68] sm:$0xff]  ;;  %v723_v15 = vld [vmem:[%s5571_s2 + $0x58] sm:$0xff]  ;;  %v724_v16 = vld [vmem:[%s5571_s2 + $0x60] sm:$0xff] }
 0x121   : > { %4207 = vmatpush3.bf16.msra.mxu0 %v4204_v29  ;;  %v4308_v17 = vpack.c.bf16 %v1372_v14, %v1371_v13  ;;  %v1373_v18 = vld [vmem:[#allocation7 + $0x70] sm:$0xff]  ;;  %v1374_v19 = vld [vmem:[#allocation7 + $0x78] sm:$0xff]  ;;  %v725_v20 = vld [vmem:[%s5571_s2 + $0x68] sm:$0xff] }
 0x122   : > { %4239 = vmatpush3.bf16.msra.mxu1 %v4236_v30  ;;  %4209 = vmatprep.subr.bf16.mxu0 %v4208_v35  ;;  %v726_v21 = vld [vmem:[%s5571_s2 + $0x70] sm:$0xff]  ;;  %v4312_v22 = vpack.c.bf16 %v1374_v19, %v1373_v18  ;;  %v727_v23 = vld [vmem:[%s5571_s2 + $0x78] sm:$0xff]  ;;  %v5639_v24 = vld [vmem:[#allocation5] sm:$0xff] }
 0x123   : > { %4241 = vmatprep.subr.bf16.mxu1 %v4240_v36  ;;  %v5641_v25 = vld [vmem:[#allocation5 + $0x8] sm:$0xff]  ;;  %v5645_v27 = vld [vmem:[#allocation5 + $0x10] sm:$0xff]  ;;  %v5647_v28 = vld [vmem:[#allocation5 + $0x18] sm:$0xff] }
 0x124   : > { %v4352_v29 = vpack.c.bf16 %v5647_v28, %v5645_v27  ;;  %v5651_v30 = vld [vmem:[#allocation5 + $0x20] sm:$0xff]  ;;  %v5653_v31 = vld [vmem:[#allocation5 + $0x28] sm:$0xff]  ;;  %v5657_v33 = vld [vmem:[#allocation5 + $0x30] sm:$0xff] }
 0x125   : > { %4211 = vmatpush3.bf16.msra.mxu0 %v4208_v35  ;;  %v4356_v32 = vpack.c.bf16 %v5653_v31, %v5651_v30  ;;  %v5659_v34 = vld [vmem:[#allocation5 + $0x38] sm:$0xff]  ;;  %v5665_v37 = vld [vmem:[#allocation5 + $0x48] sm:$0xff]  ;;  %v5669_v39 = vld [vmem:[#allocation5 + $0x50] sm:$0xff] }
 0x126   : > { %4243 = vmatpush3.bf16.msra.mxu1 %v4240_v36  ;;  %4213 = vmatprep.subr.bf16.mxu0 %v4212_v41  ;;  %v4360_v35 = vpack.c.bf16 %v5659_v34, %v5657_v33  ;;  %v5663_v36 = vld [vmem:[#allocation5 + $0x40] sm:$0xff]  ;;  %v5671_v40 = vld [vmem:[#allocation5 + $0x58] sm:$0xff]  ;;  %v5677_v43 = vld [vmem:[#allocation5 + $0x68] sm:$0xff] }
 0x127   : > { %4245 = vmatprep.subr.bf16.mxu1 %v4244_v42  ;;  %v4364_v38 = vpack.c.bf16 %v5665_v37, %v5663_v36  ;;  %v5681_v45 = vld [vmem:[#allocation5 + $0x70] sm:$0xff]  ;;  %v5683_v46 = vld [vmem:[#allocation5 + $0x78] sm:$0xff]  ;;  %v5695_v49 = vld [vmem:[%s6921_s7] ss:$0 sm:$0xff] }
 0x129   : > { %4215 = vmatpush3.bf16.msra.mxu0 %v4212_v41  ;;  %v4368_v41 = vpack.c.bf16 %v5671_v40, %v5669_v39 }
 0x12a   : > { %4247 = vmatpush3.bf16.msra.mxu1 %v4244_v42  ;;  %4217 = vmatprep.subr.bf16.mxu0 %v4216_v47  ;;  %v5675_v42 = vld [vmem:[#allocation5 + $0x60] sm:$0xff] }
 0x12b   : > { %4249 = vmatprep.subr.bf16.mxu1 %v4248_v48  ;;  %v4372_v44 = vpack.c.bf16 %v5677_v43, %v5675_v42 }
 0x12d   : > { %4219 = vmatpush3.bf16.msra.mxu0 %v4216_v47  ;;  %v4376_v47 = vpack.c.bf16 %v5683_v46, %v5681_v45 }
 0x12e   : > { %4251 = vmatpush3.bf16.msra.mxu1 %v4248_v48  ;;  %v5690_v48 = vld [vmem:[%s6919_s5] ss:$0 sm:$0xff] }
 0x12f   : > { %4285 = vmatprep.subr.bf16.mxu1 %v4284_v51 }
 0x130   : > { %3829 = vmatmul.mubr.f32.vlgmr.msra.gmra.mrb[0].mxu0 %v5599_v54 }
 0x131   : > { %3885 = vmatmul.mubr.f32.vlgmr.msra.gmra.mrb[0].mxu1 %v5599_v54  ;;  %3831 = vmatprep.mubr.f32.mxu0 %v5602_v55 }
 0x132   : > { %4287 = vmatpush3.bf16.msra.mxu1 %v4284_v51  ;;  %3887 = vmatprep.mubr.f32.mxu1 %v5602_v55 }
 0x133   : > { %4289 = vmatprep.subr.bf16.mxu1 %v4288_v56 }
 0x134   : > { %3832 = vmatmul.mubr.f32.gmra.mrb[2].mxu0 %v5608_v59 }
 0x135   : > { %3888 = vmatmul.mubr.f32.gmra.mrb[2].mxu1 %v5608_v59  ;;  %3834 = vmatprep.mubr.f32.mxu0 %v5612_v60 }
 0x136   : > { %4291 = vmatpush3.bf16.msra.mxu1 %v4288_v56  ;;  %3890 = vmatprep.mubr.f32.mxu1 %v5612_v60 }
 0x137   : > { %4293 = vmatprep.subr.bf16.mxu1 %v4292_v61 }
 0x138   : > { %3835 = vmatmul.mubr.f32.gmra.mrb[4].mxu0 %v5618_v0 }
 0x139   : > { %3891 = vmatmul.mubr.f32.gmra.mrb[4].mxu1 %v5618_v0  ;;  %3837 = vmatprep.mubr.f32.mxu0 %v718_v1 }
 0x13a   : > { %4295 = vmatpush3.bf16.msra.mxu1 %v4292_v61  ;;  %3893 = vmatprep.mubr.f32.mxu1 %v718_v1 }
 0x13b   : > { %4297 = vmatprep.subr.bf16.mxu1 %v4296_v2 }
 0x13c   : > { %3838 = vmatmul.mubr.f32.gmra.mrb[6].mxu0 %v719_v5 }
 0x13d   : > { %3894 = vmatmul.mubr.f32.gmra.mrb[6].mxu1 %v719_v5  ;;  %3840 = vmatprep.mubr.f32.mxu0 %v720_v6 }
 0x13e   : > { %4299 = vmatpush3.bf16.msra.mxu1 %v4296_v2  ;;  %3896 = vmatprep.mubr.f32.mxu1 %v720_v6 }
 0x13f   : > { %4301 = vmatprep.subr.bf16.mxu1 %v4300_v7 }
 0x140   : > { %3841 = vmatmul.mubr.f32.gmra.mrb[8].mxu0 %v721_v10 }
 0x141   : > { %3897 = vmatmul.mubr.f32.gmra.mrb[8].mxu1 %v721_v10  ;;  %3843 = vmatprep.mubr.f32.mxu0 %v722_v11 }
 0x142   : > { %4303 = vmatpush3.bf16.msra.mxu1 %v4300_v7  ;;  %3899 = vmatprep.mubr.f32.mxu1 %v722_v11 }
 0x143   : > { %4305 = vmatprep.subr.bf16.mxu1 %v4304_v12 }
 0x144   : > { %3844 = vmatmul.mubr.f32.gmra.mrb[10].mxu0 %v723_v15 }
 0x145   : > { %3900 = vmatmul.mubr.f32.gmra.mrb[10].mxu1 %v723_v15  ;;  %3846 = vmatprep.mubr.f32.mxu0 %v724_v16 }
 0x146   : > { %4307 = vmatpush3.bf16.msra.mxu1 %v4304_v12  ;;  %3902 = vmatprep.mubr.f32.mxu1 %v724_v16 }
 0x147   : > { %4309 = vmatprep.subr.bf16.mxu1 %v4308_v17 }
 0x148   : > { %3847 = vmatmul.mubr.f32.gmra.mrb[12].mxu0 %v725_v20 }
 0x149   : > { %3903 = vmatmul.mubr.f32.gmra.mrb[12].mxu1 %v725_v20  ;;  %3849 = vmatprep.mubr.f32.mxu0 %v726_v21 }
 0x14a   : > { %4311 = vmatpush3.bf16.msra.mxu1 %v4308_v17  ;;  %3905 = vmatprep.mubr.f32.mxu1 %v726_v21 }
 0x14b   : > { %4313 = vmatprep.subr.bf16.mxu1 %v4312_v22 }
 0x14c   : > { %3850 = vmatmul.mubr.f32.gmra.mrb[14].mxu0 %v727_v23 }
 0x14d   : > { %3906 = vmatmul.mubr.f32.gmra.mrb[14].mxu1 %v727_v23 }
 0x14e   : > { %4315 = vmatpush3.bf16.msra.mxu1 %v4312_v22  ;;  %3996 = vmatprep.mubr.f32.mxu1 %v5594_v26  ;;  %v4348_v26 = vpack.c.bf16 %v5641_v25, %v5639_v24 }
 0x150   : > { %4349 = vmatprep.subr.bf16.mxu1 %v4348_v26 }
 0x151   : > { %3997 = vmatmul.mubr.f32.vlgmr.msra.gmra.mrb[16].mxu1 %v5599_v54 }
 0x152   : > { %3999 = vmatprep.mubr.f32.mxu1 %v5602_v55  ;;  %4351 = vmatpush3.bf16.msra.mxu1 %v4348_v26 }
 0x153   : > { %4353 = vmatprep.subr.bf16.mxu1 %v4352_v29 }
 0x155   : > { %4000 = vmatmul.mubr.f32.gmra.mrb[18].mxu1 %v5608_v59 }
 0x156   : > { %4002 = vmatprep.mubr.f32.mxu1 %v5612_v60  ;;  %4355 = vmatpush3.bf16.msra.mxu1 %v4352_v29 }
 0x157   : > { %4357 = vmatprep.subr.bf16.mxu1 %v4356_v32 }
 0x159   : > { %4003 = vmatmul.mubr.f32.gmra.mrb[20].mxu1 %v5618_v0 }
 0x15a   : > { %4005 = vmatprep.mubr.f32.mxu1 %v718_v1  ;;  %4359 = vmatpush3.bf16.msra.mxu1 %v4356_v32 }
 0x15b   : > { %4361 = vmatprep.subr.bf16.mxu1 %v4360_v35 }
 0x15d   : > { %4006 = vmatmul.mubr.f32.gmra.mrb[22].mxu1 %v719_v5 }
 0x15e   : > { %4008 = vmatprep.mubr.f32.mxu1 %v720_v6  ;;  %4363 = vmatpush3.bf16.msra.mxu1 %v4360_v35 }
 0x15f   : > { %4365 = vmatprep.subr.bf16.mxu1 %v4364_v38 }
 0x161   : > { %4009 = vmatmul.mubr.f32.gmra.mrb[24].mxu1 %v721_v10 }
 0x162   : > { %4011 = vmatprep.mubr.f32.mxu1 %v722_v11  ;;  %4367 = vmatpush3.bf16.msra.mxu1 %v4364_v38 }
 0x163   : > { %4369 = vmatprep.subr.bf16.mxu1 %v4368_v41 }
 0x165   : > { %4012 = vmatmul.mubr.f32.gmra.mrb[26].mxu1 %v723_v15 }
 0x166   : > { %4014 = vmatprep.mubr.f32.mxu1 %v724_v16  ;;  %4371 = vmatpush3.bf16.msra.mxu1 %v4368_v41 }
 0x167   : > { %4373 = vmatprep.subr.bf16.mxu1 %v4372_v44 }
 0x169   : > { %4015 = vmatmul.mubr.f32.gmra.mrb[28].mxu1 %v725_v20 }
 0x16a   : > { %4017 = vmatprep.mubr.f32.mxu1 %v726_v21  ;;  %4375 = vmatpush3.bf16.msra.mxu1 %v4372_v44 }
 0x16b   : > { %4377 = vmatprep.subr.bf16.mxu1 %v4376_v47 }
 0x16d   : > { %4018 = vmatmul.mubr.f32.gmra.mrb[30].mxu1 %v727_v23 }
 0x16e   : > { %4379 = vmatpush3.bf16.msra.mxu1 %v4376_v47 }
 0x203   : > { %v3830_v50 = vpop.f32.mrb[0].mxu0 }
 0x204   : > { %v5698_v51 = vadd.f32 %v3830_v50, %v5690_v48  ;;  %v817_v52 = vpop.f32.mrb[1].mxu0  ;;  %v3886_v53 = vpop.f32.mrb[0].mxu1 }
 0x205   : > { %v5701_v54 = vadd.f32 %v5690_v48, %v817_v52  ;;  %v1071_v55 = vadd.f32 %v3886_v53, %v5695_v49  ;;  %v1065_v56 = vpop.f32.mrb[1].mxu1 }
 0x206   : > { %v897_v57 = vmin.f32 %v5698_v51, 0.0  ;;  %v1066_v58 = vadd.f32 %v5695_v49, %v1065_v56  ;;  %v945_v53 = vmax.f32 %v5698_v51, 0.0 }
 0x207   : > { %v896_v59 = vmin.f32 %v5701_v54, 0.0  ;;  %v3833_v60 = vpop.f32.mrb[2].mxu0 }
 0x208   : > { %v914_v61 = vmul.f32 1.442695, %v897_v57  ;;  %v5708_v62 = vadd.f32 %v3833_v60, %v5690_v48  ;;  %v827_v63 = vpop.f32.mrb[3].mxu0  ;;  %v4252_v0 = vpack.c.bf16 %v1071_v55, %v1066_v58  ;;  %v3889_v1 = vpop.f32.mrb[2].mxu1  ;;  %v944_v58 = vmax.f32 %v5701_v54, 0.0 }
 0x209   : > { %v912_v2 = vmul.f32 1.442695, %v896_v59  ;;  %v5711_v3 = vadd.f32 %v5690_v48, %v827_v63  ;;  %v1081_v4 = vadd.f32 %v3889_v1, %v5695_v49  ;;  %v1075_v5 = vpop.f32.mrb[3].mxu1 }
 0x20a   : > { %4616 = vpow2.f32 %v914_v61  ;;  %v899_v6 = vmin.f32 %v5708_v62, 0.0  ;;  %v1076_v7 = vadd.f32 %v5695_v49, %v1075_v5  ;;  %4253 = vmatprep.subr.bf16.mxu0 %v4252_v0 }
 0x20b   : > { %4618 = vpow2.f32 %v912_v2  ;;  %v898_v8 = vmin.f32 %v5711_v3, 0.0  ;;  %v3836_v9 = vpop.f32.mrb[4].mxu0  ;;  %4255 = vmatpush3.bf16.msra.mxu0 %v4252_v0 }
 0x20c   : > { %v918_v10 = vmul.f32 1.442695, %v899_v6  ;;  %v5718_v11 = vadd.f32 %v3836_v9, %v5690_v48  ;;  %v837_v12 = vpop.f32.mrb[5].mxu0  ;;  %v4256_v13 = vpack.c.bf16 %v1081_v4, %v1076_v7  ;;  %v3892_v14 = vpop.f32.mrb[4].mxu1 }
 0x20d   : > { %v916_v15 = vmul.f32 1.442695, %v898_v8  ;;  %v5721_v16 = vadd.f32 %v5690_v48, %v837_v12  ;;  %v1091_v17 = vadd.f32 %v3892_v14, %v5695_v49  ;;  %v1085_v18 = vpop.f32.mrb[5].mxu1  ;;  %v946_v8 = vmax.f32 %v5711_v3, 0.0 }
 0x20e   : > { %4620 = vpow2.f32 %v918_v10  ;;  %v901_v19 = vmin.f32 %v5718_v11, 0.0  ;;  %v1086_v20 = vadd.f32 %v5695_v49, %v1085_v18  ;;  %4257 = vmatprep.subr.bf16.mxu0 %v4256_v13 }
 0x20f   : > { %4622 = vpow2.f32 %v916_v15  ;;  %v900_v21 = vmin.f32 %v5721_v16, 0.0  ;;  %v3839_v22 = vpop.f32.mrb[6].mxu0  ;;  %4259 = vmatpush3.bf16.msra.mxu0 %v4256_v13 }
 0x210   : > { %v5728_v23 = vadd.f32 %v3839_v22, %v5690_v48  ;;  %v847_v26 = vpop.f32.mrb[7].mxu0  ;;  %v4260_v29 = vpack.c.bf16 %v1091_v17, %v1086_v20  ;;  %v3895_v32 = vpop.f32.mrb[6].mxu1  ;;  %v922_v47 = vmul.f32 1.442695, %v901_v19 }
 0x211   : > { %v920_v35 = vmul.f32 1.442695, %v900_v21  ;;  %v5731_v38 = vadd.f32 %v5690_v48, %v847_v26  ;;  %v1101_v41 = vadd.f32 %v3895_v32, %v5695_v49  ;;  %v1095_v44 = vpop.f32.mrb[7].mxu1  ;;  %v947_v32 = vmax.f32 %v5708_v62, 0.0 }
 0x212   : > { %v903_v50 = vmin.f32 %v5728_v23, 0.0  ;;  %v1096_v52 = vadd.f32 %v5695_v49, %v1095_v44  ;;  %4261 = vmatprep.subr.bf16.mxu0 %v4260_v29 }
 0x213   : > { %4624 = vpow2.f32 %v920_v35  ;;  %v902_v55 = vmin.f32 %v5731_v38, 0.0  ;;  %v3842_v56 = vpop.f32.mrb[8].mxu0  ;;  %4263 = vmatpush3.bf16.msra.mxu0 %v4260_v29 }
 0x214   : > { %v4617_v57 = vpop.eup %4616  ;;  %v926_v59 = vmul.f32 1.442695, %v903_v50  ;;  %v5740_v60 = vadd.f32 %v3842_v56, %v5690_v48  ;;  %v857_v61 = vpop.f32.mrb[9].mxu0  ;;  %v4264_v63 = vpack.c.bf16 %v1101_v41, %v1096_v52  ;;  %4626 = vpow2.f32 %v922_v47 }
 0x215   : > { %v3898_v0 = vpop.f32.mrb[8].mxu1  ;;  %v4619_v1 = vpop.eup %4618  ;;  %v924_v2 = vmul.f32 1.442695, %v902_v55  ;;  %v5743_v4 = vadd.f32 %v5690_v48, %v857_v61  ;;  %v961_v51 = vadd.f32 %v4617_v57, %v945_v53 }
 0x216   : > { %v1111_v5 = vadd.f32 %v3898_v0, %v5695_v49  ;;  %v1105_v6 = vpop.f32.mrb[9].mxu1  ;;  %v905_v7 = vmin.f32 %v5740_v60, 0.0  ;;  %v960_v54 = vadd.f32 %v4619_v1, %v944_v58  ;;  %4265 = vmatprep.subr.bf16.mxu0 %v4264_v63 }
 0x217   : > { %4628 = vpow2.f32 %v924_v2  ;;  %v904_v9 = vmin.f32 %v5743_v4, 0.0  ;;  %v3845_v10 = vpop.f32.mrb[10].mxu0  ;;  %v1106_v12 = vadd.f32 %v5695_v49, %v1105_v6  ;;  %4267 = vmatpush3.bf16.msra.mxu0 %v4264_v63  ;;  %v949_v2 = vmax.f32 %v5718_v11, 0.0 }
 0x218   : > { %v4621_v13 = vpop.eup %4620  ;;  %4630 = vpow2.f32 %v926_v59  ;;  %v930_v14 = vmul.f32 1.442695, %v905_v7  ;;  %v5751_v15 = vadd.f32 %v3845_v10, %v5690_v48  ;;  %v867_v17 = vpop.f32.mrb[11].mxu0  ;;  %1166 = vxpose.xlu0.b32.start [1/16] %v960_v54, 128  ;;  %v1144_v18 = vadd.f32 %v961_v51, %v960_v54 }
 0x219   : > { %v3901_v19 = vpop.f32.mrb[10].mxu1  ;;  %v4623_v20 = vpop.eup %4622  ;;  %v928_v21 = vmul.f32 1.442695, %v904_v9  ;;  %v5754_v3 = vadd.f32 %v5690_v48, %v867_v17  ;;  %v4268_v22 = vpack.c.bf16 %v1111_v5, %v1106_v12  ;;  %v963_v57 = vadd.f32 %v4621_v13, %v947_v32 }
 0x21a   : > { %v1121_v26 = vadd.f32 %v3901_v19, %v5695_v49  ;;  %v1115_v29 = vpop.f32.mrb[11].mxu1  ;;  %4632 = vpow2.f32 %v930_v14  ;;  %v907_v35 = vmin.f32 %v5751_v15, 0.0  ;;  %v962_v41 = vadd.f32 %v4623_v20, %v946_v8 }
 0x21b   : > { %4634 = vpow2.f32 %v928_v21  ;;  %v906_v44 = vmin.f32 %v5754_v3, 0.0  ;;  %v3848_v47 = vpop.f32.mrb[12].mxu0  ;;  %v1116_v50 = vadd.f32 %v5695_v49, %v1115_v29  ;;  %4269 = vmatprep.subr.bf16.mxu0 %v4268_v22  ;;  %v948_v5 = vmax.f32 %v5721_v16, 0.0 }
 0x21c   : > { %v934_v52 = vmul.f32 1.442695, %v907_v35  ;;  %v5762_v53 = vadd.f32 %v3848_v47, %v5690_v48  ;;  %v877_v55 = vpop.f32.mrb[13].mxu0  ;;  %1167 = vxpose.xlu0.b32.cont [2/16] %v961_v51, 128  ;;  %v1145_v56 = vadd.f32 %v1144_v18, %v962_v41  ;;  %v3904_v62 = vpop.f32.mrb[12].mxu1  ;;  %4271 = vmatpush3.bf16.msra.mxu0 %v4268_v22  ;;  %v951_v7 = vmax.f32 %v5728_v23, 0.0 }
 0x21d   : > { %v4625_v58 = vpop.eup %4624  ;;  %v932_v59 = vmul.f32 1.442695, %v906_v44  ;;  %v5765_v61 = vadd.f32 %v5690_v48, %v877_v55  ;;  %v4272_v63 = vpack.c.bf16 %v1121_v26, %v1116_v50  ;;  %v1131_v0 = vadd.f32 %v3904_v62, %v5695_v49  ;;  %v1125_v1 = vpop.f32.mrb[13].mxu1 }
 0x21e   : > { %v909_v6 = vmin.f32 %v5762_v53, 0.0  ;;  %v1146_v51 = vadd.f32 %v1145_v56, %v963_v57  ;;  %v1126_v9 = vadd.f32 %v5695_v49, %v1125_v1  ;;  %v4627_v10 = vpop.eup %4626  ;;  %v964_v14 = vadd.f32 %v4625_v58, %v948_v5 }
 0x21f   : > { %4636 = vpow2.f32 %v932_v59  ;;  %v908_v54 = vmin.f32 %v5765_v61, 0.0  ;;  %v3851_v8 = vpop.f32.mrb[14].mxu0  ;;  %4273 = vmatprep.subr.bf16.mxu0 %v4272_v63  ;;  %v950_v26 = vmax.f32 %v5731_v38, 0.0  ;;  %v952_v29 = vmax.f32 %v5743_v4, 0.0 }
 0x220   : > { %4638 = vpow2.f32 %v934_v52  ;;  %v938_v12 = vmul.f32 1.442695, %v909_v6  ;;  %v5775_v13 = vadd.f32 %v3851_v8, %v5690_v48  ;;  %v887_v11 = vpop.f32.mrb[15].mxu0  ;;  %1168 = vxpose.xlu0.b32.cont [3/16] %v962_v41, 128  ;;  %v3907_v16 = vpop.f32.mrb[14].mxu1  ;;  %4275 = vmatpush3.bf16.msra.mxu0 %v4272_v63  ;;  %v4276_v19 = vpack.c.bf16 %v1131_v0, %v1126_v9  ;;  %v5791_v63 = vld [vmem:[%s6917_s3] ss:$0 sm:$0xff] }
 0x221   : > { %v4629_v17 = vpop.eup %4628  ;;  %v936_v23 = vmul.f32 1.442695, %v908_v54  ;;  %v5778_v18 = vadd.f32 %v5690_v48, %v887_v11  ;;  %v1141_v20 = vadd.f32 %v3907_v16, %v5695_v49  ;;  %v1135_v21 = vpop.f32.mrb[15].mxu1  ;;  %v1147_v44 = vadd.f32 %v1146_v51, %v964_v14 }
 0x222   : > { %v4631_v22 = vpop.eup %4630  ;;  %v911_v32 = vmin.f32 %v5775_v13, 0.0  ;;  %v1136_v35 = vadd.f32 %v5695_v49, %v1135_v21  ;;  %v965_v47 = vadd.f32 %v4627_v10, %v949_v2  ;;  %4277 = vmatprep.subr.bf16.mxu0 %v4276_v19  ;;  %v966_v55 = vadd.f32 %v4629_v17, %v950_v26 }
 0x223   : > { %4640 = vpow2.f32 %v936_v23  ;;  %v910_v41 = vmin.f32 %v5778_v18, 0.0  ;;  %v953_v4 = vmax.f32 %v5740_v60, 0.0  ;;  %v954_v59 = vmax.f32 %v5754_v3, 0.0 }
 0x224   : > { %v4633_v48 = vpop.eup %4632  ;;  %4642 = vpow2.f32 %v938_v12  ;;  %1169 = vxpose.xlu0.b32.cont [4/16] %v963_v57, 128  ;;  %v4280_v50 = vpack.c.bf16 %v1141_v20, %v1136_v35  ;;  %v3998_v52 = vpop.f32.mrb[16].mxu1  ;;  %4279 = vmatpush3.bf16.msra.mxu0 %v4276_v19  ;;  %v942_v56 = vmul.f32 1.442695, %v911_v32  ;;  %v1148_v49 = vadd.f32 %v1147_v44, %v965_v47 }
 0x225   : > { %v4635_v38 = vpop.eup %4634  ;;  %v940_v62 = vmul.f32 1.442695, %v910_v41  ;;  %v1448_v58 = vpop.f32.mrb[17].mxu1  ;;  %v967_v0 = vadd.f32 %v4631_v22, %v951_v7  ;;  %v955_v5 = vmax.f32 %v5751_v15, 0.0  ;;  %v5794_v3 = vadd.f32 %v4633_v48, %v953_v4 }
 0x226   : > { %4281 = vmatprep.subr.bf16.mxu0 %v4280_v50  ;;  %v1149_v57 = vadd.f32 %v1148_v49, %v966_v55  ;;  %v968_v1 = vadd.f32 %v4635_v38, %v952_v29  ;;  %v5797_v8 = vadd.f32 %v3998_v52, %v5791_v63  ;;  %v956_v9 = vmax.f32 %v5765_v61, 0.0 }
 0x227   : > { %4644 = vpow2.f32 %v940_v62  ;;  %v5801_v7 = vadd.f32 %v5791_v63, %v1448_v58  ;;  %v957_v16 = vmax.f32 %v5762_v53, 0.0  ;;  %v958_v29 = vmax.f32 %v5778_v18, 0.0 }
 0x228   : > { %1170 = vxpose.xlu0.b32.cont [5/16] %v964_v14, 128  ;;  %v4001_v2 = vpop.f32.mrb[18].mxu1  ;;  %4283 = vmatpush3.bf16.msra.mxu0 %v4280_v50  ;;  %4646 = vpow2.f32 %v942_v56  ;;  %v1150_v51 = vadd.f32 %v1149_v57, %v967_v0  ;;  %v1528_v20 = vmin.f32 %v5797_v8, 0.0  ;;  %v959_v52 = vmax.f32 %v5775_v13, 0.0 }
 0x229   : > { %v4637_v60 = vpop.eup %4636  ;;  %v1458_v6 = vpop.f32.mrb[19].mxu1  ;;  %v1527_v22 = vmin.f32 %v5801_v7, 0.0  ;;  %v5819_v53 = vadd.f32 %v4001_v2, %v5791_v63 }
 0x22a   : > { %v4639_v54 = vpop.eup %4638  ;;  %v1151_v10 = vadd.f32 %v1150_v51, %v968_v1  ;;  %v5803_v12 = vadd.f32 %v4637_v60, %v954_v59  ;;  %v5807_v14 = vadd.f32 %v5791_v63, %v1458_v6  ;;  %v1545_v38 = vmul.f32 1.442695, %v1528_v20 }
 0x22b   : > { %v5810_v19 = vadd.f32 %v4639_v54, %v955_v5  ;;  %v1543_v4 = vmul.f32 1.442695, %v1527_v22 }
 0x22c   : > { %1171 = vxpose.xlu0.b32.cont [6/16] %v965_v47, 128  ;;  %v4004_v11 = vpop.f32.mrb[20].mxu1  ;;  %v1152_v23 = vadd.f32 %v1151_v10, %v5794_v3  ;;  %v1529_v44 = vmin.f32 %v5807_v14, 0.0  ;;  %4648 = vpow2.f32 %v1545_v38 }
 0x22d   : > { %v4641_v15 = vpop.eup %4640  ;;  %v1468_v17 = vpop.f32.mrb[21].mxu1  ;;  %v5834_v58 = vadd.f32 %v4004_v11, %v5791_v63  ;;  %4650 = vpow2.f32 %v1543_v4 }
 0x22e   : > { %v4643_v61 = vpop.eup %4642  ;;  %v5813_v21 = vadd.f32 %v4641_v15, %v956_v9  ;;  %v1153_v26 = vadd.f32 %v1152_v23, %v5803_v12  ;;  %v5825_v47 = vadd.f32 %v5791_v63, %v1468_v17  ;;  %v1547_v59 = vmul.f32 1.442695, %v1529_v44 }
 0x22f   : > { %v5821_v41 = vadd.f32 %v4643_v61, %v957_v16  ;;  %v1532_v51 = vmin.f32 %v5834_v58, 0.0 }
 0x230   : > { %v4007_v32 = vpop.f32.mrb[22].mxu1  ;;  %1172 = vxpose.xlu0.b32.cont [7/16] %v966_v55, 128  ;;  %v1154_v50 = vadd.f32 %v1153_v26, %v5810_v19  ;;  %v1530_v55 = vmin.f32 %v5819_v53, 0.0  ;;  %v1531_v57 = vmin.f32 %v5825_v47, 0.0  ;;  %4652 = vpow2.f32 %v1547_v59 }
 0x231   : > { %v4645_v35 = vpop.eup %4644  ;;  %v1478_v48 = vpop.f32.mrb[23].mxu1  ;;  %v5845_v54 = vadd.f32 %v4007_v32, %v5791_v63  ;;  %v1553_v61 = vmul.f32 1.442695, %v1532_v51  ;;  %v1578_v51 = vmax.f32 %v5819_v53, 0.0 }
 0x232   : > { %v4647_v18 = vpop.eup %4646  ;;  %v1155_v56 = vadd.f32 %v1154_v50, %v5813_v21  ;;  %v5830_v62 = vadd.f32 %v4645_v35, %v958_v29  ;;  %v5838_v2 = vadd.f32 %v5791_v63, %v1478_v48  ;;  %v1549_v6 = vmul.f32 1.442695, %v1530_v55 }
 0x233   : > { %v5841_v5 = vadd.f32 %v4647_v18, %v959_v52  ;;  %v1551_v10 = vmul.f32 1.442695, %v1531_v57  ;;  %v1534_v20 = vmin.f32 %v5845_v54, 0.0  ;;  %v1576_v48 = vmax.f32 %v5797_v8, 0.0 }
 0x234   : > { %v4010_v49 = vpop.f32.mrb[24].mxu1  ;;  %1173 = vxpose.xlu0.b32.cont [8/16] %v967_v0, 128  ;;  %v1156_v60 = vadd.f32 %v1155_v56, %v5821_v41  ;;  %v1533_v11 = vmin.f32 %v5838_v2, 0.0  ;;  %4654 = vpow2.f32 %v1549_v6 }
 0x235   : > { %v1488_v13 = vpop.f32.mrb[25].mxu1  ;;  %v5854_v23 = vadd.f32 %v4010_v49, %v5791_v63  ;;  %4656 = vpow2.f32 %v1551_v10  ;;  %v1557_v18 = vmul.f32 1.442695, %v1534_v20  ;;  %v1579_v20 = vmax.f32 %v5825_v47, 0.0 }
 0x236   : > { %v1157_v9 = vadd.f32 %v1156_v60, %v5830_v62  ;;  %v5850_v15 = vadd.f32 %v5791_v63, %v1488_v13  ;;  %v1555_v26 = vmul.f32 1.442695, %v1533_v11  ;;  %v4649_v38 = vpop.eup %4648  ;;  %4658 = vpow2.f32 %v1553_v61 }
 0x237   : > { %v1536_v50 = vmin.f32 %v5854_v23, 0.0  ;;  %v4651_v55 = vpop.eup %4650  ;;  %v1577_v13 = vmax.f32 %v5807_v14, 0.0 }
 0x238   : > { %v4013_v0 = vpop.f32.mrb[26].mxu1  ;;  %1174 = vxpose.xlu0.b32.cont [9/16] %v968_v1, 128  ;;  %v1158_v17 = vadd.f32 %v1157_v9, %v5841_v5  ;;  %v1535_v29 = vmin.f32 %v5850_v15, 0.0  ;;  %4660 = vpow2.f32 %v1555_v26 }
 0x239   : > { %v1498_v16 = vpop.f32.mrb[27].mxu1  ;;  %v5865_v52 = vadd.f32 %v4013_v0, %v5791_v63  ;;  %v1561_v0 = vmul.f32 1.442695, %v1536_v50  ;;  %4662 = vpow2.f32 %v1557_v18 }
 0x23a   : > { %v1159_v22 = vrot.slane %v1158_v17, 4  ;;  %v5860_v32 = vadd.f32 %v5791_v63, %v1498_v16  ;;  %v1559_v49 = vmul.f32 1.442695, %v1535_v29  ;;  %v4653_v6 = vpop.eup %4652 }
 0x23b   : > { %v5888_v61 = vadd.f32 %v4653_v6, %v1577_v13 }
 0x23c   : > { %v4016_v1 = vpop.f32.mrb[28].mxu1  ;;  %1175 = vxpose.xlu0.b32.cont [10/16] %v5794_v3, 128  ;;  %v1160_v44 = vadd.f32 %v1159_v22, %v1158_v17  ;;  %v1575_v3 = vmax.f32 %v5801_v7, 0.0  ;;  %v1537_v59 = vmin.f32 %v5860_v32, 0.0  ;;  %v5874_v7 = vadd.f32 %v4649_v38, %v1576_v48 }
 0x23d   : > { %v1508_v35 = vpop.f32.mrb[29].mxu1  ;;  %v5881_v10 = vadd.f32 %v4016_v1, %v5791_v63  ;;  %4664 = vpow2.f32 %v1559_v49  ;;  %v1580_v1 = vmax.f32 %v5834_v58, 0.0 }
 0x23e   : > { %v1161_v56 = vrot.slane %v1160_v44, 2  ;;  %v5871_v8 = vadd.f32 %v5791_v63, %v1508_v35  ;;  %v5878_v9 = vadd.f32 %v4651_v55, %v1575_v3  ;;  %v1563_v14 = vmul.f32 1.442695, %v1537_v59  ;;  %v4655_v53 = vpop.eup %4654 }
 0x23f   : > { %v4657_v26 = vpop.eup %4656  ;;  %4666 = vpow2.f32 %v1561_v0  ;;  %v1540_v29 = vmin.f32 %v5881_v10, 0.0  ;;  %v5903_v47 = vadd.f32 %v4655_v53, %v1578_v51 }
 0x240   : > { %v4019_v4 = vpop.f32.mrb[30].mxu1  ;;  %1176 = vxpose.xlu0.b32.cont [11/16] %v5803_v12, 128  ;;  %v1162_v60 = vadd.f32 %v1161_v56, %v1160_v44  ;;  %v1538_v12 = vmin.f32 %v5865_v52, 0.0  ;;  %v1539_v16 = vmin.f32 %v5871_v8, 0.0  ;;  %4668 = vpow2.f32 %v1563_v14  ;;  %v4659_v38 = vpop.eup %4658 }
 0x241   : > { %v1518_v57 = vpop.f32.mrb[31].mxu1  ;;  %v5896_v35 = vadd.f32 %v4019_v4, %v5791_v63  ;;  %v5906_v3 = vadd.f32 %v4657_v26, %v1579_v20  ;;  %v1582_v56 = vmax.f32 %v5845_v54, 0.0  ;;  %v5914_v49 = vadd.f32 %v4659_v38, %v1580_v1 }
 0x242   : > { %v1163_v11 = vrot.slane %v1162_v60, 1  ;;  %v5886_v17 = vadd.f32 %v5791_v63, %v1518_v57  ;;  %v1567_v50 = vmul.f32 1.442695, %v1539_v16  ;;  %v1581_v63 = vmax.f32 %v5838_v2, 0.0  ;;  %v4661_v4 = vpop.eup %4660 }
 0x243   : > { %v1542_v55 = vmin.f32 %v5896_v35, 0.0  ;;  %v4663_v57 = vpop.eup %4662  ;;  %v1585_v14 = vmax.f32 %v5860_v32, 0.0  ;;  %v1587_v32 = vmax.f32 %v5871_v8, 0.0 }
 0x244   : > { %1177 = vxpose.xlu0.b32.cont [12/16] %v5810_v19, 128  ;;  %v5891_v22 = vadd.f32 %v1163_v11, %v1162_v60  ;;  %v1565_v19 = vmul.f32 1.442695, %v1538_v12  ;;  %v1541_v58 = vmin.f32 %v5886_v17, 0.0  ;;  %v5918_v13 = vadd.f32 %v4661_v4, %v1581_v63 }
 0x245   : > { %v1583_v60 = vmax.f32 %v5850_v15, 0.0  ;;  %v1573_v51 = vmul.f32 1.442695, %v1542_v55  ;;  %v5924_v0 = vadd.f32 %v4663_v57, %v1582_v56  ;;  %v1584_v12 = vmax.f32 %v5854_v23, 0.0 }
 0x246   : > { %v1752_v44 = vmul.f32 %v5878_v9, %v5891_v22  ;;  %v1753_v48 = vmul.f32 %v5874_v7, %v5891_v22  ;;  %v1754_v18 = vmul.f32 %v5888_v61, %v5891_v22  ;;  %4670 = vpow2.f32 %v1565_v19 }
 0x247   : > { %4672 = vpow2.f32 %v1567_v50  ;;  %v1571_v59 = vmul.f32 1.442695, %v1541_v58  ;;  %v1755_v2 = vmul.f32 %v5903_v47, %v5891_v22  ;;  %v1756_v54 = vmul.f32 %v5906_v3, %v5891_v22  ;;  %v4665_v6 = vpop.eup %4664 }
 0x248   : > { %1178 = vxpose.xlu0.b32.cont [13/16] %v5813_v21, 128  ;;  %4108 = vmatprep.mubr.f32.mxu1 %v1752_v44  ;;  %v1569_v21 = vmul.f32 1.442695, %v1540_v29  ;;  %v1757_v11 = vmul.f32 %v5914_v49, %v5891_v22  ;;  %v5929_v15 = vadd.f32 %v4665_v6, %v1583_v60  ;;  %v1758_v16 = vmul.f32 %v5918_v13, %v5891_v22 }
 0x249   : > { %4109 = vmatmul.mubr.f32.vlgmr.msra.gmra.mrb[32].mxu1 %v1753_v48  ;;  %v1586_v23 = vmax.f32 %v5865_v52, 0.0  ;;  %v1759_v20 = vmul.f32 %v5924_v0, %v5891_v22  ;;  %v1589_v58 = vmax.f32 %v5886_v17, 0.0 }
 0x24a   : > { %4111 = vmatprep.mubr.f32.mxu1 %v1754_v18  ;;  %4674 = vpow2.f32 %v1569_v21  ;;  %v1760_v19 = vmul.f32 %v5929_v15, %v5891_v22  ;;  %v1590_v18 = vmax.f32 %v5896_v35, 0.0 }
 0x24b   : > { %4676 = vpow2.f32 %v1571_v59 }
 0x24c   : > { %1179 = vxpose.xlu0.b32.cont [14/16] %v5821_v41, 128  ;;  %v4667_v41 = vpop.eup %4666  ;;  %4678 = vpow2.f32 %v1573_v51 }
 0x24d   : > { %4112 = vmatmul.mubr.f32.gmra.mrb[34].mxu1 %v1755_v2  ;;  %v4669_v53 = vpop.eup %4668 }
 0x24e   : > { %4114 = vmatprep.mubr.f32.mxu1 %v1756_v54  ;;  %v5940_v1 = vadd.f32 %v4669_v53, %v1585_v14 }
 0x250   : > { %1180 = vxpose.xlu0.b32.cont [15/16] %v5830_v62, 128  ;;  %v5935_v62 = vadd.f32 %v4667_v41, %v1584_v12  ;;  %v4671_v26 = vpop.eup %4670  ;;  %v1762_v8 = vmul.f32 %v5940_v1, %v5891_v22 }
 0x251   : > { %4115 = vmatmul.mubr.f32.gmra.mrb[36].mxu1 %v1757_v11  ;;  %v4673_v29 = vpop.eup %4672  ;;  %v5945_v44 = vadd.f32 %v4671_v26, %v1586_v23 }
 0x252   : > { %4117 = vmatprep.mubr.f32.mxu1 %v1758_v16  ;;  %v1761_v52 = vmul.f32 %v5935_v62, %v5891_v22  ;;  %v5950_v50 = vadd.f32 %v4673_v29, %v1587_v32 }
 0x254   : > { %1181 = vxpose.xlu0.b32.end [16/16] %v5841_v5, 128  ;;  %v1588_v5 = vmax.f32 %v5881_v10, 0.0  ;;  %v4675_v48 = vpop.eup %4674  ;;  %v1763_v10 = vmul.f32 %v5945_v44, %v5891_v22  ;;  %v1764_v21 = vmul.f32 %v5950_v50, %v5891_v22 }
 0x255   : > { %4118 = vmatmul.mubr.f32.gmra.mrb[38].mxu1 %v1759_v20  ;;  %v4677_v38 = vpop.eup %4676 }
 0x256   : > { %4120 = vmatprep.mubr.f32.mxu1 %v1760_v19  ;;  %v5955_v63 = vadd.f32 %v4675_v48, %v1588_v5  ;;  %v4679_v4 = vpop.eup %4678  ;;  %v5960_v56 = vadd.f32 %v4677_v38, %v1589_v58 }
 0x257   : > { %v5964_v17 = vadd.f32 %v4679_v4, %v1590_v18 }
 0x258   : > { %v1765_v55 = vmul.f32 %v5955_v63, %v5891_v22  ;;  %v1766_v59 = vmul.f32 %v5960_v56, %v5891_v22 }
 0x259   : > { %4121 = vmatmul.mubr.f32.gmra.mrb[40].mxu1 %v1761_v52  ;;  %v1767_v35 = vmul.f32 %v5964_v17, %v5891_v22 }
 0x25a   : > { %4123 = vmatprep.mubr.f32.mxu1 %v1762_v8 }
 0x25d   : > { %4124 = vmatmul.mubr.f32.gmra.mrb[42].mxu1 %v1763_v10 }
 0x25e   : > { %4126 = vmatprep.mubr.f32.mxu1 %v1764_v21 }
 0x261   : > { %4127 = vmatmul.mubr.f32.gmra.mrb[44].mxu1 %v1765_v55 }
 0x262   : > { %4129 = vmatprep.mubr.f32.mxu1 %v1766_v59 }
 0x265   : > { %4130 = vmatmul.mubr.f32.gmra.mrb[46].mxu1 %v1767_v35 }
 0x298   : > { %v1182_v2 = vpop.trf.xlu0 }
 0x299   : > { %3940 = vmatprep.mubr.f32.mxu0 %v1182_v2 }
 0x29c   : > { %v1183_v57 = vpop.trf.xlu0 }
 0x29d   : > { %3941 = vmatmul.mubr.f32.vlgmr.msra.gmra.mrb[16].mxu0 %v1183_v57 }
 0x2a0   : > { %v1184_v60 = vpop.trf.xlu0 }
 0x2a1   : > { %3943 = vmatprep.mubr.f32.mxu0 %v1184_v60 }
 0x2a4   : > { %v1185_v54 = vpop.trf.xlu0 }
 0x2a5   : > { %3944 = vmatmul.mubr.f32.gmra.mrb[18].mxu0 %v1185_v54 }
 0x2a8   : > { %v1186_v6 = vpop.trf.xlu0 }
 0x2a9   : > { %3946 = vmatprep.mubr.f32.mxu0 %v1186_v6 }
 0x2ac   : > { %v1187_v51 = vpop.trf.xlu0 }
 0x2ad   : > { %3947 = vmatmul.mubr.f32.gmra.mrb[20].mxu0 %v1187_v51 }
 0x2b0   : > { %v1188_v41 = vpop.trf.xlu0 }
 0x2b1   : > { %3949 = vmatprep.mubr.f32.mxu0 %v1188_v41 }
 0x2b4   : > { %v1189_v12 = vpop.trf.xlu0 }
 0x2b5   : > { %3950 = vmatmul.mubr.f32.gmra.mrb[22].mxu0 %v1189_v12 }
 0x2b8   : > { %v1190_v11 = vpop.trf.xlu0 }
 0x2b9   : > { %3952 = vmatprep.mubr.f32.mxu0 %v1190_v11 }
 0x2bc   : > { %v1191_v22 = vpop.trf.xlu0 }
 0x2bd   : > { %3953 = vmatmul.mubr.f32.gmra.mrb[24].mxu0 %v1191_v22 }
 0x2c0   : > { %v1192_v14 = vpop.trf.xlu0 }
 0x2c1   : > { %3955 = vmatprep.mubr.f32.mxu0 %v1192_v14 }
 0x2c4   : > { %v1193_v16 = vpop.trf.xlu0 }
 0x2c5   : > { %3956 = vmatmul.mubr.f32.gmra.mrb[26].mxu0 %v1193_v16 }
 0x2c8   : > { %v1194_v53 = vpop.trf.xlu0 }
 0x2c9   : > { %3958 = vmatprep.mubr.f32.mxu0 %v1194_v53 }
 0x2cc   : > { %v1195_v23 = vpop.trf.xlu0 }
 0x2cd   : > { %3959 = vmatmul.mubr.f32.gmra.mrb[28].mxu0 %v1195_v23 }
 0x2d0   : > { %v1196_v20 = vpop.trf.xlu0 }
 0x2d1   : > { %3961 = vmatprep.mubr.f32.mxu0 %v1196_v20 }
 0x2d4   : > { %v1197_v26 = vpop.trf.xlu0 }
 0x2d5   : > { %3962 = vmatmul.mubr.f32.gmra.mrb[30].mxu0 %v1197_v26 }
 0x2d6   : > { %4052 = vmatprep.mubr.f32.mxu0 %v5878_v9 }
 0x31c   : > { %v5973_v32 = vpop.f32.mrb[32].mxu1 }
 0x31d   : > { %v5975_v19 = vpop.f32.mrb[33].mxu1 }
 0x320   : > { %v5977_v29 = vpop.f32.mrb[34].mxu1 }
 0x321   : > { %v5979_v5 = vpop.f32.mrb[35].mxu1 }
 0x324   : > { %v5981_v52 = vpop.f32.mrb[36].mxu1 }
 0x325   : > { %v5983_v48 = vpop.f32.mrb[37].mxu1 }
 0x328   : > { %v5985_v58 = vpop.f32.mrb[38].mxu1 }
 0x329   : > { %v5987_v8 = vpop.f32.mrb[39].mxu1 }
 0x32c   : > { %v5989_v38 = vpop.f32.mrb[40].mxu1 }
 0x32d   : > { %v5991_v18 = vpop.f32.mrb[41].mxu1 }
 0x330   : > { %v5993_v9 = vpop.f32.mrb[42].mxu1 }
 0x331   : > { %v5995_v10 = vpop.f32.mrb[43].mxu1 }
 0x334   : > { %v5997_v4 = vpop.f32.mrb[44].mxu1 }
 0x335   : > { %v5999_v21 = vpop.f32.mrb[45].mxu1 }
 0x338   : > { %v6001_v55 = vpop.f32.mrb[46].mxu1 }
 0x339   : > { %v6003_v59 = vpop.f32.mrb[47].mxu1 }
 0x370   : > { %v3942_v35 = vpop.f32.mrb[16].mxu0 }
 0x371   : > { %v1344_v2 = vmul.f32 %v3942_v35, %v5641_v25  ;;  %v1264_v57 = vpop.f32.mrb[17].mxu0 }
 0x372   : > { %v1343_v60 = vmul.f32 %v1264_v57, %v5639_v24 }
 0x374   : > { %v4316_v54 = vpack.c.bf16 %v1344_v2, %v1343_v60 }
 0x376   : > { %4317 = vmatprep.subr.bf16.mxu0 %v4316_v54 }
 0x377   : > { %4319 = vmatpush3.bf16.msra.mxu0 %v4316_v54 }
 0x378   : > { %v3945_v6 = vpop.f32.mrb[18].mxu0 }
 0x379   : > { %v1346_v51 = vmul.f32 %v3945_v6, %v5647_v28  ;;  %v1274_v41 = vpop.f32.mrb[19].mxu0 }
 0x37a   : > { %v1345_v12 = vmul.f32 %v1274_v41, %v5645_v27 }
 0x37c   : > { %v4320_v11 = vpack.c.bf16 %v1346_v51, %v1345_v12 }
 0x37e   : > { %4321 = vmatprep.subr.bf16.mxu0 %v4320_v11 }
 0x37f   : > { %4323 = vmatpush3.bf16.msra.mxu0 %v4320_v11 }
 0x380   : > { %v3948_v22 = vpop.f32.mrb[20].mxu0 }
 0x381   : > { %v1348_v14 = vmul.f32 %v3948_v22, %v5653_v31  ;;  %v1284_v16 = vpop.f32.mrb[21].mxu0 }
 0x382   : > { %v1347_v25 = vmul.f32 %v1284_v16, %v5651_v30 }
 0x384   : > { %v4324_v53 = vpack.c.bf16 %v1348_v14, %v1347_v25  ;;  %v1946_v14 = vld [vmem:[#allocation11 + $0x8] sm:$0xff] }
 0x386   : > { %4325 = vmatprep.subr.bf16.mxu0 %v4324_v53 }
 0x387   : > { %4327 = vmatpush3.bf16.msra.mxu0 %v4324_v53  ;;  %v1947_v53 = vld [vmem:[#allocation11 + $0x10] sm:$0xff] }
 0x388   : > { %v3951_v24 = vpop.f32.mrb[22].mxu0 }
 0x389   : > { %v1350_v23 = vmul.f32 %v3951_v24, %v5659_v34  ;;  %v1294_v20 = vpop.f32.mrb[23].mxu0  ;;  %v1948_v24 = vld [vmem:[#allocation11 + $0x18] sm:$0xff] }
 0x38a   : > { %v1349_v28 = vmul.f32 %v1294_v20, %v5657_v33  ;;  %v1951_v20 = vld [vmem:[#allocation11 + $0x30] sm:$0xff] }
 0x38c   : > { %v4328_v26 = vpack.c.bf16 %v1350_v23, %v1349_v28  ;;  %v1950_v23 = vld [vmem:[#allocation11 + $0x28] sm:$0xff]  ;;  %v1952_v28 = vld [vmem:[#allocation11 + $0x38] sm:$0xff] }
 0x38e   : > { %4329 = vmatprep.subr.bf16.mxu0 %v4328_v26 }
 0x38f   : > { %4331 = vmatpush3.bf16.msra.mxu0 %v4328_v26  ;;  %v1953_v26 = vld [vmem:[#allocation11 + $0x40] sm:$0xff] }
 0x390   : > { %v3954_v27 = vpop.f32.mrb[24].mxu0 }
 0x391   : > { %v1352_v35 = vmul.f32 %v3954_v27, %v5665_v37  ;;  %v1304_v2 = vpop.f32.mrb[25].mxu0  ;;  %v1954_v27 = vld [vmem:[#allocation11 + $0x48] sm:$0xff] }
 0x392   : > { %v1351_v31 = vmul.f32 %v1304_v2, %v5663_v36  ;;  %v1958_v2 = vld [vmem:[#allocation11 + $0x68] sm:$0xff] }
 0x394   : > { %v4332_v57 = vpack.c.bf16 %v1352_v35, %v1351_v31  ;;  %v1956_v35 = vld [vmem:[#allocation11 + $0x58] sm:$0xff] }
 0x396   : > { %4333 = vmatprep.subr.bf16.mxu0 %v4332_v57 }
 0x397   : > { %4335 = vmatpush3.bf16.msra.mxu0 %v4332_v57 }
 0x398   : > { %v3957_v30 = vpop.f32.mrb[26].mxu0 }
 0x399   : > { %v1354_v60 = vmul.f32 %v3957_v30, %v5671_v40  ;;  %v1314_v54 = vpop.f32.mrb[27].mxu0  ;;  %v1945_v40 = vld [vmem:[#allocation11] sm:$0xff] }
 0x39a   : > { %v1353_v34 = vmul.f32 %v1314_v54, %v5669_v39  ;;  %v4380_v25 = vpack.c.bf16 %v1946_v14, %v1945_v40 }
 0x39c   : > { %v4336_v6 = vpack.c.bf16 %v1354_v60, %v1353_v34 }
 0x39e   : > { %4337 = vmatprep.subr.bf16.mxu0 %v4336_v6 }
 0x39f   : > { %4339 = vmatpush3.bf16.msra.mxu0 %v4336_v6 }
 0x3a0   : > { %v3960_v33 = vpop.f32.mrb[28].mxu0 }
 0x3a1   : > { %v1356_v51 = vmul.f32 %v3960_v33, %v5677_v43  ;;  %v1324_v41 = vpop.f32.mrb[29].mxu0  ;;  %v4384_v43 = vpack.c.bf16 %v1948_v24, %v1947_v53  ;;  %v1905_v53 = vadd.f32 1e-06, %v6003_v59 }
 0x3a2   : > { %v1355_v37 = vmul.f32 %v1324_v41, %v5675_v42  ;;  %v1949_v42 = vld [vmem:[#allocation11 + $0x20] sm:$0xff] }
 0x3a4   : > { %v4340_v12 = vpack.c.bf16 %v1356_v51, %v1355_v37  ;;  %v1885_v51 = vadd.f32 1e-06, %v5995_v10 }
 0x3a6   : > { %4341 = vmatprep.subr.bf16.mxu0 %v4340_v12 }
 0x3a7   : > { %4343 = vmatpush3.bf16.msra.mxu0 %v4340_v12 }
 0x3a8   : > { %v3963_v36 = vpop.f32.mrb[30].mxu0 }
 0x3a9   : > { %v1358_v11 = vmul.f32 %v3963_v36, %v5683_v46  ;;  %v1334_v22 = vpop.f32.mrb[31].mxu0  ;;  %v4388_v46 = vpack.c.bf16 %v1950_v23, %v1949_v42  ;;  %v1900_v36 = vadd.f32 1e-06, %v5997_v4 }
 0x3aa   : > { %v1357_v39 = vmul.f32 %v1334_v22, %v5681_v45  ;;  %v4392_v45 = vpack.c.bf16 %v1952_v28, %v1951_v20  ;;  %v1895_v22 = vadd.f32 1e-06, %v5999_v21 }
 0x3ac   : > { %v4344_v16 = vpack.c.bf16 %v1358_v11, %v1357_v39 }
 0x3ae   : > { %4345 = vmatprep.subr.bf16.mxu0 %v4344_v16 }
 0x3af   : > { %4347 = vmatpush3.bf16.msra.mxu0 %v4344_v16  ;;  %v1910_v16 = vadd.f32 1e-06, %v6001_v55 }
 0x3b0   : > { %4381 = vmatprep.subr.bf16.mxu0 %v4380_v25 }
 0x3b2   : > { %4053 = vmatmul.mubr.f32.vlgmr.msra.gmra.mrb[32].mxu0 %v5874_v7  ;;  %v4396_v7 = vpack.c.bf16 %v1954_v27, %v1953_v26 }
 0x3b3   : > { %4055 = vmatprep.mubr.f32.mxu0 %v5888_v61  ;;  %4383 = vmatpush3.bf16.msra.mxu0 %v4380_v25  ;;  %v1955_v61 = vld [vmem:[#allocation11 + $0x50] sm:$0xff] }
 0x3b4   : > { %4385 = vmatprep.subr.bf16.mxu0 %v4384_v43 }
 0x3b6   : > { %4056 = vmatmul.mubr.f32.gmra.mrb[34].mxu0 %v5903_v47  ;;  %v4400_v47 = vpack.c.bf16 %v1956_v35, %v1955_v61 }
 0x3b7   : > { %4058 = vmatprep.mubr.f32.mxu0 %v5906_v3  ;;  %4387 = vmatpush3.bf16.msra.mxu0 %v4384_v43  ;;  %v1957_v3 = vld [vmem:[#allocation11 + $0x60] sm:$0xff] }
 0x3b8   : > { %4389 = vmatprep.subr.bf16.mxu0 %v4388_v46 }
 0x3ba   : > { %4059 = vmatmul.mubr.f32.gmra.mrb[36].mxu0 %v5914_v49  ;;  %v4404_v49 = vpack.c.bf16 %v1958_v2, %v1957_v3 }
 0x3bb   : > { %4061 = vmatprep.mubr.f32.mxu0 %v5918_v13  ;;  %4391 = vmatpush3.bf16.msra.mxu0 %v4388_v46  ;;  %v1959_v13 = vld [vmem:[#allocation11 + $0x70] sm:$0xff] }
 0x3bc   : > { %4393 = vmatprep.subr.bf16.mxu0 %v4392_v45 }
 0x3be   : > { %4062 = vmatmul.mubr.f32.gmra.mrb[38].mxu0 %v5924_v0  ;;  %v1960_v0 = vld [vmem:[#allocation11 + $0x78] sm:$0xff] }
 0x3bf   : > { %4064 = vmatprep.mubr.f32.mxu0 %v5929_v15  ;;  %4395 = vmatpush3.bf16.msra.mxu0 %v4392_v45  ;;  %v4408_v15 = vpack.c.bf16 %v1960_v0, %v1959_v13 }
 0x3c0   : > { %4397 = vmatprep.subr.bf16.mxu0 %v4396_v7 }
 0x3c2   : > { %4065 = vmatmul.mubr.f32.gmra.mrb[40].mxu0 %v5935_v62  ;;  %v1840_v62 = vadd.f32 1e-06, %v5973_v32  ;;  %v1865_v32 = vadd.f32 1e-06, %v5987_v8  ;;  %v1890_v8 = vadd.f32 1e-06, %v5993_v9 }
 0x3c3   : > { %4067 = vmatprep.mubr.f32.mxu0 %v5940_v1  ;;  %4399 = vmatpush3.bf16.msra.mxu0 %v4396_v7  ;;  %v1835_v1 = vadd.f32 1e-06, %v5975_v19 }
 0x3c4   : > { %4401 = vmatprep.subr.bf16.mxu0 %v4400_v47  ;;  %4680 = vrcp.f32 %v1840_v62  ;;  %v6055_v62 = vld [vmem:[%s6986_s0] ss:$0 sm:$0xff]  ;;  %s6995_s0 = sld [smem:[#allocation37_spill]] }
 0x3c5   : > { %4682 = vrcp.f32 %v1835_v1 }
 0x3c6   : > { %4068 = vmatmul.mubr.f32.gmra.mrb[42].mxu0 %v5945_v44  ;;  %v1850_v44 = vadd.f32 1e-06, %v5977_v29 }
 0x3c7   : > { %4070 = vmatprep.mubr.f32.mxu0 %v5950_v50  ;;  %4403 = vmatpush3.bf16.msra.mxu0 %v4400_v47  ;;  %v1845_v50 = vadd.f32 1e-06, %v5979_v5  ;;  %v1880_v5 = vadd.f32 1e-06, %v5989_v38 }
 0x3c8   : > { %4405 = vmatprep.subr.bf16.mxu0 %v4404_v49  ;;  %4684 = vrcp.f32 %v1850_v44 }
 0x3c9   : > { %4686 = vrcp.f32 %v1845_v50 }
 0x3ca   : > { %4071 = vmatmul.mubr.f32.gmra.mrb[44].mxu0 %v5955_v63  ;;  %v1860_v63 = vadd.f32 1e-06, %v5981_v52  ;;  %v1875_v52 = vadd.f32 1e-06, %v5991_v18 }
 0x3cb   : > { %4073 = vmatprep.mubr.f32.mxu0 %v5960_v56  ;;  %4407 = vmatpush3.bf16.msra.mxu0 %v4404_v49  ;;  %v1855_v56 = vadd.f32 1e-06, %v5983_v48 }
 0x3cc   : > { %4409 = vmatprep.subr.bf16.mxu0 %v4408_v15  ;;  %4688 = vrcp.f32 %v1860_v63 }
 0x3cd   : > { %4690 = vrcp.f32 %v1855_v56 }
 0x3ce   : > { %4074 = vmatmul.mubr.f32.gmra.mrb[46].mxu0 %v5964_v17  ;;  %v1870_v17 = vadd.f32 1e-06, %v5985_v58  ;;  %v4681_v31 = vpop.eup %4680 }
 0x3cf   : > { %4411 = vmatpush3.bf16.msra.mxu0 %v4408_v15  ;;  %v4683_v57 = vpop.eup %4682 }
 0x3d0   : > { %4692 = vrcp.f32 %v1870_v17  ;;  %v4840_v17 = vld [vmem:[%s5571_s2] sm:$0xff] }
 0x3d1   : > { %4694 = vrcp.f32 %v1865_v32 }
 0x3d2   : > { %v4685_v54 = vpop.eup %4684  ;;  %4696 = vrcp.f32 %v1880_v5 }
 0x3d3   : > { %v4687_v34 = vpop.eup %4686  ;;  %4698 = vrcp.f32 %v1875_v52 }
 0x3d4   : > { %4700 = vrcp.f32 %v1890_v8  ;;  %v4843_v8 = vld [vmem:[%s5571_s2 + $0x18] sm:$0xff] }
 0x3d5   : > { %4702 = vrcp.f32 %v1885_v51 }
 0x3d6   : > { %v4689_v41 = vpop.eup %4688  ;;  %4704 = vrcp.f32 %v1900_v36 }
 0x3d7   : > { %v4691_v37 = vpop.eup %4690  ;;  %4706 = vrcp.f32 %v1895_v22  ;;  %v4845_v22 = vld [vmem:[%s5571_s2 + $0x28] sm:$0xff] }
 0x3d8   : > { %4708 = vrcp.f32 %v1910_v16 }
 0x3d9   : > { %4710 = vrcp.f32 %v1905_v53 }
 0x3da   : > { %v4693_v40 = vpop.eup %4692 }
 0x3db   : > { %v4695_v14 = vpop.eup %4694 }
 0x3dc   : > { %v4697_v24 = vpop.eup %4696 }
 0x3dd   : > { %v4699_v43 = vpop.eup %4698 }
 0x3de   : > { %v4701_v46 = vpop.eup %4700 }
 0x3df   : > { %v4703_v28 = vpop.eup %4702 }
 0x3e0   : > { %v4705_v27 = vpop.eup %4704 }
 0x3e1   : > { %v4707_v7 = vpop.eup %4706 }
 0x3e2   : > { %v4709_v3 = vpop.eup %4708 }
 0x3e3   : > { %v4711_v49 = vpop.eup %4710 }
 0x485   : > { %v4054_v19 = vpop.f32.mrb[32].mxu0 }
 0x486   : > { %v1930_v30 = vmul.f32 %v4681_v31, %v4054_v19  ;;  %v1673_v29 = vpop.f32.mrb[33].mxu0 }
 0x487   : > { %v1929_v60 = vmul.f32 %v4683_v57, %v1673_v29 }
 0x489   : > { %v4057_v48 = vpop.f32.mrb[34].mxu0  ;;  %4164 = vmatprep.mubr.f32.mxu0 %v1929_v60 }
 0x48a   : > { %v1932_v58 = vmul.f32 %v4685_v54, %v4057_v48  ;;  %v1683_v6 = vpop.f32.mrb[35].mxu0  ;;  %4165 = vmatmul.mubr.f32.vlgmr.msra.gmra.mrb[48].mxu0 %v1930_v30  ;;  %v4841_v30 = vld [vmem:[%s5571_s2 + $0x8] sm:$0xff]  ;;  %v4842_v54 = vld [vmem:[%s5571_s2 + $0x10] sm:$0xff] }
 0x48b   : > { %v1931_v33 = vmul.f32 %v4687_v34, %v1683_v6 }
 0x48d   : > { %v4060_v38 = vpop.f32.mrb[36].mxu0  ;;  %4167 = vmatprep.mubr.f32.mxu0 %v1931_v33 }
 0x48e   : > { %v1934_v12 = vmul.f32 %v4689_v41, %v4060_v38  ;;  %v1693_v18 = vpop.f32.mrb[37].mxu0  ;;  %4168 = vmatmul.mubr.f32.gmra.mrb[50].mxu0 %v1932_v58 }
 0x48f   : > { %v1933_v11 = vmul.f32 %v4691_v37, %v1693_v18  ;;  %v4844_v37 = vld [vmem:[%s5571_s2 + $0x20] sm:$0xff] }
 0x491   : > { %v4063_v9 = vpop.f32.mrb[38].mxu0  ;;  %4170 = vmatprep.mubr.f32.mxu0 %v1933_v11 }
 0x492   : > { %v1936_v39 = vmul.f32 %v4693_v40, %v4063_v9  ;;  %v1703_v10 = vpop.f32.mrb[39].mxu0  ;;  %4171 = vmatmul.mubr.f32.gmra.mrb[52].mxu0 %v1934_v12 }
 0x493   : > { %v1935_v25 = vmul.f32 %v4695_v14, %v1703_v10  ;;  %v4846_v10 = vld [vmem:[%s5571_s2 + $0x30] sm:$0xff] }
 0x495   : > { %v4066_v4 = vpop.f32.mrb[40].mxu0  ;;  %4173 = vmatprep.mubr.f32.mxu0 %v1935_v25 }
 0x496   : > { %v1938_v42 = vmul.f32 %v4697_v24, %v4066_v4  ;;  %v1713_v21 = vpop.f32.mrb[41].mxu0  ;;  %4174 = vmatmul.mubr.f32.gmra.mrb[54].mxu0 %v1936_v39  ;;  %v4847_v24 = vld [vmem:[%s5571_s2 + $0x38] sm:$0xff] }
 0x497   : > { %v1937_v23 = vmul.f32 %v4699_v43, %v1713_v21 }
 0x499   : > { %v4069_v20 = vpop.f32.mrb[42].mxu0  ;;  %4176 = vmatprep.mubr.f32.mxu0 %v1937_v23 }
 0x49a   : > { %v1940_v45 = vmul.f32 %v4701_v46, %v4069_v20  ;;  %v1723_v55 = vpop.f32.mrb[43].mxu0  ;;  %4177 = vmatmul.mubr.f32.gmra.mrb[56].mxu0 %v1938_v42  ;;  %v4848_v42 = vld [vmem:[%s5571_s2 + $0x40] sm:$0xff]  ;;  %v4849_v46 = vld [vmem:[%s5571_s2 + $0x48] sm:$0xff] }
 0x49b   : > { %v1939_v26 = vmul.f32 %v4703_v28, %v1723_v55 }
 0x49d   : > { %v4072_v59 = vpop.f32.mrb[44].mxu0  ;;  %4179 = vmatprep.mubr.f32.mxu0 %v1939_v26 }
 0x49e   : > { %v1942_v61 = vmul.f32 %v4705_v27, %v4072_v59  ;;  %v1733_v35 = vpop.f32.mrb[45].mxu0  ;;  %4180 = vmatmul.mubr.f32.gmra.mrb[58].mxu0 %v1940_v45  ;;  %v4850_v45 = vld [vmem:[%s5571_s2 + $0x50] sm:$0xff]  ;;  %v4851_v27 = vld [vmem:[%s5571_s2 + $0x58] sm:$0xff] }
 0x49f   : > { %v1941_v47 = vmul.f32 %v4707_v7, %v1733_v35 }
 0x4a1   : > { %v4075_v2 = vpop.f32.mrb[46].mxu0  ;;  %4182 = vmatprep.mubr.f32.mxu0 %v1941_v47 }
 0x4a2   : > { %v1944_v13 = vmul.f32 %v4709_v3, %v4075_v2  ;;  %v1743_v0 = vpop.f32.mrb[47].mxu0  ;;  %4183 = vmatmul.mubr.f32.gmra.mrb[60].mxu0 %v1942_v61  ;;  %v4852_v61 = vld [vmem:[%s5571_s2 + $0x60] sm:$0xff]  ;;  %v4853_v3 = vld [vmem:[%s5571_s2 + $0x68] sm:$0xff] }
 0x4a3   : > { %v1943_v15 = vmul.f32 %v4711_v49, %v1743_v0 }
 0x4a5   : > { %4185 = vmatprep.mubr.f32.mxu0 %v1943_v15  ;;  %v4855_v15 = vld [vmem:[%s5571_s2 + $0x78] sm:$0xff] }
 0x4a6   : > { %4186 = vmatmul.mubr.f32.gmra.mrb[62].mxu0 %v1944_v13  ;;  %v4854_v13 = vld [vmem:[%s5571_s2 + $0x70] sm:$0xff]  ;;  %s6987_s2 = sld [smem:[#allocation34_spill]] }
 0x55d   : > { %v4166_v1 = vpop.f32.mrb[48].mxu0 }
 0x55e   : > { %v2034_v44 = vpop.f32.mrb[49].mxu0  ;;  %v2040_v63 = vadd.f32 %v4166_v1, %v6055_v62 }
 0x55f   : > { %v2035_v50 = vadd.f32 %v6055_v62, %v2034_v44  ;;  %v2353_v44 = vld [vmem:[#allocation13 + $0x8] sm:$0xff] }
 0x560   : > { %v6065_v29 = vadd.f32 %v4841_v30, %v2040_v63  ;;  %v2352_v63 = vld [vmem:[#allocation13] sm:$0xff] }
 0x561   : > { %v4169_v56 = vpop.f32.mrb[50].mxu0  ;;  %v6060_v32 = vadd.f32 %v4840_v17, %v2035_v50  ;;  %v2355_v50 = vld [vmem:[#allocation13 + $0x18] sm:$0xff]  ;;  %v2354_v17 = vld [vmem:[#allocation13 + $0x10] sm:$0xff] }
 0x562   : > { %v2044_v31 = vpop.f32.mrb[51].mxu0  ;;  %v2050_v60 = vadd.f32 %v4169_v56, %v6055_v62  ;;  %v4412_v56 = vpack.c.bf16 %v2355_v50, %v2353_v44  ;;  %v2369_v44 = vld [vmem:[#allocation13 + $0x88] sm:$0xff]  ;;  %v2371_v50 = vld [vmem:[#allocation13 + $0x98] sm:$0xff] }
 0x563   : > { %2131 = vadd.xlane.f32.xlu1 %v6060_v32  ;;  %v2045_v19 = vadd.f32 %v6055_v62, %v2044_v31  ;;  %v2357_v31 = vld [vmem:[#allocation13 + $0x28] sm:$0xff] }
 0x564   : > { %v6075_v33 = vadd.f32 %v4843_v8, %v2050_v60  ;;  %v2361_v60 = vld [vmem:[#allocation13 + $0x48] sm:$0xff]  ;;  %4413 = vmatprep.subr.bf16.mxu1 %v4412_v56  ;;  %v2368_v56 = vld [vmem:[#allocation13 + $0x80] sm:$0xff] }
 0x565   : > { %v4172_v57 = vpop.f32.mrb[52].mxu0  ;;  %v6070_v48 = vadd.f32 %v4842_v54, %v2045_v19  ;;  %v2359_v19 = vld [vmem:[#allocation13 + $0x38] sm:$0xff] }
 0x566   : > { %v2054_v5 = vpop.f32.mrb[53].mxu0  ;;  %v2060_v41 = vadd.f32 %v4172_v57, %v6055_v62  ;;  %v4414_v57 = vpack.c.bf16 %v2354_v17, %v2352_v63  ;;  %v4416_v30 = vpack.c.bf16 %v2359_v19, %v2357_v31  ;;  %v4428_v63 = vpack.c.bf16 %v2371_v50, %v2369_v44  ;;  %v2370_v17 = vld [vmem:[#allocation13 + $0x90] sm:$0xff] }
 0x567   : > { %2133 = vadd.xlane.f32.xlu1 %v6065_v29  ;;  %v2055_v58 = vadd.f32 %v6055_v62, %v2054_v5  ;;  %v2358_v5 = vld [vmem:[#allocation13 + $0x30] sm:$0xff] }
 0x568   : > { %v6085_v40 = vadd.f32 %v4845_v22, %v2060_v41  ;;  %4415 = vmatpush1.bf16.msra.mxu1 %v4414_v57 }
 0x569   : > { %v4175_v52 = vpop.f32.mrb[54].mxu0  ;;  %v6080_v12 = vadd.f32 %v4844_v37, %v2055_v58  ;;  %4417 = vmatprep.subr.bf16.mxu1 %v4416_v30  ;;  %v2360_v58 = vld [vmem:[#allocation13 + $0x40] sm:$0xff] }
 0x56a   : > { %v2064_v34 = vpop.f32.mrb[55].mxu0  ;;  %v2070_v14 = vadd.f32 %v4175_v52, %v6055_v62  ;;  %v2363_v52 = vld [vmem:[#allocation13 + $0x58] sm:$0xff] }
 0x56b   : > { %2135 = vadd.xlane.f32.xlu1 %v6070_v48  ;;  %v2065_v36 = vadd.f32 %v6055_v62, %v2064_v34  ;;  %v4420_v34 = vpack.c.bf16 %v2363_v52, %v2361_v60  ;;  %v2372_v52 = vld [vmem:[#allocation13 + $0xa0] sm:$0xff] }
 0x56c   : > { %v6095_v4 = vadd.f32 %v4847_v24, %v2070_v14 }
 0x56d   : > { %v4178_v6 = vpop.f32.mrb[56].mxu0  ;;  %v6090_v16 = vadd.f32 %v4846_v10, %v2065_v36 }
 0x56e   : > { %v2074_v51 = vpop.f32.mrb[57].mxu0  ;;  %v2080_v43 = vadd.f32 %v4178_v6, %v6055_v62  ;;  %v2362_v6 = vld [vmem:[#allocation13 + $0x50] sm:$0xff] }
 0x56f   : > { %2137 = vadd.xlane.f32.xlu1 %v6075_v33  ;;  %v2075_v53 = vadd.f32 %v6055_v62, %v2074_v51  ;;  %v4422_v8 = vpack.c.bf16 %v2362_v6, %v2360_v58 }
 0x570   : > { %v6105_v20 = vadd.f32 %v4849_v46, %v2080_v43 }
 0x571   : > { %v4181_v38 = vpop.f32.mrb[58].mxu0  ;;  %v6100_v21 = vadd.f32 %v4848_v42, %v2075_v53 }
 0x572   : > { %v2084_v18 = vpop.f32.mrb[59].mxu0  ;;  %v2090_v28 = vadd.f32 %v4181_v38, %v6055_v62 }
 0x573   : > { %2139 = vadd.xlane.f32.xlu1 %v6080_v12  ;;  %v2085_v23 = vadd.f32 %v6055_v62, %v2084_v18 }
 0x574   : > { %v6115_v59 = vadd.f32 %v4851_v27, %v2090_v28  ;;  %v2365_v27 = vld [vmem:[#allocation13 + $0x68] sm:$0xff] }
 0x575   : > { %v4184_v11 = vpop.f32.mrb[60].mxu0  ;;  %v6110_v55 = vadd.f32 %v4850_v45, %v2085_v23 }
 0x576   : > { %v2094_v9 = vpop.f32.mrb[61].mxu0  ;;  %v2100_v7 = vadd.f32 %v4184_v11, %v6055_v62 }
 0x577   : > { %2141 = vadd.xlane.f32.xlu1 %v6085_v40  ;;  %v2095_v26 = vadd.f32 %v6055_v62, %v2094_v9 }
 0x578   : > { %v6125_v2 = vadd.f32 %v4853_v3, %v2100_v7  ;;  %v2367_v7 = vld [vmem:[#allocation13 + $0x78] sm:$0xff] }
 0x579   : > { %v4187_v39 = vpop.f32.mrb[62].mxu0  ;;  %v6120_v35 = vadd.f32 %v4852_v61, %v2095_v26  ;;  %v4424_v61 = vpack.c.bf16 %v2367_v7, %v2365_v27 }
 0x57a   : > { %v2104_v25 = vpop.f32.mrb[63].mxu0  ;;  %v2110_v49 = vadd.f32 %v4187_v39, %v6055_v62 }
 0x57b   : > { %2143 = vadd.xlane.f32.xlu1 %v6090_v16  ;;  %v2105_v47 = vadd.f32 %v6055_v62, %v2104_v25  ;;  %v2356_v62 = vld [vmem:[#allocation13 + $0x20] sm:$0xff] }
 0x57c   : > { %v6134_v1 = vadd.f32 %v4855_v15, %v2110_v49  ;;  %v4418_v54 = vpack.c.bf16 %v2358_v5, %v2356_v62  ;;  %v2373_v62 = vld [vmem:[#allocation13 + $0xa8] sm:$0xff]  ;;  %v2375_v5 = vld [vmem:[#allocation13 + $0xb8] sm:$0xff] }
 0x57d   : > { %v6130_v0 = vadd.f32 %v4854_v13, %v2105_v47  ;;  %v2366_v47 = vld [vmem:[#allocation13 + $0x70] sm:$0xff]  ;;  %v4432_v60 = vpack.c.bf16 %v2375_v5, %v2373_v62 }
 0x57e   : > { %4419 = vmatpush1.bf16.msra.mxu1 %v4418_v54  ;;  %v2374_v54 = vld [vmem:[#allocation13 + $0xb0] sm:$0xff] }
 0x57f   : > { %2145 = vadd.xlane.f32.xlu1 %v6095_v4  ;;  %4421 = vmatprep.subr.bf16.mxu1 %v4420_v34 }
 0x582   : > { %4423 = vmatpush1.bf16.msra.mxu1 %v4422_v8 }
 0x583   : > { %2147 = vadd.xlane.f32.xlu1 %v6100_v21  ;;  %4425 = vmatprep.subr.bf16.mxu1 %v4424_v61 }
 0x587   : > { %2149 = vadd.xlane.f32.xlu1 %v6105_v20 }
 0x58b   : > { %2151 = vadd.xlane.f32.xlu1 %v6110_v55 }
 0x58f   : > { %2153 = vadd.xlane.f32.xlu1 %v6115_v59 }
 0x593   : > { %2155 = vadd.xlane.f32.xlu1 %v6120_v35 }
 0x597   : > { %2157 = vadd.xlane.f32.xlu1 %v6125_v2 }
 0x59b   : > { %2159 = vadd.xlane.f32.xlu1 %v6130_v0 }
 0x59f   : > { %2161 = vadd.xlane.f32.xlu1 %v6134_v1 }
 0x5f0   : > { %v2132_v51 = vpop.xlane.xlu1 %2131 }
 0x5f1   : > { %v2164_v41 = vmul.f32 0.0078125, %v2132_v51  ;;  %v2377_v51 = vld [vmem:[#allocation13 + $0xc8] sm:$0xff] }
 0x5f3   : > { %v6138_v38 = vsub.f32 %v6060_v32, %v2164_v41  ;;  %v2379_v41 = vld [vmem:[#allocation13 + $0xd8] sm:$0xff] }
 0x5f4   : > { %v2134_v37 = vpop.xlane.xlu1 %2133 }
 0x5f5   : > { %v2165_v18 = vmul.f32 0.0078125, %v2134_v37  ;;  %v2196_v36 = vmul.f32 %v6138_v38, %v6138_v38  ;;  %v2376_v37 = vld [vmem:[#allocation13 + $0xc0] sm:$0xff] }
 0x5f7   : > { %v6143_v11 = vsub.f32 %v6065_v29, %v2165_v18  ;;  %2212 = vadd.xlane.f32.xlu0 %v2196_v36  ;;  %v4436_v18 = vpack.c.bf16 %v2379_v41, %v2377_v51  ;;  %v2378_v36 = vld [vmem:[#allocation13 + $0xd0] sm:$0xff]  ;;  %v6227_v41 = vld [vmem:[%s6988_s19] ss:$0 sm:$0xff]  ;;  %s7002_s19 = sld [smem:[#allocation39_spill]] }
 0x5f8   : > { %v2136_v22 = vpop.xlane.xlu1 %2135 }
 0x5f9   : > { %v2166_v9 = vmul.f32 0.0078125, %v2136_v22  ;;  %v2197_v14 = vmul.f32 %v6143_v11, %v6143_v11 }
 0x5fb   : > { %v6148_v39 = vsub.f32 %v6070_v48, %v2166_v9  ;;  %2214 = vadd.xlane.f32.xlu1 %v2197_v14 }
 0x5fc   : > { %v2138_v32 = vpop.xlane.xlu1 %2137 }
 0x5fd   : > { %v2167_v10 = vmul.f32 0.0078125, %v2138_v32  ;;  %v2198_v25 = vmul.f32 %v6148_v39, %v6148_v39 }
 0x5ff   : > { %v6153_v53 = vsub.f32 %v6075_v33, %v2167_v10  ;;  %2216 = vadd.xlane.f32.xlu1 %v2198_v25  ;;  %v2381_v10 = vld [vmem:[#allocation13 + $0xe8] sm:$0xff]  ;;  %v2383_v25 = vld [vmem:[#allocation13 + $0xf8] sm:$0xff] }
 0x600   : > { %v2140_v29 = vpop.xlane.xlu1 %2139 }
 0x601   : > { %v2168_v24 = vmul.f32 0.0078125, %v2140_v29  ;;  %v2199_v43 = vmul.f32 %v6153_v53, %v6153_v53  ;;  %v2380_v29 = vld [vmem:[#allocation13 + $0xe0] sm:$0xff] }
 0x603   : > { %v6158_v42 = vsub.f32 %v6080_v12, %v2168_v24  ;;  %2218 = vadd.xlane.f32.xlu1 %v2199_v43  ;;  %v2364_v12 = vld [vmem:[#allocation13 + $0x60] sm:$0xff]  ;;  %v4440_v24 = vpack.c.bf16 %v2383_v25, %v2381_v10  ;;  %v2382_v43 = vld [vmem:[#allocation13 + $0xf0] sm:$0xff] }
 0x604   : > { %v2142_v48 = vpop.xlane.xlu1 %2141  ;;  %v4426_v49 = vpack.c.bf16 %v2366_v47, %v2364_v12 }
 0x605   : > { %v2169_v23 = vmul.f32 0.0078125, %v2142_v48  ;;  %v2200_v46 = vmul.f32 %v6158_v42, %v6158_v42 }
 0x606   : > { %4427 = vmatpush1.bf16.msra.mxu1 %v4426_v49 }
 0x607   : > { %v6163_v28 = vsub.f32 %v6085_v40, %v2169_v23  ;;  %2220 = vadd.xlane.f32.xlu1 %v2200_v46  ;;  %4429 = vmatprep.subr.bf16.mxu1 %v4428_v63 }
 0x608   : > { %v2144_v33 = vpop.xlane.xlu1 %2143 }
 0x609   : > { %v2170_v45 = vmul.f32 0.0078125, %v2144_v33  ;;  %v2201_v26 = vmul.f32 %v6163_v28, %v6163_v28 }
 0x60b   : > { %v6168_v3 = vsub.f32 %v6090_v16, %v2170_v45  ;;  %2222 = vadd.xlane.f32.xlu1 %v2201_v26  ;;  %v4430_v16 = vpack.c.bf16 %v2370_v17, %v2368_v56  ;;  %v5178_v45 = vmov 0.0  }
 0x60c   : > { %v2146_v13 = vpop.xlane.xlu1 %2145  ;;  %2460 = vmatprep.mubr.f32.mxu1 %v5178_v45 }
 0x60d   : > { %v2171_v40 = vmul.f32 0.0078125, %v2146_v13  ;;  %v2202_v15 = vmul.f32 %v6168_v3, %v6168_v3  ;;  %4431 = vmatpush1.bf16.msra.mxu1 %v4430_v16 }
 0x60e   : > { %4433 = vmatprep.subr.bf16.mxu1 %v4432_v60 }
 0x60f   : > { %v6173_v31 = vsub.f32 %v6095_v4, %v2171_v40  ;;  %2224 = vadd.xlane.f32.xlu1 %v2202_v15  ;;  %v4434_v4 = vpack.c.bf16 %v2374_v54, %v2372_v52 }
 0x610   : > { %v2148_v19 = vpop.xlane.xlu1 %2147 }
 0x611   : > { %v2172_v57 = vmul.f32 0.0078125, %v2148_v19  ;;  %v2203_v30 = vmul.f32 %v6173_v31, %v6173_v31  ;;  %4435 = vmatpush1.bf16.msra.mxu1 %v4434_v4 }
 0x612   : > { %4437 = vmatprep.subr.bf16.mxu1 %v4436_v18 }
 0x613   : > { %v6178_v34 = vsub.f32 %v6100_v21, %v2172_v57  ;;  %2226 = vadd.xlane.f32.xlu1 %v2203_v30  ;;  %v4438_v21 = vpack.c.bf16 %v2378_v36, %v2376_v37 }
 0x614   : > { %v2150_v58 = vpop.xlane.xlu1 %2149 }
 0x615   : > { %v2173_v6 = vmul.f32 0.0078125, %v2150_v58  ;;  %v2204_v8 = vmul.f32 %v6178_v34, %v6178_v34  ;;  %4439 = vmatpush1.bf16.msra.mxu1 %v4438_v21  ;;  %v6221_v58 = vld [vmem:[%s6987_s2] ss:$0 sm:$0xff]  ;;  %s7001_s2 = sld [smem:[#allocation38_spill]] }
 0x616   : > { %4441 = vmatprep.subr.bf16.mxu1 %v4440_v24 }
 0x617   : > { %v6183_v22 = vsub.f32 %v6105_v20, %v2173_v6  ;;  %2228 = vadd.xlane.f32.xlu1 %v2204_v8  ;;  %v4442_v20 = vpack.c.bf16 %v2382_v43, %v2380_v29 }
 0x618   : > { %v2152_v9 = vpop.xlane.xlu1 %2151 }
 0x619   : > { %v2174_v14 = vmul.f32 0.0078125, %v2152_v9  ;;  %v2205_v32 = vmul.f32 %v6183_v22, %v6183_v22  ;;  %4443 = vmatpush1.bf16.msra.mxu1 %v4442_v20 }
 0x61b   : > { %v6188_v48 = vsub.f32 %v6110_v55, %v2174_v14  ;;  %2230 = vadd.xlane.f32.xlu1 %v2205_v32 }
 0x61c   : > { %v2154_v23 = vpop.xlane.xlu1 %2153 }
 0x61d   : > { %v2175_v46 = vmul.f32 0.0078125, %v2154_v23  ;;  %v2206_v33 = vmul.f32 %v6188_v48, %v6188_v48 }
 0x61f   : > { %v6194_v26 = vsub.f32 %v6115_v59, %v2175_v46  ;;  %2232 = vadd.xlane.f32.xlu1 %v2206_v33 }
 0x620   : > { %v2156_v27 = vpop.xlane.xlu1 %2155 }
 0x621   : > { %v2176_v7 = vmul.f32 0.0078125, %v2156_v27  ;;  %v2207_v55 = vmul.f32 %v6194_v26, %v6194_v26 }
 0x623   : > { %v6199_v61 = vsub.f32 %v6120_v35, %v2176_v7  ;;  %2234 = vadd.xlane.f32.xlu1 %v2207_v55 }
 0x624   : > { %v2158_v12 = vpop.xlane.xlu1 %2157 }
 0x625   : > { %v2177_v47 = vmul.f32 0.0078125, %v2158_v12  ;;  %v2208_v49 = vmul.f32 %v6199_v61, %v6199_v61 }
 0x627   : > { %v6204_v13 = vsub.f32 %v6125_v2, %v2177_v47  ;;  %2236 = vadd.xlane.f32.xlu1 %v2208_v49 }
 0x628   : > { %v2160_v59 = vpop.xlane.xlu1 %2159 }
 0x629   : > { %v2178_v40 = vmul.f32 0.0078125, %v2160_v59  ;;  %v2209_v15 = vmul.f32 %v6204_v13, %v6204_v13 }
 0x62b   : > { %v6209_v44 = vsub.f32 %v6130_v0, %v2178_v40  ;;  %2238 = vadd.xlane.f32.xlu0 %v2209_v15 }
 0x62c   : > { %v2162_v35 = vpop.xlane.xlu1 %2161 }
 0x62d   : > { %v2179_v50 = vmul.f32 0.0078125, %v2162_v35  ;;  %v2210_v63 = vmul.f32 %v6209_v44, %v6209_v44 }
 0x62f   : > { %v6214_v56 = vsub.f32 %v6134_v1, %v2179_v50  ;;  %2240 = vadd.xlane.f32.xlu1 %v2210_v63 }
 0x631   : > { %v2211_v2 = vmul.f32 %v6214_v56, %v6214_v56 }
 0x633   : > { %2242 = vadd.xlane.f32.xlu0 %v2211_v2 }
 0x684   : > { %v2213_v17 = vpop.xlane.xlu0 %2212 }
 0x685   : > { %v2244_v16 = vmul.f32 0.0078125, %v2213_v17 }
 0x687   : > { %v2260_v19 = vadd.f32 1e-05, %v2244_v16 }
 0x688   : > { %v2215_v57 = vpop.xlane.xlu1 %2214 }
 0x689   : > { %4712 = vrsqrt.f32 %v2260_v19  ;;  %v2245_v0 = vmul.f32 0.0078125, %v2215_v57 }
 0x68b   : > { %v2261_v30 = vadd.f32 1e-05, %v2245_v0 }
 0x68c   : > { %v2217_v62 = vpop.xlane.xlu1 %2216 }
 0x68d   : > { %4714 = vrsqrt.f32 %v2261_v30  ;;  %v2246_v5 = vmul.f32 0.0078125, %v2217_v62 }
 0x68f   : > { %v2262_v60 = vadd.f32 1e-05, %v2246_v5 }
 0x690   : > { %v2219_v52 = vpop.xlane.xlu1 %2218 }
 0x691   : > { %4716 = vrsqrt.f32 %v2262_v60  ;;  %v2247_v1 = vmul.f32 0.0078125, %v2219_v52 }
 0x693   : > { %v4713_v54 = vpop.eup %4712  ;;  %v2263_v4 = vadd.f32 1e-05, %v2247_v1 }
 0x694   : > { %v2292_v6 = vmul.f32 %v4713_v54, %v6138_v38  ;;  %v2221_v8 = vpop.xlane.xlu1 %2220 }
 0x695   : > { %4718 = vrsqrt.f32 %v2263_v4  ;;  %v2248_v51 = vmul.f32 0.0078125, %v2221_v8 }
 0x696   : > { %v2314_v37 = vmul.f32 %v6221_v58, %v2292_v6 }
 0x697   : > { %v4715_v18 = vpop.eup %4714  ;;  %v2264_v36 = vadd.f32 1e-05, %v2248_v51 }
 0x698   : > { %v2223_v21 = vpop.xlane.xlu1 %2222  ;;  %v6231_v9 = vadd.f32 %v6227_v41, %v2314_v37  ;;  %v2293_v14 = vmul.f32 %v4715_v18, %v6143_v11 }
 0x699   : > { %4720 = vrsqrt.f32 %v2264_v36  ;;  %v2249_v38 = vmul.f32 0.0078125, %v2223_v21 }
 0x69a   : > { %2461 = vmatmul.mubr.f32.vlgmr.msra.gmra.mrb[48].mxu1 %v6231_v9  ;;  %v2315_v32 = vmul.f32 %v6221_v58, %v2293_v14 }
 0x69b   : > { %v4717_v10 = vpop.eup %4716  ;;  %v2265_v25 = vadd.f32 1e-05, %v2249_v38  ;;  %2466 = vmatprep.mubr.f32.mxu1 %v5178_v45 }
 0x69c   : > { %v2225_v29 = vpop.xlane.xlu1 %2224  ;;  %v6238_v24 = vadd.f32 %v6227_v41, %v2315_v32  ;;  %v2294_v43 = vmul.f32 %v4717_v10, %v6148_v39 }
 0x69d   : > { %4722 = vrsqrt.f32 %v2265_v25  ;;  %v2250_v20 = vmul.f32 0.0078125, %v2225_v29 }
 0x69e   : > { %2467 = vmatmul.mubr.f32.gmra.mrb[50].mxu1 %v6238_v24  ;;  %v2316_v11 = vmul.f32 %v6221_v58, %v2294_v43 }
 0x69f   : > { %v4719_v23 = vpop.eup %4718  ;;  %v2266_v46 = vadd.f32 1e-05, %v2250_v20  ;;  %2472 = vmatprep.mubr.f32.mxu1 %v5178_v45 }
 0x6a0   : > { %v2227_v33 = vpop.xlane.xlu1 %2226  ;;  %v6245_v27 = vadd.f32 %v6227_v41, %v2316_v11  ;;  %v2295_v7 = vmul.f32 %v4719_v23, %v6153_v53 }
 0x6a1   : > { %4724 = vrsqrt.f32 %v2266_v46  ;;  %v2251_v55 = vmul.f32 0.0078125, %v2227_v33 }
 0x6a2   : > { %2473 = vmatmul.mubr.f32.gmra.mrb[52].mxu1 %v6245_v27  ;;  %v2317_v39 = vmul.f32 %v6221_v58, %v2295_v7 }
 0x6a3   : > { %v4721_v12 = vpop.eup %4720  ;;  %v2267_v47 = vadd.f32 1e-05, %v2251_v55  ;;  %2478 = vmatprep.mubr.f32.mxu1 %v5178_v45 }
 0x6a4   : > { %v2229_v49 = vpop.xlane.xlu1 %2228  ;;  %v6252_v59 = vadd.f32 %v6227_v41, %v2317_v39  ;;  %v2296_v40 = vmul.f32 %v4721_v12, %v6158_v42 }
 0x6a5   : > { %4726 = vrsqrt.f32 %v2267_v47  ;;  %v2252_v15 = vmul.f32 0.0078125, %v2229_v49 }
 0x6a6   : > { %2479 = vmatmul.mubr.f32.gmra.mrb[54].mxu1 %v6252_v59  ;;  %v2318_v53 = vmul.f32 %v6221_v58, %v2296_v40 }
 0x6a7   : > { %v4723_v35 = vpop.eup %4722  ;;  %v2268_v50 = vadd.f32 1e-05, %v2252_v15  ;;  %2484 = vmatprep.mubr.f32.mxu1 %v5178_v45 }
 0x6a8   : > { %v2231_v63 = vpop.xlane.xlu1 %2230  ;;  %v6259_v2 = vadd.f32 %v6227_v41, %v2318_v53  ;;  %v2297_v17 = vmul.f32 %v4723_v35, %v6163_v28 }
 0x6a9   : > { %4728 = vrsqrt.f32 %v2268_v50  ;;  %v2253_v16 = vmul.f32 0.0078125, %v2231_v63 }
 0x6aa   : > { %2485 = vmatmul.mubr.f32.gmra.mrb[56].mxu1 %v6259_v2  ;;  %v2319_v42 = vmul.f32 %v6221_v58, %v2297_v17 }
 0x6ab   : > { %v4725_v19 = vpop.eup %4724  ;;  %v2269_v57 = vadd.f32 1e-05, %v2253_v16  ;;  %2490 = vmatprep.mubr.f32.mxu1 %v5178_v45 }
 0x6ac   : > { %v2233_v0 = vpop.xlane.xlu1 %2232  ;;  %v6266_v30 = vadd.f32 %v6227_v41, %v2319_v42  ;;  %v2298_v62 = vmul.f32 %v4725_v19, %v6168_v3 }
 0x6ad   : > { %4730 = vrsqrt.f32 %v2269_v57  ;;  %v2254_v5 = vmul.f32 0.0078125, %v2233_v0 }
 0x6ae   : > { %2491 = vmatmul.mubr.f32.gmra.mrb[58].mxu1 %v6266_v30  ;;  %v2320_v28 = vmul.f32 %v6221_v58, %v2298_v62 }
 0x6af   : > { %v4727_v60 = vpop.eup %4726  ;;  %v2270_v52 = vadd.f32 1e-05, %v2254_v5  ;;  %2496 = vmatprep.mubr.f32.mxu1 %v5178_v45 }
 0x6b0   : > { %v2235_v1 = vpop.xlane.xlu1 %2234  ;;  %v6273_v54 = vadd.f32 %v6227_v41, %v2320_v28  ;;  %v2299_v4 = vmul.f32 %v4727_v60, %v6173_v31  ;;  %v2861_v28 = vld [vmem:[#allocation14 + $0x80] sm:$0xff]  ;;  %v2862_v60 = vld [vmem:[#allocation14 + $0x88] sm:$0xff] }
 0x6b1   : > { %4732 = vrsqrt.f32 %v2270_v52  ;;  %v2255_v6 = vmul.f32 0.0078125, %v2235_v1  ;;  %v4444_v52 = vpack.c.bf16 %v2862_v60, %v2861_v28  ;;  %v2845_v1 = vld [vmem:[#allocation14] sm:$0xff]  ;;  %v2386_v28 = vlaneseq }
 0x6b2   : > { %2497 = vmatmul.mubr.f32.gmra.mrb[60].mxu1 %v6273_v54  ;;  %v2321_v3 = vmul.f32 %v6221_v58, %v2299_v4  ;;  %v2846_v4 = vld [vmem:[#allocation14 + $0x8] sm:$0xff] }
 0x6b3   : > { %v4729_v8 = vpop.eup %4728  ;;  %v2271_v51 = vadd.f32 1e-05, %v2255_v6  ;;  %2502 = vmatprep.mubr.f32.mxu1 %v5178_v45  ;;  %v4446_v6 = vpack.c.bf16 %v2846_v4, %v2845_v1  ;;  %4445 = vmatprep.subr.bf16.mxu0 %v4444_v52  ;;  %v2387_v60 = vshrl.u32 %v2386_v28, 7  ;;  %v2384_v1 = vld [vmem:[%s6994_s4] sm:$0x3] }
 0x6b4   : > { %v2237_v37 = vpop.xlane.xlu1 %2236  ;;  %v6280_v18 = vadd.f32 %v6227_v41, %v2321_v3  ;;  %v2300_v36 = vmul.f32 %v4729_v8, %v6178_v34  ;;  %4476 = vmatprep.subr.bf16.mxu1 %v4444_v52  ;;  %v2864_v3 = vld [vmem:[#allocation14 + $0x98] sm:$0xff]  ;;  %v2847_v8 = vld [vmem:[#allocation14 + $0x10] sm:$0xff] }
 0x6b5   : > { %4734 = vrsqrt.f32 %v2271_v51  ;;  %v2256_v21 = vmul.f32 0.0078125, %v2237_v37  ;;  %4447 = vmatpush3.bf16.msra.mxu0 %v4446_v6  ;;  %4484 = vmatpush3.bf16.msra.mxu1 %v4446_v6  ;;  %v2866_v37 = vld [vmem:[#allocation14 + $0xa8] sm:$0xff]  ;;  %v2388_v52 = vsub.s32 0, %v2387_v60  ;;  %v2392_v4 = vsub.s32 1, %v2387_v60 }
 0x6b6   : > { %2503 = vmatmul.mubr.f32.gmra.mrb[62].mxu1 %v6280_v18  ;;  %v2322_v31 = vmul.f32 %v6221_v58, %v2300_v36 }
 0x6b7   : > { %v4731_v14 = vpop.eup %4730  ;;  %v2272_v38 = vadd.f32 1e-05, %v2256_v21  ;;  %2508 = vmatprep.mubr.f32.mxu1 %v5178_v45  ;;  %v2849_v21 = vld [vmem:[#allocation14 + $0x20] sm:$0xff]  ;;  %v6342_v6 = vrot.slane %v2384_v1, %v2388_v52 }
 0x6b8   : > { %v2239_v32 = vpop.xlane.xlu0 %2238  ;;  %v6287_v10 = vadd.f32 %v6227_v41, %v2322_v31  ;;  %v2301_v25 = vmul.f32 %v4731_v14, %v6183_v22  ;;  %v2850_v31 = vld [vmem:[#allocation14 + $0x28] sm:$0xff] }
 0x6b9   : > { %4736 = vrsqrt.f32 %v2272_v38  ;;  %v2257_v29 = vmul.f32 0.0078125, %v2239_v32  ;;  %v4454_v14 = vpack.c.bf16 %v2850_v31, %v2849_v21  ;;  %v2867_v38 = vld [vmem:[#allocation14 + $0xb0] sm:$0xff]  ;;  %v2868_v32 = vld [vmem:[#allocation14 + $0xb8] sm:$0xff] }
 0x6ba   : > { %2509 = vmatmul.mubr.f32.gmra.mrb[64].mxu1 %v6287_v10  ;;  %v2323_v34 = vmul.f32 %v6221_v58, %v2301_v25  ;;  %v4456_v25 = vpack.c.bf16 %v2868_v32, %v2867_v38 }
 0x6bb   : > { %v4733_v43 = vpop.eup %4732  ;;  %v2273_v20 = vadd.f32 1e-05, %v2257_v29  ;;  %2514 = vmatprep.mubr.f32.mxu1 %v5178_v45  ;;  %v2851_v29 = vld [vmem:[#allocation14 + $0x30] sm:$0xff] }
 0x6bc   : > { %v2241_v11 = vpop.xlane.xlu1 %2240  ;;  %v6294_v23 = vadd.f32 %v6227_v41, %v2323_v34  ;;  %v2302_v46 = vmul.f32 %v4733_v43, %v6188_v48  ;;  %v2852_v34 = vld [vmem:[#allocation14 + $0x38] sm:$0xff] }
 0x6bd   : > { %4738 = vrsqrt.f32 %v2273_v20  ;;  %v2258_v33 = vmul.f32 0.0078125, %v2241_v11  ;;  %v4458_v43 = vpack.c.bf16 %v2852_v34, %v2851_v29  ;;  %v2869_v20 = vld [vmem:[#allocation14 + $0xc0] sm:$0xff]  ;;  %v2870_v11 = vld [vmem:[#allocation14 + $0xc8] sm:$0xff] }
 0x6be   : > { %2515 = vmatmul.mubr.f32.gmra.mrb[66].mxu1 %v6294_v23  ;;  %v2324_v22 = vmul.f32 %v6221_v58, %v2302_v46  ;;  %v4460_v46 = vpack.c.bf16 %v2870_v11, %v2869_v20 }
 0x6bf   : > { %v4735_v7 = vpop.eup %4734  ;;  %v2274_v55 = vadd.f32 1e-05, %v2258_v33  ;;  %2520 = vmatprep.mubr.f32.mxu1 %v5178_v45  ;;  %v2853_v33 = vld [vmem:[#allocation14 + $0x40] sm:$0xff] }
 0x6c0   : > { %v2243_v39 = vpop.xlane.xlu0 %2242  ;;  %v6301_v12 = vadd.f32 %v6227_v41, %v2324_v22  ;;  %v2303_v47 = vmul.f32 %v4735_v7, %v6194_v26  ;;  %v2854_v22 = vld [vmem:[#allocation14 + $0x48] sm:$0xff] }
 0x6c1   : > { %4740 = vrsqrt.f32 %v2274_v55  ;;  %v2259_v49 = vmul.f32 0.0078125, %v2243_v39  ;;  %v4462_v7 = vpack.c.bf16 %v2854_v22, %v2853_v33  ;;  %v2871_v55 = vld [vmem:[#allocation14 + $0xd0] sm:$0xff]  ;;  %v2872_v39 = vld [vmem:[#allocation14 + $0xd8] sm:$0xff] }
 0x6c2   : > { %2521 = vmatmul.mubr.f32.gmra.mrb[68].mxu1 %v6301_v12  ;;  %v2325_v48 = vmul.f32 %v6221_v58, %v2303_v47  ;;  %v4464_v47 = vpack.c.bf16 %v2872_v39, %v2871_v55 }
 0x6c3   : > { %v4737_v40 = vpop.eup %4736  ;;  %v2275_v15 = vadd.f32 1e-05, %v2259_v49  ;;  %2526 = vmatprep.mubr.f32.mxu1 %v5178_v45  ;;  %v2855_v49 = vld [vmem:[#allocation14 + $0x50] sm:$0xff] }
 0x6c4   : > { %v6308_v53 = vadd.f32 %v6227_v41, %v2325_v48  ;;  %v2304_v35 = vmul.f32 %v4737_v40, %v6199_v61  ;;  %v2856_v48 = vld [vmem:[#allocation14 + $0x58] sm:$0xff] }
 0x6c5   : > { %4742 = vrsqrt.f32 %v2275_v15  ;;  %v4466_v40 = vpack.c.bf16 %v2856_v48, %v2855_v49  ;;  %v2873_v15 = vld [vmem:[#allocation14 + $0xe0] sm:$0xff] }
 0x6c6   : > { %6989 = vst [vmem:[#allocation23_spill] sm:$0xff] %v6308_v53  ;;  %2527 = vmatmul.mubr.f32.gmra.mrb[70].mxu1 %v6308_v53  ;;  %v2326_v26 = vmul.f32 %v6221_v58, %v2304_v35  ;;  %v2874_v35 = vld [vmem:[#allocation14 + $0xe8] sm:$0xff] }
 0x6c7   : > { %v4739_v50 = vpop.eup %4738  ;;  %2532 = vmatprep.mubr.f32.mxu1 %v5178_v45 }
 0x6c8   : > { %v6315_v63 = vadd.f32 %v6227_v41, %v2326_v26  ;;  %v2305_v17 = vmul.f32 %v4739_v50, %v6204_v13  ;;  %v4468_v26 = vpack.c.bf16 %v2874_v35, %v2873_v15  ;;  %v2857_v50 = vld [vmem:[#allocation14 + $0x60] sm:$0xff] }
 0x6ca   : > { %6990 = vst [vmem:[#allocation24_spill] sm:$0xff] %v6315_v63  ;;  %2533 = vmatmul.mubr.f32.gmra.mrb[72].mxu1 %v6315_v63  ;;  %v2327_v16 = vmul.f32 %v6221_v58, %v2305_v17  ;;  %v2858_v17 = vld [vmem:[#allocation14 + $0x68] sm:$0xff] }
 0x6cb   : > { %v4741_v42 = vpop.eup %4740  ;;  %2538 = vmatprep.mubr.f32.mxu1 %v5178_v45 }
 0x6cc   : > { %v6322_v61 = vadd.f32 %v6227_v41, %v2327_v16  ;;  %v2306_v19 = vmul.f32 %v4741_v42, %v6209_v44  ;;  %v4470_v16 = vpack.c.bf16 %v2858_v17, %v2857_v50  ;;  %v2875_v42 = vld [vmem:[#allocation14 + $0xf0] sm:$0xff] }
 0x6ce   : > { %6991 = vst [vmem:[#allocation25_spill] sm:$0xff] %v6322_v61  ;;  %2539 = vmatmul.mubr.f32.gmra.mrb[74].mxu1 %v6322_v61  ;;  %v2328_v57 = vmul.f32 %v6221_v58, %v2306_v19  ;;  %v2876_v19 = vld [vmem:[#allocation14 + $0xf8] sm:$0xff] }
 0x6cf   : > { %v4743_v0 = vpop.eup %4742  ;;  %2544 = vmatprep.mubr.f32.mxu1 %v5178_v45 }
 0x6d0   : > { %v6329_v13 = vadd.f32 %v6227_v41, %v2328_v57  ;;  %v2307_v62 = vmul.f32 %v4743_v0, %v6214_v56  ;;  %v2863_v56 = vld [vmem:[#allocation14 + $0x90] sm:$0xff]  ;;  %v4472_v57 = vpack.c.bf16 %v2876_v19, %v2875_v42 }
 0x6d1   : > { %v2859_v0 = vld [vmem:[#allocation14 + $0x70] sm:$0xff] }
 0x6d2   : > { %6992 = vst [vmem:[#allocation26_spill] sm:$0xff] %v6329_v13  ;;  %2545 = vmatmul.mubr.f32.gmra.mrb[76].mxu1 %v6329_v13  ;;  %v2329_v5 = vmul.f32 %v6221_v58, %v2307_v62  ;;  %v4448_v58 = vpack.c.bf16 %v2864_v3, %v2863_v56  ;;  %v2860_v62 = vld [vmem:[#allocation14 + $0x78] sm:$0xff]  ;;  %v6344_v56 = vrot.slane %v2384_v1, %v2392_v4 }
 0x6d3   : > { %2550 = vmatprep.mubr.f32.mxu1 %v5178_v45  ;;  %v2848_v45 = vld [vmem:[#allocation14 + $0x18] sm:$0xff] }
 0x6d4   : > { %v6336_v44 = vadd.f32 %v6227_v41, %v2329_v5  ;;  %v4450_v51 = vpack.c.bf16 %v2848_v45, %v2847_v8  ;;  %4449 = vmatprep.subr.bf16.mxu0 %v4448_v58  ;;  %4477 = vmatprep.subr.bf16.mxu1 %v4448_v58  ;;  %v2865_v41 = vld [vmem:[#allocation14 + $0xa0] sm:$0xff]  ;;  %v4474_v5 = vpack.c.bf16 %v2860_v62, %v2859_v0 }
 0x6d5   : > { %v4452_v36 = vpack.c.bf16 %v2866_v37, %v2865_v41 }
 0x6d6   : > { %6993 = vst [vmem:[#allocation27_spill] sm:$0xff] %v6336_v44  ;;  %2551 = vmatmul.mubr.f32.gmra.mrb[78].mxu1 %v6336_v44  ;;  %4451 = vmatpush3.bf16.msra.mxu0 %v4450_v51 }
 0x6d7   : > { %4485 = vmatpush3.bf16.msra.mxu1 %v4450_v51  ;;  %4453 = vmatprep.subr.bf16.mxu0 %v4452_v36 }
 0x6d8   : > { %4478 = vmatprep.subr.bf16.mxu1 %v4452_v36 }
 0x6da   : > { %4455 = vmatpush3.bf16.msra.mxu0 %v4454_v14 }
 0x6db   : > { %4486 = vmatpush3.bf16.msra.mxu1 %v4454_v14  ;;  %4457 = vmatprep.subr.bf16.mxu0 %v4456_v25 }
 0x6dc   : > { %4479 = vmatprep.subr.bf16.mxu1 %v4456_v25 }
 0x6de   : > { %4459 = vmatpush3.bf16.msra.mxu0 %v4458_v43 }
 0x6df   : > { %4487 = vmatpush3.bf16.msra.mxu1 %v4458_v43  ;;  %4461 = vmatprep.subr.bf16.mxu0 %v4460_v46 }
 0x6e0   : > { %4480 = vmatprep.subr.bf16.mxu1 %v4460_v46 }
 0x6e2   : > { %4463 = vmatpush3.bf16.msra.mxu0 %v4462_v7 }
 0x6e3   : > { %4488 = vmatpush3.bf16.msra.mxu1 %v4462_v7  ;;  %4465 = vmatprep.subr.bf16.mxu0 %v4464_v47 }
 0x6e4   : > { %4481 = vmatprep.subr.bf16.mxu1 %v4464_v47 }
 0x6e6   : > { %4467 = vmatpush3.bf16.msra.mxu0 %v4466_v40 }
 0x6e7   : > { %4489 = vmatpush3.bf16.msra.mxu1 %v4466_v40  ;;  %4469 = vmatprep.subr.bf16.mxu0 %v4468_v26 }
 0x6e8   : > { %4482 = vmatprep.subr.bf16.mxu1 %v4468_v26 }
 0x6ea   : > { %4471 = vmatpush3.bf16.msra.mxu0 %v4470_v16 }
 0x6eb   : > { %4490 = vmatpush3.bf16.msra.mxu1 %v4470_v16  ;;  %4473 = vmatprep.subr.bf16.mxu0 %v4472_v57 }
 0x6ec   : > { %4483 = vmatprep.subr.bf16.mxu1 %v4472_v57 }
 0x6ee   : > { %4475 = vmatpush3.bf16.msra.mxu0 %v4474_v5 }
 0x6ef   : > { %4491 = vmatpush3.bf16.msra.mxu1 %v4474_v5 }
 0x76d   : > { %v2462_v3 = vpop.f32.mrb[48].mxu1 }
 0x76e   : > { %v6347_v58 = vadd.f32 %v2462_v3, %v6342_v6  ;;  %v2464_v8 = vpop.f32.mrb[49].mxu1 }
 0x76f   : > { %v6350_v45 = vadd.f32 %v2464_v8, %v6344_v56 }
 0x770   : > { %v2557_v51 = vmul.f32 %v6347_v58, %v6347_v58 }
 0x771   : > { %v2558_v41 = vmul.f32 %v6350_v45, %v6350_v45  ;;  %v2468_v37 = vpop.f32.mrb[50].mxu1 }
 0x772   : > { %v2589_v36 = vmul.f32 %v2557_v51, %v6347_v58  ;;  %v6358_v21 = vadd.f32 %v2468_v37, %v6342_v6  ;;  %v2470_v31 = vpop.f32.mrb[51].mxu1 }
 0x773   : > { %v2590_v14 = vmul.f32 %v2558_v41, %v6350_v45  ;;  %v6362_v38 = vadd.f32 %v2470_v31, %v6344_v56 }
 0x774   : > { %v2621_v32 = vmul.f32 0.044715, %v2589_v36  ;;  %v2559_v25 = vmul.f32 %v6358_v21, %v6358_v21 }
 0x775   : > { %v2622_v29 = vmul.f32 0.044715, %v2590_v14  ;;  %v2560_v34 = vmul.f32 %v6362_v38, %v6362_v38  ;;  %v2474_v43 = vpop.f32.mrb[52].mxu1 }
 0x776   : > { %v2653_v20 = vadd.f32 %v2621_v32, %v6347_v58  ;;  %v2591_v11 = vmul.f32 %v2559_v25, %v6358_v21  ;;  %v6371_v46 = vadd.f32 %v2474_v43, %v6342_v6  ;;  %v2476_v33 = vpop.f32.mrb[53].mxu1 }
 0x777   : > { %v2654_v22 = vadd.f32 %v2622_v29, %v6350_v45  ;;  %v2592_v7 = vmul.f32 %v2560_v34, %v6362_v38  ;;  %v6376_v55 = vadd.f32 %v2476_v33, %v6344_v56 }
 0x778   : > { %v2685_v39 = vmul.f32 0.7978846, %v2653_v20  ;;  %v2623_v47 = vmul.f32 0.044715, %v2591_v11  ;;  %v2561_v49 = vmul.f32 %v6371_v46, %v6371_v46 }
 0x779   : > { %v2686_v48 = vmul.f32 0.7978846, %v2654_v22  ;;  %v2624_v40 = vmul.f32 0.044715, %v2592_v7  ;;  %v2562_v15 = vmul.f32 %v6376_v55, %v6376_v55  ;;  %v2480_v35 = vpop.f32.mrb[54].mxu1 }
 0x77a   : > { %4744 = vtanh.f32 %v2685_v39  ;;  %v2655_v26 = vadd.f32 %v2623_v47, %v6358_v21  ;;  %v2593_v50 = vmul.f32 %v2561_v49, %v6371_v46  ;;  %v6385_v17 = vadd.f32 %v2480_v35, %v6342_v6  ;;  %v2482_v16 = vpop.f32.mrb[55].mxu1 }
 0x77b   : > { %v2656_v42 = vadd.f32 %v2624_v40, %v6362_v38  ;;  %v2594_v19 = vmul.f32 %v2562_v15, %v6376_v55  ;;  %v6390_v57 = vadd.f32 %v2482_v16, %v6344_v56  ;;  %4746 = vtanh.f32 %v2686_v48 }
 0x77c   : > { %v2687_v0 = vmul.f32 0.7978846, %v2655_v26  ;;  %v2625_v62 = vmul.f32 0.044715, %v2593_v50  ;;  %v2563_v5 = vmul.f32 %v6385_v17, %v6385_v17 }
 0x77d   : > { %v2688_v28 = vmul.f32 0.7978846, %v2656_v42  ;;  %v2626_v60 = vmul.f32 0.044715, %v2594_v19  ;;  %v2564_v52 = vmul.f32 %v6390_v57, %v6390_v57  ;;  %v2486_v1 = vpop.f32.mrb[56].mxu1 }
 0x77e   : > { %v2657_v4 = vadd.f32 %v2625_v62, %v6371_v46  ;;  %v2595_v3 = vmul.f32 %v2563_v5, %v6385_v17  ;;  %v6399_v8 = vadd.f32 %v2486_v1, %v6342_v6  ;;  %v2488_v51 = vpop.f32.mrb[57].mxu1  ;;  %4748 = vtanh.f32 %v2687_v0 }
 0x77f   : > { %v2658_v41 = vadd.f32 %v2626_v60, %v6376_v55  ;;  %v2596_v37 = vmul.f32 %v2564_v52, %v6390_v57  ;;  %v6404_v36 = vadd.f32 %v2488_v51, %v6344_v56  ;;  %4750 = vtanh.f32 %v2688_v28 }
 0x780   : > { %v2627_v31 = vmul.f32 0.044715, %v2595_v3  ;;  %v2565_v14 = vmul.f32 %v6399_v8, %v6399_v8  ;;  %v2689_v32 = vmul.f32 0.7978846, %v2657_v4 }
 0x781   : > { %v2690_v25 = vmul.f32 0.7978846, %v2658_v41  ;;  %v2566_v29 = vmul.f32 %v6404_v36, %v6404_v36  ;;  %v2492_v34 = vpop.f32.mrb[58].mxu1  ;;  %v2628_v33 = vmul.f32 0.044715, %v2596_v37 }
 0x782   : > { %v2597_v43 = vmul.f32 %v2565_v14, %v6399_v8  ;;  %v6412_v20 = vadd.f32 %v2492_v34, %v6342_v6  ;;  %v2494_v11 = vpop.f32.mrb[59].mxu1  ;;  %v2659_v39 = vadd.f32 %v2627_v31, %v6385_v17 }
 0x783   : > { %v6415_v22 = vadd.f32 %v2494_v11, %v6344_v56  ;;  %v2598_v47 = vmul.f32 %v2566_v29, %v6404_v36  ;;  %4752 = vtanh.f32 %v2690_v25  ;;  %v2660_v60 = vadd.f32 %v2628_v33, %v6390_v57 }
 0x784   : > { %v4745_v7 = vpop.eup %4744  ;;  %v2567_v49 = vmul.f32 %v6412_v20, %v6412_v20  ;;  %v2629_v15 = vmul.f32 0.044715, %v2597_v43  ;;  %4754 = vtanh.f32 %v2689_v32  ;;  %v6434_v51 = vmul.f32 0.7978846, %v2659_v39 }
 0x785   : > { %v4747_v48 = vpop.eup %4746  ;;  %v2749_v40 = vadd.f32 1.0, %v4745_v7  ;;  %v2568_v35 = vmul.f32 %v6415_v22, %v6415_v22  ;;  %v2498_v26 = vpop.f32.mrb[60].mxu1  ;;  %v2630_v52 = vmul.f32 0.044715, %v2598_v47  ;;  %v2692_v47 = vmul.f32 0.7978846, %v2660_v60 }
 0x786   : > { %v2599_v50 = vmul.f32 %v2567_v49, %v6412_v20  ;;  %v6425_v16 = vadd.f32 %v2498_v26, %v6342_v6  ;;  %v2500_v42 = vpop.f32.mrb[61].mxu1  ;;  %v2750_v19 = vadd.f32 1.0, %v4747_v48  ;;  %v2661_v41 = vadd.f32 %v2629_v15, %v6399_v8 }
 0x787   : > { %v2781_v0 = vmul.f32 0.5, %v2749_v40  ;;  %v2600_v62 = vmul.f32 %v2568_v35, %v6415_v22  ;;  %v6429_v5 = vadd.f32 %v2500_v42, %v6344_v56  ;;  %v2662_v49 = vadd.f32 %v2630_v52, %v6404_v36 }
 0x788   : > { %v4749_v28 = vpop.eup %4748  ;;  %v2569_v1 = vmul.f32 %v6425_v16, %v6425_v16  ;;  %v2782_v4 = vmul.f32 0.5, %v2750_v19  ;;  %v2631_v37 = vmul.f32 0.044715, %v2599_v50  ;;  %v2693_v42 = vmul.f32 0.7978846, %v2661_v41 }
 0x789   : > { %v4751_v3 = vpop.eup %4750  ;;  %v2570_v31 = vmul.f32 %v6429_v5, %v6429_v5  ;;  %v2504_v14 = vpop.f32.mrb[62].mxu1  ;;  %v2813_v32 = vmul.f32 %v2781_v0, %v6347_v58  ;;  %v2632_v11 = vmul.f32 0.044715, %v2600_v62  ;;  %v2751_v48 = vadd.f32 1.0, %v4749_v28 }
 0x78a   : > { %v2601_v25 = vmul.f32 %v2569_v1, %v6425_v16  ;;  %v6442_v29 = vadd.f32 %v2504_v14, %v6342_v6  ;;  %v2506_v34 = vpop.f32.mrb[63].mxu1  ;;  %v2814_v43 = vmul.f32 %v2782_v4, %v6350_v45  ;;  %v2752_v39 = vadd.f32 1.0, %v4751_v3 }
 0x78b   : > { %v2602_v33 = vmul.f32 %v2570_v31, %v6429_v5  ;;  %v6447_v7 = vadd.f32 %v2506_v34, %v6344_v56  ;;  %v2663_v19 = vadd.f32 %v2631_v37, %v6412_v20  ;;  %v2783_v60 = vmul.f32 0.5, %v2751_v48 }
 0x78c   : > { %v2571_v58 = vmul.f32 %v6442_v29, %v6442_v29  ;;  %2941 = vmatprep.mubr.f32.mxu0 %v2814_v43  ;;  %v2633_v40 = vmul.f32 0.044715, %v2601_v25  ;;  %v2784_v26 = vmul.f32 0.5, %v2752_v39  ;;  %v2664_v28 = vadd.f32 %v2632_v11, %v6415_v22 }
 0x78d   : > { %v2634_v15 = vmul.f32 0.044715, %v2602_v33  ;;  %v2572_v45 = vmul.f32 %v6447_v7, %v6447_v7  ;;  %v2510_v35 = vpop.f32.mrb[64].mxu1  ;;  %2942 = vmatmul.mubr.f32.vlgmr.msra.gmra.mrb[64].mxu0 %v2813_v32  ;;  %v4753_v50 = vpop.eup %4752  ;;  %v2694_v31 = vmul.f32 0.7978846, %v2662_v49  ;;  %v2815_v14 = vmul.f32 %v2783_v60, %v6358_v21 }
 0x78e   : > { %v6456_v0 = vadd.f32 %v2510_v35, %v6342_v6  ;;  %v2512_v62 = vpop.f32.mrb[65].mxu1  ;;  %v4755_v52 = vpop.eup %4754  ;;  %v2816_v3 = vmul.f32 %v2784_v26, %v6362_v38  ;;  %v2603_v41 = vmul.f32 %v2571_v58, %v6442_v29  ;;  %v2665_v32 = vadd.f32 %v2633_v40, %v6425_v16 }
 0x78f   : > { %v2604_v1 = vmul.f32 %v2572_v45, %v6447_v7  ;;  %v6461_v4 = vadd.f32 %v2512_v62, %v6344_v56  ;;  %v2666_v25 = vadd.f32 %v2634_v15, %v6429_v5  ;;  %v2754_v11 = vadd.f32 1.0, %v4753_v50 }
 0x790   : > { %v2573_v37 = vmul.f32 %v6456_v0, %v6456_v0  ;;  %2946 = vmatprep.mubr.f32.mxu0 %v2816_v3  ;;  %v2695_v33 = vmul.f32 0.7978846, %v2663_v19  ;;  %v2753_v58 = vadd.f32 1.0, %v4755_v52  ;;  %v2696_v48 = vmul.f32 0.7978846, %v2664_v28 }
 0x791   : > { %v2574_v34 = vmul.f32 %v6461_v4, %v6461_v4  ;;  %v2516_v43 = vpop.f32.mrb[66].mxu1  ;;  %v2636_v38 = vmul.f32 0.044715, %v2604_v1  ;;  %2947 = vmatmul.mubr.f32.gmra.mrb[66].mxu0 %v2815_v14  ;;  %v2786_v15 = vmul.f32 0.5, %v2754_v11  ;;  %v2635_v45 = vmul.f32 0.044715, %v2603_v41 }
 0x792   : > { %v6473_v39 = vadd.f32 %v2516_v43, %v6342_v6  ;;  %v2518_v49 = vpop.f32.mrb[67].mxu1  ;;  %v2605_v21 = vmul.f32 %v2573_v37, %v6456_v0  ;;  %v2785_v50 = vmul.f32 0.5, %v2753_v58  ;;  %v2697_v19 = vmul.f32 0.7978846, %v2665_v32 }
 0x793   : > { %v6477_v40 = vadd.f32 %v2518_v49, %v6344_v56  ;;  %v2606_v35 = vmul.f32 %v2574_v34, %v6461_v4  ;;  %v2698_v62 = vmul.f32 0.7978846, %v2666_v25  ;;  %v2818_v52 = vmul.f32 %v2786_v15, %v6376_v55 }
 0x794   : > { %v2575_v26 = vmul.f32 %v6473_v39, %v6473_v39  ;;  %v2668_v1 = vadd.f32 %v2636_v38, %v6447_v7  ;;  %v2817_v37 = vmul.f32 %v2785_v50, %v6371_v46  ;;  %v2637_v34 = vmul.f32 0.044715, %v2605_v21 }
 0x795   : > { %v2576_v60 = vmul.f32 %v6477_v40, %v6477_v40  ;;  %v2522_v28 = vpop.f32.mrb[68].mxu1  ;;  %2951 = vmatprep.mubr.f32.mxu0 %v2818_v52  ;;  %4756 = vtanh.f32 %v2692_v47  ;;  %v2667_v55 = vadd.f32 %v2635_v45, %v6442_v29  ;;  %v2638_v43 = vmul.f32 0.044715, %v2606_v35 }
 0x796   : > { %v2607_v3 = vmul.f32 %v2575_v26, %v6473_v39  ;;  %v6488_v41 = vadd.f32 %v2522_v28, %v6342_v6  ;;  %v2524_v14 = vpop.f32.mrb[69].mxu1  ;;  %2952 = vmatmul.mubr.f32.gmra.mrb[68].mxu0 %v2817_v37  ;;  %4758 = vtanh.f32 %v6434_v51  ;;  %v2700_v21 = vmul.f32 0.7978846, %v2668_v1 }
 0x797   : > { %v2608_v32 = vmul.f32 %v2576_v60, %v6477_v40  ;;  %v6493_v25 = vadd.f32 %v2524_v14, %v6344_v56  ;;  %4760 = vtanh.f32 %v2694_v31  ;;  %v2669_v35 = vadd.f32 %v2637_v34, %v6456_v0 }
 0x798   : > { %v2577_v11 = vmul.f32 %v6488_v41, %v6488_v41  ;;  %v2639_v38 = vmul.f32 0.044715, %v2607_v3  ;;  %4762 = vtanh.f32 %v2693_v42  ;;  %v2670_v50 = vadd.f32 %v2638_v43, %v6461_v4 }
 0x799   : > { %v2640_v46 = vmul.f32 0.044715, %v2608_v32  ;;  %v2578_v49 = vmul.f32 %v6493_v25, %v6493_v25  ;;  %v2528_v58 = vpop.f32.mrb[70].mxu1  ;;  %4764 = vtanh.f32 %v2696_v48  ;;  %v2699_v3 = vmul.f32 0.7978846, %v2667_v55 }
 0x79a   : > { %v2609_v15 = vmul.f32 %v2577_v11, %v6488_v41  ;;  %v6503_v47 = vadd.f32 %v2528_v58, %v6342_v6  ;;  %v2530_v45 = vpop.f32.mrb[71].mxu1  ;;  %4766 = vtanh.f32 %v2695_v33  ;;  %v2671_v52 = vadd.f32 %v2639_v38, %v6473_v39 }
 0x79b   : > { %v2610_v26 = vmul.f32 %v2578_v49, %v6493_v25  ;;  %v6508_v51 = vadd.f32 %v2530_v45, %v6344_v56  ;;  %v2672_v28 = vadd.f32 %v2640_v46, %v6477_v40  ;;  %4768 = vtanh.f32 %v2698_v62 }
 0x79c   : > { %v2641_v60 = vmul.f32 0.044715, %v2609_v15  ;;  %v2579_v31 = vmul.f32 %v6503_v47, %v6503_v47  ;;  %4770 = vtanh.f32 %v2697_v19  ;;  %v6525_v43 = vmul.f32 0.7978846, %v2669_v35 }
 0x79d   : > { %v2642_v42 = vmul.f32 0.044715, %v2610_v26  ;;  %v2534_v1 = vpop.f32.mrb[72].mxu1  ;;  %v2580_v37 = vmul.f32 %v6508_v51, %v6508_v51  ;;  %4772 = vtanh.f32 %v2700_v21  ;;  %v2702_v62 = vmul.f32 0.7978846, %v2670_v50 }
 0x79e   : > { %v6518_v48 = vadd.f32 %v2534_v1, %v6342_v6  ;;  %v2536_v14 = vpop.f32.mrb[73].mxu1  ;;  %v2673_v34 = vadd.f32 %v2641_v60, %v6488_v41  ;;  %v2611_v33 = vmul.f32 %v2579_v31, %v6503_v47  ;;  %v6529_v38 = vmul.f32 0.7978846, %v2671_v52 }
 0x79f   : > { %v6523_v32 = vadd.f32 %v2536_v14, %v6344_v56  ;;  %v4757_v11 = vpop.eup %4756  ;;  %v6531_v46 = vmul.f32 0.7978846, %v2672_v28  ;;  %v2674_v19 = vadd.f32 %v2642_v42, %v6493_v25  ;;  %v2612_v21 = vmul.f32 %v2580_v37, %v6508_v51 }
 0x7a0   : > { %v2581_v55 = vmul.f32 %v6518_v48, %v6518_v48  ;;  %v4759_v15 = vpop.eup %4758  ;;  %v2756_v45 = vadd.f32 1.0, %v4757_v11  ;;  %v6541_v31 = vmul.f32 0.7978846, %v2673_v34  ;;  %v2643_v52 = vmul.f32 0.044715, %v2611_v33 }
 0x7a1   : > { %v2582_v49 = vmul.f32 %v6523_v32, %v6523_v32  ;;  %v2540_v58 = vpop.f32.mrb[74].mxu1  ;;  %v4761_v60 = vpop.eup %4760  ;;  %v2755_v28 = vadd.f32 1.0, %v4759_v15  ;;  %4774 = vtanh.f32 %v2699_v3 }
 0x7a2   : > { %v2613_v35 = vmul.f32 %v2581_v55, %v6518_v48  ;;  %v6539_v26 = vadd.f32 %v2540_v58, %v6342_v6  ;;  %v2542_v50 = vpop.f32.mrb[75].mxu1  ;;  %v4763_v42 = vpop.eup %4762  ;;  %v2788_v1 = vmul.f32 0.5, %v2756_v45  ;;  %v2758_v14 = vadd.f32 1.0, %v4761_v60 }
 0x7a3   : > { %4776 = vtanh.f32 %v2702_v62  ;;  %v4765_v11 = vpop.eup %4764  ;;  %v2787_v13 = vmul.f32 0.5, %v2755_v28  ;;  %v2757_v37 = vadd.f32 1.0, %v4763_v42  ;;  %v2614_v55 = vmul.f32 %v2582_v49, %v6523_v32 }
 0x7a4   : > { %v2645_v44 = vmul.f32 0.044715, %v2613_v35  ;;  %v6545_v58 = vadd.f32 %v2542_v50, %v6344_v56  ;;  %v4767_v61 = vpop.eup %4766  ;;  %v2820_v34 = vmul.f32 %v2788_v1, %v6390_v57  ;;  %v2790_v53 = vmul.f32 0.5, %v2758_v14 }
 0x7a5   : > { %v2760_v3 = vadd.f32 1.0, %v4765_v11  ;;  %v2546_v15 = vpop.f32.mrb[76].mxu1  ;;  %v4769_v45 = vpop.eup %4768  ;;  %v6549_v60 = vmul.f32 0.7978846, %v2674_v19  ;;  %v2819_v62 = vmul.f32 %v2787_v13, %v6385_v17  ;;  %v2789_v35 = vmul.f32 0.5, %v2757_v37 }
 0x7a6   : > { %v2677_v33 = vadd.f32 %v2645_v44, %v6518_v48  ;;  %v2583_v49 = vmul.f32 %v6539_v26, %v6539_v26  ;;  %v2548_v28 = vpop.f32.mrb[77].mxu1  ;;  %v4771_v50 = vpop.eup %4770  ;;  %2956 = vmatprep.mubr.f32.mxu0 %v2820_v34  ;;  %v2644_v42 = vmul.f32 0.044715, %v2612_v21  ;;  %v2822_v57 = vmul.f32 %v2790_v53, %v6404_v36 }
 0x7a7   : > { %v2792_v1 = vmul.f32 0.5, %v2760_v3  ;;  %v2759_v14 = vadd.f32 1.0, %v4767_v61  ;;  %v4773_v44 = vpop.eup %4772  ;;  %v2675_v11 = vadd.f32 %v2643_v52, %v6503_v47  ;;  %2957 = vmatmul.mubr.f32.gmra.mrb[70].mxu0 %v2819_v62  ;;  %v2646_v63 = vmul.f32 0.044715, %v2614_v55 }
 0x7a8   : > { %v2709_v19 = vmul.f32 0.7978846, %v2677_v33  ;;  %v2584_v13 = vmul.f32 %v6545_v58, %v6545_v58  ;;  %2961 = vmatprep.mubr.f32.mxu0 %v2822_v57  ;;  %v2821_v37 = vmul.f32 %v2789_v35, %v6399_v8  ;;  %v2615_v21 = vmul.f32 %v2583_v49, %v6539_v26 }
 0x7a9   : > { %v2552_v17 = vpop.f32.mrb[78].mxu1  ;;  %v2824_v34 = vmul.f32 %v2792_v1, %v6415_v22  ;;  %v2762_v53 = vadd.f32 1.0, %v4769_v45  ;;  %v2791_v61 = vmul.f32 0.5, %v2759_v14  ;;  %v6563_v52 = vadd.f32 %v2546_v15, %v6342_v6 }
 0x7aa   : > { %v2554_v36 = vpop.f32.mrb[79].mxu1  ;;  %v2616_v3 = vmul.f32 %v2584_v13, %v6545_v58  ;;  %v2761_v55 = vadd.f32 1.0, %v4771_v50  ;;  %v2676_v33 = vadd.f32 %v2644_v42, %v6508_v51  ;;  %v6567_v57 = vadd.f32 %v2548_v28, %v6344_v56 }
 0x7ab   : > { %v2794_v62 = vmul.f32 0.5, %v2762_v53  ;;  %v2764_v8 = vadd.f32 1.0, %v4773_v44  ;;  %v4775_v35 = vpop.eup %4774  ;;  %2962 = vmatmul.mubr.f32.gmra.mrb[72].mxu0 %v2821_v37  ;;  %v2678_v22 = vadd.f32 %v2646_v63, %v6523_v32  ;;  %v2585_v49 = vmul.f32 %v6563_v52, %v6563_v52 }
 0x7ac   : > { %v2648_v45 = vmul.f32 0.044715, %v2616_v3  ;;  %v2793_v1 = vmul.f32 0.5, %v2761_v55  ;;  %2966 = vmatprep.mubr.f32.mxu0 %v2824_v34  ;;  %v2586_v50 = vmul.f32 %v6567_v57, %v6567_v57  ;;  %v6576_v28 = vadd.f32 %v2552_v17, %v6342_v6 }
 0x7ad   : > { %v4777_v14 = vpop.eup %4776  ;;  %v2826_v15 = vmul.f32 %v2794_v62, %v6429_v5  ;;  %v2796_v42 = vmul.f32 0.5, %v2764_v8  ;;  %4778 = vtanh.f32 %v2709_v19  ;;  %v2647_v44 = vmul.f32 0.044715, %v2615_v21 }
 0x7ae   : > { %v2823_v63 = vmul.f32 %v2791_v61, %v6412_v20  ;;  %v2617_v13 = vmul.f32 %v2585_v49, %v6563_v52  ;;  %v2680_v37 = vadd.f32 %v2648_v45, %v6545_v58  ;;  %v2618_v53 = vmul.f32 %v2586_v50, %v6567_v57 }
 0x7af   : > { %v2587_v5 = vmul.f32 %v6576_v28, %v6576_v28  ;;  %v2763_v34 = vadd.f32 1.0, %v4775_v35  ;;  %v2825_v3 = vmul.f32 %v2793_v1, %v6425_v16  ;;  %v2828_v6 = vmul.f32 %v2796_v42, %v6447_v7 }
 0x7b0   : > { %2967 = vmatmul.mubr.f32.gmra.mrb[74].mxu0 %v2823_v63  ;;  %v6587_v19 = vadd.f32 %v2554_v36, %v6344_v56  ;;  %v2766_v17 = vadd.f32 1.0, %v4777_v14  ;;  %v2649_v20 = vmul.f32 0.044715, %v2617_v13  ;;  %v2650_v21 = vmul.f32 0.044715, %v2618_v53 }
 0x7b1   : > { %2971 = vmatprep.mubr.f32.mxu0 %v2826_v15  ;;  %v2619_v61 = vmul.f32 %v2587_v5, %v6576_v28  ;;  %4780 = vtanh.f32 %v6525_v43  ;;  %v2795_v55 = vmul.f32 0.5, %v2763_v34  ;;  %v2708_v16 = vmul.f32 0.7978846, %v2676_v33 }
 0x7b2   : > { %v2588_v62 = vmul.f32 %v6587_v19, %v6587_v19  ;;  %v2798_v8 = vmul.f32 0.5, %v2766_v17  ;;  %4782 = vtanh.f32 %v6531_v46  ;;  %v2679_v7 = vadd.f32 %v2647_v44, %v6539_v26 }
 0x7b3   : > { %4784 = vtanh.f32 %v6529_v38  ;;  %v2707_v56 = vmul.f32 0.7978846, %v2675_v11  ;;  %v2682_v36 = vadd.f32 %v2650_v21, %v6567_v57  ;;  %v2651_v35 = vmul.f32 0.044715, %v2619_v61 }
 0x7b4   : > { %2972 = vmatmul.mubr.f32.gmra.mrb[76].mxu0 %v2825_v3  ;;  %v2620_v45 = vmul.f32 %v2588_v62, %v6587_v19  ;;  %v2710_v43 = vmul.f32 0.7978846, %v2678_v22  ;;  %v2681_v49 = vadd.f32 %v2649_v20, %v6563_v52  ;;  %v2830_v1 = vmul.f32 %v2798_v8, %v6461_v4 }
 0x7b5   : > { %2976 = vmatprep.mubr.f32.mxu0 %v2828_v6  ;;  %4786 = vtanh.f32 %v6549_v60  ;;  %v2712_v46 = vmul.f32 0.7978846, %v2680_v37  ;;  %v2827_v33 = vmul.f32 %v2795_v55, %v6442_v29  ;;  %v2711_v38 = vmul.f32 0.7978846, %v2679_v7 }
 0x7b6   : > { %v2652_v14 = vmul.f32 0.044715, %v2620_v45  ;;  %4788 = vtanh.f32 %v6541_v31  ;;  %v2714_v15 = vmul.f32 0.7978846, %v2682_v36  ;;  %v2683_v50 = vadd.f32 %v2651_v35, %v6576_v28 }
 0x7b7   : > { %4790 = vtanh.f32 %v2708_v16  ;;  %v4779_v11 = vpop.eup %4778  ;;  %v2713_v42 = vmul.f32 0.7978846, %v2681_v49 }
 0x7b8   : > { %2977 = vmatmul.mubr.f32.gmra.mrb[78].mxu0 %v2827_v33  ;;  %v2684_v22 = vadd.f32 %v2652_v14, %v6587_v19  ;;  %4792 = vtanh.f32 %v2707_v56  ;;  %v2715_v44 = vmul.f32 0.7978846, %v2683_v50  ;;  %v2773_v34 = vadd.f32 1.0, %v4779_v11 }
 0x7b9   : > { %2981 = vmatprep.mubr.f32.mxu0 %v2830_v1  ;;  %4794 = vtanh.f32 %v2710_v43 }
 0x7ba   : > { %v2716_v4 = vmul.f32 0.7978846, %v2684_v22  ;;  %4796 = vtanh.f32 %v2712_v46  ;;  %v2805_v36 = vmul.f32 0.5, %v2773_v34 }
 0x7bb   : > { %v4781_v60 = vpop.eup %4780  ;;  %4798 = vtanh.f32 %v2711_v38 }
 0x7bc   : > { %v4783_v29 = vpop.eup %4782  ;;  %v2765_v31 = vadd.f32 1.0, %v4781_v60  ;;  %4800 = vtanh.f32 %v2714_v15  ;;  %v2837_v50 = vmul.f32 %v2805_v36, %v6518_v48 }
 0x7bd   : > { %v4785_v63 = vpop.eup %4784  ;;  %v2768_v13 = vadd.f32 1.0, %v4783_v29  ;;  %4802 = vtanh.f32 %v2713_v42 }
 0x7be   : > { %v2797_v37 = vmul.f32 0.5, %v2765_v31  ;;  %v2767_v53 = vadd.f32 1.0, %v4785_v63  ;;  %4804 = vtanh.f32 %v2716_v4 }
 0x7bf   : > { %v4787_v5 = vpop.eup %4786  ;;  %v2800_v3 = vmul.f32 0.5, %v2768_v13  ;;  %4806 = vtanh.f32 %v2715_v44 }
 0x7c0   : > { %v4789_v6 = vpop.eup %4788  ;;  %v2829_v17 = vmul.f32 %v2797_v37, %v6456_v0  ;;  %v2799_v20 = vmul.f32 0.5, %v2767_v53  ;;  %v2770_v21 = vadd.f32 1.0, %v4787_v5 }
 0x7c1   : > { %v4791_v61 = vpop.eup %4790  ;;  %v2832_v55 = vmul.f32 %v2800_v3, %v6477_v40  ;;  %v2769_v62 = vadd.f32 1.0, %v4789_v6 }
 0x7c2   : > { %v4793_v8 = vpop.eup %4792  ;;  %2982 = vmatmul.mubr.f32.gmra.mrb[80].mxu0 %v2829_v17  ;;  %v2802_v16 = vmul.f32 0.5, %v2770_v21  ;;  %v2772_v7 = vadd.f32 1.0, %v4791_v61  ;;  %v2831_v35 = vmul.f32 %v2799_v20, %v6473_v39 }
 0x7c3   : > { %v4795_v56 = vpop.eup %4794  ;;  %2986 = vmatprep.mubr.f32.mxu0 %v2832_v55  ;;  %v2801_v45 = vmul.f32 0.5, %v2769_v62  ;;  %v2771_v1 = vadd.f32 1.0, %v4793_v8 }
 0x7c4   : > { %v4797_v43 = vpop.eup %4796  ;;  %v2834_v0 = vmul.f32 %v2802_v16, %v6493_v25  ;;  %v2804_v49 = vmul.f32 0.5, %v2772_v7  ;;  %v2774_v46 = vadd.f32 1.0, %v4795_v56 }
 0x7c5   : > { %v4799_v33 = vpop.eup %4798  ;;  %v2776_v14 = vadd.f32 1.0, %v4797_v43  ;;  %v2833_v25 = vmul.f32 %v2801_v45, %v6488_v41  ;;  %v2803_v60 = vmul.f32 0.5, %v2771_v1 }
 0x7c6   : > { %v4801_v40 = vpop.eup %4800  ;;  %2987 = vmatmul.mubr.f32.gmra.mrb[82].mxu0 %v2831_v35  ;;  %v2806_v38 = vmul.f32 0.5, %v2774_v46  ;;  %v2775_v11 = vadd.f32 1.0, %v4799_v33  ;;  %v2836_v22 = vmul.f32 %v2804_v49, %v6508_v51 }
 0x7c7   : > { %v4803_v15 = vpop.eup %4802  ;;  %2991 = vmatprep.mubr.f32.mxu0 %v2834_v0  ;;  %v2808_v39 = vmul.f32 0.5, %v2776_v14  ;;  %v2778_v42 = vadd.f32 1.0, %v4801_v40  ;;  %v2835_v51 = vmul.f32 %v2803_v60, %v6503_v47 }
 0x7c8   : > { %v4805_v4 = vpop.eup %4804  ;;  %v2838_v29 = vmul.f32 %v2806_v38, %v6523_v32  ;;  %v2807_v44 = vmul.f32 0.5, %v2775_v11  ;;  %v2777_v13 = vadd.f32 1.0, %v4803_v15 }
 0x7c9   : > { %v2840_v31 = vmul.f32 %v2808_v39, %v6545_v58  ;;  %v2810_v63 = vmul.f32 0.5, %v2778_v42  ;;  %v2780_v37 = vadd.f32 1.0, %v4805_v4  ;;  %v4807_v53 = vpop.eup %4806 }
 0x7ca   : > { %2992 = vmatmul.mubr.f32.gmra.mrb[84].mxu0 %v2833_v25  ;;  %3001 = vmatprep.mubr.f32.mxu1 %v2838_v29  ;;  %v2839_v5 = vmul.f32 %v2807_v44, %v6539_v26  ;;  %v2809_v32 = vmul.f32 0.5, %v2777_v13  ;;  %v2779_v34 = vadd.f32 1.0, %v4807_v53  ;;  %v6623_v26 = vld [vmem:[%s6995_s0] ss:$0 sm:$0xff]  ;;  %s6866_s0 = scalar_lea.hbm %s7003_s22, %s3491_s24 }
 0x7cb   : > { %2996 = vmatprep.mubr.f32.mxu0 %v2836_v22  ;;  %3002 = vmatmul.mubr.f32.vlgmr.msra.gmra.mrb[80].mxu1 %v2837_v50  ;;  %v2842_v48 = vmul.f32 %v2810_v63, %v6567_v57  ;;  %v2812_v41 = vmul.f32 0.5, %v2780_v37 }
 0x7cc   : > { %3006 = vmatprep.mubr.f32.mxu1 %v2840_v31  ;;  %v2841_v3 = vmul.f32 %v2809_v32, %v6563_v52  ;;  %v2811_v6 = vmul.f32 0.5, %v2779_v34 }
 0x7cd   : > { %v2844_v58 = vmul.f32 %v2812_v41, %v6587_v19 }
 0x7ce   : > { %2997 = vmatmul.mubr.f32.gmra.mrb[86].mxu0 %v2835_v51  ;;  %v2843_v47 = vmul.f32 %v2811_v6, %v6576_v28  ;;  %v6996_v6 = vld [vmem:[#allocation24_spill] sm:$0xff] }
 0x7cf   : > { %3007 = vmatmul.mubr.f32.gmra.mrb[82].mxu1 %v2839_v5 }
 0x7d0   : > { %3011 = vmatprep.mubr.f32.mxu1 %v2842_v48 }
 0x7d3   : > { %3012 = vmatmul.mubr.f32.gmra.mrb[84].mxu1 %v2841_v3 }
 0x7d4   : > { %3016 = vmatprep.mubr.f32.mxu1 %v2844_v58 }
 0x7d7   : > { %3017 = vmatmul.mubr.f32.gmra.mrb[86].mxu1 %v2843_v47 }
 0x860   : > { %v3748_v17 = vpop.f32.mrb[64].mxu0 }
 0x861   : > { %v3749_v57 = vpop.f32.mrb[65].mxu0 }
 0x862   : > { %v3750_v20 = vadd.f32 %v3749_v57, %v3748_v17 }
 0x864   : > { %v3022_v21 = vadd.f32 %v3750_v20, %v6231_v9  ;;  %v3751_v61 = vpop.f32.mrb[66].mxu0 }
 0x865   : > { %v3752_v19 = vpop.f32.mrb[67].mxu0 }
 0x866   : > { %v6627_v52 = vadd.f32 %v6623_v26, %v3022_v21  ;;  %v3753_v55 = vadd.f32 %v3752_v19, %v3751_v61  ;;  %v6997_v61 = vld [vmem:[#allocation23_spill] sm:$0xff] }
 0x868   : > { %3063 = vadd.xlane.f32.xlu1 %v6627_v52  ;;  %v3023_v28 = vadd.f32 %v3753_v55, %v6238_v24 }
 0x869   : > { %v3754_v62 = vpop.f32.mrb[68].mxu0 }
 0x86a   : > { %v6632_v8 = vadd.f32 %v6623_v26, %v3023_v28  ;;  %v3755_v16 = vpop.f32.mrb[69].mxu0 }
 0x86b   : > { %v3756_v7 = vadd.f32 %v3755_v16, %v3754_v62 }
 0x86c   : > { %3065 = vadd.xlane.f32.xlu0 %v6632_v8 }
 0x86d   : > { %v3024_v9 = vadd.f32 %v3756_v7, %v6245_v27 }
 0x86f   : > { %v6637_v56 = vadd.f32 %v6623_v26, %v3024_v9 }
 0x871   : > { %3067 = vadd.xlane.f32.xlu1 %v6637_v56 }
 0x87a   : > { %v3757_v36 = vpop.f32.mrb[70].mxu0 }
 0x87b   : > { %v3758_v35 = vpop.f32.mrb[71].mxu0 }
 0x87c   : > { %v3759_v45 = vadd.f32 %v3758_v35, %v3757_v36  ;;  %v6999_v35 = vld [vmem:[#allocation26_spill] sm:$0xff] }
 0x87e   : > { %v3025_v24 = vadd.f32 %v3759_v45, %v6252_v59  ;;  %v3760_v43 = vpop.f32.mrb[72].mxu0 }
 0x87f   : > { %v3761_v0 = vpop.f32.mrb[73].mxu0 }
 0x880   : > { %v3762_v49 = vadd.f32 %v3761_v0, %v3760_v43  ;;  %v6642_v1 = vadd.f32 %v6623_v26, %v3025_v24 }
 0x882   : > { %v3026_v46 = vadd.f32 %v3762_v49, %v6259_v2  ;;  %3069 = vadd.xlane.f32.xlu0 %v6642_v1 }
 0x883   : > { %v3763_v27 = vpop.f32.mrb[74].mxu0 }
 0x884   : > { %v3764_v33 = vpop.f32.mrb[75].mxu0  ;;  %v6647_v40 = vadd.f32 %v6623_v26, %v3026_v46  ;;  %v7000_v46 = vld [vmem:[#allocation27_spill] sm:$0xff] }
 0x885   : > { %v3765_v14 = vadd.f32 %v3764_v33, %v3763_v27 }
 0x886   : > { %3071 = vadd.xlane.f32.xlu1 %v6647_v40 }
 0x887   : > { %v3027_v38 = vadd.f32 %v3765_v14, %v6266_v30  ;;  %v3766_v59 = vpop.f32.mrb[76].mxu0 }
 0x888   : > { %v3767_v11 = vpop.f32.mrb[77].mxu0 }
 0x889   : > { %v3768_v15 = vadd.f32 %v3767_v11, %v3766_v59  ;;  %v6652_v50 = vadd.f32 %v6623_v26, %v3027_v38 }
 0x88b   : > { %v3028_v2 = vadd.f32 %v3768_v15, %v6273_v54  ;;  %3073 = vadd.xlane.f32.xlu0 %v6652_v50  ;;  %v3769_v22 = vpop.f32.mrb[78].mxu0 }
 0x88c   : > { %v3770_v39 = vpop.f32.mrb[79].mxu0 }
 0x88d   : > { %v3771_v42 = vadd.f32 %v3770_v39, %v3769_v22  ;;  %v6657_v4 = vadd.f32 %v6623_v26, %v3028_v2 }
 0x88f   : > { %v3029_v30 = vadd.f32 %v3771_v42, %v6280_v18  ;;  %3075 = vadd.xlane.f32.xlu1 %v6657_v4 }
 0x891   : > { %v6662_v25 = vadd.f32 %v6623_v26, %v3029_v30 }
 0x893   : > { %3077 = vadd.xlane.f32.xlu0 %v6662_v25 }
 0x895   : > { %v3772_v60 = vpop.f32.mrb[80].mxu0 }
 0x896   : > { %v3773_v29 = vpop.f32.mrb[81].mxu0 }
 0x897   : > { %v3774_v54 = vadd.f32 %v3773_v29, %v3772_v60 }
 0x899   : > { %v3030_v44 = vadd.f32 %v3774_v54, %v6287_v10  ;;  %v3775_v31 = vpop.f32.mrb[82].mxu0 }
 0x89a   : > { %v3776_v63 = vpop.f32.mrb[83].mxu0 }
 0x89b   : > { %v3777_v13 = vadd.f32 %v3776_v63, %v3775_v31  ;;  %v6667_v37 = vadd.f32 %v6623_v26, %v3030_v44 }
 0x89d   : > { %v3031_v18 = vadd.f32 %v3777_v13, %v6294_v23  ;;  %3079 = vadd.xlane.f32.xlu1 %v6667_v37  ;;  %v3778_v53 = vpop.f32.mrb[84].mxu0 }
 0x89e   : > { %v3779_v51 = vpop.f32.mrb[85].mxu0  ;;  %v3784_v48 = vpop.f32.mrb[80].mxu1 }
 0x89f   : > { %v3780_v41 = vadd.f32 %v3779_v51, %v3778_v53  ;;  %v6672_v5 = vadd.f32 %v6623_v26, %v3031_v18  ;;  %v3785_v32 = vpop.f32.mrb[81].mxu1 }
 0x8a0   : > { %v3786_v34 = vadd.f32 %v3785_v32, %v3784_v48 }
 0x8a1   : > { %v3032_v10 = vadd.f32 %v3780_v41, %v6301_v12  ;;  %3081 = vadd.xlane.f32.xlu0 %v6672_v5  ;;  %v3781_v58 = vpop.f32.mrb[86].mxu0  ;;  %v6998_v12 = vld [vmem:[#allocation25_spill] sm:$0xff] }
 0x8a2   : > { %v3782_v3 = vpop.f32.mrb[87].mxu0  ;;  %v3034_v47 = vadd.f32 %v3786_v34, %v6996_v6  ;;  %v3787_v23 = vpop.f32.mrb[82].mxu1 }
 0x8a3   : > { %v3783_v17 = vadd.f32 %v3782_v3, %v3781_v58  ;;  %v6678_v57 = vadd.f32 %v6623_v26, %v3032_v10  ;;  %v3788_v20 = vpop.f32.mrb[83].mxu1 }
 0x8a4   : > { %v3789_v21 = vadd.f32 %v3788_v20, %v3787_v23  ;;  %v6683_v55 = vadd.f32 %v6623_v26, %v3034_v47 }
 0x8a5   : > { %v3033_v19 = vadd.f32 %v3783_v17, %v6997_v61  ;;  %3083 = vadd.xlane.f32.xlu1 %v6678_v57 }
 0x8a6   : > { %v3035_v28 = vadd.f32 %v3789_v21, %v6998_v12  ;;  %v3790_v62 = vpop.f32.mrb[84].mxu1 }
 0x8a7   : > { %v6687_v16 = vadd.f32 %v6623_v26, %v3033_v19  ;;  %v3791_v7 = vpop.f32.mrb[85].mxu1 }
 0x8a8   : > { %v3792_v9 = vadd.f32 %v3791_v7, %v3790_v62  ;;  %v6692_v36 = vadd.f32 %v6623_v26, %v3035_v28 }
 0x8a9   : > { %3085 = vadd.xlane.f32.xlu0 %v6687_v16  ;;  %3087 = vadd.xlane.f32.xlu1 %v6683_v55 }
 0x8aa   : > { %v3036_v45 = vadd.f32 %v3792_v9, %v6999_v35  ;;  %v3793_v24 = vpop.f32.mrb[86].mxu1 }
 0x8ab   : > { %v3794_v43 = vpop.f32.mrb[87].mxu1 }
 0x8ac   : > { %v3795_v0 = vadd.f32 %v3794_v43, %v3793_v24  ;;  %v6696_v49 = vadd.f32 %v6623_v26, %v3036_v45 }
 0x8ad   : > { %3089 = vadd.xlane.f32.xlu0 %v6692_v36 }
 0x8ae   : > { %v3037_v27 = vadd.f32 %v3795_v0, %v7000_v46  ;;  %3091 = vadd.xlane.f32.xlu1 %v6696_v49 }
 0x8b0   : > { %v6702_v33 = vadd.f32 %v6623_v26, %v3037_v27 }
 0x8b2   : > { %3093 = vadd.xlane.f32.xlu0 %v6702_v33 }
 0x8f5   : > { %v3064_v14 = vpop.xlane.xlu1 %3063 }
 0x8f6   : > { %v3095_v38 = vmul.f32 0.0078125, %v3064_v14 }
 0x8f8   : > { %v6706_v59 = vsub.f32 %v6627_v52, %v3095_v38 }
 0x8f9   : > { %v3066_v11 = vpop.xlane.xlu0 %3065 }
 0x8fa   : > { %v3127_v15 = vmul.f32 %v6706_v59, %v6706_v59  ;;  %v3096_v2 = vmul.f32 0.0078125, %v3066_v11 }
 0x8fc   : > { %3143 = vadd.xlane.f32.xlu1 %v3127_v15  ;;  %v6711_v22 = vsub.f32 %v6632_v8, %v3096_v2 }
 0x8fe   : > { %v3128_v26 = vmul.f32 %v6711_v22, %v6711_v22  ;;  %v3068_v39 = vpop.xlane.xlu1 %3067 }
 0x8ff   : > { %v3097_v42 = vmul.f32 0.0078125, %v3068_v39 }
 0x900   : > { %3145 = vadd.xlane.f32.xlu0 %v3128_v26 }
 0x901   : > { %v6716_v30 = vsub.f32 %v6637_v56, %v3097_v42 }
 0x903   : > { %v3129_v52 = vmul.f32 %v6716_v30, %v6716_v30 }
 0x905   : > { %3147 = vadd.xlane.f32.xlu1 %v3129_v52 }
 0x90f   : > { %v3070_v60 = vpop.xlane.xlu0 %3069 }
 0x910   : > { %v3098_v29 = vmul.f32 0.0078125, %v3070_v60 }
 0x912   : > { %v6721_v54 = vsub.f32 %v6642_v1, %v3098_v29 }
 0x913   : > { %v3072_v8 = vpop.xlane.xlu1 %3071 }
 0x914   : > { %v3099_v44 = vmul.f32 0.0078125, %v3072_v8  ;;  %v3130_v31 = vmul.f32 %v6721_v54, %v6721_v54 }
 0x916   : > { %v6726_v63 = vsub.f32 %v6647_v40, %v3099_v44  ;;  %3149 = vadd.xlane.f32.xlu0 %v3130_v31  ;;  %v6794_v44 = vld [vmem:[%s7002_s19] ss:$0 sm:$0xff] }
 0x918   : > { %v3074_v56 = vpop.xlane.xlu0 %3073  ;;  %v3131_v18 = vmul.f32 %v6726_v63, %v6726_v63 }
 0x919   : > { %v3100_v13 = vmul.f32 0.0078125, %v3074_v56 }
 0x91a   : > { %3151 = vadd.xlane.f32.xlu1 %v3131_v18 }
 0x91b   : > { %v6731_v53 = vsub.f32 %v6652_v50, %v3100_v13 }
 0x91c   : > { %v3076_v1 = vpop.xlane.xlu1 %3075 }
 0x91d   : > { %v3101_v51 = vmul.f32 0.0078125, %v3076_v1  ;;  %v3132_v48 = vmul.f32 %v6731_v53, %v6731_v53 }
 0x91f   : > { %v6736_v41 = vsub.f32 %v6657_v4, %v3101_v51  ;;  %3153 = vadd.xlane.f32.xlu0 %v3132_v48 }
 0x920   : > { %v3078_v40 = vpop.xlane.xlu0 %3077 }
 0x921   : > { %v3102_v32 = vmul.f32 0.0078125, %v3078_v40  ;;  %v3133_v34 = vmul.f32 %v6736_v41, %v6736_v41 }
 0x923   : > { %v6741_v10 = vsub.f32 %v6662_v25, %v3102_v32  ;;  %3155 = vadd.xlane.f32.xlu1 %v3133_v34 }
 0x925   : > { %v3134_v50 = vmul.f32 %v6741_v10, %v6741_v10 }
 0x927   : > { %3157 = vadd.xlane.f32.xlu0 %v3134_v50 }
 0x92a   : > { %v3080_v58 = vpop.xlane.xlu1 %3079 }
 0x92b   : > { %v3103_v3 = vmul.f32 0.0078125, %v3080_v58 }
 0x92d   : > { %v6746_v6 = vsub.f32 %v6667_v37, %v3103_v3 }
 0x92e   : > { %v3082_v4 = vpop.xlane.xlu0 %3081 }
 0x92f   : > { %v3104_v47 = vmul.f32 0.0078125, %v3082_v4  ;;  %v3135_v23 = vmul.f32 %v6746_v6, %v6746_v6 }
 0x931   : > { %v6751_v17 = vsub.f32 %v6672_v5, %v3104_v47  ;;  %3159 = vadd.xlane.f32.xlu1 %v3135_v23 }
 0x932   : > { %v3084_v25 = vpop.xlane.xlu1 %3083 }
 0x933   : > { %v3105_v20 = vmul.f32 0.0078125, %v3084_v25  ;;  %v3136_v21 = vmul.f32 %v6751_v17, %v6751_v17 }
 0x935   : > { %v6756_v61 = vsub.f32 %v6678_v57, %v3105_v20  ;;  %3161 = vadd.xlane.f32.xlu0 %v3136_v21 }
 0x936   : > { %v3086_v37 = vpop.xlane.xlu0 %3085  ;;  %v3088_v19 = vpop.xlane.xlu1 %3087 }
 0x937   : > { %v3106_v12 = vmul.f32 0.0078125, %v3086_v37  ;;  %v3137_v28 = vmul.f32 %v6756_v61, %v6756_v61  ;;  %v3107_v62 = vmul.f32 0.0078125, %v3088_v19 }
 0x939   : > { %v6761_v5 = vsub.f32 %v6687_v16, %v3106_v12  ;;  %3163 = vadd.xlane.f32.xlu1 %v3137_v28  ;;  %v6764_v7 = vsub.f32 %v6683_v55, %v3107_v62 }
 0x93a   : > { %v3090_v9 = vpop.xlane.xlu0 %3089 }
 0x93b   : > { %v3138_v57 = vmul.f32 %v6761_v5, %v6761_v5  ;;  %v3108_v35 = vmul.f32 0.0078125, %v3090_v9  ;;  %v3139_v45 = vmul.f32 %v6764_v7, %v6764_v7  ;;  %v3092_v24 = vpop.xlane.xlu1 %3091 }
 0x93c   : > { %v3109_v43 = vmul.f32 0.0078125, %v3092_v24 }
 0x93d   : > { %3165 = vadd.xlane.f32.xlu0 %v3138_v57  ;;  %v6771_v0 = vsub.f32 %v6692_v36, %v3108_v35  ;;  %3167 = vadd.xlane.f32.xlu1 %v3139_v45 }
 0x93e   : > { %v6774_v16 = vsub.f32 %v6696_v49, %v3109_v43 }
 0x93f   : > { %v3140_v55 = vmul.f32 %v6771_v0, %v6771_v0  ;;  %v3094_v46 = vpop.xlane.xlu0 %3093 }
 0x940   : > { %v3110_v27 = vmul.f32 0.0078125, %v3094_v46  ;;  %v3141_v14 = vmul.f32 %v6774_v16, %v6774_v16 }
 0x941   : > { %3169 = vadd.xlane.f32.xlu0 %v3140_v55 }
 0x942   : > { %v6781_v38 = vsub.f32 %v6702_v33, %v3110_v27  ;;  %3171 = vadd.xlane.f32.xlu1 %v3141_v14  ;;  %v6788_v33 = vld [vmem:[%s7001_s2] ss:$0 sm:$0xff]  ;;  %s5086_s2 = sshll.u32 %s5179_s25, 4  ;;  %s5087_s2 = int_to_ptr.vmem [resolvable:$false] %s5086_s2 }
 0x943   : > { %s5088_s20 = scalar_lea.vmem %s5087_s2, 4096  ;;  %p5089_p2 = scmp.lt.s32.totalorder %s6868_s11, %s5087_s2 }
 0x944   : > { %v3142_v36 = vmul.f32 %v6781_v38, %v6781_v38  ;;  %p5090_p8 = scmp.lt.s32.totalorder %s5088_s20, %s5082_s1 }
 0x946   : > { %3173 = vadd.xlane.f32.xlu0 %v3142_v36  ;;  %p5091_p6 = por %p5090_p8, %p5089_p2 }
 0x948   : > { %p5092_p10 = pnand %p5091_p6, %p5085_p0 }
 0x989   : > { %v3144_v11 = vpop.xlane.xlu1 %3143 }
 0x98a   : > { %v3175_v49 = vmul.f32 0.0078125, %v3144_v11 }
 0x98c   : > { %v3191_v15 = vadd.f32 1e-05, %v3175_v49 }
 0x98d   : > { %v3146_v2 = vpop.xlane.xlu0 %3145 }
 0x98e   : > { %4808 = vrsqrt.f32 %v3191_v15  ;;  %v3176_v26 = vmul.f32 0.0078125, %v3146_v2 }
 0x990   : > { %v3192_v39 = vadd.f32 1e-05, %v3176_v26 }
 0x992   : > { %4810 = vrsqrt.f32 %v3192_v39  ;;  %v3148_v42 = vpop.xlane.xlu1 %3147 }
 0x993   : > { %v3177_v52 = vmul.f32 0.0078125, %v3148_v42 }
 0x995   : > { %v3193_v60 = vadd.f32 1e-05, %v3177_v52 }
 0x997   : > { %4812 = vrsqrt.f32 %v3193_v60 }
 0x998   : > { %v4809_v29 = vpop.eup %4808 }
 0x999   : > { %v3223_v8 = vmul.f32 %v4809_v29, %v6706_v59 }
 0x99b   : > { %v3245_v31 = vmul.f32 %v6788_v33, %v3223_v8 }
 0x99c   : > { %v4811_v56 = vpop.eup %4810 }
 0x99d   : > { %v3267_v13 = vadd.f32 %v6794_v44, %v3245_v31  ;;  %v3224_v18 = vmul.f32 %v4811_v56, %v6711_v22 }
 0x99f   : > { %3283 = vst [vmem:[%s6801_s13] sm:$0xff] %v3267_v13  ;;  %v3246_v59 = vmul.f32 %v6788_v33, %v3224_v18 }
 0x9a1   : > { %v3268_v1 = vadd.f32 %v6794_v44, %v3246_v59  ;;  %v4813_v51 = vpop.eup %4812 }
 0x9a2   : > { %v3225_v48 = vmul.f32 %v4813_v51, %v6716_v30 }
 0x9a3   : > { %3284 = vst [vmem:[%s6801_s13 + $0x8] sm:$0xff] %v3268_v1  ;;  %v3150_v40 = vpop.xlane.xlu0 %3149 }
 0x9a4   : > { %v3247_v32 = vmul.f32 %v6788_v33, %v3225_v48  ;;  %v3178_v34 = vmul.f32 0.0078125, %v3150_v40 }
 0x9a6   : > { %v3269_v22 = vadd.f32 %v6794_v44, %v3247_v32  ;;  %v3194_v50 = vadd.f32 1e-05, %v3178_v34 }
 0x9a7   : > { %v3152_v58 = vpop.xlane.xlu1 %3151 }
 0x9a8   : > { %3285 = vst [vmem:[%s6801_s13 + $0x10] sm:$0xff] %v3269_v22  ;;  %4814 = vrsqrt.f32 %v3194_v50  ;;  %v3179_v3 = vmul.f32 0.0078125, %v3152_v58 }
 0x9aa   : > { %v3195_v4 = vadd.f32 1e-05, %v3179_v3 }
 0x9ac   : > { %v3154_v47 = vpop.xlane.xlu0 %3153  ;;  %4816 = vrsqrt.f32 %v3195_v4 }
 0x9ad   : > { %v3180_v23 = vmul.f32 0.0078125, %v3154_v47 }
 0x9af   : > { %v3196_v25 = vadd.f32 1e-05, %v3180_v23 }
 0x9b0   : > { %v3156_v20 = vpop.xlane.xlu1 %3155 }
 0x9b1   : > { %4818 = vrsqrt.f32 %v3196_v25  ;;  %v3181_v30 = vmul.f32 0.0078125, %v3156_v20 }
 0x9b2   : > { %v4815_v21 = vpop.eup %4814 }
 0x9b3   : > { %v3197_v37 = vadd.f32 1e-05, %v3181_v30  ;;  %v3226_v19 = vmul.f32 %v4815_v21, %v6721_v54 }
 0x9b4   : > { %v3158_v12 = vpop.xlane.xlu0 %3157 }
 0x9b5   : > { %4820 = vrsqrt.f32 %v3197_v37  ;;  %v3182_v28 = vmul.f32 0.0078125, %v3158_v12  ;;  %v3248_v62 = vmul.f32 %v6788_v33, %v3226_v19 }
 0x9b6   : > { %v4817_v9 = vpop.eup %4816 }
 0x9b7   : > { %v3198_v57 = vadd.f32 1e-05, %v3182_v28  ;;  %v3270_v35 = vadd.f32 %v6794_v44, %v3248_v62  ;;  %v3227_v45 = vmul.f32 %v4817_v9, %v6726_v63 }
 0x9b9   : > { %4822 = vrsqrt.f32 %v3198_v57  ;;  %3286 = vst [vmem:[%s6801_s13 + $0x18] sm:$0xff] %v3270_v35  ;;  %v3249_v24 = vmul.f32 %v6788_v33, %v3227_v45 }
 0x9bb   : > { %v4819_v43 = vpop.eup %4818  ;;  %v3271_v55 = vadd.f32 %v6794_v44, %v3249_v24 }
 0x9bc   : > { %v3228_v54 = vmul.f32 %v4819_v43, %v6731_v53 }
 0x9bd   : > { %3287 = vst [vmem:[%s6801_s13 + $0x20] sm:$0xff] %v3271_v55 }
 0x9be   : > { %v3250_v46 = vmul.f32 %v6788_v33, %v3228_v54  ;;  %v3160_v27 = vpop.xlane.xlu1 %3159 }
 0x9bf   : > { %v4821_v14 = vpop.eup %4820  ;;  %v3183_v36 = vmul.f32 0.0078125, %v3160_v27 }
 0x9c0   : > { %v3272_v11 = vadd.f32 %v6794_v44, %v3250_v46  ;;  %v3229_v63 = vmul.f32 %v4821_v14, %v6736_v41 }
 0x9c1   : > { %v3199_v49 = vadd.f32 1e-05, %v3183_v36 }
 0x9c2   : > { %3288 = vst [vmem:[%s6801_s13 + $0x28] sm:$0xff] %v3272_v11  ;;  %v3251_v15 = vmul.f32 %v6788_v33, %v3229_v63  ;;  %v3162_v2 = vpop.xlane.xlu0 %3161 }
 0x9c3   : > { %v4823_v26 = vpop.eup %4822  ;;  %4824 = vrsqrt.f32 %v3199_v49  ;;  %v3184_v53 = vmul.f32 0.0078125, %v3162_v2 }
 0x9c4   : > { %v3273_v39 = vadd.f32 %v6794_v44, %v3251_v15  ;;  %v3230_v42 = vmul.f32 %v4823_v26, %v6741_v10 }
 0x9c5   : > { %v3200_v52 = vadd.f32 1e-05, %v3184_v53 }
 0x9c6   : > { %3289 = vst [vmem:[%s6801_s13 + $0x30] sm:$0xff] %v3273_v39  ;;  %v3252_v60 = vmul.f32 %v6788_v33, %v3230_v42  ;;  %v3164_v29 = vpop.xlane.xlu1 %3163 }
 0x9c7   : > { %4826 = vrsqrt.f32 %v3200_v52  ;;  %v3185_v41 = vmul.f32 0.0078125, %v3164_v29 }
 0x9c8   : > { %v3274_v8 = vadd.f32 %v6794_v44, %v3252_v60 }
 0x9c9   : > { %v3201_v31 = vadd.f32 1e-05, %v3185_v41 }
 0x9ca   : > { %3290 = vst [vmem:[%s6801_s13 + $0x38] sm:$0xff] %v3274_v8  ;;  %v3166_v56 = vpop.xlane.xlu0 %3165  ;;  %v3168_v13 = vpop.xlane.xlu1 %3167 }
 0x9cb   : > { %4828 = vrsqrt.f32 %v3201_v31  ;;  %v3186_v18 = vmul.f32 0.0078125, %v3166_v56  ;;  %v3187_v59 = vmul.f32 0.0078125, %v3168_v13 }
 0x9cd   : > { %v4825_v1 = vpop.eup %4824  ;;  %v3202_v51 = vadd.f32 1e-05, %v3186_v18  ;;  %v3203_v48 = vadd.f32 1e-05, %v3187_v59 }
 0x9ce   : > { %v3231_v10 = vmul.f32 %v4825_v1, %v6746_v6  ;;  %v3170_v40 = vpop.xlane.xlu0 %3169 }
 0x9cf   : > { %4830 = vrsqrt.f32 %v3202_v51  ;;  %v3188_v32 = vmul.f32 0.0078125, %v3170_v40  ;;  %v3172_v34 = vpop.xlane.xlu1 %3171 }
 0x9d0   : > { %v3253_v22 = vmul.f32 %v6788_v33, %v3231_v10  ;;  %4832 = vrsqrt.f32 %v3203_v48  ;;  %v3189_v50 = vmul.f32 0.0078125, %v3172_v34 }
 0x9d1   : > { %v4827_v58 = vpop.eup %4826  ;;  %v3204_v3 = vadd.f32 1e-05, %v3188_v32 }
 0x9d2   : > { %v3275_v4 = vadd.f32 %v6794_v44, %v3253_v22  ;;  %v3232_v47 = vmul.f32 %v4827_v58, %v6751_v17  ;;  %v3205_v23 = vadd.f32 1e-05, %v3189_v50 }
 0x9d3   : > { %4834 = vrsqrt.f32 %v3204_v3  ;;  %v3174_v25 = vpop.xlane.xlu0 %3173 }
 0x9d4   : > { %3291 = vst [vmem:[%s6801_s13 + $0x40] sm:$0xff] %v3275_v4  ;;  %v3254_v6 = vmul.f32 %v6788_v33, %v3232_v47  ;;  %4836 = vrsqrt.f32 %v3205_v23  ;;  %v3190_v20 = vmul.f32 0.0078125, %v3174_v25 }
 0x9d5   : > { %v4829_v30 = vpop.eup %4828 }
 0x9d6   : > { %v3276_v21 = vadd.f32 %v6794_v44, %v3254_v6  ;;  %v3233_v37 = vmul.f32 %v4829_v30, %v6756_v61  ;;  %v3206_v19 = vadd.f32 1e-05, %v3190_v20 }
 0x9d8   : > { %3292 = vst [vmem:[%s6801_s13 + $0x48] sm:$0xff] %v3276_v21  ;;  %v3255_v12 = vmul.f32 %v6788_v33, %v3233_v37  ;;  %4838 = vrsqrt.f32 %v3206_v19 }
 0x9d9   : > { %v4831_v17 = vpop.eup %4830 }
 0x9da   : > { %v4833_v28 = vpop.eup %4832  ;;  %v3277_v62 = vadd.f32 %v6794_v44, %v3255_v12  ;;  %v3234_v9 = vmul.f32 %v4831_v17, %v6761_v5 }
 0x9db   : > { %v3235_v57 = vmul.f32 %v4833_v28, %v6764_v7 }
 0x9dc   : > { %3293 = vst [vmem:[%s6801_s13 + $0x50] sm:$0xff] %v3277_v62  ;;  %v3256_v35 = vmul.f32 %v6788_v33, %v3234_v9 }
 0x9dd   : > { %v4835_v61 = vpop.eup %4834  ;;  %v3257_v45 = vmul.f32 %v6788_v33, %v3235_v57 }
 0x9de   : > { %v4837_v24 = vpop.eup %4836  ;;  %v3278_v43 = vadd.f32 %v6794_v44, %v3256_v35  ;;  %v3236_v55 = vmul.f32 %v4835_v61, %v6771_v0 }
 0x9df   : > { %v3279_v54 = vadd.f32 %v6794_v44, %v3257_v45  ;;  %v3237_v5 = vmul.f32 %v4837_v24, %v6774_v16 }
 0x9e0   : > { %3294 = vst [vmem:[%s6801_s13 + $0x58] sm:$0xff] %v3278_v43  ;;  %v3258_v7 = vmul.f32 %v6788_v33, %v3236_v55 }
 0x9e1   : > { %3295 = vst [vmem:[%s6801_s13 + $0x60] sm:$0xff] %v3279_v54  ;;  %v3259_v46 = vmul.f32 %v6788_v33, %v3237_v5 }
 0x9e2   : > { %v4839_v27 = vpop.eup %4838  ;;  %v3280_v14 = vadd.f32 %v6794_v44, %v3258_v7 }
 0x9e3   : > { %v3281_v36 = vadd.f32 %v6794_v44, %v3259_v46  ;;  %v3238_v0 = vmul.f32 %v4839_v27, %v6781_v38 }
 0x9e4   : > { %3296 = vst [vmem:[%s6801_s13 + $0x68] sm:$0xff] %v3280_v14 }
 0x9e5   : > { %3297 = vst [vmem:[%s6801_s13 + $0x70] sm:$0xff] %v3281_v36  ;;  %v3260_v16 = vmul.f32 %v6788_v33, %v3238_v0 }
 0x9e7   : > { %v3282_v11 = vadd.f32 %v6794_v44, %v3260_v16 }
 0x9e9   : > { %3298 = vst [vmem:[%s6801_s13 + $0x78] sm:$0xff] %v3282_v11 }
 0x9ea   : > { %5095 = shalt.err (!%p5092_p10)
}
 0x9eb   : > { %s5096_s15 = scalar_lea.hbm %s6866_s0, 2048  ;;  %s5100_s24 = scalar_lea.hbm %s7003_s22, 4096 }
 0x9ec   : > { %p5097_p11 = scmp.ne.s32.totalorder %s6866_s0, %s5096_s15  ;;  %p5101_p9 = scmp.lt.u32.totalorder %s6866_s0, %s7003_s22 }
 0x9ed   : > { %p5102_p7 = scmp.lt.u32.totalorder %s5100_s24, %s5096_s15  ;;  %p5104_p12 = scmp.lt.u32.totalorder %s5096_s15, %s6866_s0 }
 0x9ee   : > { %p5098_p3 = pnand %p5097_p11, %p7004_p1 }
 0x9ef   : > { %p5103_p4 = por %p5102_p7, %p5101_p9 }
 0x9f0   : > { %p5099_p5 = pneg %p5098_p3 }
 0x9f1   : > { %p5105_p13 = por %p5104_p12, %p5103_p4 }
 0x9f3   : > { %p5106_p0 = pnand %p5105_p13, %p5099_p5 }
 0x9f5   : > { %5109 = shalt.err (!%p5106_p0)
}
 0x9f6   : > { %s5180_s1 = smov 128   ;;  %s5181_s25 = smov 8  }
 0x9f7   : > { %4522 = dma.vmem_to_hbm [thread:$0]  (%p7004_p1), %s6868_s11, 2048, %s6866_s0, %s3300_s6, %s5180_s1, %s5180_s1, %s5181_s25  }
 0x9f8 PF: > { %s3328_s2 = sand.u32 1, %s5152_s27   ;;  %p7005_p2 = scmp.ne.s32.totalorder %s6973_s26, 0 }
 0x9f9   : > { %p7006_p8 = scmp.ge.s32.totalorder %s5164_s30, 2  ;;  %s3329_s20 = scalar_lea.sflag [#allocation4], %s3328_s2 }
 0x9fb   : > { %p4551_p6 = pnand %p7006_p8, %p7005_p2 }
 0x9fd   : > { %5147 = dma.done.wait (!%p4551_p6), %s3329_s20, 2048  }
 0x9fe   : > { %5149 = vsyncadd (!%p4551_p6), %s3329_s20, 4294965248  ;;  %p35_p10 = scmp.ge.s32.totalorder %s5489_s21, 4   ;;  %s7007_s27 = smov %s5156_s28 }
 0x9ff   : > { %s7008_s28 = smov %s5160_s29  ;;  %s7009_s29 = smov %s5501_s9 }
 0xa00   : > { %s7010_s30 = smov %s5489_s21  ;;  %37 = sbr.rel (!%p35_p10) target bundleno = 23 (0x17), region = 165 }
 0xa07   :  { %3334 = vsyncpa [#allocation3], 1 }
 0xa08   :  { %3336 = vsyncpa [#allocation3 + $0x1], 1 }
 0xa09   :  { %3337 = vsyncpa [#allocation6], 1 }
 0xa0a   :  { %3338 = vsyncpa [#allocation9], 1 }
 0xa0b   :  { %3339 = vsyncpa [#allocation12], 1 }
 0xa0c   :  { %3340 = vsyncpa [#allocation15], 1 }
 0xa0d   :  { %3341 = vsyncpa [#allocation4], 1 }
 0xa0e   :  { %3343 = vsyncpa [#allocation4 + $0x1], 1 }

</bundles_post_ra>
